<compile_context>
chip_gen: v6e
topology: v6e:2x2x1
jax: 0.10.0
libtpu: 0.0.40
codegen_flags: <defaults>
</compile_context>

<pallas_src>
import functools

import jax
import jax.numpy as jnp
from jax import lax
from jax.experimental import pallas as pl
from jax.experimental.pallas import tpu as pltpu

ALPHA = 0.5        # HGNNPConv_GIB_v2.alpha
THRESHOLD = 0.4    # HGNNPConv_GIB_v2.threshold
COS_EPS = 1e-6     # torch.nn.CosineSimilarity eps
PACK_LANES = 128   # lane-dense packed-output width (multiple of 128)


def _hgib_v2_kernel(x_ref, hflat_ref, hbd_ref, w1_ref, b1_ref, att_ref,
                    w2_ref, b2_ref, g_ref, p_ref, out_ref):
    X = x_ref[...]          # (R, Cin)   R = Bt*Nv stacked vertex rows of Bt graphs
    Hf = hflat_ref[...]     # (R, Ne)    per-graph incidence rows, stacked
    Hbd = hbd_ref[0]        # (R, R)     block-diagonal incidence for this graph tile
    W1 = w1_ref[...]        # (Cin, Hid)
    b1 = b1_ref[...]        # (1, Hid)
    att = att_ref[...]      # (R, Hid)   att rows tiled per graph (heads == Nv == Ne)
    W2 = w2_ref[...]        # (Hid, Cls)
    b2 = b2_ref[...]        # (1, Cls)
    G = g_ref[...]          # (R, Bt)    G[i,b] = 1 iff row i belongs to graph b
    P = p_ref[...]          # (R, Ne)    P[i,e] = 1 iff (i mod Nv) == e

    n_cls = W2.shape[1]
    n_e = Hf.shape[1]

    # ---- hypergraph normalisation shared by both layers (hg.v2v, aggr='mean') ----
    d_e = jnp.sum(Hbd, axis=0, keepdims=True)          # (1, R)  stacked per-edge degrees
    d_v = jnp.sum(Hf, axis=1, keepdims=True)           # (R, 1)  stacked per-vertex degrees
    # Exact reciprocals (tiny vectors; they feed the thresholded updated_H / KL).
    inv_de = jnp.where(d_e > 0.0, 1.0 / jnp.where(d_e > 0.0, d_e, 1.0), 0.0)
    inv_dv = jnp.where(d_v > 0.0, 1.0 / jnp.where(d_v > 0.0, d_v, 1.0), 0.0)
    Hde = Hbd * inv_de                                 # H D_e^-1 (block diagonal)

    cdims = (((0,), (0,)), ((), ()))                   # contract vertex axis: A^T @ B

    # ================= conv1 (is_last=False) =================
    X1 = jnp.dot(X, W1, preferred_element_type=jnp.float32) + b1                 # theta1
    ze1 = lax.dot_general(Hde, X1, cdims, preferred_element_type=jnp.float32)    # (R, Hid)
    x1 = jnp.dot(Hbd, ze1, preferred_element_type=jnp.float32) * inv_dv          # (R, Hid)
    # TODO(synk): training-mode nn.Dropout(0.5) would need pltpu.prng_*; eval = identity.
    x1 = jnp.maximum(x1, 0.0)                                                    # ReLU

    # ---- GIB head: Ze = H^T x1 (v2e, aggr='sum'), row-wise cosine similarity ----
    ze_sum = lax.dot_general(Hbd, x1, cdims, preferred_element_type=jnp.float32) # (R, Hid)
    U = x1 * att
    V = ze_sum * att
    num = jnp.sum(U * V, axis=-1, keepdims=True)                                 # (R, 1)
    nu = jnp.sum(U * U, axis=-1, keepdims=True)
    nv2 = jnp.sum(V * V, axis=-1, keepdims=True)
    # torch CosineSimilarity: dot / sqrt(clamp_min(|u|^2 |v|^2, eps^2)); rsqrt -> EUP.
    a_col = num * lax.rsqrt(jnp.maximum(nu * nv2, COS_EPS * COS_EPS))            # (R, 1)
    a_col = jnp.clip(a_col, 0.0, 1.0)   # mathematically in [0,1]; clamp numeric drift

    # ---- Bernoulli KL(Bern(A) || Bern(0.5)) per head ----
    t1 = jnp.where(a_col > 0.0, a_col * jnp.log(jnp.maximum(a_col, 1e-30) * 2.0), 0.0)
    t2 = jnp.where(a_col < 1.0,
                   (1.0 - a_col) * jnp.log(jnp.maximum(1.0 - a_col, 1e-30) * 2.0), 0.0)
    term = t1 + t2                                                               # (R, 1)

    # Per-graph gather of the cosine row (A[b, :]) and per-graph KL sum, then broadcast
    # back to the graph's vertex rows -- two tiny MXU matmuls against resident constants
    # (replaces the per-step iota/eye rebuild of the previous version).
    rhs = jnp.concatenate([a_col * P, term], axis=-1)                            # (R, Ne+1)
    per_graph = lax.dot_general(G, rhs, cdims, preferred_element_type=jnp.float32)  # (Bt, Ne+1)
    bcast = jnp.dot(G, per_graph, preferred_element_type=jnp.float32)            # (R, Ne+1)
    a_bc = bcast[:, :n_e]                 # A[b, e] replicated on every row of graph b
    kl1 = bcast[:, n_e:n_e + 1]           # kl1 per graph, replicated on its rows

    # ---- updated incidence matrix (hg.cache['H'] side effect), f32 0/1 mask ----
    uh = (ALPHA * Hf + (1.0 - ALPHA) * a_bc > THRESHOLD).astype(jnp.float32)     # (R, Ne)

    # ===== top-level glue: F.relu + F.dropout (eval) are the identity on x1 >= 0 =====

    # ================= conv2 (is_last=True): theta2 + v2v('mean'), kl2 = 0 =================
    # TODO(synk): dhg's lazy cache could route conv2 through the overwritten hg.cache['H'];
    # here conv2 propagates with the original H, matching the matrix-format semantics.
    X2 = jnp.dot(x1, W2, preferred_element_type=jnp.float32) + b2                # (R, Cls)
    ze2 = lax.dot_general(Hde, X2, cdims, preferred_element_type=jnp.float32)
    y = jnp.dot(Hbd, ze2, preferred_element_type=jnp.float32) * inv_dv           # (R, Cls)

    # ---- single lane-dense packed output: [ Y | updated_H | (kl1+kl2)/2 | zeros ] ----
    tail = out_ref.shape[1] - (n_cls + n_e + 1)
    packed = jnp.concatenate(
        [y, uh, 0.5 * kl1, jnp.zeros((y.shape[0], tail), jnp.float32)], axis=-1)
    out_ref[...] = packed


def hgib_v2_forward(x, w1_t, b1, att1, w2_t, b2, h_dense, *, block_graphs=None):
    """Batched HGIB_v2 forward.

    x:(B,Nv,Cin) f32, w1_t:(Cin,Hid), b1:(1,Hid), att1:(heads,Hid),
    w2_t:(Hid,Cls), b2:(1,Cls), h_dense:(B,Nv,Ne) dense 0/1 incidence matrices.
    Each batch element is an independent hypergraph; weights are shared.
    Returns (y:(B,Nv,Cls), kl:(B,), updated_H:(B,Nv,Ne)).
    """
    bsz, n_v, c_in = x.shape
    n_hid = w1_t.shape[1]
    n_class = w2_t.shape[1]
    n_e = h_dense.shape[2]
    heads = att1.shape[0]
    # These constraints come straight from the PyTorch broadcasting rules in forward():
    assert n_e == heads, "cos-sim broadcast (Ze * att) requires N_e == heads"
    assert n_v == heads, "alpha*H + (1-alpha)*A broadcast requires N_v == heads (K == 1)"

    # ---- choose graphs-per-grid-step so Bt*Nv ~ 256 rows (full v6e/v7x MXU tile) ----
    if block_graphs is None:
        block_graphs = max(1, min(bsz, max(1, 256 // n_v)))
        while block_graphs > 1 and bsz % block_graphs:
            block_graphs -= 1
    bt = block_graphs
    assert bsz % bt == 0
    if (bt * n_v) % 8 != 0 and bt != bsz:   # keep sublane dim 8-aligned (or full)
        bt = bsz
    rows = bt * n_v
    cols = bt * n_e
    num_tiles = bsz // bt

    pack_w = max(PACK_LANES, -(-(n_class + n_e + 1) // PACK_LANES) * PACK_LANES)
    dt = jnp.float32

    # ---- layout plumbing in the wrapper (done once, outside the kernel) ----
    x_flat = x.reshape(bsz * n_v, c_in).astype(dt)
    h_flat = h_dense.reshape(bsz * n_v, n_e).astype(dt)
    # Block-diagonal incidence per tile of Bt graphs -> dense MXU aggregation matmuls.
    h_tiles = h_dense.reshape(num_tiles, bt, n_v, n_e).astype(dt)
    eye_bt = jnp.eye(bt, dtype=dt)
    h_bd = jnp.einsum('tgve,gh->tgvhe', h_tiles, eye_bt).reshape(num_tiles, rows, cols)
    att_tiled = jnp.tile(att1.astype(dt), (bt, 1))                    # (rows, Hid)
    g_ind = jnp.repeat(jnp.eye(bt, dtype=dt), n_v, axis=0)            # (rows, Bt)
    p_sel = jnp.tile(jnp.eye(n_v, n_e, dtype=dt), (bt, 1))            # (rows, Ne)

    in_specs = [
        pl.BlockSpec((rows, c_in), lambda i: (i, 0)),            # x_flat   (per tile)
        pl.BlockSpec((rows, n_e), lambda i: (i, 0)),             # h_flat   (per tile)
        pl.BlockSpec((1, rows, cols), lambda i: (i, 0, 0)),      # h_bd     (per tile)
        pl.BlockSpec((c_in, n_hid), lambda i: (0, 0)),           # W1       (shared)
        pl.BlockSpec((1, n_hid), lambda i: (0, 0)),              # b1       (shared)
        pl.BlockSpec((rows, n_hid), lambda i: (0, 0)),           # att      (shared)
        pl.BlockSpec((n_hid, n_class), lambda i: (0, 0)),        # W2       (shared)
        pl.BlockSpec((1, n_class), lambda i: (0, 0)),            # b2       (shared)
        pl.BlockSpec((rows, bt), lambda i: (0, 0)),              # G        (shared)
        pl.BlockSpec((rows, n_e), lambda i: (0, 0)),             # P        (shared)
    ]
    out_spec = pl.BlockSpec((rows, pack_w), lambda i: (i, 0))
    out_shape = jax.ShapeDtypeStruct((bsz * n_v, pack_w), jnp.float32)

    fn = pl.pallas_call(
        _hgib_v2_kernel,
        grid=(num_tiles,),
        in_specs=in_specs,
        out_specs=out_spec,
        out_shape=out_shape,
        compiler_params=pltpu.CompilerParams(dimension_semantics=("parallel",)),
    )
    packed = fn(x_flat, h_flat, h_bd, w1_t.astype(dt), b1.astype(dt), att_tiled,
                w2_t.astype(dt), b2.astype(dt), g_ind, p_sel)

    # Cheap XLA unpacking of the lane-dense slab.
    y = packed[:, :n_class].reshape(bsz, n_v, n_class)
    upd_h = packed[:, n_class:n_class + n_e].reshape(bsz, n_v, n_e)
    kl = packed[:, n_class + n_e].reshape(bsz, n_v)[:, 0]
    return y, kl, upd_h


def _reference(x, h, *, w1_t, b1, att, w2_t, b2):
    """Pure-JAX single-graph reference (high-precision matmuls) for sanity check."""
    dot = functools.partial(jnp.dot, precision=jax.lax.Precision.HIGHEST)
    d_e = h.sum(0, keepdims=True)
    d_v = h.sum(1, keepdims=True)
    inv_de = jnp.where(d_e > 0, 1.0 / jnp.where(d_e > 0, d_e, 1.0), 0.0)
    inv_dv = jnp.where(d_v > 0, 1.0 / jnp.where(d_v > 0, d_v, 1.0), 0.0)

    x1 = dot(x, w1_t) + b1
    x1 = dot(h, dot((h * inv_de).T, x1)) * inv_dv
    x1 = jnp.maximum(x1, 0.0)

    ze = dot(h.T, x1)
    u = x1 * att
    v = ze * att
    num = jnp.sum(u * v, -1)
    a = num / jnp.sqrt(jnp.maximum(jnp.sum(u * u, -1) * jnp.sum(v * v, -1), COS_EPS ** 2))
    a = jnp.clip(a, 0.0, 1.0)
    t1 = jnp.where(a > 0, a * jnp.log(jnp.maximum(a, 1e-30) * 2.0), 0.0)
    t2 = jnp.where(a < 1, (1 - a) * jnp.log(jnp.maximum(1 - a, 1e-30) * 2.0), 0.0)
    kl1 = jnp.sum(t1 + t2)

    logits = ALPHA * h + (1.0 - ALPHA) * a[None, :]
    upd = (logits > THRESHOLD).astype(jnp.float32)

    x2 = dot(x1, w2_t) + b2
    y = dot(h, dot((h * inv_de).T, x2)) * inv_dv
    return y, kl1 / 2.0, logits, upd


if __name__ == "__main__":
    key = jax.random.PRNGKey(0)
    bsz = 64                      # 64 independent hypergraphs -> 2 grid steps of 32 graphs
    n_v = n_e = heads = 8         # module broadcasting requires N_v == N_e == heads
    c_in, n_hid, n_class = 32, 64, 8

    ks = jax.random.split(key, 7)
    x = jax.random.normal(ks[0], (bsz, n_v, c_in), dtype=jnp.float32)

    # Deterministic synthetic params (PyTorch shapes: W (Cout,Cin), b (Cout,), att (heads,Cout)).
    bound1 = 1.0 / (c_in ** 0.5)
    w1 = jax.random.uniform(ks[1], (n_hid, c_in), jnp.float32, -bound1, bound1)
    b1 = jax.random.uniform(ks[2], (n_hid,), jnp.float32, -bound1, bound1)
    stdv = 1.0 / (n_hid ** 0.5)
    att1 = jax.random.uniform(ks[3], (heads, n_hid), jnp.float32, -stdv, stdv)
    bound2 = 1.0 / (n_hid ** 0.5)
    w2 = jax.random.uniform(ks[4], (n_class, n_hid), jnp.float32, -bound2, bound2)
    b2 = jax.random.uniform(ks[5], (n_class,), jnp.float32, -bound2, bound2)
    # conv2's own att parameter exists in the module but is unused when is_last=True.

    # Dense binary incidence matrices; every vertex / hyperedge non-empty.
    h_rand = (jax.random.uniform(ks[6], (bsz, n_v, n_e)) > 0.5).astype(jnp.float32)
    h_dense = jnp.maximum(h_rand, jnp.eye(n_v, n_e, dtype=jnp.float32)[None])

    y, kl, upd_h = hgib_v2_forward(x, w1.T, b1[None, :], att1, w2.T, b2[None, :], h_dense)
    jax.block_until_ready((y, kl, upd_h))

    # Sanity check vs. pure-JAX reference (tight now: exact reciprocals, no approx rsqrt).
    ref_fn = functools.partial(_reference, w1_t=w1.T, b1=b1[None, :], att=att1,
                               w2_t=w2.T, b2=b2[None, :])
    y_exp, kl_exp, logits_exp, upd_exp = jax.vmap(ref_fn)(x, h_dense)

    assert jnp.allclose(y, y_exp, rtol=1e-2, atol=1e-3), "Y mismatch vs reference"
    assert jnp.allclose(kl, kl_exp, rtol=1e-2, atol=1e-3), "KL mismatch vs reference"
    # Compare the thresholded incidence only away from the decision boundary (tiny
    # matmul-rounding differences could flip entries sitting exactly on the threshold).
    safe = jnp.abs(logits_exp - THRESHOLD) > 5e-3
    assert bool(jnp.all(jnp.where(safe, upd_h == upd_exp, True))), "updated_H mismatch"

    print("KERNEL_OK")
</pallas_src>

<mosaic_0001>
module attributes {stable_mosaic.version = 11 : i64} {
  func.func @_hgib_v2_kernel(%arg0: i32, %arg1: memref<256x32xf32, #tpu.memory_space<vmem>>, %arg2: memref<256x8xf32, #tpu.memory_space<vmem>>, %arg3: memref<1x256x256xf32, #tpu.memory_space<vmem>>, %arg4: memref<32x64xf32, #tpu.memory_space<vmem>>, %arg5: memref<1x64xf32, #tpu.memory_space<vmem>>, %arg6: memref<256x64xf32, #tpu.memory_space<vmem>>, %arg7: memref<64x8xf32, #tpu.memory_space<vmem>>, %arg8: memref<1x8xf32, #tpu.memory_space<vmem>>, %arg9: memref<256x32xf32, #tpu.memory_space<vmem>>, %arg10: memref<256x8xf32, #tpu.memory_space<vmem>>, %arg11: memref<256x128xf32, #tpu.memory_space<vmem>>) attributes {dimension_semantics = [#tpu.dimension_semantics<parallel>], iteration_bounds = array<i64: 2>, scalar_prefetch = 0 : i64, scratch_operands = 0 : i64, tpu.core_type = #tpu.core_type<tc>, window_params = [{transform_indices = @transform_0, window_bounds = array<i64: 256, 32>}, {transform_indices = @transform_1, window_bounds = array<i64: 256, 8>}, {transform_indices = @transform_2, window_bounds = array<i64: 1, 256, 256>}, {pipeline_mode = #tpu.pipeline_mode<synchronous>, transform_indices = @transform_3, window_bounds = array<i64: 32, 64>}, {pipeline_mode = #tpu.pipeline_mode<synchronous>, transform_indices = @transform_4, window_bounds = array<i64: 1, 64>}, {pipeline_mode = #tpu.pipeline_mode<synchronous>, transform_indices = @transform_5, window_bounds = array<i64: 256, 64>}, {pipeline_mode = #tpu.pipeline_mode<synchronous>, transform_indices = @transform_6, window_bounds = array<i64: 64, 8>}, {pipeline_mode = #tpu.pipeline_mode<synchronous>, transform_indices = @transform_7, window_bounds = array<i64: 1, 8>}, {pipeline_mode = #tpu.pipeline_mode<synchronous>, transform_indices = @transform_8, window_bounds = array<i64: 256, 32>}, {pipeline_mode = #tpu.pipeline_mode<synchronous>, transform_indices = @transform_9, window_bounds = array<i64: 256, 8>}, {transform_indices = @transform_10, window_bounds = array<i64: 256, 128>}]} {
    %c0 = arith.constant 0 : index
    %c0_0 = arith.constant 0 : index
    %0 = vector.load %arg1[%c0, %c0_0] : memref<256x32xf32, #tpu.memory_space<vmem>>, vector<256x32xf32>
    %c0_1 = arith.constant 0 : index
    %c0_2 = arith.constant 0 : index
    %1 = vector.load %arg2[%c0_1, %c0_2] : memref<256x8xf32, #tpu.memory_space<vmem>>, vector<256x8xf32>
    %c0_3 = arith.constant 0 : index
    %c0_4 = arith.constant 0 : index
    %c0_5 = arith.constant 0 : index
    %2 = vector.load %arg3[%c0_3, %c0_4, %c0_5] : memref<1x256x256xf32, #tpu.memory_space<vmem>>, vector<1x256x256xf32>
    %3 = vector.shape_cast %2 : vector<1x256x256xf32> to vector<256x256xf32>
    %c0_6 = arith.constant 0 : index
    %c0_7 = arith.constant 0 : index
    %4 = vector.load %arg4[%c0_6, %c0_7] : memref<32x64xf32, #tpu.memory_space<vmem>>, vector<32x64xf32>
    %c0_8 = arith.constant 0 : index
    %c0_9 = arith.constant 0 : index
    %5 = vector.load %arg5[%c0_8, %c0_9] : memref<1x64xf32, #tpu.memory_space<vmem>>, vector<1x64xf32>
    %c0_10 = arith.constant 0 : index
    %c0_11 = arith.constant 0 : index
    %6 = vector.load %arg6[%c0_10, %c0_11] : memref<256x64xf32, #tpu.memory_space<vmem>>, vector<256x64xf32>
    %c0_12 = arith.constant 0 : index
    %c0_13 = arith.constant 0 : index
    %7 = vector.load %arg7[%c0_12, %c0_13] : memref<64x8xf32, #tpu.memory_space<vmem>>, vector<64x8xf32>
    %c0_14 = arith.constant 0 : index
    %c0_15 = arith.constant 0 : index
    %8 = vector.load %arg8[%c0_14, %c0_15] : memref<1x8xf32, #tpu.memory_space<vmem>>, vector<1x8xf32>
    %c0_16 = arith.constant 0 : index
    %c0_17 = arith.constant 0 : index
    %9 = vector.load %arg9[%c0_16, %c0_17] : memref<256x32xf32, #tpu.memory_space<vmem>>, vector<256x32xf32>
    %c0_18 = arith.constant 0 : index
    %c0_19 = arith.constant 0 : index
    %10 = vector.load %arg10[%c0_18, %c0_19] : memref<256x8xf32, #tpu.memory_space<vmem>>, vector<256x8xf32>
    %cst = arith.constant dense<0.000000e+00> : vector<256xf32>
    %11 = vector.multi_reduction <add>, %3, %cst [0] : vector<256x256xf32> to vector<256xf32>
    %12 = vector.shape_cast %11 : vector<256xf32> to vector<1x256xf32>
    %cst_20 = arith.constant dense<0.000000e+00> : vector<256xf32>
    %13 = vector.multi_reduction <add>, %1, %cst_20 [1] : vector<256x8xf32> to vector<256xf32>
    %14 = vector.shape_cast %13 : vector<256xf32> to vector<256x1xf32>
    %cst_21 = arith.constant 0.000000e+00 : f32
    %15 = vector.broadcast %cst_21 : f32 to vector<1x256xf32>
    %16 = arith.cmpf ogt, %12, %15 : vector<1x256xf32>
    %cst_22 = arith.constant 0.000000e+00 : f32
    %17 = vector.broadcast %cst_22 : f32 to vector<1x256xf32>
    %18 = arith.cmpf ogt, %12, %17 : vector<1x256xf32>
    %cst_23 = arith.constant 1.000000e+00 : f32
    %19 = vector.broadcast %cst_23 : f32 to vector<1x256xf32>
    %20 = arith.select %18, %12, %19 : vector<1x256xi1>, vector<1x256xf32>
    %cst_24 = arith.constant 1.000000e+00 : f32
    %21 = vector.broadcast %cst_24 : f32 to vector<1x256xf32>
    %22 = arith.divf %21, %20 : vector<1x256xf32>
    %cst_25 = arith.constant 0.000000e+00 : f32
    %23 = vector.broadcast %cst_25 : f32 to vector<1x256xf32>
    %24 = arith.select %16, %22, %23 : vector<1x256xi1>, vector<1x256xf32>
    %cst_26 = arith.constant 0.000000e+00 : f32
    %25 = vector.broadcast %cst_26 : f32 to vector<256x1xf32>
    %26 = arith.cmpf ogt, %14, %25 : vector<256x1xf32>
    %cst_27 = arith.constant 0.000000e+00 : f32
    %27 = vector.broadcast %cst_27 : f32 to vector<256x1xf32>
    %28 = arith.cmpf ogt, %14, %27 : vector<256x1xf32>
    %cst_28 = arith.constant 1.000000e+00 : f32
    %29 = vector.broadcast %cst_28 : f32 to vector<256x1xf32>
    %30 = arith.select %28, %14, %29 : vector<256x1xi1>, vector<256x1xf32>
    %cst_29 = arith.constant 1.000000e+00 : f32
    %31 = vector.broadcast %cst_29 : f32 to vector<256x1xf32>
    %32 = arith.divf %31, %30 : vector<256x1xf32>
    %cst_30 = arith.constant 0.000000e+00 : f32
    %33 = vector.broadcast %cst_30 : f32 to vector<256x1xf32>
    %34 = arith.select %26, %32, %33 : vector<256x1xi1>, vector<256x1xf32>
    %35 = vector.broadcast %24 : vector<1x256xf32> to vector<256x256xf32>
    %36 = arith.mulf %3, %35 : vector<256x256xf32>
    %cst_31 = arith.constant dense<0.000000e+00> : vector<256x64xf32>
    %37 = tpu.matmul %0, %4, %cst_31 {dimension_numbers = #tpu.dot_dimension_numbers<[1], [0], [0], [1], [0, 0, 1, 1], [], []>} : vector<256x32xf32>, vector<32x64xf32>, vector<256x64xf32> -> vector<256x64xf32>
    %38 = vector.broadcast %5 : vector<1x64xf32> to vector<256x64xf32>
    %39 = arith.addf %37, %38 : vector<256x64xf32>
    %cst_32 = arith.constant dense<0.000000e+00> : vector<256x64xf32>
    %40 = tpu.matmul %36, %39, %cst_32 {dimension_numbers = #tpu.dot_dimension_numbers<[0], [0], [1], [1], [0, 1, 1, 1], [], []>} : vector<256x256xf32>, vector<256x64xf32>, vector<256x64xf32> -> vector<256x64xf32>
    %cst_33 = arith.constant dense<0.000000e+00> : vector<256x64xf32>
    %41 = tpu.matmul %3, %40, %cst_33 {dimension_numbers = #tpu.dot_dimension_numbers<[1], [0], [0], [1], [0, 0, 1, 1], [], []>} : vector<256x256xf32>, vector<256x64xf32>, vector<256x64xf32> -> vector<256x64xf32>
    %42 = vector.broadcast %34 : vector<256x1xf32> to vector<256x64xf32>
    %43 = arith.mulf %41, %42 : vector<256x64xf32>
    %cst_34 = arith.constant 0.000000e+00 : f32
    %44 = vector.broadcast %cst_34 : f32 to vector<256x64xf32>
    %45 = arith.maximumf %43, %44 : vector<256x64xf32>
    %cst_35 = arith.constant dense<0.000000e+00> : vector<256x64xf32>
    %46 = tpu.matmul %3, %45, %cst_35 {dimension_numbers = #tpu.dot_dimension_numbers<[0], [0], [1], [1], [0, 1, 1, 1], [], []>} : vector<256x256xf32>, vector<256x64xf32>, vector<256x64xf32> -> vector<256x64xf32>
    %47 = arith.mulf %45, %6 : vector<256x64xf32>
    %48 = arith.mulf %46, %6 : vector<256x64xf32>
    %49 = arith.mulf %47, %48 : vector<256x64xf32>
    %cst_36 = arith.constant dense<0.000000e+00> : vector<256xf32>
    %50 = vector.multi_reduction <add>, %49, %cst_36 [1] : vector<256x64xf32> to vector<256xf32>
    %51 = vector.shape_cast %50 : vector<256xf32> to vector<256x1xf32>
    %52 = arith.mulf %47, %47 : vector<256x64xf32>
    %cst_37 = arith.constant dense<0.000000e+00> : vector<256xf32>
    %53 = vector.multi_reduction <add>, %52, %cst_37 [1] : vector<256x64xf32> to vector<256xf32>
    %54 = vector.shape_cast %53 : vector<256xf32> to vector<256x1xf32>
    %55 = arith.mulf %48, %48 : vector<256x64xf32>
    %cst_38 = arith.constant dense<0.000000e+00> : vector<256xf32>
    %56 = vector.multi_reduction <add>, %55, %cst_38 [1] : vector<256x64xf32> to vector<256xf32>
    %57 = vector.shape_cast %56 : vector<256xf32> to vector<256x1xf32>
    %58 = arith.mulf %54, %57 : vector<256x1xf32>
    %cst_39 = arith.constant 9.99999996E-13 : f32
    %59 = vector.broadcast %cst_39 : f32 to vector<256x1xf32>
    %60 = arith.maximumf %58, %59 : vector<256x1xf32>
    %61 = math.rsqrt %60 : vector<256x1xf32>
    %62 = arith.mulf %51, %61 : vector<256x1xf32>
    %cst_40 = arith.constant 0.000000e+00 : f32
    %cst_41 = arith.constant 1.000000e+00 : f32
    %63 = vector.broadcast %cst_40 : f32 to vector<256x1xf32>
    %64 = arith.maximumf %63, %62 : vector<256x1xf32>
    %65 = vector.broadcast %cst_41 : f32 to vector<256x1xf32>
    %66 = arith.minimumf %65, %64 : vector<256x1xf32>
    %cst_42 = arith.constant 0.000000e+00 : f32
    %67 = vector.broadcast %cst_42 : f32 to vector<256x1xf32>
    %68 = arith.cmpf ogt, %66, %67 : vector<256x1xf32>
    %cst_43 = arith.constant 1.000000e-30 : f32
    %69 = vector.broadcast %cst_43 : f32 to vector<256x1xf32>
    %70 = arith.maximumf %66, %69 : vector<256x1xf32>
    %cst_44 = arith.constant 2.000000e+00 : f32
    %71 = vector.broadcast %cst_44 : f32 to vector<256x1xf32>
    %72 = arith.mulf %70, %71 : vector<256x1xf32>
    %73 = math.log %72 : vector<256x1xf32>
    %74 = arith.mulf %66, %73 : vector<256x1xf32>
    %cst_45 = arith.constant 0.000000e+00 : f32
    %75 = vector.broadcast %cst_45 : f32 to vector<256x1xf32>
    %76 = arith.select %68, %74, %75 : vector<256x1xi1>, vector<256x1xf32>
    %cst_46 = arith.constant 1.000000e+00 : f32
    %77 = vector.broadcast %cst_46 : f32 to vector<256x1xf32>
    %78 = arith.cmpf olt, %66, %77 : vector<256x1xf32>
    %cst_47 = arith.constant 1.000000e+00 : f32
    %79 = vector.broadcast %cst_47 : f32 to vector<256x1xf32>
    %80 = arith.subf %79, %66 : vector<256x1xf32>
    %cst_48 = arith.constant 1.000000e+00 : f32
    %81 = vector.broadcast %cst_48 : f32 to vector<256x1xf32>
    %82 = arith.subf %81, %66 : vector<256x1xf32>
    %cst_49 = arith.constant 1.000000e-30 : f32
    %83 = vector.broadcast %cst_49 : f32 to vector<256x1xf32>
    %84 = arith.maximumf %82, %83 : vector<256x1xf32>
    %cst_50 = arith.constant 2.000000e+00 : f32
    %85 = vector.broadcast %cst_50 : f32 to vector<256x1xf32>
    %86 = arith.mulf %84, %85 : vector<256x1xf32>
    %87 = math.log %86 : vector<256x1xf32>
    %88 = arith.mulf %80, %87 : vector<256x1xf32>
    %cst_51 = arith.constant 0.000000e+00 : f32
    %89 = vector.broadcast %cst_51 : f32 to vector<256x1xf32>
    %90 = arith.select %78, %88, %89 : vector<256x1xi1>, vector<256x1xf32>
    %91 = arith.addf %76, %90 : vector<256x1xf32>
    %92 = vector.broadcast %66 : vector<256x1xf32> to vector<256x8xf32>
    %93 = arith.mulf %92, %10 : vector<256x8xf32>
    %94 = tpu.concatenate %93, %91 in 1 : vector<256x8xf32>, vector<256x1xf32> -> vector<256x9xf32>
    %cst_52 = arith.constant dense<0.000000e+00> : vector<32x9xf32>
    %95 = tpu.matmul %9, %94, %cst_52 {dimension_numbers = #tpu.dot_dimension_numbers<[0], [0], [1], [1], [0, 1, 1, 1], [], []>} : vector<256x32xf32>, vector<256x9xf32>, vector<32x9xf32> -> vector<32x9xf32>
    %cst_53 = arith.constant dense<0.000000e+00> : vector<256x9xf32>
    %96 = tpu.matmul %9, %95, %cst_53 {dimension_numbers = #tpu.dot_dimension_numbers<[1], [0], [0], [1], [0, 0, 1, 1], [], []>} : vector<256x32xf32>, vector<32x9xf32>, vector<256x9xf32> -> vector<256x9xf32>
    %97 = vector.extract_strided_slice %96 {offsets = [0, 0], sizes = [256, 8], strides = [1, 1]} : vector<256x9xf32> to vector<256x8xf32>
    %98 = vector.extract_strided_slice %96 {offsets = [0, 8], sizes = [256, 1], strides = [1, 1]} : vector<256x9xf32> to vector<256x1xf32>
    %cst_54 = arith.constant 5.000000e-01 : f32
    %99 = vector.broadcast %cst_54 : f32 to vector<256x8xf32>
    %100 = arith.mulf %99, %1 : vector<256x8xf32>
    %cst_55 = arith.constant 5.000000e-01 : f32
    %101 = vector.broadcast %cst_55 : f32 to vector<256x8xf32>
    %102 = arith.mulf %101, %97 : vector<256x8xf32>
    %103 = arith.addf %100, %102 : vector<256x8xf32>
    %cst_56 = arith.constant 4.000000e-01 : f32
    %104 = vector.broadcast %cst_56 : f32 to vector<256x8xf32>
    %105 = arith.cmpf ogt, %103, %104 : vector<256x8xf32>
    %106 = arith.extui %105 : vector<256x8xi1> to vector<256x8xi32>
    %107 = arith.sitofp %106 : vector<256x8xi32> to vector<256x8xf32>
    %cst_57 = arith.constant dense<0.000000e+00> : vector<256x8xf32>
    %108 = tpu.matmul %45, %7, %cst_57 {dimension_numbers = #tpu.dot_dimension_numbers<[1], [0], [0], [1], [0, 0, 1, 1], [], []>} : vector<256x64xf32>, vector<64x8xf32>, vector<256x8xf32> -> vector<256x8xf32>
    %109 = vector.broadcast %8 : vector<1x8xf32> to vector<256x8xf32>
    %110 = arith.addf %108, %109 : vector<256x8xf32>
    %cst_58 = arith.constant dense<0.000000e+00> : vector<256x8xf32>
    %111 = tpu.matmul %36, %110, %cst_58 {dimension_numbers = #tpu.dot_dimension_numbers<[0], [0], [1], [1], [0, 1, 1, 1], [], []>} : vector<256x256xf32>, vector<256x8xf32>, vector<256x8xf32> -> vector<256x8xf32>
    %cst_59 = arith.constant dense<0.000000e+00> : vector<256x8xf32>
    %112 = tpu.matmul %3, %111, %cst_59 {dimension_numbers = #tpu.dot_dimension_numbers<[1], [0], [0], [1], [0, 0, 1, 1], [], []>} : vector<256x256xf32>, vector<256x8xf32>, vector<256x8xf32> -> vector<256x8xf32>
    %113 = vector.broadcast %34 : vector<256x1xf32> to vector<256x8xf32>
    %114 = arith.mulf %112, %113 : vector<256x8xf32>
    %cst_60 = arith.constant 5.000000e-01 : f32
    %115 = vector.broadcast %cst_60 : f32 to vector<256x1xf32>
    %116 = arith.mulf %115, %98 : vector<256x1xf32>
    %cst_61 = arith.constant 0.000000e+00 : f32
    %117 = vector.broadcast %cst_61 : f32 to vector<256x111xf32>
    %118 = tpu.concatenate %114, %107, %116, %117 in 1 : vector<256x8xf32>, vector<256x8xf32>, vector<256x1xf32>, vector<256x111xf32> -> vector<256x128xf32>
    %c0_62 = arith.constant 0 : index
    %c0_63 = arith.constant 0 : index
    %119 = vector.load %arg11[%c0_62, %c0_63] : memref<256x128xf32, #tpu.memory_space<vmem>>, vector<256x128xf32>
    tpu.vector_store %arg11[%c0_62, %c0_63], %118 {strides = array<i32>} : memref<256x128xf32, #tpu.memory_space<vmem>>, vector<256x128xf32>,
    return
  }
  func.func @transform_0(%arg0: i32) -> (i32, i32) {
    %c0_i32 = arith.constant 0 : i32
    %c0_i32_0 = arith.constant 0 : i32
    return %arg0, %c0_i32 : i32, i32
  }
  func.func @transform_1(%arg0: i32) -> (i32, i32) {
    %c0_i32 = arith.constant 0 : i32
    %c0_i32_0 = arith.constant 0 : i32
    return %arg0, %c0_i32 : i32, i32
  }
  func.func @transform_2(%arg0: i32) -> (i32, i32, i32) {
    %c0_i32 = arith.constant 0 : i32
    %c0_i32_0 = arith.constant 0 : i32
    %c0_i32_1 = arith.constant 0 : i32
    return %arg0, %c0_i32, %c0_i32_0 : i32, i32, i32
  }
  func.func @transform_3(%arg0: i32) -> (i32, i32) {
    %c0_i32 = arith.constant 0 : i32
    %c0_i32_0 = arith.constant 0 : i32
    %c0_i32_1 = arith.constant 0 : i32
    return %c0_i32, %c0_i32_0 : i32, i32
  }
  func.func @transform_4(%arg0: i32) -> (i32, i32) {
    %c0_i32 = arith.constant 0 : i32
    %c0_i32_0 = arith.constant 0 : i32
    %c0_i32_1 = arith.constant 0 : i32
    return %c0_i32, %c0_i32_0 : i32, i32
  }
  func.func @transform_5(%arg0: i32) -> (i32, i32) {
    %c0_i32 = arith.constant 0 : i32
    %c0_i32_0 = arith.constant 0 : i32
    %c0_i32_1 = arith.constant 0 : i32
    return %c0_i32, %c0_i32_0 : i32, i32
  }
  func.func @transform_6(%arg0: i32) -> (i32, i32) {
    %c0_i32 = arith.constant 0 : i32
    %c0_i32_0 = arith.constant 0 : i32
    %c0_i32_1 = arith.constant 0 : i32
    return %c0_i32, %c0_i32_0 : i32, i32
  }
  func.func @transform_7(%arg0: i32) -> (i32, i32) {
    %c0_i32 = arith.constant 0 : i32
    %c0_i32_0 = arith.constant 0 : i32
    %c0_i32_1 = arith.constant 0 : i32
    return %c0_i32, %c0_i32_0 : i32, i32
  }
  func.func @transform_8(%arg0: i32) -> (i32, i32) {
    %c0_i32 = arith.constant 0 : i32
    %c0_i32_0 = arith.constant 0 : i32
    %c0_i32_1 = arith.constant 0 : i32
    return %c0_i32, %c0_i32_0 : i32, i32
  }
  func.func @transform_9(%arg0: i32) -> (i32, i32) {
    %c0_i32 = arith.constant 0 : i32
    %c0_i32_0 = arith.constant 0 : i32
    %c0_i32_1 = arith.constant 0 : i32
    return %c0_i32, %c0_i32_0 : i32, i32
  }
  func.func @transform_10(%arg0: i32) -> (i32, i32) {
    %c0_i32 = arith.constant 0 : i32
    %c0_i32_0 = arith.constant 0 : i32
    return %arg0, %c0_i32 : i32, i32
  }
}

</mosaic_0001>

<bundles_post_ra>
// kernel: tpu_custom_call.1
= control target key start
LH: loop header
LB: loop body
LE: loop exit
PB: predicated region body
PF: predicated region fallthrough
CT: control target
= control target key end

     0   :  { %15 = vsyncpa [#allocation3], 0  ;;  %s12142_s0 = inlined_call_operand.vmem [shape: f32[512,32], index: 0, kind: input, shape index: {}]   ;;  %s12143_s1 = inlined_call_operand.vmem [shape: f32[512,8], index: 1, kind: input, shape index: {}]   ;;  %s12144_s2 = inlined_call_operand.vmem [shape: f32[2,256,256], index: 2, kind: input, shape index: {}]   ;;  %s12145_s3 = inlined_call_operand.vmem [shape: f32[32,64], index: 3, kind: input, shape index: {}]   ;;  %s12146_s4 = inlined_call_operand.vmem [shape: f32[1,64], index: 4, kind: input, shape index: {}]   ;;  %s12147_s5 = inlined_call_operand.vmem [shape: f32[256,64], index: 5, kind: input, shape index: {}]   ;;  %s12148_s6 = inlined_call_operand.vmem [shape: f32[64,8], index: 6, kind: input, shape index: {}]   ;;  %s12149_s7 = inlined_call_operand.vmem [shape: f32[1,8], index: 7, kind: input, shape index: {}]   ;;  %s12150_s8 = inlined_call_operand.vmem [shape: f32[256,32], index: 8, kind: input, shape index: {}]   ;;  %s12151_s9 = inlined_call_operand.vmem [shape: f32[256,8], index: 9, kind: input, shape index: {}]   ;;  %s12152_s10 = inlined_call_operand.hbm [shape: f32[512,128], index: 10, kind: output, shape index: {}]  }
   0x1   :  { %17 = vsyncpa [#allocation3 + $0x1], 0  ;;  %s7297_s13 = smov 0   ;;  %s7299_s14 = smov 0  }
   0x2   :  { %s7301_s15 = smov 0   ;;  %s7303_s16 = smov 0  }
   0x3 LB: > { %s7318_s17 = sadd.s32 4294967295, %s7236_s16   ;;  %s5543_s18 = sadd.s32 4294967294, %s7236_s16   ;;  %s7236_s16 = sphi %s7303_s16, %s12799_s16   ;;  %s7232_s15 = sphi %s7301_s15, %s12798_s15   ;;  %s7228_s14 = sphi %s7299_s14, %s12797_s14   ;;  %s7224_s13 = sphi %s7297_s13, %s12796_s13  }
   0x4   : > { %s7322_s19 = sadd.s32 1, %s7236_s16   ;;  %s255_s20 = sadd.s32 1, %s7232_s15 }
   0x5   : > { %s252_s21 = ssub.s32 %s7236_s16, %s7322_s19  ;;  %p265_p0 = scmp.ne.s32.totalorder %s7232_s15, %s7228_s14 }
   0x6   : > { %p253_p1 = scmp.eq.s32.totalorder %s252_s21, 0  ;;  %p266_p2 = scmp.eq.s32.totalorder %s7318_s17, 1 }
   0x7   : > { %p271_p3 = scmp.ne.s32.totalorder %s7228_s14, %s7224_s13  ;;  %p272_p4 = scmp.eq.s32.totalorder %s5543_s18, 1 }
   0x8   : > { %s7333_s22 = scalar_select %p253_p1, %s7232_s15, %s255_s20  }
   0x9   : > { %p7335_p5 = por %p266_p2, %p265_p0  ;;  %p7339_p6 = por %p272_p4, %p271_p3 }
   0xa   : > { %12409 = sst [smem:[#allocation5_spill]] %s7333_s22  ;;  %p5546_p7 = scmp.ge.s32.totalorder %s7236_s16, 1 }
   0xb   : > { %p337_p8 = scmp.lt.s32.totalorder %s7236_s16, 3 }
   0xd   : > { %p338_p9 = pnand %p5546_p7, %p337_p8 }
   0xf   : > { %341 = sbr.rel (%p338_p9) target bundleno = 2882 (0xb42), region = 60 }
  0x14   : > { %v534_v0 = vld [vmem:[%s12145_s3 + $0x18] sm:$0xff]  ;;  %v533_v1 = vld [vmem:[%s12145_s3 + $0x10] sm:$0xff]  ;;  %s5548_s29 = sshll.u32 %s7318_s17, 5  ;;  %p397_p10 = scmp.lt.s32.totalorder %s7318_s17, 1  ;;  %v532_v2 = vld [vmem:[%s12145_s3 + $0x8] sm:$0xff]  ;;  %vm1052_vm0 = vcmask 261120  }
  0x15   : > { %5847 = vmatprep.subr.mxu0 %v534_v0  ;;  %p386_p11 = scmp.lt.s32.totalorder %s5548_s29, 63  ;;  %v531_v3 = vld [vmem:[%s12145_s3] sm:$0xff]  ;;  %vm715_vm3 = vcmask 64512   ;;  %vm2465_vm12 = vcmask 523264   ;;  %s7239_s26 = smov 8  }
  0x16   : > { %5848 = vmatpush3.msra.mxu0 %v534_v0  ;;  %s398_s12 = scalar_select %p397_p10, %s7318_s17, 1 }
  0x17   : > { %5849 = vmatprep.subr.mxu0 %v533_v1  ;;  %s12801_s29 = smov (!%p386_p11, %s5548_s29), 63 }
  0x18   : > { %5850 = vmatpush3.msra.mxu0 %v533_v1  ;;  %s5689_s21 = sshll.u32 %s398_s12, 9  ;;  %s5549_s25 = sshll.u32 %s12801_s29, 3 }
  0x19   : > { %5851 = vmatprep.subr.mxu0 %v532_v2  ;;  %s7366_s28 = scalar_lea.vmem %s12144_s2, %s5689_s21  ;;  %s7373_s22 = scalar_lea.vmem %s12142_s0, %s5549_s25 }
  0x1a   : > { %5852 = vmatpush3.msra.mxu0 %v532_v2  ;;  %v7376_v4 = vld [vmem:[%s7366_s28] sm:$0xff]  ;;  %v7379_v5 = vld [vmem:[%s7366_s28 + $0x10] sm:$0xff]  ;;  %v404_v7 = vld [vmem:[%s7373_s22 + $0x8] sm:$0xff]  ;;  %s8214_s21 = scalar_lea.vmem %s12143_s1, %s5549_s25 }
  0x1b   : > { %5853 = vmatprep.subr.mxu0 %v531_v3  ;;  %v403_v6 = vld [vmem:[%s7373_s22] sm:$0xff]  ;;  %v405_v8 = vld [vmem:[%s7373_s22 + $0x10] sm:$0xff]  ;;  %v406_v9 = vld [vmem:[%s7373_s22 + $0x18] sm:$0xff]  ;;  %v641_v10 = vadd.f32 %v7379_v5, %v7376_v4 }
  0x1c   : > { %5854 = vmatpush3.msra.mxu0 %v531_v3  ;;  %5855 = vmatprep.mubr.msk.f32.mxu0 %vm1052_vm0, %v403_v6  ;;  %v407_v11 = vld [vmem:[%s7373_s22 + $0x20] sm:$0xff]  ;;  %v408_v13 = vld [vmem:[%s7373_s22 + $0x28] sm:$0xff]  ;;  %v409_v15 = vld [vmem:[%s7373_s22 + $0x30] sm:$0xff] }
  0x1d   : > { %5856 = vmatmul.mubr.msk.f32.vlgmr.msra.gmra.mxu0 %vm1052_vm0, %v404_v7  ;;  %v7392_v12 = vld [vmem:[%s7366_s28 + $0x20] sm:$0xff]  ;;  %v7401_v16 = vld [vmem:[%s7366_s28 + $0x30] sm:$0xff]  ;;  %v410_v17 = vld [vmem:[%s7373_s22 + $0x38] sm:$0xff] }
  0x1e   : > { %5858 = vmatprep.mubr.msk.f32.mxu0 %vm1052_vm0, %v405_v8  ;;  %v642_v14 = vadd.f32 %v641_v10, %v7392_v12  ;;  %v7406_v18 = vld [vmem:[%s7366_s28 + $0x40] sm:$0xff]  ;;  %v7411_v21 = vld [vmem:[%s7366_s28 + $0x50] sm:$0xff]  ;;  %v412_v24 = vld [vmem:[%s7373_s22 + $0x48] sm:$0xff] }
  0x1f   : > { %v411_v20 = vld [vmem:[%s7373_s22 + $0x40] sm:$0xff]  ;;  %v413_v26 = vld [vmem:[%s7373_s22 + $0x50] sm:$0xff]  ;;  %v414_v30 = vld [vmem:[%s7373_s22 + $0x58] sm:$0xff] }
  0x20   : > { %v643_v19 = vadd.f32 %v642_v14, %v7401_v16  ;;  %v7416_v23 = vld [vmem:[%s7366_s28 + $0x60] sm:$0xff]  ;;  %v7423_v27 = vld [vmem:[%s7366_s28 + $0x70] sm:$0xff]  ;;  %v7438_v34 = vld [vmem:[%s7366_s28 + $0x8] sm:$0xff] }
  0x21   : > { %5859 = vmatmul.mubr.msk.f32.gmra.mxu0 %vm1052_vm0, %v406_v9  ;;  %v7428_v29 = vld [vmem:[%s7366_s28 + $0x80] sm:$0xff]  ;;  %v7435_v33 = vld [vmem:[%s7366_s28 + $0x90] sm:$0xff]  ;;  %v7441_v35 = vld [vmem:[%s7366_s28 + $0x18] sm:$0xff] }
  0x22   : > { %5861 = vmatprep.mubr.msk.f32.mxu0 %vm1052_vm0, %v407_v11  ;;  %v644_v22 = vadd.f32 %v643_v19, %v7406_v18  ;;  %v415_v31 = vld [vmem:[%s7373_s22 + $0x60] sm:$0xff]  ;;  %v7445_v37 = vld [vmem:[%s7366_s28 + $0x28] sm:$0xff]  ;;  %v678_v38 = vadd.f32 %v7441_v35, %v7438_v34  ;;  %v7454_v40 = vld [vmem:[%s7366_s28 + $0x38] sm:$0xff] }
  0x23   : > { %v7451_v39 = vld [vmem:[%s7366_s28 + $0xa0] sm:$0xff]  ;;  %v416_v41 = vld [vmem:[%s7373_s22 + $0x68] sm:$0xff]  ;;  %v417_v44 = vld [vmem:[%s7373_s22 + $0x70] sm:$0xff] }
  0x24   : > { %v645_v25 = vadd.f32 %v644_v22, %v7411_v21  ;;  %v679_v43 = vadd.f32 %v678_v38, %v7445_v37  ;;  %v7462_v45 = vld [vmem:[%s7366_s28 + $0xb0] sm:$0xff]  ;;  %v7465_v46 = vld [vmem:[%s7366_s28 + $0x48] sm:$0xff]  ;;  %v7471_v49 = vld [vmem:[%s7366_s28 + $0xc0] sm:$0xff] }
  0x25   : > { %5862 = vmatmul.mubr.msk.f32.gmra.mxu0 %vm1052_vm0, %v408_v13  ;;  %v7474_v50 = vld [vmem:[%s7366_s28 + $0x58] sm:$0xff]  ;;  %v419_v54 = vld [vmem:[%s7373_s22 + $0x80] sm:$0xff]  ;;  %v7482_v55 = vld [vmem:[%s7366_s28 + $0xd0] sm:$0xff] }
  0x26   : > { %5864 = vmatprep.mubr.msk.f32.mxu0 %vm1052_vm0, %v409_v15  ;;  %v646_v28 = vadd.f32 %v645_v25, %v7416_v23  ;;  %v680_v48 = vadd.f32 %v679_v43, %v7454_v40  ;;  %v418_v51 = vld [vmem:[%s7373_s22 + $0x78] sm:$0xff]  ;;  %12412 = vst [vmem:[#allocation6_spill] sm:$0xff] %v7482_v55  ;;  %v7485_v56 = vld [vmem:[%s7366_s28 + $0x68] sm:$0xff]  ;;  %v7491_v59 = vld [vmem:[%s7366_s28 + $0xe0] sm:$0xff] }
  0x27   : > { %12413 = vst [vmem:[#allocation7_spill] sm:$0xff] %v7491_v59  ;;  %v7494_v60 = vld [vmem:[%s7366_s28 + $0x78] sm:$0xff]  ;;  %v420_v61 = vld [vmem:[%s7373_s22 + $0x88] sm:$0xff]  ;;  %v421_v0 = vld [vmem:[%s7373_s22 + $0x90] sm:$0xff] }
  0x28   : > { %v647_v32 = vadd.f32 %v646_v28, %v7423_v27  ;;  %v681_v53 = vadd.f32 %v680_v48, %v7465_v46  ;;  %v7502_v1 = vld [vmem:[%s7366_s28 + $0xf0] sm:$0xff]  ;;  %v7505_v2 = vld [vmem:[%s7366_s28 + $0x88] sm:$0xff]  ;;  %v7511_v7 = vld [vmem:[%s7366_s28 + $0x100] sm:$0xff] }
  0x29   : > { %5865 = vmatmul.mubr.msk.f32.gmra.mxu0 %vm1052_vm0, %v410_v17  ;;  %12414 = vst [vmem:[#allocation8_spill] sm:$0xff] %v7502_v1  ;;  %v7514_v8 = vld [vmem:[%s7366_s28 + $0x98] sm:$0xff]  ;;  %v423_v13 = vld [vmem:[%s7373_s22 + $0xa0] sm:$0xff]  ;;  %v7522_v14 = vld [vmem:[%s7366_s28 + $0x110] sm:$0xff] }
  0x2a   : > { %5867 = vmatprep.mubr.msk.f32.mxu0 %vm1052_vm0, %v411_v20  ;;  %v648_v36 = vadd.f32 %v647_v32, %v7428_v29  ;;  %v682_v58 = vadd.f32 %v681_v53, %v7474_v50  ;;  %v422_v9 = vld [vmem:[%s7373_s22 + $0x98] sm:$0xff]  ;;  %v7525_v15 = vld [vmem:[%s7366_s28 + $0xa8] sm:$0xff]  ;;  %v7531_v20 = vld [vmem:[%s7366_s28 + $0x120] sm:$0xff] }
  0x2b   : > { %12415 = vst [vmem:[#allocation9_spill] sm:$0xff] %v7525_v15  ;;  %v7534_v22 = vld [vmem:[%s7366_s28 + $0xb8] sm:$0xff]  ;;  %v425_v28 = vld [vmem:[%s7373_s22 + $0xb0] sm:$0xff]  ;;  %v7551_v38 = vld [vmem:[%s7366_s28 + $0x140] sm:$0xff] }
  0x2c   : > { %v649_v42 = vadd.f32 %v648_v36, %v7435_v33  ;;  %v683_v63 = vadd.f32 %v682_v58, %v7485_v56  ;;  %12416 = vst [vmem:[#allocation10_spill] sm:$0xff] %v7534_v22  ;;  %v7562_v48 = vld [vmem:[%s7366_s28 + $0x150] sm:$0xff]  ;;  %v428_v58 = vld [vmem:[%s7373_s22 + $0xc8] sm:$0xff] }
  0x2d   : > { %5868 = vmatmul.mubr.msk.f32.gmra.mxu0 %vm1052_vm0, %v412_v24  ;;  %v424_v24 = vld [vmem:[%s7373_s22 + $0xa8] sm:$0xff] }
  0x2e   : > { %5870 = vmatprep.mubr.msk.f32.mxu0 %vm1052_vm0, %v413_v26  ;;  %v650_v47 = vadd.f32 %v649_v42, %v7451_v39  ;;  %v684_v6 = vadd.f32 %v683_v63, %v7494_v60  ;;  %v426_v42 = vld [vmem:[%s7373_s22 + $0xb8] sm:$0xff]  ;;  %v429_v63 = vld [vmem:[%s7373_s22 + $0xd0] sm:$0xff] }
  0x30   : > { %v651_v52 = vadd.f32 %v650_v47, %v7462_v45  ;;  %v685_v11 = vadd.f32 %v684_v6, %v7505_v2  ;;  %v427_v47 = vld [vmem:[%s7373_s22 + $0xc0] sm:$0xff] }
  0x31   : > { %5871 = vmatmul.mubr.msk.f32.gmra.mxu0 %vm1052_vm0, %v414_v30  ;;  %v7542_v30 = vld [vmem:[%s7366_s28 + $0x130] sm:$0xff] }
  0x32   : > { %5873 = vmatprep.mubr.msk.f32.mxu0 %vm1052_vm0, %v415_v31  ;;  %v652_v57 = vadd.f32 %v651_v52, %v7471_v49  ;;  %v686_v19 = vadd.f32 %v685_v11, %v7514_v8  ;;  %v7545_v31 = vld [vmem:[%s7366_s28 + $0xc8] sm:$0xff]  ;;  %v7594_v11 = vld [vmem:[%s7366_s28 + $0x118] sm:$0xff] }
  0x33   : > { %12417 = vst [vmem:[#allocation11_spill] sm:$0xff] %v7545_v31 }
  0x34   : > { %v653_v62 = vadd.f32 %v652_v57, %v7482_v55  ;;  %v687_v26 = vadd.f32 %v686_v19, %v7525_v15  ;;  %v7574_v57 = vld [vmem:[%s7366_s28 + $0xf8] sm:$0xff] }
  0x35   : > { %5874 = vmatmul.mubr.msk.f32.gmra.mxu0 %vm1052_vm0, %v416_v41  ;;  %v7554_v41 = vld [vmem:[%s7366_s28 + $0xd8] sm:$0xff]  ;;  %12420 = vst [vmem:[#allocation14_spill] sm:$0xff] %v7574_v57 }
  0x36   : > { %5876 = vmatprep.mubr.msk.f32.mxu0 %vm1052_vm0, %v417_v44  ;;  %v654_v3 = vadd.f32 %v653_v62, %v7491_v59  ;;  %v688_v36 = vadd.f32 %v687_v26, %v7534_v22  ;;  %12418 = vst [vmem:[#allocation12_spill] sm:$0xff] %v7554_v41  ;;  %v7605_v26 = vld [vmem:[%s7366_s28 + $0x128] sm:$0xff]  ;;  %v7684_v59 = vld [vmem:[%s7366_s28 + $0x1d8] sm:$0xff] }
  0x37   : > { %v7680_v22 = vld [vmem:[%s7366_s28 + $0x1c8] sm:$0xff] }
  0x38   : > { %v655_v10 = vadd.f32 %v654_v3, %v7502_v1  ;;  %v689_v44 = vadd.f32 %v688_v36, %v7545_v31  ;;  %v7585_v3 = vld [vmem:[%s7366_s28 + $0x108] sm:$0xff]  ;;  %v7611_v36 = vld [vmem:[%s7366_s28 + $0x1a0] sm:$0xff]  ;;  %v7676_v31 = vld [vmem:[%s7366_s28 + $0x1b8] sm:$0xff]  ;;  %12426 = vst [vmem:[#allocation20_spill] sm:$0xff] %v7680_v22 }
  0x39   : > { %5877 = vmatmul.mubr.msk.f32.gmra.mxu0 %vm1052_vm0, %v418_v51  ;;  %v7565_v51 = vld [vmem:[%s7366_s28 + $0xe8] sm:$0xff]  ;;  %12425 = vst [vmem:[#allocation19_spill] sm:$0xff] %v7676_v31 }
  0x3a   : > { %5879 = vmatprep.mubr.msk.f32.mxu0 %vm1052_vm0, %v419_v54  ;;  %v656_v17 = vadd.f32 %v655_v10, %v7511_v7  ;;  %12419 = vst [vmem:[#allocation13_spill] sm:$0xff] %v7565_v51  ;;  %v690_v53 = vadd.f32 %v689_v44, %v7554_v41  ;;  %v7571_v54 = vld [vmem:[%s7366_s28 + $0x160] sm:$0xff] }
  0x3b   : > { %v7591_v10 = vld [vmem:[%s7366_s28 + $0x180] sm:$0xff] }
  0x3c   : > { %v657_v25 = vadd.f32 %v656_v17, %v7522_v14  ;;  %v691_v62 = vadd.f32 %v690_v53, %v7565_v51  ;;  %v7622_v53 = vld [vmem:[%s7366_s28 + $0x1b0] sm:$0xff] }
  0x3d   : > { %5880 = vmatmul.mubr.msk.f32.gmra.mxu0 %vm1052_vm0, %v420_v61 }
  0x3e   : > { %5882 = vmatprep.mubr.msk.f32.mxu0 %vm1052_vm0, %v421_v0  ;;  %v658_v32 = vadd.f32 %v657_v25, %v7531_v20  ;;  %v7582_v0 = vld [vmem:[%s7366_s28 + $0x170] sm:$0xff] }
  0x3f   : > { %v7602_v25 = vld [vmem:[%s7366_s28 + $0x190] sm:$0xff] }
  0x40   : > { %v659_v43 = vadd.f32 %v658_v32, %v7542_v30 }
  0x41   : > { %5883 = vmatmul.mubr.msk.f32.gmra.mxu0 %vm1052_vm0, %v422_v9  ;;  %v692_v9 = vadd.f32 %v691_v62, %v7574_v57 }
  0x42   : > { %5885 = vmatprep.mubr.msk.f32.mxu0 %vm1052_vm0, %v423_v13  ;;  %v660_v52 = vadd.f32 %v659_v43, %v7551_v38  ;;  %v430_v13 = vld [vmem:[%s7373_s22 + $0xd8] sm:$0xff]  ;;  %v432_v43 = vld [vmem:[%s7373_s22 + $0xe8] sm:$0xff] }
  0x43   : > { %v693_v19 = vadd.f32 %v692_v9, %v7585_v3  ;;  %v434_v9 = vld [vmem:[%s7373_s22 + $0xf8] sm:$0xff] }
  0x44   : > { %v661_v61 = vadd.f32 %v660_v52, %v7562_v48  ;;  %v433_v52 = vld [vmem:[%s7373_s22 + $0xf0] sm:$0xff] }
  0x45   : > { %5886 = vmatmul.mubr.msk.f32.gmra.mxu0 %vm1052_vm0, %v424_v24  ;;  %v431_v24 = vld [vmem:[%s7373_s22 + $0xe0] sm:$0xff]  ;;  %v694_v32 = vadd.f32 %v693_v19, %v7594_v11  ;;  %v7641_v19 = vld [vmem:[%s7366_s28 + $0x1d0] sm:$0xff]  ;;  %s5690_s22 = sshll.u32 %s7318_s17, 12 }
  0x46   : > { %5888 = vmatprep.mubr.msk.f32.mxu0 %vm1052_vm0, %v425_v28  ;;  %v662_v6 = vadd.f32 %v661_v61, %v7571_v54  ;;  %12421 = vst [vmem:[#allocation15_spill] sm:$0xff] %v7641_v19  ;;  %s12091_s29 = scalar_lea.hbm %s12152_s10, %s5690_s22 }
  0x48   : > { %v663_v17 = vadd.f32 %v662_v6, %v7582_v0  ;;  %v7634_v6 = vld [vmem:[%s7366_s28 + $0x158] sm:$0xff] }
  0x49   : > { %5889 = vmatmul.mubr.msk.f32.gmra.mxu0 %vm1052_vm0, %v426_v42  ;;  %v7614_v42 = vld [vmem:[%s7366_s28 + $0x138] sm:$0xff] }
  0x4a   : > { %5891 = vmatprep.mubr.msk.f32.mxu0 %vm1052_vm0, %v427_v47  ;;  %v664_v28 = vadd.f32 %v663_v17, %v7591_v10  ;;  %v695_v47 = vadd.f32 %v694_v32, %v7605_v26 }
  0x4c   : > { %v665_v44 = vadd.f32 %v664_v28, %v7602_v25  ;;  %v696_v62 = vadd.f32 %v695_v47, %v7614_v42 }
  0x4d   : > { %5892 = vmatmul.mubr.msk.f32.gmra.mxu0 %vm1052_vm0, %v428_v58  ;;  %v7625_v58 = vld [vmem:[%s7366_s28 + $0x148] sm:$0xff] }
  0x4e   : > { %5894 = vmatprep.mubr.msk.f32.mxu0 %vm1052_vm0, %v429_v63  ;;  %v666_v61 = vadd.f32 %v665_v44, %v7611_v36  ;;  %v7631_v63 = vld [vmem:[%s7366_s28 + $0x1c0] sm:$0xff]  ;;  %v697_v17 = vadd.f32 %v696_v62, %v7625_v58  ;;  %v7653_v44 = vld [vmem:[%s7366_s28 + $0x178] sm:$0xff]  ;;  %v7662_v62 = vld [vmem:[%s7366_s28 + $0x188] sm:$0xff] }
  0x50   : > { %v698_v32 = vadd.f32 %v697_v17, %v7634_v6  ;;  %v7667_v17 = vld [vmem:[%s7366_s28 + $0x198] sm:$0xff] }
  0x51   : > { %5895 = vmatmul.mubr.msk.f32.gmra.mxu0 %vm1052_vm0, %v430_v13  ;;  %v667_v13 = vadd.f32 %v666_v61, %v7622_v53  ;;  %v7659_v61 = vld [vmem:[%s7366_s28 + $0x1f0] sm:$0xff] }
  0x52   : > { %5897 = vmatprep.mubr.msk.f32.mxu0 %vm1052_vm0, %v431_v24  ;;  %v7644_v24 = vld [vmem:[%s7366_s28 + $0x168] sm:$0xff]  ;;  %12423 = vst [vmem:[#allocation17_spill] sm:$0xff] %v7659_v61 }
  0x53   : > { %v668_v28 = vadd.f32 %v667_v13, %v7631_v63 }
  0x55   : > { %5898 = vmatmul.mubr.msk.f32.gmra.mxu0 %vm1052_vm0, %v432_v43  ;;  %v7650_v43 = vld [vmem:[%s7366_s28 + $0x1e0] sm:$0xff]  ;;  %v669_v47 = vadd.f32 %v668_v28, %v7641_v19  ;;  %v7692_v19 = vld [vmem:[%s7366_s28 + $0x1f8] sm:$0xff] }
  0x56   : > { %5900 = vmatprep.mubr.msk.f32.mxu0 %vm1052_vm0, %v433_v52  ;;  %12422 = vst [vmem:[#allocation16_spill] sm:$0xff] %v7650_v43  ;;  %v699_v52 = vadd.f32 %v698_v32, %v7644_v24  ;;  %v7672_v32 = vld [vmem:[%s7366_s28 + $0x1a8] sm:$0xff] }
  0x57   : > { %v670_v13 = vadd.f32 %v669_v47, %v7650_v43  ;;  %12424 = vst [vmem:[#allocation18_spill] sm:$0xff] %v7672_v32 }
  0x59   : > { %5901 = vmatmul.mubr.msk.f32.gmra.mxu0 %vm1052_vm0, %v434_v9  ;;  %v700_v9 = vadd.f32 %v699_v52, %v7653_v44  ;;  %v671_v57 = vadd.f32 %v670_v13, %v7659_v61  ;;  %v7688_v61 = vld [vmem:[%s7366_s28 + $0x1e8] sm:$0xff] }
  0x5a   : > { %1791 = vmatprep.mubr.f32.mxu0 %v7438_v34 }
  0x5b   : > { %v701_v28 = vadd.f32 %v700_v9, %v7662_v62  ;;  %v672_v51 = vrot.slane %v671_v57, 4 }
  0x5d   : > { %v702_v41 = vadd.f32 %v701_v28, %v7667_v17  ;;  %v673_v1 = vadd.f32 %v672_v51, %v671_v57 }
  0x5f   : > { %v703_v47 = vadd.f32 %v702_v41, %v7672_v32  ;;  %v674_v52 = vrot.slane %v673_v1, 2 }
  0x61   : > { %v704_v43 = vadd.f32 %v703_v47, %v7676_v31  ;;  %v675_v13 = vadd.f32 %v674_v52, %v673_v1 }
  0x63   : > { %v705_v9 = vadd.f32 %v704_v43, %v7680_v22  ;;  %v676_v15 = vrot.slane %v675_v13, 1 }
  0x65   : > { %v706_v28 = vadd.f32 %v705_v9, %v7684_v59  ;;  %v677_v51 = vadd.f32 %v676_v15, %v675_v13  ;;  %v12232_v9 = vmov 0.0  }
  0x66   : > { %1502 = vmatprep.subr.mxu1 %v12232_v9  ;;  %1727 = vmatprep.subr.mxu0 %v12232_v9 }
  0x67   : > { %v707_v41 = vadd.f32 %v706_v28, %v7688_v61  ;;  %vm812_vm1 = vcmp.gt.f32.partialorder %v677_v51, 0.0 }
  0x68   : > { %v814_v47 = vsel %vm812_vm1, %v677_v51, 1.0 }
  0x69   : > { %v708_v57 = vadd.f32 %v707_v41, %v7692_v19  ;;  %6709 = vrcp.f32 %v814_v47 }
  0x6b   : > { %v709_v31 = vrot.slane %v708_v57, 4 }
  0x6d   : > { %v710_v1 = vadd.f32 %v709_v31, %v708_v57 }
  0x6f   : > { %v711_v52 = vrot.slane %v710_v1, 2 }
  0x71   : > { %v712_v43 = vadd.f32 %v711_v52, %v710_v1 }
  0x73   : > { %v713_v22 = vrot.slane %v712_v43, 1 }
  0x75   : > { %v714_v32 = vadd.f32 %v713_v22, %v712_v43 }
  0x76   : > { %v6710_v55 = vpop.eup %6709 }
  0x77   : > { %vm813_vm2 = vcmp.gt.f32.partialorder %v714_v32, 0.0  ;;  %v7701_v13 = vsel %vm812_vm1, %v6710_v55, 0.0 }
  0x78   : > { %v815_v15 = vsel %vm813_vm2, %v714_v32, 1.0  ;;  %v982_v31 = vmul.f32 %v7701_v13, %v7376_v4  ;;  %v1014_v28 = vmul.f32 %v7701_v13, %v7511_v7  ;;  %v984_v22 = vmul.f32 %v7701_v13, %v7379_v5 }
  0x79   : > { %6711 = vrcp.f32 %v815_v15  ;;  %v1016_v41 = vmul.f32 %v7701_v13, %v7522_v14  ;;  %v986_v55 = vmul.f32 %v7701_v13, %v7392_v12  ;;  %v1018_v51 = vmul.f32 %v7701_v13, %v7531_v20 }
  0x7a   : > { %v6129_v57 = vpack.i.bf16 %v982_v31, %v1014_v28  ;;  %v988_v7 = vmul.f32 %v7701_v13, %v7401_v16  ;;  %v1020_v5 = vmul.f32 %v7701_v13, %v7542_v30  ;;  %v990_v52 = vmul.f32 %v7701_v13, %v7406_v18 }
  0x7b   : > { %v6131_v47 = vpack.i.bf16 %v984_v22, %v1016_v41  ;;  %v6133_v4 = vpack.i.bf16 %v986_v55, %v1018_v51  ;;  %v1022_v12 = vmul.f32 %v7701_v13, %v7551_v38  ;;  %v992_v38 = vmul.f32 %v7701_v13, %v7411_v21 }
  0x7c   : > { %6130 = vxpose.xlu0.b32.start [1/16] %v6129_v57, 128  ;;  %v6135_v14 = vpack.i.bf16 %v988_v7, %v1020_v5  ;;  %v1024_v32 = vmul.f32 %v7701_v13, %v7562_v48  ;;  %v1026_v21 = vmul.f32 %v7701_v13, %v7571_v54  ;;  %v1028_v57 = vmul.f32 %v7701_v13, %v7582_v0 }
  0x7d   : > { %v6137_v18 = vpack.i.bf16 %v990_v52, %v1022_v12  ;;  %v1030_v55 = vmul.f32 %v7701_v13, %v7591_v10  ;;  %v1034_v5 = vmul.f32 %v7701_v13, %v7611_v36  ;;  %v1038_v12 = vmul.f32 %v7701_v13, %v7631_v63 }
  0x7e   : > { %v6139_v28 = vpack.i.bf16 %v992_v38, %v1024_v32  ;;  %v12430_v38 = vld [vmem:[#allocation18_spill] sm:$0xff] }
  0x80   : > { %6132 = vxpose.xlu0.b32.cont [2/16] %v6131_v47, 128 }
  0x84   : > { %6134 = vxpose.xlu0.b32.cont [3/16] %v6133_v4, 128  ;;  %v1032_v4 = vmul.f32 %v7701_v13, %v7602_v25 }
  0x86   : > { %v6712_v1 = vpop.eup %6711 }
  0x87   : > { %v7724_v43 = vsel %vm813_vm2, %v6712_v1, 0.0 }
  0x88   : > { %v983_v20 = vmul.f32 %v7724_v43, %v7438_v34  ;;  %v1015_v16 = vmul.f32 %v7724_v43, %v7585_v3  ;;  %v985_v30 = vmul.f32 %v7724_v43, %v7441_v35  ;;  %v1017_v15 = vmul.f32 %v7724_v43, %v7594_v11  ;;  %6136 = vxpose.xlu0.b32.cont [4/16] %v6135_v14, 128 }
  0x89   : > { %v987_v3 = vmul.f32 %v7724_v43, %v7445_v37  ;;  %v1019_v35 = vmul.f32 %v7724_v43, %v7605_v26  ;;  %v994_v11 = vmul.f32 %v7701_v13, %v7416_v23  ;;  %v989_v48 = vmul.f32 %v7724_v43, %v7454_v40 }
  0x8a   : > { %v6241_v31 = vpack.i.bf16 %v983_v20, %v1015_v16  ;;  %v6243_v34 = vpack.i.bf16 %v985_v30, %v1017_v15  ;;  %v1021_v41 = vmul.f32 %v7724_v43, %v7614_v42  ;;  %v996_v26 = vmul.f32 %v7701_v13, %v7423_v27  ;;  %v12427_v16 = vld [vmem:[#allocation6_spill] sm:$0xff]  ;;  %v12428_v30 = vld [vmem:[#allocation15_spill] sm:$0xff] }
  0x8b   : > { %v6245_v22 = vpack.i.bf16 %v987_v3, %v1019_v35  ;;  %v6141_v37 = vpack.i.bf16 %v994_v11, %v1026_v21  ;;  %v991_v54 = vmul.f32 %v7724_v43, %v7465_v46  ;;  %v1023_v47 = vmul.f32 %v7724_v43, %v7625_v58  ;;  %v12434_v21 = vld [vmem:[#allocation19_spill] sm:$0xff] }
  0x8c   : > { %6242 = vxpose.xlu1.b32.start [1/16] %v6241_v31, 128  ;;  %6138 = vxpose.xlu0.b32.cont [5/16] %v6137_v18, 128  ;;  %v6247_v23 = vpack.i.bf16 %v989_v48, %v1021_v41  ;;  %v6143_v40 = vpack.i.bf16 %v996_v26, %v1028_v57  ;;  %v998_v42 = vmul.f32 %v7701_v13, %v7428_v29  ;;  %v12429_v18 = vld [vmem:[#allocation9_spill] sm:$0xff]  ;;  %v12431_v31 = vld [vmem:[#allocation7_spill] sm:$0xff]  ;;  %v12435_v41 = vld [vmem:[#allocation8_spill] sm:$0xff] }
  0x8d   : > { %v6249_v27 = vpack.i.bf16 %v991_v54, %v1023_v47  ;;  %v993_v0 = vmul.f32 %v7724_v43, %v7474_v50  ;;  %v1025_v51 = vmul.f32 %v7724_v43, %v7634_v6  ;;  %v1000_v58 = vmul.f32 %v7701_v13, %v7435_v33  ;;  %v12436_v26 = vld [vmem:[#allocation17_spill] sm:$0xff]  ;;  %v12437_v54 = vld [vmem:[#allocation11_spill] sm:$0xff] }
  0x8e   : > { %v6145_v46 = vpack.i.bf16 %v998_v42, %v1030_v55  ;;  %v995_v10 = vmul.f32 %v7724_v43, %v7485_v56  ;;  %v1027_v7 = vmul.f32 %v7724_v43, %v7644_v24  ;;  %v1002_v6 = vmul.f32 %v7701_v13, %v7451_v39 }
  0x8f   : > { %v6251_v29 = vpack.i.bf16 %v993_v0, %v1025_v51  ;;  %v6147_v50 = vpack.i.bf16 %v1000_v58, %v1032_v4  ;;  %v997_v25 = vmul.f32 %v7724_v43, %v7494_v60  ;;  %v1029_v1 = vmul.f32 %v7724_v43, %v7653_v44  ;;  %v12439_v0 = vld [vmem:[#allocation12_spill] sm:$0xff]  ;;  %v12440_v58 = vld [vmem:[#allocation13_spill] sm:$0xff] }
  0x90   : > { %6244 = vxpose.xlu1.b32.cont [2/16] %v6243_v34, 128  ;;  %6140 = vxpose.xlu0.b32.cont [6/16] %v6139_v28, 128  ;;  %v6253_v33 = vpack.i.bf16 %v995_v10, %v1027_v7  ;;  %v6149_v56 = vpack.i.bf16 %v1002_v6, %v1034_v5  ;;  %v1004_v24 = vmul.f32 %v7701_v13, %v7462_v45  ;;  %v12432_v34 = vld [vmem:[#allocation16_spill] sm:$0xff]  ;;  %v12433_v28 = vld [vmem:[#allocation10_spill] sm:$0xff] }
  0x91   : > { %v1036_v14 = vmul.f32 %v7701_v13, %v7622_v53  ;;  %v6255_v39 = vpack.i.bf16 %v997_v25, %v1029_v1  ;;  %v999_v36 = vmul.f32 %v7724_v43, %v7505_v2  ;;  %v1031_v52 = vmul.f32 %v7724_v43, %v7662_v62  ;;  %v12441_v7 = vld [vmem:[#allocation14_spill] sm:$0xff] }
  0x92   : > { %v1006_v44 = vmul.f32 %v7701_v13, %v7471_v49  ;;  %v1001_v53 = vmul.f32 %v7724_v43, %v7514_v8  ;;  %v1033_v20 = vmul.f32 %v7724_v43, %v7667_v17  ;;  %v1008_v62 = vmul.f32 %v7701_v13, %v12427_v16 }
  0x93   : > { %v6151_v60 = vpack.i.bf16 %v1004_v24, %v1036_v14  ;;  %v6257_v45 = vpack.i.bf16 %v999_v36, %v1031_v52  ;;  %v1040_v15 = vmul.f32 %v7701_v13, %v12428_v30  ;;  %v1003_v63 = vmul.f32 %v7724_v43, %v12429_v18 }
  0x94   : > { %6246 = vxpose.xlu1.b32.cont [3/16] %v6245_v22, 128  ;;  %6142 = vxpose.xlu0.b32.cont [7/16] %v6141_v37, 128  ;;  %v6153_v2 = vpack.i.bf16 %v1006_v44, %v1038_v12  ;;  %v6259_v49 = vpack.i.bf16 %v1001_v53, %v1033_v20  ;;  %v1035_v32 = vmul.f32 %v7724_v43, %v12430_v38  ;;  %v7845_v44 = vld [vmem:[%s12146_s4] ss:$0 sm:$0xff] }
  0x95   : > { %v6155_v8 = vpack.i.bf16 %v1008_v62, %v1040_v15  ;;  %v1010_v17 = vmul.f32 %v7701_v13, %v12431_v31  ;;  %v1042_v3 = vmul.f32 %v7701_v13, %v12432_v34  ;;  %v1005_v11 = vmul.f32 %v7724_v43, %v12433_v28 }
  0x96   : > { %v6261_v35 = vpack.i.bf16 %v1003_v63, %v1035_v32  ;;  %v1037_v22 = vmul.f32 %v7724_v43, %v12434_v21  ;;  %v1012_v37 = vmul.f32 %v7701_v13, %v12435_v41  ;;  %v1044_v57 = vmul.f32 %v7701_v13, %v12436_v26 }
  0x97   : > { %v6157_v48 = vpack.i.bf16 %v1010_v17, %v1042_v3  ;;  %v1007_v47 = vmul.f32 %v7724_v43, %v12437_v54  ;;  %v1009_v51 = vmul.f32 %v7724_v43, %v12439_v0  ;;  %v1011_v4 = vmul.f32 %v7724_v43, %v12440_v58 }
  0x98   : > { %6248 = vxpose.xlu1.b32.cont [4/16] %v6247_v23, 128  ;;  %6144 = vxpose.xlu0.b32.cont [8/16] %v6143_v40, 128  ;;  %v6263_v23 = vpack.i.bf16 %v1005_v11, %v1037_v22  ;;  %v12438_v40 = vld [vmem:[#allocation20_spill] sm:$0xff]  ;;  %v6159_v55 = vpack.i.bf16 %v1012_v37, %v1044_v57  ;;  %v1045_v6 = vmul.f32 %v7724_v43, %v7692_v19 }
  0x99   : > { %v1039_v42 = vmul.f32 %v7724_v43, %v12438_v40 }
  0x9c   : > { %6250 = vxpose.xlu1.b32.cont [5/16] %v6249_v27, 128  ;;  %6146 = vxpose.xlu0.b32.cont [9/16] %v6145_v46, 128  ;;  %v6265_v27 = vpack.i.bf16 %v1007_v47, %v1039_v42  ;;  %v1041_v46 = vmul.f32 %v7724_v43, %v7684_v59 }
  0x9e   : > { %v6267_v13 = vpack.i.bf16 %v1009_v51, %v1041_v46 }
  0xa0   : > { %6252 = vxpose.xlu1.b32.cont [6/16] %v6251_v29, 128  ;;  %6148 = vxpose.xlu0.b32.cont [10/16] %v6147_v50, 128  ;;  %v1043_v29 = vmul.f32 %v7724_v43, %v7688_v61  ;;  %v1013_v50 = vmul.f32 %v7724_v43, %v12441_v7 }
  0xa2   : > { %v6269_v10 = vpack.i.bf16 %v1011_v4, %v1043_v29  ;;  %v6271_v5 = vpack.i.bf16 %v1013_v50, %v1045_v6 }
  0xa4   : > { %6254 = vxpose.xlu1.b32.cont [7/16] %v6253_v33, 128  ;;  %6150 = vxpose.xlu0.b32.cont [11/16] %v6149_v56, 128 }
  0xa8   : > { %6256 = vxpose.xlu1.b32.cont [8/16] %v6255_v39, 128  ;;  %6152 = vxpose.xlu0.b32.cont [12/16] %v6151_v60, 128 }
  0xac   : > { %6258 = vxpose.xlu1.b32.cont [9/16] %v6257_v45, 128  ;;  %6154 = vxpose.xlu0.b32.cont [13/16] %v6153_v2, 128 }
  0xb0   : > { %6260 = vxpose.xlu1.b32.cont [10/16] %v6259_v49, 128  ;;  %6156 = vxpose.xlu0.b32.cont [14/16] %v6155_v8, 128 }
  0xb4   : > { %6262 = vxpose.xlu1.b32.cont [11/16] %v6261_v35, 128  ;;  %6158 = vxpose.xlu0.b32.cont [15/16] %v6157_v48, 128 }
  0xb8   : > { %6264 = vxpose.xlu1.b32.cont [12/16] %v6263_v23, 128  ;;  %6160 = vxpose.xlu0.b32.end [16/16] %v6159_v55, 128 }
  0xbc   : > { %6266 = vxpose.xlu1.b32.cont [13/16] %v6265_v27, 128 }
  0xc0   : > { %6268 = vxpose.xlu1.b32.cont [14/16] %v6267_v13, 128 }
  0xc4   : > { %6270 = vxpose.xlu1.b32.cont [15/16] %v6269_v10, 128 }
  0xc8   : > { %6272 = vxpose.xlu1.b32.end [16/16] %v6271_v5, 128 }
  0xdd   : > { %v7834_v59 = vpop.f32.mrf.mxu0 }
  0xde   : > { %v1221_v58 = vadd.f32 %v7834_v59, %v7845_v44 }
  0xdf   : > { %v7836_v33 = vpop.f32.mrf.mxu0 }
  0xe0   : > { %v1216_v10 = vadd.f32 %v7845_v44, %v7836_v33 }
  0xe1   : > { %v7838_v25 = vpop.f32.mrf.mxu0 }
  0xe2   : > { %v1231_v55 = vadd.f32 %v7838_v25, %v7845_v44 }
  0xe3   : > { %v7840_v1 = vpop.f32.mrf.mxu0 }
  0xe4   : > { %v1226_v51 = vadd.f32 %v7845_v44, %v7840_v1 }
  0xe5   : > { %v5863_v61 = vpop.f32.mrf.mxu0 }
  0xe6   : > { %v1241_v57 = vadd.f32 %v5863_v61, %v7845_v44 }
  0xe7   : > { %v1235_v56 = vpop.f32.mrf.mxu0 }
  0xe8   : > { %v1236_v47 = vadd.f32 %v7845_v44, %v1235_v56 }
  0xe9   : > { %v5866_v24 = vpop.f32.mrf.mxu0 }
  0xea   : > { %v1251_v21 = vadd.f32 %v5866_v24, %v7845_v44 }
  0xeb   : > { %v1245_v14 = vpop.f32.mrf.mxu0 }
  0xec   : > { %v1246_v41 = vadd.f32 %v7845_v44, %v1245_v14 }
  0xed   : > { %v5869_v39 = vpop.f32.mrf.mxu0 }
  0xee   : > { %v1261_v34 = vadd.f32 %v5869_v39, %v7845_v44 }
  0xef   : > { %v1255_v36 = vpop.f32.mrf.mxu0 }
  0xf0   : > { %v1256_v35 = vadd.f32 %v7845_v44, %v1255_v36 }
  0xf1   : > { %v5872_v52 = vpop.f32.mrf.mxu0 }
  0xf2   : > { %v1271_v38 = vadd.f32 %v5872_v52, %v7845_v44 }
  0xf3   : > { %v1265_v60 = vpop.f32.mrf.mxu0 }
  0xf4   : > { %v1266_v8 = vadd.f32 %v7845_v44, %v1265_v60 }
  0xf5   : > { %v5875_v19 = vpop.f32.mrf.mxu0 }
  0xf6   : > { %v1281_v62 = vadd.f32 %v5875_v19, %v7845_v44 }
  0xf7   : > { %v1275_v43 = vpop.f32.mrf.mxu0 }
  0xf8   : > { %v7852_v16 = vpop.trf.xlu0  ;;  %v1276_v49 = vadd.f32 %v7845_v44, %v1275_v43 }
  0xf9   : > { %v5878_v12 = vpop.f32.mrf.mxu0  ;;  %12442 = vst [vmem:[#allocation6_spill] sm:$0xff] %v7852_v16  ;;  %v12231_v30 = vunpack.i.l.bf16 %v7852_v16 }
  0xfa   : > { %v1291_v45 = vadd.f32 %v5878_v12, %v7845_v44 }
  0xfb   : > { %v1285_v53 = vpop.f32.mrf.mxu0  ;;  %1566 = vmatprep.mubr.f32.mxu1 %v12231_v30  ;;  %v7001_v30 = vld [vmem:[%s7366_s28 + $0xd0] sm:$0xff] }
  0xfc   : > { %v1286_v20 = vadd.f32 %v7845_v44, %v1285_v53  ;;  %1503 = vmatpush1.msra.mxu1 %v1291_v45  ;;  %v7865_v63 = vpop.trf.xlu0 }
  0xfd   : > { %v7849_v2 = vpop.f32.mrf.mxu0  ;;  %1504 = vmatprep.subr.mxu1 %v12232_v9  ;;  %12443 = vst [vmem:[#allocation15_spill] sm:$0xff] %v7865_v63 }
  0xfe   : > { %1505 = vmatpush1.msra.mxu1 %v1286_v20 }
  0xff   : > { %v7856_v15 = vpop.f32.mrf.mxu0  ;;  %1506 = vmatprep.subr.mxu1 %v12232_v9 }
 0x100   : > { %1507 = vmatpush1.msra.mxu1 %v1281_v62  ;;  %v7875_v17 = vpop.trf.xlu0 }
 0x101   : > { %v7862_v18 = vpop.f32.mrf.mxu0  ;;  %1508 = vmatprep.subr.mxu1 %v12232_v9  ;;  %12444 = vst [vmem:[#allocation9_spill] sm:$0xff] %v7875_v17 }
 0x102   : > { %1509 = vmatpush1.msra.mxu1 %v1276_v49 }
 0x103   : > { %v7868_v32 = vpop.f32.mrf.mxu0  ;;  %1510 = vmatprep.subr.mxu1 %v12232_v9 }
 0x104   : > { %1511 = vmatpush1.msra.mxu1 %v1271_v38  ;;  %v7885_v11 = vpop.trf.xlu0 }
 0x105   : > { %v7872_v31 = vpop.f32.mrf.mxu0  ;;  %1512 = vmatprep.subr.mxu1 %v12232_v9  ;;  %12445 = vst [vmem:[#allocation18_spill] sm:$0xff] %v7885_v11 }
 0x106   : > { %1513 = vmatpush1.msra.mxu1 %v1266_v8  ;;  %v1321_v49 = vadd.f32 %v7872_v31, %v7845_v44 }
 0x107   : > { %v7878_v3 = vpop.f32.mrf.mxu0  ;;  %1514 = vmatprep.subr.mxu1 %v12232_v9 }
 0x108   : > { %1515 = vmatpush1.msra.mxu1 %v1261_v34  ;;  %v7891_v48 = vpop.trf.xlu1  ;;  %v7895_v26 = vpop.trf.xlu0  ;;  %v1316_v8 = vadd.f32 %v7845_v44, %v7878_v3 }
 0x109   : > { %v7882_v28 = vpop.f32.mrf.mxu0  ;;  %1516 = vmatprep.subr.mxu1 %v12232_v9  ;;  %12446 = vst [vmem:[#allocation7_spill] sm:$0xff] %v7891_v48  ;;  %12447 = vst [vmem:[#allocation16_spill] sm:$0xff] %v7895_v26 }
 0x10a   : > { %1517 = vmatpush1.msra.mxu1 %v1256_v35  ;;  %v1331_v45 = vadd.f32 %v7882_v28, %v7845_v44  ;;  %v1311_v35 = vadd.f32 %v7862_v18, %v7845_v44  ;;  %v1306_v28 = vadd.f32 %v7845_v44, %v7868_v32  ;;  %v12230_v18 = vunpack.i.h.bf16 %v7852_v16 }
 0x10b   : > { %v7888_v22 = vpop.f32.mrf.mxu0  ;;  %1518 = vmatprep.subr.mxu1 %v12232_v9  ;;  %v12229_v32 = vunpack.i.l.bf16 %v7865_v63 }
 0x10c   : > { %1519 = vmatpush1.msra.mxu1 %v1251_v21  ;;  %v7899_v54 = vpop.trf.xlu1  ;;  %v7903_v42 = vpop.trf.xlu0  ;;  %v1326_v20 = vadd.f32 %v7845_v44, %v7888_v22  ;;  %v1301_v21 = vadd.f32 %v7849_v2, %v7845_v44  ;;  %v12228_v2 = vunpack.i.h.bf16 %v7865_v63 }
 0x10d   : > { %v5893_v37 = vpop.f32.mrf.mxu0  ;;  %1520 = vmatprep.subr.mxu1 %v12232_v9  ;;  %12448 = vst [vmem:[#allocation10_spill] sm:$0xff] %v7899_v54  ;;  %12449 = vst [vmem:[#allocation19_spill] sm:$0xff] %v7903_v42 }
 0x10e   : > { %1521 = vmatpush1.msra.mxu1 %v1246_v41  ;;  %v1341_v60 = vadd.f32 %v5893_v37, %v7845_v44  ;;  %v1296_v41 = vadd.f32 %v7845_v44, %v7856_v15  ;;  %v12226_v15 = vunpack.i.h.bf16 %v7875_v17 }
 0x10f   : > { %v1335_v23 = vpop.f32.mrf.mxu0  ;;  %1522 = vmatprep.subr.mxu1 %v12232_v9 }
 0x110   : > { %1523 = vmatpush1.msra.mxu1 %v1241_v57  ;;  %v7908_v0 = vpop.trf.xlu1  ;;  %v7913_v13 = vpop.trf.xlu0  ;;  %v1336_v43 = vadd.f32 %v7845_v44, %v1335_v23 }
 0x111   : > { %v5896_v40 = vpop.f32.mrf.mxu0  ;;  %1524 = vmatprep.subr.mxu1 %v12232_v9  ;;  %12450 = vst [vmem:[#allocation8_spill] sm:$0xff] %v7908_v0  ;;  %12451 = vst [vmem:[#allocation17_spill] sm:$0xff] %v7913_v13 }
 0x112   : > { %1525 = vmatpush1.msra.mxu1 %v1236_v47  ;;  %v1351_v14 = vadd.f32 %v5896_v40, %v7845_v44  ;;  %v12225_v47 = vunpack.i.l.bf16 %v7885_v11  ;;  %v12224_v40 = vunpack.i.h.bf16 %v7885_v11 }
 0x113   : > { %v1345_v27 = vpop.f32.mrf.mxu0  ;;  %1526 = vmatprep.subr.mxu1 %v12232_v9 }
 0x114   : > { %1527 = vmatpush1.msra.mxu1 %v1231_v55  ;;  %v7918_v29 = vpop.trf.xlu1  ;;  %v7923_v50 = vpop.trf.xlu0  ;;  %v1346_v36 = vadd.f32 %v7845_v44, %v1345_v27  ;;  %v12223_v27 = vunpack.i.l.bf16 %v7895_v26 }
 0x115   : > { %v5899_v46 = vpop.f32.mrf.mxu0  ;;  %1528 = vmatprep.subr.mxu1 %v12232_v9  ;;  %12452 = vst [vmem:[#allocation11_spill] sm:$0xff] %v7918_v29  ;;  %12453 = vst [vmem:[#allocation20_spill] sm:$0xff] %v7923_v50 }
 0x116   : > { %1529 = vmatpush1.msra.mxu1 %v1226_v51  ;;  %v1361_v1 = vadd.f32 %v5899_v46, %v7845_v44  ;;  %v12222_v51 = vunpack.i.h.bf16 %v7895_v26 }
 0x117   : > { %v1355_v4 = vpop.f32.mrf.mxu0  ;;  %1530 = vmatprep.subr.mxu1 %v12232_v9 }
 0x118   : > { %1531 = vmatpush1.msra.mxu1 %v1221_v58  ;;  %v7927_v59 = vpop.trf.xlu1  ;;  %v7931_v33 = vpop.trf.xlu0  ;;  %v1356_v56 = vadd.f32 %v7845_v44, %v1355_v4  ;;  %v12221_v58 = vunpack.i.l.bf16 %v7903_v42  ;;  %v12220_v4 = vunpack.i.h.bf16 %v7903_v42 }
 0x119   : > { %v5902_v7 = vpop.f32.mrf.mxu0  ;;  %1532 = vmatprep.subr.mxu1 %v12232_v9  ;;  %12454 = vst [vmem:[#allocation12_spill] sm:$0xff] %v7927_v59  ;;  %12455 = vst [vmem:[#allocation13_spill] sm:$0xff] %v7931_v33 }
 0x11a   : > { %v1371_v6 = vadd.f32 %v5902_v7, %v7845_v44  ;;  %1533 = vmatpush1.msra.mxu1 %v1216_v10  ;;  %v12219_v10 = vunpack.i.l.bf16 %v7913_v13  ;;  %v12218_v7 = vunpack.i.h.bf16 %v7913_v13 }
 0x11b   : > { %v1365_v5 = vpop.f32.mrf.mxu0  ;;  %1534 = vmatprep.subr.mxu1 %v12232_v9 }
 0x11c   : > { %v1366_v25 = vadd.f32 %v7845_v44, %v1365_v5  ;;  %1535 = vmatpush2.msra.mxu1 %v1371_v6  ;;  %v7935_v61 = vpop.trf.xlu1  ;;  %v7939_v24 = vpop.trf.xlu0  ;;  %v12227_v44 = vunpack.i.l.bf16 %v7875_v17  ;;  %v12217_v6 = vunpack.i.l.bf16 %v7923_v50  ;;  %v12216_v5 = vunpack.i.h.bf16 %v7923_v50 }
 0x11d   : > { %1536 = vmatprep.subr.mxu1 %v12232_v9  ;;  %12456 = vst [vmem:[#allocation14_spill] sm:$0xff] %v7935_v61  ;;  %12457 = vst [vmem:[#allocation21_spill] sm:$0xff] %v7939_v24 }
 0x11e   : > { %1537 = vmatpush2.msra.mxu1 %v1366_v25  ;;  %v12215_v25 = vunpack.i.l.bf16 %v7931_v33 }
 0x11f   : > { %1538 = vmatprep.subr.mxu1 %v12232_v9 }
 0x120   : > { %1539 = vmatpush2.msra.mxu1 %v1361_v1  ;;  %v7943_v39 = vpop.trf.xlu1  ;;  %v7947_v52 = vpop.trf.xlu0  ;;  %v12213_v1 = vunpack.i.h.bf16 %v7931_v33 }
 0x121   : > { %1540 = vmatprep.subr.mxu1 %v12232_v9  ;;  %12458 = vst [vmem:[#allocation22_spill] sm:$0xff] %v7943_v39  ;;  %12459 = vst [vmem:[#allocation23_spill] sm:$0xff] %v7947_v52 }
 0x122   : > { %1541 = vmatpush2.msra.mxu1 %v1356_v56  ;;  %v12211_v56 = vunpack.i.l.bf16 %v7939_v24 }
 0x123   : > { %1542 = vmatprep.subr.mxu1 %v12232_v9 }
 0x124   : > { %1543 = vmatpush2.msra.mxu1 %v1351_v14  ;;  %v7951_v19 = vpop.trf.xlu1  ;;  %v7955_v12 = vpop.trf.xlu0  ;;  %v12210_v14 = vunpack.i.h.bf16 %v7939_v24 }
 0x125   : > { %1544 = vmatprep.subr.mxu1 %v12232_v9  ;;  %12460 = vst [vmem:[#allocation24_spill] sm:$0xff] %v7951_v19  ;;  %12461 = vst [vmem:[#allocation25_spill] sm:$0xff] %v7955_v12 }
 0x126   : > { %1545 = vmatpush2.msra.mxu1 %v1346_v36  ;;  %v12209_v36 = vunpack.i.l.bf16 %v7947_v52 }
 0x127   : > { %1546 = vmatprep.subr.mxu1 %v12232_v9 }
 0x128   : > { %1547 = vmatpush2.msra.mxu1 %v1341_v60  ;;  %v7960_v53 = vpop.trf.xlu1  ;;  %v7965_v62 = vpop.trf.xlu0  ;;  %v12207_v60 = vunpack.i.h.bf16 %v7947_v52 }
 0x129   : > { %1548 = vmatprep.subr.mxu1 %v12232_v9  ;;  %12462 = vst [vmem:[#allocation26_spill] sm:$0xff] %v7960_v53  ;;  %12463 = vst [vmem:[#allocation27_spill] sm:$0xff] %v7965_v62 }
 0x12a   : > { %1549 = vmatpush2.msra.mxu1 %v1336_v43  ;;  %v12206_v43 = vunpack.i.l.bf16 %v7955_v12 }
 0x12b   : > { %1550 = vmatprep.subr.mxu1 %v12232_v9 }
 0x12c   : > { %1551 = vmatpush2.msra.mxu1 %v1331_v45  ;;  %v7970_v38 = vpop.trf.xlu1  ;;  %v7975_v34 = vpop.trf.xlu0  ;;  %v12205_v45 = vunpack.i.h.bf16 %v7955_v12 }
 0x12d   : > { %1552 = vmatprep.subr.mxu1 %v12232_v9  ;;  %12464 = vst [vmem:[#allocation28_spill] sm:$0xff] %v7970_v38  ;;  %12465 = vst [vmem:[#allocation29_spill] sm:$0xff] %v7975_v34 }
 0x12e   : > { %1553 = vmatpush2.msra.mxu1 %v1326_v20  ;;  %v12203_v20 = vunpack.i.l.bf16 %v7965_v62 }
 0x12f   : > { %1554 = vmatprep.subr.mxu1 %v12232_v9 }
 0x130   : > { %1555 = vmatpush2.msra.mxu1 %v1321_v49  ;;  %v7980_v31 = vpop.trf.xlu1  ;;  %v7985_v3 = vpop.trf.xlu0  ;;  %v12168_v49 = vunpack.i.h.bf16 %v7965_v62 }
 0x131   : > { %1556 = vmatprep.subr.mxu1 %v12232_v9  ;;  %12466 = vst [vmem:[#allocation30_spill] sm:$0xff] %v7980_v31  ;;  %12467 = vst [vmem:[#allocation31_spill] sm:$0xff] %v7985_v3 }
 0x132   : > { %1557 = vmatpush2.msra.mxu1 %v1316_v8  ;;  %v12169_v8 = vunpack.i.l.bf16 %v7975_v34 }
 0x133   : > { %1558 = vmatprep.subr.mxu1 %v12232_v9 }
 0x134   : > { %1559 = vmatpush2.msra.mxu1 %v1311_v35  ;;  %v7991_v22 = vpop.trf.xlu1  ;;  %v7997_v37 = vpop.trf.xlu0  ;;  %v12170_v35 = vunpack.i.h.bf16 %v7975_v34 }
 0x135   : > { %1560 = vmatprep.subr.mxu1 %v12232_v9  ;;  %12468 = vst [vmem:[#allocation32_spill] sm:$0xff] %v7991_v22  ;;  %12469 = vst [vmem:[#allocation33_spill] sm:$0xff] %v7997_v37 }
 0x136   : > { %1561 = vmatpush2.msra.mxu1 %v1306_v28  ;;  %v12171_v28 = vunpack.i.l.bf16 %v7985_v3 }
 0x137   : > { %1562 = vmatprep.subr.mxu1 %v12232_v9 }
 0x138   : > { %1563 = vmatpush2.msra.mxu1 %v1301_v21  ;;  %v8002_v57 = vpop.trf.xlu1  ;;  %v12172_v21 = vunpack.i.h.bf16 %v7985_v3 }
 0x139   : > { %1564 = vmatprep.subr.mxu1 %v12232_v9  ;;  %12470 = vst [vmem:[#allocation34_spill] sm:$0xff] %v8002_v57 }
 0x13a   : > { %1565 = vmatpush2.msra.mxu1 %v1296_v41  ;;  %v12173_v41 = vunpack.i.l.bf16 %v7997_v37 }
 0x13b   : > { %1567 = vmatmul.mubr.f32.vlgmr.msra.gmra.mxu1 %v12230_v18  ;;  %2144 = vmatprep.subr.mxu1 %v12232_v9  ;;  %v8424_v18 = vld [vmem:[%s7366_s28 + $0x1c0] sm:$0xff] }
 0x13c   : > { %1571 = vmatprep.mubr.f32.mxu1 %v12229_v32  ;;  %v8011_v23 = vpop.trf.xlu1  ;;  %v6998_v32 = vld [vmem:[%s7366_s28 + $0xc0] sm:$0xff] }
 0x13d   : > { %12471 = vst [vmem:[#allocation35_spill] sm:$0xff] %v8011_v23 }
 0x13f   : > { %1572 = vmatmul.mubr.f32.gmra.mxu1 %v12228_v2  ;;  %v8418_v2 = vld [vmem:[%s7366_s28 + $0x1b0] sm:$0xff] }
 0x140   : > { %1576 = vmatprep.mubr.f32.mxu1 %v12227_v44  ;;  %v8019_v55 = vpop.trf.xlu1  ;;  %v6995_v44 = vld [vmem:[%s7366_s28 + $0xb0] sm:$0xff] }
 0x141   : > { %12472 = vst [vmem:[#allocation36_spill] sm:$0xff] %v8019_v55 }
 0x143   : > { %1577 = vmatmul.mubr.f32.gmra.mxu1 %v12226_v15 }
 0x144   : > { %1581 = vmatprep.mubr.f32.mxu1 %v12225_v47  ;;  %v8027_v46 = vpop.trf.xlu1 }
 0x145   : > { %12473 = vst [vmem:[#allocation37_spill] sm:$0xff] %v8027_v46 }
 0x147   : > { %1582 = vmatmul.mubr.f32.gmra.mxu1 %v12224_v40 }
 0x148   : > { %1586 = vmatprep.mubr.f32.mxu1 %v12223_v27 }
 0x14b   : > { %1587 = vmatmul.mubr.f32.gmra.mxu1 %v12222_v51  ;;  %v445_v51 = vld [vmem:[%s8214_s21 + $0x50] sm:$0xff] }
 0x14c   : > { %1591 = vmatprep.mubr.f32.mxu1 %v12221_v58 }
 0x14f   : > { %1592 = vmatmul.mubr.f32.gmra.mxu1 %v12220_v4 }
 0x150   : > { %1596 = vmatprep.mubr.f32.mxu1 %v12219_v10 }
 0x153   : > { %1597 = vmatmul.mubr.f32.gmra.mxu1 %v12218_v7 }
 0x154   : > { %1601 = vmatprep.mubr.f32.mxu1 %v12217_v6  ;;  %v444_v6 = vld [vmem:[%s8214_s21 + $0x48] sm:$0xff] }
 0x157   : > { %1602 = vmatmul.mubr.f32.gmra.mxu1 %v12216_v5  ;;  %v449_v5 = vld [vmem:[%s8214_s21 + $0x70] sm:$0xff] }
 0x158   : > { %1606 = vmatprep.mubr.f32.mxu1 %v12215_v25 }
 0x15b   : > { %1607 = vmatmul.mubr.f32.gmra.mxu1 %v12213_v1 }
 0x15c   : > { %1611 = vmatprep.mubr.f32.mxu1 %v12211_v56 }
 0x15f   : > { %1612 = vmatmul.mubr.f32.gmra.mxu1 %v12210_v14 }
 0x160   : > { %1616 = vmatprep.mubr.f32.mxu1 %v12209_v36 }
 0x163   : > { %1617 = vmatmul.mubr.f32.gmra.mxu1 %v12207_v60 }
 0x164   : > { %1621 = vmatprep.mubr.f32.mxu1 %v12206_v43 }
 0x167   : > { %1622 = vmatmul.mubr.f32.gmra.mxu1 %v12205_v45 }
 0x168   : > { %1626 = vmatprep.mubr.f32.mxu1 %v12203_v20 }
 0x16b   : > { %1627 = vmatmul.mubr.f32.gmra.mxu1 %v12168_v49  ;;  %v12174_v49 = vunpack.i.h.bf16 %v7997_v37 }
 0x16c   : > { %1631 = vmatprep.mubr.f32.mxu1 %v12169_v8  ;;  %v12175_v8 = vunpack.i.l.bf16 %v7891_v48 }
 0x16f   : > { %1632 = vmatmul.mubr.f32.gmra.mxu1 %v12170_v35  ;;  %v12176_v35 = vunpack.i.h.bf16 %v7891_v48 }
 0x170   : > { %1636 = vmatprep.mubr.f32.mxu1 %v12171_v28  ;;  %v12177_v28 = vunpack.i.l.bf16 %v7899_v54 }
 0x173   : > { %1637 = vmatmul.mubr.f32.gmra.mxu1 %v12172_v21  ;;  %v12178_v21 = vunpack.i.h.bf16 %v7899_v54 }
 0x174   : > { %1641 = vmatprep.mubr.f32.mxu1 %v12173_v41  ;;  %v12179_v41 = vunpack.i.l.bf16 %v7908_v0 }
 0x177   : > { %1642 = vmatmul.mubr.f32.gmra.mxu1 %v12174_v49  ;;  %v12180_v49 = vunpack.i.h.bf16 %v7908_v0 }
 0x178   : > { %1646 = vmatprep.mubr.f32.mxu1 %v12175_v8  ;;  %v12181_v8 = vunpack.i.l.bf16 %v7918_v29 }
 0x17b   : > { %1647 = vmatmul.mubr.f32.gmra.mxu1 %v12176_v35  ;;  %v12182_v35 = vunpack.i.h.bf16 %v7918_v29 }
 0x17c   : > { %1651 = vmatprep.mubr.f32.mxu1 %v12177_v28  ;;  %v12183_v28 = vunpack.i.l.bf16 %v7927_v59 }
 0x17f   : > { %1652 = vmatmul.mubr.f32.gmra.mxu1 %v12178_v21  ;;  %v12184_v21 = vunpack.i.h.bf16 %v7927_v59 }
 0x180   : > { %1656 = vmatprep.mubr.f32.mxu1 %v12179_v41  ;;  %v12185_v41 = vunpack.i.l.bf16 %v7935_v61 }
 0x183   : > { %1657 = vmatmul.mubr.f32.gmra.mxu1 %v12180_v49  ;;  %v12186_v49 = vunpack.i.h.bf16 %v7935_v61  ;;  %v7017_v61 = vld [vmem:[%s7366_s28 + $0xb8] sm:$0xff] }
 0x184   : > { %1661 = vmatprep.mubr.f32.mxu1 %v12181_v8  ;;  %v12187_v8 = vunpack.i.l.bf16 %v7943_v39 }
 0x187   : > { %1662 = vmatmul.mubr.f32.gmra.mxu1 %v12182_v35  ;;  %v12188_v35 = vunpack.i.h.bf16 %v7943_v39  ;;  %v7016_v39 = vld [vmem:[%s7366_s28 + $0x148] sm:$0xff] }
 0x188   : > { %1666 = vmatprep.mubr.f32.mxu1 %v12183_v28  ;;  %v12189_v28 = vunpack.i.l.bf16 %v7951_v19 }
 0x18b   : > { %1667 = vmatmul.mubr.f32.gmra.mxu1 %v12184_v21  ;;  %v12190_v21 = vunpack.i.h.bf16 %v7951_v19 }
 0x18c   : > { %1671 = vmatprep.mubr.f32.mxu1 %v12185_v41  ;;  %v12191_v41 = vunpack.i.l.bf16 %v7960_v53 }
 0x18f   : > { %1672 = vmatmul.mubr.f32.gmra.mxu1 %v12186_v49  ;;  %v12192_v49 = vunpack.i.h.bf16 %v7960_v53  ;;  %v7012_v53 = vld [vmem:[%s7366_s28 + $0x128] sm:$0xff] }
 0x190   : > { %1676 = vmatprep.mubr.f32.mxu1 %v12187_v8  ;;  %v12193_v8 = vunpack.i.l.bf16 %v7970_v38 }
 0x193   : > { %1677 = vmatmul.mubr.f32.gmra.mxu1 %v12188_v35  ;;  %v12194_v35 = vunpack.i.h.bf16 %v7970_v38  ;;  %v8451_v38 = vld [vmem:[%s7366_s28 + $0x1f0] sm:$0xff] }
 0x194   : > { %1681 = vmatprep.mubr.f32.mxu1 %v12189_v28  ;;  %v12195_v28 = vunpack.i.l.bf16 %v7980_v31 }
 0x197   : > { %1682 = vmatmul.mubr.f32.gmra.mxu1 %v12190_v21  ;;  %v12196_v21 = vunpack.i.h.bf16 %v7980_v31 }
 0x198   : > { %1686 = vmatprep.mubr.f32.mxu1 %v12191_v41  ;;  %v12197_v41 = vunpack.i.l.bf16 %v7991_v22 }
 0x19b   : > { %1687 = vmatmul.mubr.f32.gmra.mxu1 %v12192_v49  ;;  %v12198_v49 = vunpack.i.h.bf16 %v7991_v22  ;;  %v7008_v22 = vld [vmem:[%s7366_s28 + $0x118] sm:$0xff] }
 0x19c   : > { %1691 = vmatprep.mubr.f32.mxu1 %v12193_v8  ;;  %v12199_v8 = vunpack.i.l.bf16 %v8002_v57 }
 0x19f   : > { %1692 = vmatmul.mubr.f32.gmra.mxu1 %v12194_v35  ;;  %v12200_v35 = vunpack.i.h.bf16 %v8002_v57 }
 0x1a0   : > { %1696 = vmatprep.mubr.f32.mxu1 %v12195_v28  ;;  %v12202_v28 = vunpack.i.l.bf16 %v8011_v23 }
 0x1a3   : > { %1697 = vmatmul.mubr.f32.gmra.mxu1 %v12196_v21  ;;  %v12201_v21 = vunpack.i.h.bf16 %v8011_v23  ;;  %v8439_v23 = vld [vmem:[%s7366_s28 + $0x78] sm:$0xff] }
 0x1a4   : > { %1701 = vmatprep.mubr.f32.mxu1 %v12197_v41  ;;  %v12204_v41 = vunpack.i.l.bf16 %v8019_v55 }
 0x1a7   : > { %1702 = vmatmul.mubr.f32.gmra.mxu1 %v12198_v49  ;;  %v12208_v49 = vunpack.i.h.bf16 %v8019_v55 }
 0x1a8   : > { %1706 = vmatprep.mubr.f32.mxu1 %v12199_v8  ;;  %v12212_v8 = vunpack.i.l.bf16 %v8027_v46 }
 0x1ab   : > { %1707 = vmatmul.mubr.f32.gmra.mxu1 %v12200_v35  ;;  %v12214_v35 = vunpack.i.h.bf16 %v8027_v46  ;;  %v7004_v46 = vld [vmem:[%s7366_s28 + $0x108] sm:$0xff] }
 0x1ac   : > { %1711 = vmatprep.mubr.f32.mxu1 %v12202_v28 }
 0x1af   : > { %1712 = vmatmul.mubr.f32.gmra.mxu1 %v12201_v21 }
 0x1b0   : > { %1716 = vmatprep.mubr.f32.mxu1 %v12204_v41 }
 0x1b3   : > { %1717 = vmatmul.mubr.f32.gmra.mxu1 %v12208_v49 }
 0x1b4   : > { %1721 = vmatprep.mubr.f32.mxu1 %v12212_v8 }
 0x1b7   : > { %1722 = vmatmul.mubr.f32.gmra.mxu1 %v12214_v35 }
 0x1fb   : > { %v8195_v21 = vpop.f32.mrf.mxu1 }
 0x1fd   : > { %v1570_v28 = vpop.f32.mrf.mxu1 }
 0x1ff   : > { %v8197_v20 = vpop.f32.mrf.mxu1 }
 0x201   : > { %v1575_v41 = vpop.f32.mrf.mxu1 }
 0x203   : > { %v8199_v45 = vpop.f32.mrf.mxu1 }
 0x205   : > { %v1580_v43 = vpop.f32.mrf.mxu1 }
 0x207   : > { %v8201_v60 = vpop.f32.mrf.mxu1 }
 0x209   : > { %v1585_v49 = vpop.f32.mrf.mxu1 }
 0x20a   : > { %v450_v49 = vld [vmem:[%s8214_s21 + $0x78] sm:$0xff] }
 0x20b   : > { %v8203_v36 = vpop.f32.mrf.mxu1 }
 0x20d   : > { %v1590_v14 = vpop.f32.mrf.mxu1 }
 0x20e   : > { %v761_v14 = vsel %vm715_vm3, %v450_v49, 0.0  ;;  %v743_v49 = vsel %vm715_vm3, %v444_v6, 0.0 }
 0x20f   : > { %v8205_v56 = vpop.f32.mrf.mxu1  ;;  %762 = vadd.xlane.f32.xlu0 %v761_v14  ;;  %v448_v14 = vld [vmem:[%s8214_s21 + $0x68] sm:$0xff] }
 0x211   : > { %v1595_v8 = vpop.f32.mrf.mxu1 }
 0x212   : > { %v446_v8 = vld [vmem:[%s8214_s21 + $0x58] sm:$0xff] }
 0x213   : > { %v8207_v1 = vpop.f32.mrf.mxu1  ;;  %v749_v35 = vsel %vm715_vm3, %v446_v8, 0.0  ;;  %v755_v8 = vsel %vm715_vm3, %v448_v14, 0.0 }
 0x214   : > { %750 = vadd.xlane.f32.xlu0 %v749_v35 }
 0x215   : > { %v1600_v43 = vpop.f32.mrf.mxu1 }
 0x216   : > { %v758_v43 = vsel %vm715_vm3, %v449_v5, 0.0 }
 0x217   : > { %v8218_v28 = vpop.f32.mrf.mxu1  ;;  %759 = vadd.xlane.f32.xlu1 %v758_v43  ;;  %v440_v43 = vld [vmem:[%s8214_s21 + $0x28] sm:$0xff] }
 0x218   : > { %744 = vadd.xlane.f32.xlu0 %v743_v49  ;;  %v731_v58 = vsel %vm715_vm3, %v440_v43, 0.0 }
 0x219   : > { %v1605_v41 = vpop.f32.mrf.mxu1 }
 0x21a   : > { %v442_v41 = vld [vmem:[%s8214_s21 + $0x38] sm:$0xff] }
 0x21b   : > { %v8222_v25 = vpop.f32.mrf.mxu1  ;;  %756 = vadd.xlane.f32.xlu1 %v755_v8  ;;  %v737_v4 = vsel %vm715_vm3, %v442_v41, 0.0  ;;  %v746_v8 = vsel %vm715_vm3, %v445_v51, 0.0  ;;  %v438_v41 = vld [vmem:[%s8214_s21 + $0x18] sm:$0xff]  ;;  %v441_v51 = vld [vmem:[%s8214_s21 + $0x30] sm:$0xff] }
 0x21c   : > { %738 = vadd.xlane.f32.xlu0 %v737_v4  ;;  %v725_v4 = vsel %vm715_vm3, %v438_v41, 0.0 }
 0x21d   : > { %v1610_v7 = vpop.f32.mrf.mxu1 }
 0x21e   : > { %v447_v7 = vld [vmem:[%s8214_s21 + $0x60] sm:$0xff] }
 0x21f   : > { %v8228_v10 = vpop.f32.mrf.mxu1  ;;  %v752_v6 = vsel %vm715_vm3, %v447_v7, 0.0  ;;  %v443_v7 = vld [vmem:[%s8214_s21 + $0x40] sm:$0xff] }
 0x220   : > { %753 = vadd.xlane.f32.xlu1 %v752_v6  ;;  %732 = vadd.xlane.f32.xlu0 %v731_v58  ;;  %v740_v6 = vsel %vm715_vm3, %v443_v7, 0.0  ;;  %v439_v7 = vld [vmem:[%s8214_s21 + $0x20] sm:$0xff] }
 0x221   : > { %v1615_v35 = vpop.f32.mrf.mxu1 }
 0x223   : > { %v8234_v5 = vpop.f32.mrf.mxu1 }
 0x224   : > { %747 = vadd.xlane.f32.xlu1 %v746_v8  ;;  %726 = vadd.xlane.f32.xlu0 %v725_v4  ;;  %v734_v8 = vsel %vm715_vm3, %v441_v51, 0.0  ;;  %v437_v51 = vld [vmem:[%s8214_s21 + $0x10] sm:$0xff] }
 0x225   : > { %v1620_v49 = vpop.f32.mrf.mxu1 }
 0x226   : > { %v436_v49 = vld [vmem:[%s8214_s21 + $0x8] sm:$0xff] }
 0x227   : > { %v1623_v14 = vpop.f32.mrf.mxu1  ;;  %v719_v58 = vsel %vm715_vm3, %v436_v49, 0.0 }
 0x228   : > { %741 = vadd.xlane.f32.xlu1 %v740_v6  ;;  %720 = vadd.xlane.f32.xlu0 %v719_v58  ;;  %v464_v6 = vld [vmem:[%s8214_s21 + $0xe8] sm:$0xff] }
 0x229   : > { %v1625_v35 = vpop.f32.mrf.mxu1  ;;  %v803_v49 = vsel %vm715_vm3, %v464_v6, 0.0  ;;  %v460_v6 = vld [vmem:[%s8214_s21 + $0xc8] sm:$0xff] }
 0x22a   : > { %v466_v35 = vld [vmem:[%s8214_s21 + $0xf8] sm:$0xff] }
 0x22b   : > { %v1628_v27 = vpop.f32.mrf.mxu1  ;;  %v809_v4 = vsel %vm715_vm3, %v466_v35, 0.0 }
 0x22c   : > { %735 = vadd.xlane.f32.xlu1 %v734_v8  ;;  %810 = vadd.xlane.f32.xlu0 %v809_v4  ;;  %v722_v8 = vsel %vm715_vm3, %v437_v51, 0.0  ;;  %v458_v51 = vld [vmem:[%s8214_s21 + $0xb8] sm:$0xff] }
 0x22d   : > { %v1630_v43 = vpop.f32.mrf.mxu1 }
 0x22e   : > { %v728_v43 = vsel %vm715_vm3, %v439_v7, 0.0  ;;  %v435_v7 = vld [vmem:[%s8214_s21] sm:$0xff] }
 0x22f   : > { %v1633_v40 = vpop.f32.mrf.mxu1 }
 0x230   : > { %729 = vadd.xlane.f32.xlu1 %v728_v43  ;;  %804 = vadd.xlane.f32.xlu0 %v803_v49  ;;  %v716_v43 = vsel %vm715_vm3, %v435_v7, 0.0 }
 0x231   : > { %v1635_v41 = vpop.f32.mrf.mxu1 }
 0x232   : > { %v462_v41 = vld [vmem:[%s8214_s21 + $0xd8] sm:$0xff] }
 0x233   : > { %v1638_v47 = vpop.f32.mrf.mxu1  ;;  %v797_v4 = vsel %vm715_vm3, %v462_v41, 0.0 }
 0x234   : > { %723 = vadd.xlane.f32.xlu1 %v722_v8  ;;  %798 = vadd.xlane.f32.xlu0 %v797_v4 }
 0x235   : > { %v1640_v15 = vpop.f32.mrf.mxu1 }
 0x237   : > { %v1643_v58 = vpop.f32.mrf.mxu1 }
 0x238   : > { %1728 = vmatpush1.msra.mxu0 %v1643_v58  ;;  %717 = vadd.xlane.f32.xlu1 %v716_v43  ;;  %v791_v58 = vsel %vm715_vm3, %v460_v6, 0.0 }
 0x239   : > { %v1645_v35 = vpop.f32.mrf.mxu1  ;;  %1729 = vmatprep.subr.mxu0 %v12232_v9  ;;  %792 = vadd.xlane.f32.xlu0 %v791_v58 }
 0x23a   : > { %1730 = vmatpush1.msra.mxu0 %v1638_v47 }
 0x23b   : > { %v8261_v15 = vpop.f32.mrf.mxu1  ;;  %1731 = vmatprep.subr.mxu0 %v12232_v9 }
 0x23c   : > { %1732 = vmatpush1.msra.mxu0 %v1633_v40  ;;  %v785_v40 = vsel %vm715_vm3, %v458_v51, 0.0 }
 0x23d   : > { %v1650_v49 = vpop.f32.mrf.mxu1  ;;  %1733 = vmatprep.subr.mxu0 %v12232_v9  ;;  %786 = vadd.xlane.f32.xlu0 %v785_v40  ;;  %v465_v40 = vld [vmem:[%s8214_s21 + $0xf0] sm:$0xff] }
 0x23e   : > { %1734 = vmatpush1.msra.mxu0 %v1628_v27  ;;  %v456_v27 = vld [vmem:[%s8214_s21 + $0xa8] sm:$0xff] }
 0x23f   : > { %v8269_v47 = vpop.f32.mrf.mxu1  ;;  %1735 = vmatprep.subr.mxu0 %v12232_v9 }
 0x240   : > { %1736 = vmatpush1.msra.mxu0 %v1623_v14  ;;  %v779_v14 = vsel %vm715_vm3, %v456_v27, 0.0  ;;  %v806_v27 = vsel %vm715_vm3, %v465_v40, 0.0  ;;  %v457_v40 = vld [vmem:[%s8214_s21 + $0xb0] sm:$0xff] }
 0x241   : > { %v1655_v8 = vpop.f32.mrf.mxu1  ;;  %1737 = vmatprep.subr.mxu0 %v12232_v9  ;;  %780 = vadd.xlane.f32.xlu0 %v779_v14  ;;  %v463_v14 = vld [vmem:[%s8214_s21 + $0xe0] sm:$0xff] }
 0x242   : > { %1738 = vmatpush1.msra.mxu0 %v8234_v5  ;;  %v454_v5 = vld [vmem:[%s8214_s21 + $0x98] sm:$0xff]  ;;  %807 = vadd.xlane.f32.xlu1 %v806_v27  ;;  %v782_v27 = vsel %vm715_vm3, %v457_v40, 0.0  ;;  %v8334_v40 = vld [vmem:[%s7366_s28 + $0x100] sm:$0xff] }
 0x243   : > { %v8276_v41 = vpop.f32.mrf.mxu1  ;;  %1739 = vmatprep.subr.mxu0 %v12232_v9 }
 0x244   : > { %1740 = vmatpush1.msra.mxu0 %v8228_v10  ;;  %v773_v10 = vsel %vm715_vm3, %v454_v5, 0.0 }
 0x245   : > { %v1660_v35 = vpop.f32.mrf.mxu1  ;;  %1741 = vmatprep.subr.mxu0 %v12232_v9  ;;  %774 = vadd.xlane.f32.xlu0 %v773_v10  ;;  %v461_v10 = vld [vmem:[%s8214_s21 + $0xd0] sm:$0xff] }
 0x246   : > { %1742 = vmatpush1.msra.mxu0 %v8222_v25  ;;  %v452_v25 = vld [vmem:[%s8214_s21 + $0x88] sm:$0xff] }
 0x247   : > { %v8284_v4 = vpop.f32.mrf.mxu1  ;;  %1743 = vmatprep.subr.mxu0 %v12232_v9 }
 0x248   : > { %1744 = vmatpush1.msra.mxu0 %v8218_v28  ;;  %v767_v28 = vsel %vm715_vm3, %v452_v25, 0.0  ;;  %v794_v25 = vsel %vm715_vm3, %v461_v10, 0.0 }
 0x249   : > { %v1665_v7 = vpop.f32.mrf.mxu1  ;;  %1745 = vmatprep.subr.mxu0 %v12232_v9  ;;  %768 = vadd.xlane.f32.xlu0 %v767_v28 }
 0x24a   : > { %1746 = vmatpush1.msra.mxu0 %v8207_v1 }
 0x24b   : > { %v8292_v43 = vpop.f32.mrf.mxu1  ;;  %1747 = vmatprep.subr.mxu0 %v12232_v9 }
 0x24c   : > { %1748 = vmatpush1.msra.mxu0 %v8205_v56 }
 0x24d   : > { %v1670_v6 = vpop.f32.mrf.mxu1  ;;  %1749 = vmatprep.subr.mxu0 %v12232_v9 }
 0x24e   : > { %1750 = vmatpush1.msra.mxu0 %v8203_v36 }
 0x24f   : > { %v8300_v49 = vpop.f32.mrf.mxu1  ;;  %1751 = vmatprep.subr.mxu0 %v12232_v9 }
 0x250   : > { %1752 = vmatpush1.msra.mxu0 %v8201_v60 }
 0x251   : > { %v1675_v1 = vpop.f32.mrf.mxu1  ;;  %1753 = vmatprep.subr.mxu0 %v12232_v9 }
 0x252   : > { %1754 = vmatpush1.msra.mxu0 %v8199_v45  ;;  %v459_v1 = vld [vmem:[%s8214_s21 + $0xc0] sm:$0xff] }
 0x253   : > { %v8306_v56 = vpop.f32.mrf.mxu1  ;;  %1755 = vmatprep.subr.mxu0 %v12232_v9 }
 0x254   : > { %1756 = vmatpush1.msra.mxu0 %v8197_v20 }
 0x255   : > { %v1680_v36 = vpop.f32.mrf.mxu1  ;;  %1757 = vmatprep.subr.mxu0 %v12232_v9 }
 0x256   : > { %1758 = vmatpush1.msra.mxu0 %v8195_v21  ;;  %v800_v21 = vsel %vm715_vm3, %v463_v14, 0.0  ;;  %v788_v36 = vsel %vm715_vm3, %v459_v1, 0.0 }
 0x257   : > { %v8312_v58 = vpop.f32.mrf.mxu1  ;;  %1759 = vmatprep.subr.mxu0 %v12232_v9  ;;  %801 = vadd.xlane.f32.xlu1 %v800_v21  ;;  %v455_v21 = vld [vmem:[%s8214_s21 + $0xa0] sm:$0xff] }
 0x259   : > { %v1685_v60 = vpop.f32.mrf.mxu1 }
 0x25b   : > { %v8315_v51 = vpop.f32.mrf.mxu1  ;;  %795 = vadd.xlane.f32.xlu1 %v794_v25 }
 0x25d   : > { %v1690_v45 = vpop.f32.mrf.mxu1 }
 0x25f   : > { %v1693_v8 = vpop.f32.mrf.mxu1  ;;  %789 = vadd.xlane.f32.xlu1 %v788_v36 }
 0x261   : > { %v1695_v20 = vpop.f32.mrf.mxu1 }
 0x263   : > { %v1698_v35 = vpop.f32.mrf.mxu1  ;;  %783 = vadd.xlane.f32.xlu1 %v782_v27 }
 0x265   : > { %v1700_v5 = vpop.f32.mrf.mxu1 }
 0x266   : > { %v776_v5 = vsel %vm715_vm3, %v455_v21, 0.0 }
 0x267   : > { %v1703_v7 = vpop.f32.mrf.mxu1  ;;  %777 = vadd.xlane.f32.xlu1 %v776_v5  ;;  %v6971_v5 = vld [vmem:[%s7366_s28 + $0x10] sm:$0xff] }
 0x269   : > { %v1705_v6 = vpop.f32.mrf.mxu1 }
 0x26a   : > { %v453_v6 = vld [vmem:[%s8214_s21 + $0x90] sm:$0xff] }
 0x26b   : > { %v1708_v28 = vpop.f32.mrf.mxu1  ;;  %v770_v1 = vsel %vm715_vm3, %v453_v6, 0.0  ;;  %v8358_v6 = vld [vmem:[%s7366_s28 + $0x130] sm:$0xff] }
 0x26c   : > { %771 = vadd.xlane.f32.xlu1 %v770_v1  ;;  %v8367_v1 = vld [vmem:[%s7366_s28 + $0x140] sm:$0xff] }
 0x26d   : > { %v1710_v60 = vpop.f32.mrf.mxu1 }
 0x26e   : > { %v6969_v60 = vld [vmem:[%s7366_s28] sm:$0xff] }
 0x26f   : > { %v1713_v45 = vpop.f32.mrf.mxu1  ;;  %v6353_v27 = vpack.i.bf16 %v6969_v60, %v8334_v40 }
 0x271   : > { %v1715_v20 = vpop.f32.mrf.mxu1 }
 0x272   : > { %v451_v20 = vld [vmem:[%s8214_s21 + $0x80] sm:$0xff] }
 0x273   : > { %v1718_v14 = vpop.f32.mrf.mxu1  ;;  %v764_v21 = vsel %vm715_vm3, %v451_v20, 0.0  ;;  %v8392_v20 = vld [vmem:[%s7366_s28 + $0x170] sm:$0xff] }
 0x274   : > { %765 = vadd.xlane.f32.xlu1 %v764_v21  ;;  %v6985_v21 = vld [vmem:[%s7366_s28 + $0x18] sm:$0xff] }
 0x275   : > { %v1720_v10 = vpop.f32.mrf.mxu1  ;;  %v6467_v31 = vpack.i.bf16 %v6985_v21, %v7008_v22 }
 0x276   : > { %6354 = vxpose.xlu0.b32.start [1/16] %v6353_v27, 128 }
 0x277   : > { %v1723_v25 = vpop.f32.mrf.mxu1 }
 0x278   : > { %1760 = vmatpush2.msra.mxu0 %v1723_v25  ;;  %v8350_v25 = vld [vmem:[%s7366_s28 + $0x120] sm:$0xff] }
 0x279   : > { %v1725_v36 = vpop.f32.mrf.mxu1  ;;  %1761 = vmatprep.subr.mxu0 %v12232_v9 }
 0x27a   : > { %1762 = vmatpush2.msra.mxu0 %v1718_v14  ;;  %v8343_v14 = vld [vmem:[%s7366_s28 + $0x110] sm:$0xff] }
 0x27b   : > { %1763 = vmatprep.subr.mxu0 %v12232_v9  ;;  %v6355_v10 = vpack.i.bf16 %v6971_v5, %v8343_v14 }
 0x27c   : > { %1764 = vmatpush2.msra.mxu0 %v1713_v45  ;;  %v6973_v45 = vld [vmem:[%s7366_s28 + $0x20] sm:$0xff] }
 0x27d   : > { %1765 = vmatprep.subr.mxu0 %v12232_v9  ;;  %6356 = vxpose.xlu0.b32.cont [2/16] %v6355_v10, 128  ;;  %v8400_v10 = vld [vmem:[%s7366_s28 + $0x180] sm:$0xff] }
 0x27e   : > { %1766 = vmatpush2.msra.mxu0 %v1708_v28  ;;  %v6357_v28 = vpack.i.bf16 %v6973_v45, %v8350_v25 }
 0x27f   : > { %1767 = vmatprep.subr.mxu0 %v12232_v9 }
 0x280   : > { %1768 = vmatpush2.msra.mxu0 %v1703_v7  ;;  %v6975_v7 = vld [vmem:[%s7366_s28 + $0x30] sm:$0xff] }
 0x281   : > { %1769 = vmatprep.subr.mxu0 %v12232_v9  ;;  %6358 = vxpose.xlu0.b32.cont [3/16] %v6357_v28, 128 }
 0x282   : > { %1770 = vmatpush2.msra.mxu0 %v1698_v35  ;;  %v6359_v35 = vpack.i.bf16 %v6975_v7, %v8358_v6 }
 0x283   : > { %1771 = vmatprep.subr.mxu0 %v12232_v9 }
 0x284   : > { %1772 = vmatpush2.msra.mxu0 %v1693_v8  ;;  %v6977_v8 = vld [vmem:[%s7366_s28 + $0x40] sm:$0xff] }
 0x285   : > { %1773 = vmatprep.subr.mxu0 %v12232_v9  ;;  %6360 = vxpose.xlu0.b32.cont [4/16] %v6359_v35, 128  ;;  %v6988_v35 = vld [vmem:[%s7366_s28 + $0x28] sm:$0xff] }
 0x286   : > { %1774 = vmatpush2.msra.mxu0 %v8315_v51  ;;  %v6361_v51 = vpack.i.bf16 %v6977_v8, %v8367_v1  ;;  %v6469_v19 = vpack.i.bf16 %v6988_v35, %v7012_v53 }
 0x287   : > { %1775 = vmatprep.subr.mxu0 %v12232_v9 }
 0x288   : > { %1776 = vmatpush2.msra.mxu0 %v8312_v58  ;;  %v6979_v58 = vld [vmem:[%s7366_s28 + $0x50] sm:$0xff] }
 0x289   : > { %1777 = vmatprep.subr.mxu0 %v12232_v9  ;;  %6362 = vxpose.xlu0.b32.cont [5/16] %v6361_v51, 128  ;;  %v8406_v51 = vld [vmem:[%s7366_s28 + $0x190] sm:$0xff] }
 0x28a   : > { %1778 = vmatpush2.msra.mxu0 %v8306_v56  ;;  %v8376_v56 = vld [vmem:[%s7366_s28 + $0x150] sm:$0xff] }
 0x28b   : > { %1779 = vmatprep.subr.mxu0 %v12232_v9  ;;  %v6363_v36 = vpack.i.bf16 %v6979_v58, %v8376_v56 }
 0x28c   : > { %1780 = vmatpush2.msra.mxu0 %v8300_v49  ;;  %v6981_v49 = vld [vmem:[%s7366_s28 + $0x60] sm:$0xff] }
 0x28d   : > { %1781 = vmatprep.subr.mxu0 %v12232_v9  ;;  %6364 = vxpose.xlu0.b32.cont [6/16] %v6363_v36, 128  ;;  %v6991_v36 = vld [vmem:[%s7366_s28 + $0x38] sm:$0xff] }
 0x28e   : > { %1782 = vmatpush2.msra.mxu0 %v8292_v43  ;;  %v8385_v43 = vld [vmem:[%s7366_s28 + $0x160] sm:$0xff] }
 0x28f   : > { %1783 = vmatprep.subr.mxu0 %v12232_v9  ;;  %v6365_v27 = vpack.i.bf16 %v6981_v49, %v8385_v43 }
 0x290   : > { %1784 = vmatpush2.msra.mxu0 %v8284_v4  ;;  %v6983_v4 = vld [vmem:[%s7366_s28 + $0x70] sm:$0xff] }
 0x291   : > { %1785 = vmatprep.subr.mxu0 %v12232_v9  ;;  %6366 = vxpose.xlu0.b32.cont [7/16] %v6365_v27, 128  ;;  %v6992_v27 = vld [vmem:[%s7366_s28 + $0xa0] sm:$0xff] }
 0x292   : > { %1786 = vmatpush2.msra.mxu0 %v8276_v41  ;;  %v6367_v41 = vpack.i.bf16 %v6983_v4, %v8392_v20 }
 0x293   : > { %1787 = vmatprep.subr.mxu0 %v12232_v9 }
 0x294   : > { %1788 = vmatpush2.msra.mxu0 %v8269_v47  ;;  %v6986_v47 = vld [vmem:[%s7366_s28 + $0x80] sm:$0xff] }
 0x295   : > { %1789 = vmatprep.subr.mxu0 %v12232_v9  ;;  %6368 = vxpose.xlu0.b32.cont [8/16] %v6367_v41, 128  ;;  %v6369_v28 = vpack.i.bf16 %v6986_v47, %v8400_v10  ;;  %v8412_v41 = vld [vmem:[%s7366_s28 + $0x1a0] sm:$0xff]  ;;  %v7003_v9 = vld [vmem:[%s7366_s28 + $0x8] sm:$0xff] }
 0x296   : > { %1790 = vmatpush2.msra.mxu0 %v8261_v15  ;;  %v6989_v15 = vld [vmem:[%s7366_s28 + $0x90] sm:$0xff]  ;;  %v6465_v55 = vpack.i.bf16 %v7003_v9, %v7004_v46  ;;  %v7009_v9 = vld [vmem:[%s7366_s28 + $0x88] sm:$0xff] }
 0x297   : > { %1792 = vmatmul.mubr.f32.vlgmr.msra.gmra.mxu0 %v6969_v60  ;;  %v6371_v60 = vpack.i.bf16 %v6989_v15, %v8406_v51 }
 0x298   : > { %1796 = vmatprep.mubr.f32.mxu0 %v6985_v21 }
 0x299   : > { %6370 = vxpose.xlu0.b32.cont [9/16] %v6369_v28, 128  ;;  %v6994_v28 = vld [vmem:[%s7366_s28 + $0x48] sm:$0xff] }
 0x29b   : > { %1797 = vmatmul.mubr.f32.gmra.mxu0 %v6971_v5  ;;  %v6373_v5 = vpack.i.bf16 %v6992_v27, %v8412_v41 }
 0x29c   : > { %1801 = vmatprep.mubr.f32.mxu0 %v6988_v35 }
 0x29d   : > { %6372 = vxpose.xlu0.b32.cont [10/16] %v6371_v60, 128  ;;  %v6997_v60 = vld [vmem:[%s7366_s28 + $0x58] sm:$0xff] }
 0x29f   : > { %1802 = vmatmul.mubr.f32.gmra.mxu0 %v6973_v45  ;;  %v6375_v45 = vpack.i.bf16 %v6995_v44, %v8418_v2 }
 0x2a0   : > { %1806 = vmatprep.mubr.f32.mxu0 %v6991_v36 }
 0x2a1   : > { %6374 = vxpose.xlu0.b32.cont [11/16] %v6373_v5, 128  ;;  %v8428_v5 = vld [vmem:[%s7366_s28 + $0x68] sm:$0xff] }
 0x2a3   : > { %1807 = vmatmul.mubr.f32.gmra.mxu0 %v6975_v7  ;;  %v6377_v7 = vpack.i.bf16 %v6998_v32, %v8424_v18 }
 0x2a4   : > { %1811 = vmatprep.mubr.f32.mxu0 %v6994_v28 }
 0x2a5   : > { %6376 = vxpose.xlu0.b32.cont [12/16] %v6375_v45, 128 }
 0x2a7   : > { %1812 = vmatmul.mubr.f32.gmra.mxu0 %v6977_v8  ;;  %v8433_v8 = vld [vmem:[%s7366_s28 + $0x1d0] sm:$0xff]  ;;  %6466 = vxpose.xlu1.b32.start [1/16] %v6465_v55, 128  ;;  %v7013_v55 = vld [vmem:[%s7366_s28 + $0x98] sm:$0xff] }
 0x2a8   : > { %1816 = vmatprep.mubr.f32.mxu0 %v6997_v60  ;;  %v6379_v45 = vpack.i.bf16 %v7001_v30, %v8433_v8 }
 0x2a9   : > { %6378 = vxpose.xlu0.b32.cont [13/16] %v6377_v7, 128  ;;  %v8444_v7 = vld [vmem:[%s7366_s28 + $0x1e0] sm:$0xff] }
 0x2ab   : > { %1817 = vmatmul.mubr.f32.gmra.mxu0 %v6979_v58  ;;  %v7006_v58 = vld [vmem:[%s7366_s28 + $0xe0] sm:$0xff]  ;;  %6468 = vxpose.xlu1.b32.cont [2/16] %v6467_v31, 128  ;;  %v6473_v31 = vpack.i.bf16 %v6994_v28, %v7016_v39  ;;  %v7023_v28 = vld [vmem:[%s7366_s28 + $0x168] sm:$0xff] }
 0x2ac   : > { %1821 = vmatprep.mubr.f32.mxu0 %v8428_v5  ;;  %v6381_v57 = vpack.i.bf16 %v7006_v58, %v8444_v7 }
 0x2ad   : > { %6380 = vxpose.xlu0.b32.cont [14/16] %v6379_v45, 128 }
 0x2af   : > { %1822 = vmatmul.mubr.f32.gmra.mxu0 %v6981_v49  ;;  %v7010_v49 = vld [vmem:[%s7366_s28 + $0xf0] sm:$0xff]  ;;  %6470 = vxpose.xlu1.b32.cont [3/16] %v6469_v19, 128  ;;  %v7019_v19 = vld [vmem:[%s7366_s28 + $0xc8] sm:$0xff] }
 0x2b0   : > { %1826 = vmatprep.mubr.f32.mxu0 %v8439_v23  ;;  %v6383_v45 = vpack.i.bf16 %v7010_v49, %v8451_v38 }
 0x2b1   : > { %6382 = vxpose.xlu0.b32.cont [15/16] %v6381_v57, 128  ;;  %v7015_v57 = vld [vmem:[%s7366_s28 + $0xa8] sm:$0xff] }
 0x2b3   : > { %1827 = vmatmul.mubr.f32.gmra.mxu0 %v6983_v4  ;;  %v7014_v4 = vld [vmem:[%s7366_s28 + $0x138] sm:$0xff] }
 0x2b4   : > { %1831 = vmatprep.mubr.f32.mxu0 %v7009_v9  ;;  %v6471_v21 = vpack.i.bf16 %v6991_v36, %v7014_v4  ;;  %v7021_v36 = vld [vmem:[%s7366_s28 + $0xe8] sm:$0xff] }
 0x2b5   : > { %6384 = vxpose.xlu0.b32.end [16/16] %v6383_v45, 128  ;;  %v7030_v45 = vld [vmem:[%s7366_s28 + $0x1d8] sm:$0xff] }
 0x2b6   : > { %6472 = vxpose.xlu1.b32.cont [4/16] %v6471_v21, 128  ;;  %v7032_v21 = vld [vmem:[%s7366_s28 + $0x1f8] sm:$0xff] }
 0x2b7   : > { %1832 = vmatmul.mubr.f32.gmra.mxu0 %v6986_v47  ;;  %v7018_v47 = vld [vmem:[%s7366_s28 + $0x158] sm:$0xff] }
 0x2b8   : > { %1836 = vmatprep.mubr.f32.mxu0 %v7013_v55  ;;  %v6475_v35 = vpack.i.bf16 %v6997_v60, %v7018_v47 }
 0x2ba   : > { %6474 = vxpose.xlu1.b32.cont [5/16] %v6473_v31, 128 }
 0x2bb   : > { %1837 = vmatmul.mubr.f32.gmra.mxu0 %v6989_v15  ;;  %v7020_v15 = vld [vmem:[%s7366_s28 + $0xd8] sm:$0xff] }
 0x2bc   : > { %1841 = vmatprep.mubr.f32.mxu0 %v7015_v57 }
 0x2be   : > { %6476 = vxpose.xlu1.b32.cont [6/16] %v6475_v35, 128 }
 0x2bf   : > { %1842 = vmatmul.mubr.f32.gmra.mxu0 %v6992_v27  ;;  %v7022_v27 = vld [vmem:[%s7366_s28 + $0xf8] sm:$0xff] }
 0x2c0   : > { %1846 = vmatprep.mubr.f32.mxu0 %v7017_v61 }
 0x2c3   : > { %1847 = vmatmul.mubr.f32.gmra.mxu0 %v6995_v44  ;;  %v8466_v44 = vpop.xlane.xlu0 %762 }
 0x2c4   : > { %1851 = vmatprep.mubr.f32.mxu0 %v7019_v19 }
 0x2c7   : > { %1852 = vmatmul.mubr.f32.gmra.mxu0 %v6998_v32  ;;  %v6477_v32 = vpack.i.bf16 %v8428_v5, %v7023_v28 }
 0x2c8   : > { %1856 = vmatprep.mubr.f32.mxu0 %v7020_v15 }
 0x2c9   : > { %6478 = vxpose.xlu1.b32.cont [7/16] %v6477_v32, 128 }
 0x2cb   : > { %1857 = vmatmul.mubr.f32.gmra.mxu0 %v7001_v30  ;;  %v7024_v30 = vld [vmem:[%s7366_s28 + $0x178] sm:$0xff] }
 0x2cc   : > { %1861 = vmatprep.mubr.f32.mxu0 %v7021_v36  ;;  %v6479_v60 = vpack.i.bf16 %v8439_v23, %v7024_v30  ;;  %v7027_v23 = vld [vmem:[%s7366_s28 + $0x1a8] sm:$0xff] }
 0x2cd   : > { %v6485_v5 = vpack.i.bf16 %v7015_v57, %v7027_v23  ;;  %v6495_v57 = vpack.i.bf16 %v7022_v27, %v7032_v21 }
 0x2ce   : > { %6480 = vxpose.xlu1.b32.cont [8/16] %v6479_v60, 128 }
 0x2cf   : > { %1862 = vmatmul.mubr.f32.gmra.mxu0 %v7006_v58  ;;  %v8473_v58 = vpop.xlane.xlu0 %750 }
 0x2d0   : > { %1866 = vmatprep.mubr.f32.mxu0 %v7022_v27  ;;  %vm833_vm15 = vcmp.gt.f32.partialorder %v8473_v58, 0.0 }
 0x2d3   : > { %1867 = vmatmul.mubr.f32.gmra.mxu0 %v7010_v49 }
 0x2d4   : > { %1871 = vmatprep.mubr.f32.mxu0 %v7004_v46 }
 0x2d7   : > { %1872 = vmatmul.mubr.f32.gmra.mxu0 %v8334_v40  ;;  %v8478_v40 = vpop.xlane.xlu0 %744 }
 0x2d8   : > { %1876 = vmatprep.mubr.f32.mxu0 %v7008_v22  ;;  %v7025_v22 = vld [vmem:[%s7366_s28 + $0x188] sm:$0xff]  ;;  %vm831_vm13 = vcmp.gt.f32.partialorder %v8478_v40, 0.0 }
 0x2d9   : > { %v6481_v46 = vpack.i.bf16 %v7009_v9, %v7025_v22 }
 0x2db   : > { %1877 = vmatmul.mubr.f32.gmra.mxu0 %v8343_v14  ;;  %6482 = vxpose.xlu1.b32.cont [9/16] %v6481_v46, 128 }
 0x2dc   : > { %1881 = vmatprep.mubr.f32.mxu0 %v7012_v53  ;;  %v7026_v53 = vld [vmem:[%s7366_s28 + $0x198] sm:$0xff] }
 0x2dd   : > { %v6483_v14 = vpack.i.bf16 %v7013_v55, %v7026_v53  ;;  %v6491_v55 = vpack.i.bf16 %v7020_v15, %v7030_v45 }
 0x2df   : > { %1882 = vmatmul.mubr.f32.gmra.mxu0 %v8350_v25  ;;  %6484 = vxpose.xlu1.b32.cont [10/16] %v6483_v14, 128  ;;  %v8483_v25 = vpop.xlane.xlu0 %738 }
 0x2e0   : > { %1886 = vmatprep.mubr.f32.mxu0 %v7014_v4  ;;  %vm829_vm10 = vcmp.gt.f32.partialorder %v8483_v25, 0.0 }
 0x2e1   : > { %v861_v12 = vsel %vm829_vm10, %v8483_v25, 1.0 }
 0x2e3   : > { %1887 = vmatmul.mubr.f32.gmra.mxu0 %v8358_v6  ;;  %6486 = vxpose.xlu1.b32.cont [11/16] %v6485_v5, 128  ;;  %v7028_v6 = vld [vmem:[%s7366_s28 + $0x1b8] sm:$0xff]  ;;  %v8488_v9 = vpop.xlane.xlu0 %732 }
 0x2e4   : > { %1891 = vmatprep.mubr.f32.mxu0 %v7016_v39  ;;  %v6487_v39 = vpack.i.bf16 %v7017_v61, %v7028_v6  ;;  %v7031_v61 = vld [vmem:[%s7366_s28 + $0x1e8] sm:$0xff]  ;;  %vm827_vm8 = vcmp.gt.f32.partialorder %v8488_v9, 0.0 }
 0x2e7   : > { %1892 = vmatmul.mubr.f32.gmra.mxu0 %v8367_v1  ;;  %6488 = vxpose.xlu1.b32.cont [12/16] %v6487_v39, 128  ;;  %v7029_v1 = vld [vmem:[%s7366_s28 + $0x1c8] sm:$0xff] }
 0x2e8   : > { %1896 = vmatprep.mubr.f32.mxu0 %v7018_v47  ;;  %v6489_v49 = vpack.i.bf16 %v7019_v19, %v7029_v1 }
 0x2eb   : > { %1897 = vmatmul.mubr.f32.gmra.mxu0 %v8376_v56  ;;  %6490 = vxpose.xlu1.b32.cont [13/16] %v6489_v49, 128  ;;  %v8493_v56 = vpop.xlane.xlu0 %726 }
 0x2ec   : > { %1901 = vmatprep.mubr.f32.mxu0 %v7023_v28  ;;  %vm825_vm6 = vcmp.gt.f32.partialorder %v8493_v56, 0.0 }
 0x2ef   : > { %1902 = vmatmul.mubr.f32.gmra.mxu0 %v8385_v43  ;;  %6492 = vxpose.xlu1.b32.cont [14/16] %v6491_v55, 128  ;;  %v6493_v43 = vpack.i.bf16 %v7021_v36, %v7031_v61  ;;  %v8498_v4 = vpop.xlane.xlu0 %720 }
 0x2f0   : > { %1906 = vmatprep.mubr.f32.mxu0 %v7024_v30  ;;  %vm823_vm4 = vcmp.gt.f32.partialorder %v8498_v4, 0.0 }
 0x2f1   : > { %v855_v5 = vsel %vm823_vm4, %v8498_v4, 1.0  ;;  %v537_v4 = vld [vmem:[%s12147_s5 + $0x8] sm:$0xff] }
 0x2f2   : > { %6713 = vrcp.f32 %v855_v5  ;;  %v859_v5 = vsel %vm827_vm8, %v8488_v9, 1.0 }
 0x2f3   : > { %1907 = vmatmul.mubr.f32.gmra.mxu0 %v8392_v20  ;;  %6494 = vxpose.xlu1.b32.cont [15/16] %v6493_v43, 128  ;;  %v8502_v20 = vpop.xlane.xlu0 %810 }
 0x2f4   : > { %1911 = vmatprep.mubr.f32.mxu0 %v7025_v22 }
 0x2f7   : > { %1912 = vmatmul.mubr.f32.gmra.mxu0 %v8400_v10  ;;  %6496 = vxpose.xlu1.b32.end [16/16] %v6495_v57, 128  ;;  %v8505_v10 = vpop.xlane.xlu0 %804 }
 0x2f8   : > { %1916 = vmatprep.mubr.f32.mxu0 %v7026_v53 }
 0x2fb   : > { %1917 = vmatmul.mubr.f32.gmra.mxu0 %v8406_v51  ;;  %v8509_v51 = vpop.xlane.xlu1 %759  ;;  %v8511_v31 = vpop.xlane.xlu0 %798 }
 0x2fc   : > { %1921 = vmatprep.mubr.f32.mxu0 %v7027_v23 }
 0x2ff   : > { %1922 = vmatmul.mubr.f32.gmra.mxu0 %v8412_v41  ;;  %v8514_v41 = vpop.xlane.xlu1 %756  ;;  %v8516_v47 = vpop.xlane.xlu0 %792 }
 0x300   : > { %1926 = vmatprep.mubr.f32.mxu0 %v7028_v6  ;;  %v6714_v57 = vpop.eup %6713  ;;  %vm835_vm2 = vcmp.gt.f32.partialorder %v8514_v41, 0.0 }
 0x301   : > { %v8593_v0 = vsel %vm823_vm4, %v6714_v57, 0.0  ;;  %vm836_vm4 = vcmp.gt.f32.partialorder %v8509_v51, 0.0 }
 0x302   : > { %12474 = vst [vmem:[#allocation38_spill] sm:$0xff] %v8593_v0 }
 0x303   : > { %1927 = vmatmul.mubr.f32.gmra.mxu0 %v8418_v2  ;;  %v8519_v2 = vpop.xlane.xlu1 %753 }
 0x304   : > { %1931 = vmatprep.mubr.f32.mxu0 %v7029_v1  ;;  %vm834_vm1 = vcmp.gt.f32.partialorder %v8519_v2, 0.0 }
 0x307   : > { %1932 = vmatmul.mubr.f32.gmra.mxu0 %v8424_v18  ;;  %v8521_v18 = vpop.xlane.xlu0 %786  ;;  %v8523_v35 = vpop.xlane.xlu1 %747 }
 0x308   : > { %1936 = vmatprep.mubr.f32.mxu0 %v7030_v45  ;;  %v857_v45 = vsel %vm825_vm6, %v8493_v56, 1.0  ;;  %vm832_vm14 = vcmp.gt.f32.partialorder %v8523_v35, 0.0 }
 0x30b   : > { %1937 = vmatmul.mubr.f32.gmra.mxu0 %v8433_v8  ;;  %v8525_v8 = vpop.xlane.xlu0 %780  ;;  %v8527_v19 = vpop.xlane.xlu1 %741 }
 0x30c   : > { %1941 = vmatprep.mubr.f32.mxu0 %v7031_v61  ;;  %vm830_vm11 = vcmp.gt.f32.partialorder %v8527_v19, 0.0 }
 0x30f   : > { %1942 = vmatmul.mubr.f32.gmra.mxu0 %v8444_v7  ;;  %v8529_v15 = vpop.xlane.xlu0 %774  ;;  %v8531_v7 = vpop.xlane.xlu1 %735 }
 0x310   : > { %1946 = vmatprep.mubr.f32.mxu0 %v7032_v21  ;;  %vm828_vm9 = vcmp.gt.f32.partialorder %v8531_v7, 0.0 }
 0x311   : > { %v860_v54 = vsel %vm828_vm9, %v8531_v7, 1.0 }
 0x313   : > { %1947 = vmatmul.mubr.f32.gmra.mxu0 %v8451_v38  ;;  %v8533_v36 = vpop.xlane.xlu0 %768  ;;  %v8537_v28 = vpop.xlane.xlu1 %729 }
 0x314   : > { %vm826_vm7 = vcmp.gt.f32.partialorder %v8537_v28, 0.0 }
 0x315   : > { %v858_v43 = vsel %vm826_vm7, %v8537_v28, 1.0 }
 0x317   : > { %v8535_v27 = vpop.trf.xlu0  ;;  %v724_v32 = vpop.xlane.xlu1 %723 }
 0x318   : > { %vm824_vm5 = vcmp.gt.f32.partialorder %v724_v32, 0.0 }
 0x319   : > { %v856_v39 = vsel %vm824_vm5, %v724_v32, 1.0 }
 0x31a   : > { %6715 = vrcp.f32 %v856_v39 }
 0x31b   : > { %v8539_v38 = vpop.trf.xlu0  ;;  %v8545_v22 = vpop.xlane.xlu1 %717  ;;  %6717 = vrcp.f32 %v857_v45 }
 0x31c   : > { %6719 = vrcp.f32 %v858_v43 }
 0x31d   : > { %6721 = vrcp.f32 %v859_v5 }
 0x31e   : > { %6723 = vrcp.f32 %v860_v54 }
 0x31f   : > { %v8541_v30 = vpop.trf.xlu0  ;;  %v8549_v53 = vpop.xlane.xlu1 %807  ;;  %6725 = vrcp.f32 %v861_v12 }
 0x323   : > { %v8543_v60 = vpop.trf.xlu0  ;;  %v8554_v23 = vpop.xlane.xlu1 %801 }
 0x327   : > { %v8547_v46 = vpop.trf.xlu0  ;;  %v8565_v49 = vpop.xlane.xlu1 %795 }
 0x328   : > { %v6716_v43 = vpop.eup %6715 }
 0x329   : > { %v6718_v5 = vpop.eup %6717 }
 0x32b   : > { %v8551_v14 = vpop.trf.xlu0  ;;  %v8573_v61 = vpop.xlane.xlu1 %789 }
 0x32f   : > { %v8559_v6 = vpop.trf.xlu0  ;;  %v8589_v45 = vpop.xlane.xlu1 %783 }
 0x333   : > { %v8562_v1 = vpop.trf.xlu0  ;;  %v8608_v57 = vpop.xlane.xlu1 %777 }
 0x337   : > { %v8570_v55 = vpop.trf.xlu0 }
 0x33b   : > { %v8578_v21 = vpop.trf.xlu0 }
 0x33f   : > { %v8584_v39 = vpop.trf.xlu0 }
 0x343   : > { %v8598_v48 = vpop.trf.xlu0 }
 0x347   : > { %v8615_v52 = vpop.trf.xlu0 }
 0x357   : > { %v8586_v59 = vpop.f32.mrf.mxu0 }
 0x359   : > { %v1795_v29 = vpop.f32.mrf.mxu0 }
 0x35a   : > { %v8603_v29 = vsel %vm824_vm5, %v6716_v43, 0.0  ;;  %v8624_v43 = vsel %vm825_vm6, %v6718_v5, 0.0  ;;  %v8639_v5 = vpop.xlane.xlu1 %771  ;;  %vm837_vm5 = vcmp.gt.f32.partialorder %v8466_v44, 0.0  ;;  %vm839_vm6 = vcmp.gt.f32.partialorder %v8533_v36, 0.0 }
 0x35b   : > { %v1798_v37 = vpop.f32.mrf.mxu0  ;;  %12475 = vst [vmem:[#allocation39_spill] sm:$0xff] %v8603_v29  ;;  %12478 = vst [vmem:[#allocation42_spill] sm:$0xff] %v8624_v43 }
 0x35c   : > { %v1953_v3 = vmul.f32 %v1798_v37, %v8593_v0  ;;  %v6720_v0 = vpop.eup %6719 }
 0x35d   : > { %v1800_v34 = vpop.f32.mrf.mxu0  ;;  %v8651_v13 = vsel %vm826_vm7, %v6720_v0, 0.0  ;;  %v6722_v42 = vpop.eup %6721  ;;  %vm840_vm7 = vcmp.gt.f32.partialorder %v8639_v5, 0.0 }
 0x35e   : > { %v8610_v62 = vmax.f32 %v1953_v3, 0.0  ;;  %v538_v3 = vld [vmem:[%s12147_s5 + $0x10] sm:$0xff]  ;;  %12481 = vst [vmem:[#allocation45_spill] sm:$0xff] %v8651_v13  ;;  %v8675_v11 = vpop.xlane.xlu1 %765  ;;  %v6724_v17 = vpop.eup %6723 }
 0x35f   : > { %v1803_v34 = vpop.f32.mrf.mxu0  ;;  %v8697_v63 = vsel %vm828_vm9, %v6724_v17, 0.0  ;;  %vm842_vm9 = vcmp.gt.f32.partialorder %v8608_v57, 0.0 }
 0x360   : > { %12476 = vst [vmem:[#allocation40_spill] sm:$0xff] %v8610_v62  ;;  %v1954_v37 = vmul.f32 %v1803_v34, %v8603_v29  ;;  %v8620_v32 = vmul.f32 %v8610_v62, %v537_v4  ;;  %v862_v4 = vsel %vm830_vm11, %v8527_v19, 1.0  ;;  %v8636_v34 = vpop.trf.xlu0  ;;  %v539_v29 = vld [vmem:[%s12147_s5 + $0x18] sm:$0xff]  ;;  %12487 = vst [vmem:[#allocation51_spill] sm:$0xff] %v8697_v63 }
 0x361   : > { %v1805_v54 = vpop.f32.mrf.mxu0  ;;  %6727 = vrcp.f32 %v862_v4  ;;  %v540_v4 = vld [vmem:[%s12147_s5 + $0x20] sm:$0xff] }
 0x362   : > { %12477 = vst [vmem:[#allocation41_spill] sm:$0xff] %v8620_v32  ;;  %v8629_v24 = vmax.f32 %v1954_v37, 0.0  ;;  %v2563_v33 = vmul.f32 %v8620_v32, %v8620_v32  ;;  %v542_v32 = vld [vmem:[%s12147_s5 + $0x30] sm:$0xff] }
 0x363   : > { %v1808_v56 = vpop.f32.mrf.mxu0 }
 0x364   : > { %12479 = vst [vmem:[#allocation43_spill] sm:$0xff] %v8629_v24  ;;  %v1955_v12 = vmul.f32 %v1808_v56, %v8624_v43  ;;  %v2597_v37 = vsel %vm2465_vm12, %v2563_v33, 0.0  ;;  %v8644_v54 = vmul.f32 %v8629_v24, %v538_v3  ;;  %v863_v3 = vsel %vm831_vm13, %v8478_v40, 1.0  ;;  %v8660_v56 = vpop.trf.xlu0 }
 0x365   : > { %2598 = vadd.xlane.f32.xlu0 %v2597_v37  ;;  %v1810_v50 = vpop.f32.mrf.mxu0  ;;  %v8673_v37 = vsel %vm827_vm8, %v6722_v42, 0.0  ;;  %6729 = vrcp.f32 %v863_v3  ;;  %vm841_vm8 = vcmp.gt.f32.partialorder %v8529_v15, 0.0 }
 0x366   : > { %12480 = vst [vmem:[#allocation44_spill] sm:$0xff] %v8644_v54  ;;  %v8653_v26 = vmax.f32 %v1955_v12, 0.0  ;;  %v2564_v33 = vmul.f32 %v8644_v54, %v8644_v54  ;;  %12484 = vst [vmem:[#allocation48_spill] sm:$0xff] %v8673_v37 }
 0x367   : > { %v1813_v43 = vpop.f32.mrf.mxu0 }
 0x368   : > { %12482 = vst [vmem:[#allocation46_spill] sm:$0xff] %v8653_v26  ;;  %v8664_v50 = vmul.f32 %v8653_v26, %v539_v29  ;;  %v1956_v0 = vmul.f32 %v1813_v43, %v8651_v13  ;;  %v2600_v28 = vsel %vm2465_vm12, %v2564_v33, 0.0  ;;  %v864_v33 = vsel %vm832_vm14, %v8523_v35, 1.0 }
 0x369   : > { %2601 = vadd.xlane.f32.xlu0 %v2600_v28  ;;  %v1815_v12 = vpop.f32.mrf.mxu0  ;;  %v8685_v28 = vpop.trf.xlu0  ;;  %6731 = vrcp.f32 %v864_v33 }
 0x36a   : > { %12483 = vst [vmem:[#allocation47_spill] sm:$0xff] %v8664_v50  ;;  %v8677_v29 = vmax.f32 %v1956_v0, 0.0  ;;  %v2565_v43 = vmul.f32 %v8664_v50, %v8664_v50  ;;  %v541_v12 = vld [vmem:[%s12147_s5 + $0x28] sm:$0xff]  ;;  %v6386_v50 = vunpack.i.l.bf16 %v8535_v27 }
 0x36b   : > { %v1818_v9 = vpop.f32.mrf.mxu0 }
 0x36c   : > { %12485 = vst [vmem:[#allocation49_spill] sm:$0xff] %v8677_v29  ;;  %v8688_v42 = vmul.f32 %v8677_v29, %v540_v4  ;;  %v1957_v3 = vmul.f32 %v1818_v9, %v8673_v37  ;;  %v2603_v0 = vsel %vm2465_vm12, %v2565_v43, 0.0  ;;  %v865_v4 = vsel %vm833_vm15, %v8473_v58, 1.0  ;;  %v8703_v9 = vpop.trf.xlu1  ;;  %v6726_v43 = vpop.eup %6725  ;;  %2208 = vmatprep.mubr.f32.mxu1 %v6386_v50 }
 0x36d   : > { %2604 = vadd.xlane.f32.xlu0 %v2603_v0  ;;  %v1820_v13 = vpop.f32.mrf.mxu0  ;;  %6733 = vrcp.f32 %v865_v4  ;;  %v868_v50 = vsel %vm836_vm4, %v8509_v51, 1.0 }
 0x36e   : > { %12486 = vst [vmem:[#allocation50_spill] sm:$0xff] %v8688_v42  ;;  %v8705_v37 = vmax.f32 %v1957_v3, 0.0  ;;  %v2566_v0 = vmul.f32 %v8688_v42, %v8688_v42  ;;  %v8719_v3 = vsel %vm829_vm10, %v6726_v43, 0.0  ;;  %v543_v42 = vld [vmem:[%s12147_s5 + $0x38] sm:$0xff]  ;;  %vm843_vm10 = vcmp.gt.f32.partialorder %v8525_v8, 0.0 }
 0x36f   : > { %v1823_v13 = vpop.f32.mrf.mxu0  ;;  %12490 = vst [vmem:[#allocation54_spill] sm:$0xff] %v8719_v3 }
 0x370   : > { %12488 = vst [vmem:[#allocation52_spill] sm:$0xff] %v8705_v37  ;;  %v8710_v7 = vmul.f32 %v8705_v37, %v541_v12  ;;  %v1958_v17 = vmul.f32 %v1823_v13, %v8697_v63  ;;  %v2606_v33 = vsel %vm2465_vm12, %v2566_v0, 0.0  ;;  %v866_v12 = vsel %vm834_vm1, %v8519_v2, 1.0  ;;  %v8725_v13 = vpop.trf.xlu1  ;;  %v6728_v0 = vpop.eup %6727 }
 0x371   : > { %2607 = vadd.xlane.f32.xlu0 %v2606_v33  ;;  %v1825_v54 = vpop.f32.mrf.mxu0  ;;  %v8742_v16 = vsel %vm830_vm11, %v6728_v0, 0.0  ;;  %6735 = vrcp.f32 %v866_v12  ;;  %vm822_vm11 = vcmp.gt.f32.partialorder %v8545_v22, 0.0 }
 0x372   : > { %12489 = vst [vmem:[#allocation53_spill] sm:$0xff] %v8710_v7  ;;  %v8727_v63 = vmax.f32 %v1958_v17, 0.0  ;;  %v2567_v33 = vmul.f32 %v8710_v7, %v8710_v7  ;;  %12493 = vst [vmem:[#allocation57_spill] sm:$0xff] %v8742_v16  ;;  %v544_v7 = vld [vmem:[%s12147_s5 + $0x40] sm:$0xff] }
 0x373   : > { %v1828_v54 = vpop.f32.mrf.mxu0 }
 0x374   : > { %12491 = vst [vmem:[#allocation55_spill] sm:$0xff] %v8727_v63  ;;  %v8732_v25 = vmul.f32 %v8727_v63, %v542_v32  ;;  %v1959_v4 = vmul.f32 %v1828_v54, %v8719_v3  ;;  %v2609_v43 = vsel %vm2465_vm12, %v2567_v33, 0.0  ;;  %v867_v32 = vsel %vm835_vm2, %v8514_v41, 1.0  ;;  %v8748_v33 = vpop.trf.xlu1  ;;  %v6730_v54 = vpop.eup %6729 }
 0x375   : > { %2610 = vadd.xlane.f32.xlu0 %v2609_v43  ;;  %v1830_v17 = vpop.f32.mrf.mxu0  ;;  %12494 = vst [vmem:[#allocation58_spill] sm:$0xff] %v8748_v33  ;;  %6737 = vrcp.f32 %v867_v32 }
 0x376   : > { %12492 = vst [vmem:[#allocation56_spill] sm:$0xff] %v8732_v25  ;;  %v8750_v3 = vmax.f32 %v1959_v4, 0.0  ;;  %v2568_v43 = vmul.f32 %v8732_v25, %v8732_v25  ;;  %v8764_v4 = vsel %vm831_vm13, %v6730_v54, 0.0  ;;  %6739 = vrcp.f32 %v868_v50 }
 0x377   : > { %v1833_v17 = vpop.f32.mrf.mxu0  ;;  %12497 = vst [vmem:[#allocation61_spill] sm:$0xff] %v8764_v4  ;;  %vm844_vm13 = vcmp.gt.f32.partialorder %v8589_v45, 0.0 }
 0x378   : > { %12495 = vst [vmem:[#allocation59_spill] sm:$0xff] %v8750_v3  ;;  %v8755_v19 = vmul.f32 %v8750_v3, %v543_v42  ;;  %v1960_v12 = vmul.f32 %v1833_v17, %v8742_v16  ;;  %v2612_v0 = vsel %vm2465_vm12, %v2568_v43, 0.0  ;;  %v8770_v42 = vpop.trf.xlu1  ;;  %v6732_v43 = vpop.eup %6731  ;;  %v545_v16 = vld [vmem:[%s12147_s5 + $0x48] sm:$0xff] }
 0x379   : > { %2613 = vadd.xlane.f32.xlu0 %v2612_v0  ;;  %v1835_v33 = vpop.f32.mrf.mxu0  ;;  %12498 = vst [vmem:[#allocation62_spill] sm:$0xff] %v8770_v42 }
 0x37a   : > { %12496 = vst [vmem:[#allocation60_spill] sm:$0xff] %v8755_v19  ;;  %v8772_v17 = vmax.f32 %v1960_v12, 0.0  ;;  %v2569_v0 = vmul.f32 %v8755_v19, %v8755_v19  ;;  %v8786_v12 = vsel %vm832_vm14, %v6732_v43, 0.0  ;;  %v546_v43 = vld [vmem:[%s12147_s5 + $0x50] sm:$0xff]  ;;  %vm845_vm14 = vcmp.gt.f32.partialorder %v8521_v18, 0.0 }
 0x37b   : > { %v1838_v33 = vpop.f32.mrf.mxu0  ;;  %12501 = vst [vmem:[#allocation65_spill] sm:$0xff] %v8786_v12 }
 0x37c   : > { %12499 = vst [vmem:[#allocation63_spill] sm:$0xff] %v8772_v17  ;;  %v8777_v40 = vmul.f32 %v8772_v17, %v544_v7  ;;  %v1961_v32 = vmul.f32 %v1838_v33, %v8764_v4  ;;  %v2615_v54 = vsel %vm2465_vm12, %v2569_v0, 0.0  ;;  %v869_v7 = vsel %vm837_vm5, %v8466_v44, 1.0  ;;  %v8791_v19 = vpop.trf.xlu1  ;;  %v6734_v33 = vpop.eup %6733 }
 0x37d   : > { %2616 = vadd.xlane.f32.xlu0 %v2615_v54  ;;  %v1840_v25 = vpop.f32.mrf.mxu0  ;;  %12502 = vst [vmem:[#allocation66_spill] sm:$0xff] %v8791_v19  ;;  %6741 = vrcp.f32 %v869_v7  ;;  %v547_v7 = vld [vmem:[%s12147_s5 + $0x58] sm:$0xff] }
 0x37e   : > { %12500 = vst [vmem:[#allocation64_spill] sm:$0xff] %v8777_v40  ;;  %v8793_v4 = vmax.f32 %v1961_v32, 0.0  ;;  %v2570_v0 = vmul.f32 %v8777_v40, %v8777_v40  ;;  %v8807_v32 = vsel %vm833_vm15, %v6734_v33, 0.0  ;;  %vm846_vm15 = vcmp.gt.f32.partialorder %v8573_v61, 0.0 }
 0x37f   : > { %v1843_v42 = vpop.f32.mrf.mxu0  ;;  %12505 = vst [vmem:[#allocation69_spill] sm:$0xff] %v8807_v32 }
 0x380   : > { %12503 = vst [vmem:[#allocation67_spill] sm:$0xff] %v8793_v4  ;;  %v8798_v25 = vmul.f32 %v8793_v4, %v545_v16  ;;  %v1962_v35 = vmul.f32 %v1843_v42, %v8786_v12  ;;  %v2618_v50 = vsel %vm2465_vm12, %v2570_v0, 0.0  ;;  %v8810_v40 = vpop.trf.xlu1  ;;  %v6736_v16 = vpop.eup %6735 }
 0x381   : > { %2619 = vadd.xlane.f32.xlu0 %v2618_v50  ;;  %v1845_v54 = vpop.f32.mrf.mxu0 }
 0x382   : > { %12504 = vst [vmem:[#allocation68_spill] sm:$0xff] %v8798_v25  ;;  %v8812_v19 = vmax.f32 %v1962_v35, 0.0  ;;  %v2571_v42 = vmul.f32 %v8798_v25, %v8798_v25  ;;  %v8826_v35 = vsel %vm834_vm1, %v6736_v16, 0.0  ;;  %v871_v54 = vsel %vm839_vm6, %v8533_v36, 1.0  ;;  %v548_v25 = vld [vmem:[%s12147_s5 + $0x60] sm:$0xff] }
 0x383   : > { %v1848_v0 = vpop.f32.mrf.mxu0  ;;  %12508 = vst [vmem:[#allocation72_spill] sm:$0xff] %v8826_v35  ;;  %6743 = vrcp.f32 %v871_v54  ;;  %vm847_vm1 = vcmp.gt.f32.partialorder %v8516_v47, 0.0 }
 0x384   : > { %12506 = vst [vmem:[#allocation70_spill] sm:$0xff] %v8812_v19  ;;  %v8817_v12 = vmul.f32 %v8812_v19, %v546_v43  ;;  %v1963_v50 = vmul.f32 %v1848_v0, %v8807_v32  ;;  %v2621_v58 = vsel %vm2465_vm12, %v2571_v42, 0.0  ;;  %v8832_v43 = vpop.trf.xlu1  ;;  %v6738_v0 = vpop.eup %6737 }
 0x385   : > { %2622 = vadd.xlane.f32.xlu0 %v2621_v58  ;;  %v1850_v33 = vpop.f32.mrf.mxu0  ;;  %12509 = vst [vmem:[#allocation73_spill] sm:$0xff] %v8832_v43 }
 0x386   : > { %12507 = vst [vmem:[#allocation71_spill] sm:$0xff] %v8817_v12  ;;  %v8834_v42 = vmax.f32 %v1963_v50, 0.0  ;;  %v2572_v32 = vmul.f32 %v8817_v12, %v8817_v12  ;;  %v8848_v50 = vsel %vm835_vm2, %v6738_v0, 0.0  ;;  %v549_v12 = vld [vmem:[%s12147_s5 + $0x68] sm:$0xff]  ;;  %vm848_vm2 = vcmp.gt.f32.partialorder %v8565_v49, 0.0 }
 0x387   : > { %v1853_v58 = vpop.f32.mrf.mxu0  ;;  %12512 = vst [vmem:[#allocation76_spill] sm:$0xff] %v8848_v50 }
 0x388   : > { %12510 = vst [vmem:[#allocation74_spill] sm:$0xff] %v8834_v42  ;;  %v8839_v33 = vmul.f32 %v8834_v42, %v547_v7  ;;  %v1964_v2 = vmul.f32 %v1853_v58, %v8826_v35  ;;  %v2624_v16 = vsel %vm2465_vm12, %v2572_v32, 0.0  ;;  %v872_v7 = vsel %vm840_vm7, %v8639_v5, 1.0  ;;  %v8854_v58 = vpop.trf.xlu1  ;;  %v6740_v32 = vpop.eup %6739 }
 0x389   : > { %2625 = vadd.xlane.f32.xlu0 %v2624_v16  ;;  %v1855_v43 = vpop.f32.mrf.mxu0  ;;  %12513 = vst [vmem:[#allocation77_spill] sm:$0xff] %v8854_v58  ;;  %6745 = vrcp.f32 %v872_v7 }
 0x38a   : > { %12511 = vst [vmem:[#allocation75_spill] sm:$0xff] %v8839_v33  ;;  %v8856_v35 = vmax.f32 %v1964_v2, 0.0  ;;  %v2573_v16 = vmul.f32 %v8839_v33, %v8839_v33  ;;  %v8870_v2 = vsel %vm836_vm4, %v6740_v32, 0.0  ;;  %v550_v33 = vld [vmem:[%s12147_s5 + $0x70] sm:$0xff]  ;;  %vm849_vm4 = vcmp.gt.f32.partialorder %v8511_v31, 0.0 }
 0x38b   : > { %v1858_v43 = vpop.f32.mrf.mxu0  ;;  %12516 = vst [vmem:[#allocation80_spill] sm:$0xff] %v8870_v2 }
 0x38c   : > { %12514 = vst [vmem:[#allocation78_spill] sm:$0xff] %v8856_v35  ;;  %v8861_v41 = vmul.f32 %v8856_v35, %v548_v25  ;;  %v1965_v54 = vmul.f32 %v1858_v43, %v8848_v50  ;;  %v2627_v0 = vsel %vm2465_vm12, %v2573_v16, 0.0  ;;  %v873_v25 = vsel %vm841_vm8, %v8529_v15, 1.0  ;;  %v8876_v43 = vpop.trf.xlu1  ;;  %v6742_v16 = vpop.eup %6741 }
 0x38d   : > { %2628 = vadd.xlane.f32.xlu0 %v2627_v0  ;;  %v1860_v58 = vpop.f32.mrf.mxu0  ;;  %12517 = vst [vmem:[#allocation81_spill] sm:$0xff] %v8876_v43  ;;  %6747 = vrcp.f32 %v873_v25 }
 0x38e   : > { %12515 = vst [vmem:[#allocation79_spill] sm:$0xff] %v8861_v41  ;;  %v8878_v50 = vmax.f32 %v1965_v54, 0.0  ;;  %v2574_v0 = vmul.f32 %v8861_v41, %v8861_v41  ;;  %v8892_v54 = vsel %vm837_vm5, %v6742_v16, 0.0  ;;  %v551_v16 = vld [vmem:[%s12147_s5 + $0x78] sm:$0xff]  ;;  %vm850_vm5 = vcmp.gt.f32.partialorder %v8554_v23, 0.0 }
 0x38f   : > { %v1863_v58 = vpop.f32.mrf.mxu0  ;;  %12520 = vst [vmem:[#allocation84_spill] sm:$0xff] %v8892_v54 }
 0x390   : > { %12518 = vst [vmem:[#allocation82_spill] sm:$0xff] %v8878_v50  ;;  %v8883_v51 = vmul.f32 %v8878_v50, %v549_v12  ;;  %v1966_v7 = vmul.f32 %v1863_v58, %v8870_v2  ;;  %v2630_v32 = vsel %vm2465_vm12, %v2574_v0, 0.0  ;;  %v874_v12 = vsel %vm842_vm9, %v8608_v57, 1.0  ;;  %v8898_v58 = vpop.trf.xlu1 }
 0x391   : > { %2631 = vadd.xlane.f32.xlu0 %v2630_v32  ;;  %v1865_v43 = vpop.f32.mrf.mxu0  ;;  %6749 = vrcp.f32 %v874_v12 }
 0x392   : > { %12519 = vst [vmem:[#allocation83_spill] sm:$0xff] %v8883_v51  ;;  %v8900_v0 = vmax.f32 %v1966_v7, 0.0  ;;  %v2575_v2 = vmul.f32 %v8883_v51, %v8883_v51  ;;  %v875_v51 = vsel %vm843_vm10, %v8525_v8, 1.0 }
 0x393   : > { %v1868_v32 = vpop.f32.mrf.mxu0  ;;  %6751 = vrcp.f32 %v875_v51 }
 0x394   : > { %12521 = vst [vmem:[#allocation85_spill] sm:$0xff] %v8900_v0  ;;  %v8905_v43 = vmul.f32 %v8900_v0, %v550_v33  ;;  %v1967_v44 = vmul.f32 %v1868_v32, %v8892_v54  ;;  %v2633_v25 = vsel %vm2465_vm12, %v2575_v2, 0.0  ;;  %v8917_v33 = vpop.trf.xlu1  ;;  %v6744_v32 = vpop.eup %6743 }
 0x395   : > { %2634 = vadd.xlane.f32.xlu0 %v2633_v25  ;;  %v1870_v7 = vpop.f32.mrf.mxu0  ;;  %12523 = vst [vmem:[#allocation87_spill] sm:$0xff] %v8917_v33 }
 0x396   : > { %12522 = vst [vmem:[#allocation86_spill] sm:$0xff] %v8905_v43  ;;  %v8919_v54 = vmax.f32 %v1967_v44, 0.0  ;;  %v2576_v2 = vmul.f32 %v8905_v43, %v8905_v43  ;;  %v854_v7 = vsel %vm822_vm11, %v8545_v22, 1.0  ;;  %v12526_v44 = vmov 0.0  }
 0x397   : > { %v8923_v41 = vpop.f32.mrf.mxu0  ;;  %v8936_v43 = vsel %vm839_vm6, %v6744_v32, 0.0  ;;  %6753 = vrcp.f32 %v854_v7  ;;  %v8954_v32 = vld [vmem:[%s12147_s5 + $0x88] sm:$0xff]  ;;  %v877_v7 = vsel %vm845_vm14, %v8521_v18, 1.0  ;;  %vm851_vm6 = vcmp.gt.f32.partialorder %v8505_v10, 0.0 }
 0x398   : > { %12524 = vst [vmem:[#allocation88_spill] sm:$0xff] %v8919_v54  ;;  %v8926_v25 = vmul.f32 %v8919_v54, %v551_v16  ;;  %2145 = vmatpush1.msra.mxu1 %v8919_v54  ;;  %v2636_v12 = vsel %vm2465_vm12, %v2576_v2, 0.0  ;;  %12527 = vst [vmem:[#allocation90_spill] sm:$0xff] %v8936_v43  ;;  %v876_v16 = vsel %vm844_vm13, %v8589_v45, 1.0  ;;  %v8941_v54 = vpop.trf.xlu1  ;;  %v6746_v2 = vpop.eup %6745 }
 0x399   : > { %2637 = vadd.xlane.f32.xlu0 %v2636_v12  ;;  %v1875_v33 = vpop.f32.mrf.mxu0  ;;  %2146 = vmatprep.subr.mxu1 %v12526_v44  ;;  %6755 = vrcp.f32 %v876_v16 }
 0x39a   : > { %12525 = vst [vmem:[#allocation89_spill] sm:$0xff] %v8926_v25  ;;  %2147 = vmatpush1.msra.mxu1 %v8900_v0  ;;  %v2577_v12 = vmul.f32 %v8926_v25, %v8926_v25  ;;  %v8959_v25 = vsel %vm840_vm7, %v6746_v2, 0.0  ;;  %v8980_v2 = vld [vmem:[%s12147_s5 + $0x90] sm:$0xff]  ;;  %6757 = vrcp.f32 %v877_v7  ;;  %vm852_vm7 = vcmp.gt.f32.partialorder %v8549_v53, 0.0 }
 0x39b   : > { %v1878_v33 = vpop.f32.mrf.mxu0  ;;  %2148 = vmatprep.subr.mxu1 %v12526_v44  ;;  %12528 = vst [vmem:[#allocation91_spill] sm:$0xff] %v8959_v25 }
 0x39c   : > { %v1969_v36 = vmul.f32 %v1878_v33, %v8936_v43  ;;  %2149 = vmatpush1.msra.mxu1 %v8878_v50  ;;  %v2639_v51 = vsel %vm2465_vm12, %v2577_v12, 0.0  ;;  %v8964_v33 = vpop.trf.xlu1  ;;  %v6748_v12 = vpop.eup %6747  ;;  %v878_v50 = vsel %vm846_vm15, %v8573_v61, 1.0 }
 0x39d   : > { %2640 = vadd.xlane.f32.xlu0 %v2639_v51  ;;  %v1880_v0 = vpop.f32.mrf.mxu0  ;;  %2150 = vmatprep.subr.mxu1 %v12526_v44  ;;  %v8985_v51 = vsel %vm841_vm8, %v6748_v12, 0.0  ;;  %6759 = vrcp.f32 %v878_v50  ;;  %vm853_vm8 = vcmp.gt.f32.partialorder %v8502_v20, 0.0 }
 0x39e   : > { %v8966_v43 = vmax.f32 %v1969_v36, 0.0  ;;  %2151 = vmatpush1.msra.mxu1 %v8856_v35  ;;  %12531 = vst [vmem:[#allocation94_spill] sm:$0xff] %v8985_v51 }
 0x39f   : > { %v1883_v0 = vpop.f32.mrf.mxu0  ;;  %2152 = vmatprep.subr.mxu1 %v12526_v44 }
 0x3a0   : > { %12529 = vst [vmem:[#allocation92_spill] sm:$0xff] %v8966_v43  ;;  %v8973_v5 = vmul.f32 %v8966_v43, %v8954_v32  ;;  %v1970_v16 = vmul.f32 %v1883_v0, %v8959_v25  ;;  %2153 = vmatpush1.msra.mxu1 %v8834_v42  ;;  %v8991_v0 = vpop.trf.xlu1  ;;  %v6750_v25 = vpop.eup %6749 }
 0x3a1   : > { %v1885_v36 = vpop.f32.mrf.mxu0  ;;  %2154 = vmatprep.subr.mxu1 %v12526_v44 }
 0x3a2   : > { %12530 = vst [vmem:[#allocation93_spill] sm:$0xff] %v8973_v5  ;;  %v8993_v35 = vmax.f32 %v1970_v16, 0.0  ;;  %2155 = vmatpush1.msra.mxu1 %v8812_v19  ;;  %v2579_v36 = vmul.f32 %v8973_v5, %v8973_v5  ;;  %v9009_v16 = vld [vmem:[%s12147_s5 + $0x98] sm:$0xff]  ;;  %v9014_v5 = vsel %vm842_vm9, %v6750_v25, 0.0  ;;  %vm838_vm9 = vcmp.gt.f32.partialorder %v8675_v11, 0.0 }
 0x3a3   : > { %v1888_v15 = vpop.f32.mrf.mxu0  ;;  %2156 = vmatprep.subr.mxu1 %v12526_v44  ;;  %12534 = vst [vmem:[#allocation97_spill] sm:$0xff] %v9009_v16  ;;  %12535 = vst [vmem:[#allocation98_spill] sm:$0xff] %v9014_v5 }
 0x3a4   : > { %12532 = vst [vmem:[#allocation95_spill] sm:$0xff] %v8993_v35  ;;  %v9001_v7 = vmul.f32 %v8993_v35, %v8980_v2  ;;  %v1971_v12 = vmul.f32 %v1888_v15, %v8985_v51  ;;  %2157 = vmatpush1.msra.mxu1 %v8793_v4  ;;  %v2645_v42 = vsel %vm2465_vm12, %v2579_v36, 0.0  ;;  %v879_v15 = vsel %vm847_vm1, %v8516_v47, 1.0  ;;  %v9020_v36 = vpop.trf.xlu1  ;;  %v6752_v51 = vpop.eup %6751 }
 0x3a5   : > { %2158 = vmatprep.subr.mxu1 %v12526_v44  ;;  %2646 = vadd.xlane.f32.xlu1 %v2645_v42  ;;  %v1890_v19 = vpop.f32.mrf.mxu0  ;;  %6761 = vrcp.f32 %v879_v15 }
 0x3a6   : > { %12533 = vst [vmem:[#allocation96_spill] sm:$0xff] %v9001_v7  ;;  %v9022_v4 = vmax.f32 %v1971_v12, 0.0  ;;  %2159 = vmatpush1.msra.mxu1 %v8772_v17  ;;  %v2580_v19 = vmul.f32 %v9001_v7, %v9001_v7  ;;  %v6754_v12 = vpop.eup %6753  ;;  %v9038_v17 = vld [vmem:[%s12147_s5 + $0xa0] sm:$0xff] }
 0x3a7   : > { %v1893_v57 = vpop.f32.mrf.mxu0  ;;  %2160 = vmatprep.subr.mxu1 %v12526_v44 }
 0x3a8   : > { %12536 = vst [vmem:[#allocation99_spill] sm:$0xff] %v9022_v4  ;;  %v9030_v42 = vmul.f32 %v9022_v4, %v9009_v16  ;;  %v1972_v50 = vmul.f32 %v1893_v57, %v9014_v5  ;;  %2161 = vmatpush1.msra.mxu1 %v8750_v3  ;;  %v2648_v25 = vsel %vm2465_vm12, %v2580_v19, 0.0  ;;  %v9043_v16 = vsel %vm843_vm10, %v6752_v51, 0.0  ;;  %v9048_v19 = vpop.trf.xlu1  ;;  %v6756_v5 = vpop.eup %6755 }
 0x3a9   : > { %2162 = vmatprep.subr.mxu1 %v12526_v44  ;;  %2649 = vadd.xlane.f32.xlu1 %v2648_v25  ;;  %v1895_v7 = vpop.f32.mrf.mxu0  ;;  %12538 = vst [vmem:[#allocation101_spill] sm:$0xff] %v9043_v16  ;;  %v880_v57 = vsel %vm848_vm2, %v8565_v49, 1.0 }
 0x3aa   : > { %12537 = vst [vmem:[#allocation100_spill] sm:$0xff] %v9030_v42  ;;  %v9050_v3 = vmax.f32 %v1972_v50, 0.0  ;;  %2163 = vmatpush1.msra.mxu1 %v8727_v63  ;;  %v2581_v25 = vmul.f32 %v9030_v42, %v9030_v42  ;;  %v9066_v50 = vsel %vm822_vm11, %v6754_v12, 0.0  ;;  %v9071_v63 = vld [vmem:[%s12147_s5 + $0xa8] sm:$0xff]  ;;  %6763 = vrcp.f32 %v880_v57 }
 0x3ab   : > { %v1898_v7 = vpop.f32.mrf.mxu0  ;;  %2164 = vmatprep.subr.mxu1 %v12526_v44  ;;  %12541 = vst [vmem:[#allocation104_spill] sm:$0xff] %v9066_v50  ;;  %v1952_v45 = vmul.f32 %v8586_v59, %v9066_v50 }
 0x3ac   : > { %12539 = vst [vmem:[#allocation102_spill] sm:$0xff] %v9050_v3  ;;  %v9058_v8 = vmul.f32 %v9050_v3, %v9038_v17  ;;  %v1973_v51 = vmul.f32 %v1898_v7, %v9043_v16  ;;  %2165 = vmatpush1.msra.mxu1 %v8705_v37  ;;  %v2651_v15 = vsel %vm2465_vm12, %v2581_v25, 0.0  ;;  %v9076_v7 = vsel %vm844_vm13, %v6756_v5, 0.0  ;;  %v6758_v25 = vpop.eup %6757 }
 0x3ad   : > { %2166 = vmatprep.subr.mxu1 %v12526_v44  ;;  %2652 = vadd.xlane.f32.xlu1 %v2651_v15  ;;  %v1900_v42 = vpop.f32.mrf.mxu0  ;;  %12542 = vst [vmem:[#allocation105_spill] sm:$0xff] %v9076_v7  ;;  %v9100_v15 = vld [vmem:[%s12147_s5 + $0xb0] sm:$0xff]  ;;  %v9105_v59 = vsel %vm845_vm14, %v6758_v25, 0.0  ;;  %v6760_v50 = vpop.eup %6759 }
 0x3ae   : > { %12540 = vst [vmem:[#allocation103_spill] sm:$0xff] %v9058_v8  ;;  %v9078_v16 = vmax.f32 %v1973_v51, 0.0  ;;  %2167 = vmatpush1.msra.mxu1 %v8677_v29  ;;  %v2582_v22 = vmul.f32 %v9058_v8, %v9058_v8  ;;  %v881_v42 = vsel %vm849_vm4, %v8511_v31, 1.0  ;;  %12545 = vst [vmem:[#allocation108_spill] sm:$0xff] %v9105_v59 }
 0x3af   : > { %v1903_v12 = vpop.f32.mrf.mxu0  ;;  %2168 = vmatprep.subr.mxu1 %v12526_v44  ;;  %6765 = vrcp.f32 %v881_v42 }
 0x3b0   : > { %12543 = vst [vmem:[#allocation106_spill] sm:$0xff] %v9078_v16  ;;  %v9092_v5 = vmul.f32 %v9078_v16, %v9071_v63  ;;  %v1974_v57 = vmul.f32 %v1903_v12, %v9076_v7  ;;  %2169 = vmatpush1.msra.mxu1 %v8653_v26  ;;  %v2654_v51 = vsel %vm2465_vm12, %v2582_v22, 0.0  ;;  %v882_v12 = vsel %vm850_vm5, %v8554_v23, 1.0  ;;  %v9238_v23 = vld [vmem:[%s12147_s5 + $0xe0] sm:$0xff] }
 0x3b1   : > { %2170 = vmatprep.subr.mxu1 %v12526_v44  ;;  %2655 = vadd.xlane.f32.xlu1 %v2654_v51  ;;  %v1905_v37 = vpop.f32.mrf.mxu0  ;;  %v9128_v51 = vld [vmem:[%s12147_s5 + $0xb8] sm:$0xff]  ;;  %6767 = vrcp.f32 %v882_v12  ;;  %v883_v12 = vsel %vm851_vm6, %v8505_v10, 1.0  ;;  %12565 = vst [vmem:[#allocation128_spill] sm:$0xff] %v9238_v23 }
 0x3b2   : > { %12544 = vst [vmem:[#allocation107_spill] sm:$0xff] %v9092_v5  ;;  %v9107_v29 = vmax.f32 %v1974_v57, 0.0  ;;  %2171 = vmatpush1.msra.mxu1 %v8629_v24  ;;  %v2583_v22 = vmul.f32 %v9092_v5, %v9092_v5  ;;  %v9116_v37 = vmax.f32 %v1952_v45, 0.0  ;;  %v9133_v45 = vsel %vm846_vm15, %v6760_v50, 0.0 }
 0x3b3   : > { %v1908_v7 = vpop.f32.mrf.mxu0  ;;  %2172 = vmatprep.subr.mxu1 %v12526_v44  ;;  %12549 = vst [vmem:[#allocation112_spill] sm:$0xff] %v9133_v45  ;;  %6769 = vrcp.f32 %v883_v12 }
 0x3b4   : > { %12546 = vst [vmem:[#allocation109_spill] sm:$0xff] %v9107_v29  ;;  %12547 = vst [vmem:[#allocation110_spill] sm:$0xff] %v9116_v37  ;;  %v9120_v18 = vmul.f32 %v9107_v29, %v9100_v15  ;;  %v1975_v25 = vmul.f32 %v1908_v7, %v9105_v59  ;;  %2173 = vmatpush1.msra.mxu1 %v8610_v62  ;;  %v2657_v57 = vsel %vm2465_vm12, %v2583_v22, 0.0  ;;  %v6762_v7 = vpop.eup %6761 }
 0x3b5   : > { %2174 = vmatprep.subr.mxu1 %v12526_v44  ;;  %2658 = vadd.xlane.f32.xlu1 %v2657_v57  ;;  %v1910_v42 = vpop.f32.mrf.mxu0  ;;  %v9158_v24 = vsel %vm847_vm1, %v6762_v7, 0.0  ;;  %v884_v7 = vsel %vm852_vm7, %v8549_v53, 1.0 }
 0x3b6   : > { %12548 = vst [vmem:[#allocation111_spill] sm:$0xff] %v9120_v18  ;;  %v9136_v59 = vmax.f32 %v1975_v25, 0.0  ;;  %2175 = vmatpush1.msra.mxu1 %v9116_v37  ;;  %v2584_v22 = vmul.f32 %v9120_v18, %v9120_v18  ;;  %v9154_v25 = vld [vmem:[%s12147_s5 + $0xc0] sm:$0xff]  ;;  %12552 = vst [vmem:[#allocation115_spill] sm:$0xff] %v9158_v24  ;;  %6771 = vrcp.f32 %v884_v7 }
 0x3b7   : > { %v1913_v26 = vpop.f32.mrf.mxu0  ;;  %2176 = vmatprep.subr.mxu1 %v12526_v44 }
 0x3b8   : > { %12550 = vst [vmem:[#allocation113_spill] sm:$0xff] %v9136_v59  ;;  %v9144_v57 = vmul.f32 %v9136_v59, %v9128_v51  ;;  %v1976_v61 = vmul.f32 %v1913_v26, %v9133_v45  ;;  %v2660_v50 = vsel %vm2465_vm12, %v2584_v22, 0.0  ;;  %v6764_v26 = vpop.eup %6763 }
 0x3b9   : > { %2661 = vadd.xlane.f32.xlu1 %v2660_v50  ;;  %v1915_v42 = vpop.f32.mrf.mxu0  ;;  %v9181_v12 = vsel %vm848_vm2, %v6764_v26, 0.0  ;;  %v885_v26 = vsel %vm853_vm8, %v8502_v20, 1.0 }
 0x3ba   : > { %12551 = vst [vmem:[#allocation114_spill] sm:$0xff] %v9144_v57  ;;  %v9161_v45 = vmax.f32 %v1976_v61, 0.0  ;;  %v2585_v22 = vmul.f32 %v9144_v57, %v9144_v57  ;;  %v9177_v61 = vld [vmem:[%s12147_s5 + $0xc8] sm:$0xff]  ;;  %12555 = vst [vmem:[#allocation118_spill] sm:$0xff] %v9181_v12  ;;  %6773 = vrcp.f32 %v885_v26 }
 0x3bb   : > { %v1918_v62 = vpop.f32.mrf.mxu0 }
 0x3bc   : > { %12553 = vst [vmem:[#allocation116_spill] sm:$0xff] %v9161_v45  ;;  %v9167_v8 = vmul.f32 %v9161_v45, %v9154_v25  ;;  %v1977_v50 = vmul.f32 %v1918_v62, %v9158_v24  ;;  %v2663_v47 = vsel %vm2465_vm12, %v2585_v22, 0.0  ;;  %v6766_v5 = vpop.eup %6765 }
 0x3bd   : > { %2664 = vadd.xlane.f32.xlu0 %v2663_v47  ;;  %v1920_v42 = vpop.f32.mrf.mxu0 }
 0x3be   : > { %12554 = vst [vmem:[#allocation117_spill] sm:$0xff] %v9167_v8  ;;  %v9184_v62 = vmax.f32 %v1977_v50, 0.0  ;;  %v2586_v22 = vmul.f32 %v9167_v8, %v9167_v8  ;;  %v9200_v50 = vld [vmem:[%s12147_s5 + $0xd0] sm:$0xff]  ;;  %v6768_v42 = vpop.eup %6767 }
 0x3bf   : > { %v1923_v24 = vpop.f32.mrf.mxu0  ;;  %v9223_v31 = vsel %vm850_vm5, %v6768_v42, 0.0 }
 0x3c0   : > { %12556 = vst [vmem:[#allocation119_spill] sm:$0xff] %v9184_v62  ;;  %v9190_v18 = vmul.f32 %v9184_v62, %v9177_v61  ;;  %v1978_v47 = vmul.f32 %v1923_v24, %v9181_v12  ;;  %v2666_v49 = vsel %vm2465_vm12, %v2586_v22, 0.0  ;;  %v9208_v24 = vsel %vm849_vm4, %v6766_v5, 0.0  ;;  %12562 = vst [vmem:[#allocation125_spill] sm:$0xff] %v9223_v31 }
 0x3c1   : > { %2667 = vadd.xlane.f32.xlu0 %v2666_v49  ;;  %v1925_v7 = vpop.f32.mrf.mxu0  ;;  %12559 = vst [vmem:[#allocation122_spill] sm:$0xff] %v9208_v24 }
 0x3c2   : > { %12557 = vst [vmem:[#allocation120_spill] sm:$0xff] %v9190_v18  ;;  %v9202_v57 = vmax.f32 %v1978_v47, 0.0  ;;  %v2587_v8 = vmul.f32 %v9190_v18, %v9190_v18  ;;  %v9219_v47 = vld [vmem:[%s12147_s5 + $0xd8] sm:$0xff] }
 0x3c3   : > { %v1928_v22 = vpop.f32.mrf.mxu0  ;;  %12561 = vst [vmem:[#allocation124_spill] sm:$0xff] %v9219_v47 }
 0x3c4   : > { %12558 = vst [vmem:[#allocation121_spill] sm:$0xff] %v9202_v57  ;;  %v9212_v12 = vmul.f32 %v9202_v57, %v9200_v50  ;;  %v1979_v37 = vmul.f32 %v1928_v22, %v9208_v24  ;;  %v2669_v49 = vsel %vm2465_vm12, %v2587_v8, 0.0  ;;  %v6770_v22 = vpop.eup %6769 }
 0x3c5   : > { %2670 = vadd.xlane.f32.xlu0 %v2669_v49  ;;  %v1930_v7 = vpop.f32.mrf.mxu0 }
 0x3c6   : > { %12560 = vst [vmem:[#allocation123_spill] sm:$0xff] %v9212_v12  ;;  %v9225_v5 = vmax.f32 %v1979_v37, 0.0  ;;  %v2588_v26 = vmul.f32 %v9212_v12, %v9212_v12 }
 0x3c7   : > { %v1933_v18 = vpop.f32.mrf.mxu0 }
 0x3c8   : > { %12563 = vst [vmem:[#allocation126_spill] sm:$0xff] %v9225_v5  ;;  %v9231_v8 = vmul.f32 %v9225_v5, %v9219_v47  ;;  %v1980_v24 = vmul.f32 %v1933_v18, %v9223_v31  ;;  %v2672_v49 = vsel %vm2465_vm12, %v2588_v26, 0.0  ;;  %v9246_v47 = vsel %vm851_vm6, %v6770_v22, 0.0  ;;  %v6772_v18 = vpop.eup %6771 }
 0x3c9   : > { %2673 = vadd.xlane.f32.xlu0 %v2672_v49  ;;  %v1935_v37 = vpop.f32.mrf.mxu0  ;;  %12567 = vst [vmem:[#allocation130_spill] sm:$0xff] %v9246_v47 }
 0x3ca   : > { %12564 = vst [vmem:[#allocation127_spill] sm:$0xff] %v9231_v8  ;;  %v9240_v42 = vmax.f32 %v1980_v24, 0.0  ;;  %v2589_v7 = vmul.f32 %v9231_v8, %v9231_v8  ;;  %v9257_v24 = vld [vmem:[%s12147_s5 + $0xe8] sm:$0xff] }
 0x3cb   : > { %v1938_v12 = vpop.f32.mrf.mxu0  ;;  %12569 = vst [vmem:[#allocation132_spill] sm:$0xff] %v9257_v24 }
 0x3cc   : > { %12566 = vst [vmem:[#allocation129_spill] sm:$0xff] %v9240_v42  ;;  %v9250_v26 = vmul.f32 %v9240_v42, %v9238_v23  ;;  %v1981_v31 = vmul.f32 %v1938_v12, %v9246_v47  ;;  %v2675_v49 = vsel %vm2465_vm12, %v2589_v7, 0.0  ;;  %v9265_v23 = vsel %vm852_vm7, %v6772_v18, 0.0  ;;  %v6774_v12 = vpop.eup %6773 }
 0x3cd   : > { %2676 = vadd.xlane.f32.xlu0 %v2675_v49  ;;  %v1940_v37 = vpop.f32.mrf.mxu0  ;;  %12571 = vst [vmem:[#allocation134_spill] sm:$0xff] %v9265_v23 }
 0x3ce   : > { %12568 = vst [vmem:[#allocation131_spill] sm:$0xff] %v9250_v26  ;;  %v9259_v10 = vmax.f32 %v1981_v31, 0.0  ;;  %v2590_v22 = vmul.f32 %v9250_v26, %v9250_v26  ;;  %v9276_v31 = vld [vmem:[%s12147_s5 + $0xf0] sm:$0xff] }
 0x3cf   : > { %v1943_v8 = vpop.f32.mrf.mxu0 }
 0x3d0   : > { %12570 = vst [vmem:[#allocation133_spill] sm:$0xff] %v9259_v10  ;;  %v9269_v7 = vmul.f32 %v9259_v10, %v9257_v24  ;;  %v1982_v47 = vmul.f32 %v1943_v8, %v9265_v23  ;;  %v2678_v49 = vsel %vm2465_vm12, %v2590_v22, 0.0  ;;  %v9284_v24 = vsel %vm853_vm8, %v6774_v12, 0.0 }
 0x3d1   : > { %2679 = vadd.xlane.f32.xlu0 %v2678_v49  ;;  %v1945_v37 = vpop.f32.mrf.mxu0  ;;  %12573 = vst [vmem:[#allocation136_spill] sm:$0xff] %v9284_v24 }
 0x3d2   : > { %v9278_v53 = vmax.f32 %v1982_v47, 0.0  ;;  %v2591_v18 = vmul.f32 %v9269_v7, %v9269_v7  ;;  %v9295_v47 = vld [vmem:[%s12147_s5 + $0xf8] sm:$0xff] }
 0x3d3   : > { %v1948_v26 = vpop.f32.mrf.mxu0 }
 0x3d4   : > { %12572 = vst [vmem:[#allocation135_spill] sm:$0xff] %v9278_v53  ;;  %v9288_v8 = vmul.f32 %v9278_v53, %v9276_v31  ;;  %v1983_v22 = vmul.f32 %v1948_v26, %v9284_v24  ;;  %v2681_v23 = vsel %vm2465_vm12, %v2591_v18, 0.0 }
 0x3d5   : > { %2682 = vadd.xlane.f32.xlu0 %v2681_v23  ;;  %v1950_v49 = vpop.f32.mrf.mxu0  ;;  %v870_v23 = vsel %vm838_vm9, %v8675_v11, 1.0 }
 0x3d6   : > { %v9297_v37 = vmax.f32 %v1983_v22, 0.0  ;;  %v2592_v20 = vmul.f32 %v9288_v8, %v9288_v8  ;;  %6775 = vrcp.f32 %v870_v23  ;;  %v6389_v23 = vunpack.i.h.bf16 %v8535_v27 }
 0x3d7   : > { %v6396_v27 = vunpack.i.l.bf16 %v8541_v30 }
 0x3d8   : > { %12574 = vst [vmem:[#allocation137_spill] sm:$0xff] %v9297_v37  ;;  %v9304_v12 = vmul.f32 %v9297_v37, %v9295_v47  ;;  %2177 = vmatpush2.msra.mxu1 %v9297_v37  ;;  %v2684_v26 = vsel %vm2465_vm12, %v2592_v20, 0.0 }
 0x3d9   : > { %2685 = vadd.xlane.f32.xlu0 %v2684_v26  ;;  %2178 = vmatprep.subr.mxu1 %v12526_v44 }
 0x3da   : > { %2179 = vmatpush2.msra.mxu1 %v9278_v53  ;;  %v2593_v18 = vmul.f32 %v9304_v12, %v9304_v12 }
 0x3db   : > { %2180 = vmatprep.subr.mxu1 %v12526_v44 }
 0x3dc   : > { %2181 = vmatpush2.msra.mxu1 %v9259_v10  ;;  %v2687_v22 = vsel %vm2465_vm12, %v2593_v18, 0.0  ;;  %v6391_v18 = vunpack.i.l.bf16 %v8539_v38 }
 0x3dd   : > { %2688 = vadd.xlane.f32.xlu0 %v2687_v22  ;;  %2182 = vmatprep.subr.mxu1 %v12526_v44  ;;  %v6399_v22 = vunpack.i.h.bf16 %v8541_v30  ;;  %v6416_v30 = vunpack.i.l.bf16 %v8559_v6 }
 0x3de   : > { %2183 = vmatpush2.msra.mxu1 %v9240_v42  ;;  %v12602_v42 = vld [vmem:[#allocation117_spill] sm:$0xff] }
 0x3df   : > { %2184 = vmatprep.subr.mxu1 %v12526_v44 }
 0x3e0   : > { %2185 = vmatpush2.msra.mxu1 %v9225_v5 }
 0x3e1   : > { %2186 = vmatprep.subr.mxu1 %v12526_v44 }
 0x3e2   : > { %2187 = vmatpush2.msra.mxu1 %v9202_v57 }
 0x3e3   : > { %2188 = vmatprep.subr.mxu1 %v12526_v44  ;;  %v6776_v49 = vpop.eup %6775 }
 0x3e4   : > { %2189 = vmatpush2.msra.mxu1 %v9184_v62  ;;  %v9336_v20 = vsel %vm838_vm9, %v6776_v49, 0.0  ;;  %v6401_v49 = vunpack.i.l.bf16 %v8543_v60 }
 0x3e5   : > { %2190 = vmatprep.subr.mxu1 %v12526_v44  ;;  %12575 = vst [vmem:[#allocation138_spill] sm:$0xff] %v9336_v20  ;;  %v1968_v26 = vmul.f32 %v8923_v41, %v9336_v20  ;;  %v6394_v41 = vunpack.i.h.bf16 %v8539_v38  ;;  %v6406_v20 = vunpack.i.l.bf16 %v8547_v46  ;;  %v6409_v38 = vunpack.i.h.bf16 %v8547_v46 }
 0x3e6   : > { %2191 = vmatpush2.msra.mxu1 %v9161_v45  ;;  %v6426_v46 = vunpack.i.l.bf16 %v8570_v55 }
 0x3e7   : > { %2192 = vmatprep.subr.mxu1 %v12526_v44  ;;  %v9348_v11 = vmax.f32 %v1968_v26, 0.0  ;;  %v6404_v26 = vunpack.i.h.bf16 %v8543_v60  ;;  %v6421_v60 = vunpack.i.l.bf16 %v8562_v1 }
 0x3e8   : > { %2193 = vmatpush2.msra.mxu1 %v9136_v59 }
 0x3e9   : > { %2194 = vmatprep.subr.mxu1 %v12526_v44  ;;  %12576 = vst [vmem:[#allocation139_spill] sm:$0xff] %v9348_v11 }
 0x3ea   : > { %2195 = vmatpush2.msra.mxu1 %v9107_v29  ;;  %v9993_v29 = vld [vmem:[%s12150_s8 + $0x78] sm:$0xff] }
 0x3eb   : > { %2196 = vmatprep.subr.mxu1 %v12526_v44 }
 0x3ec   : > { %2197 = vmatpush2.msra.mxu1 %v9078_v16  ;;  %v9998_v16 = vld [vmem:[%s12150_s8 + $0xf8] sm:$0xff] }
 0x3ed   : > { %2198 = vmatprep.subr.mxu1 %v12526_v44 }
 0x3ee   : > { %2199 = vmatpush2.msra.mxu1 %v9050_v3 }
 0x3ef   : > { %2200 = vmatprep.subr.mxu1 %v12526_v44 }
 0x3f0   : > { %2201 = vmatpush2.msra.mxu1 %v9022_v4 }
 0x3f1   : > { %2202 = vmatprep.subr.mxu1 %v12526_v44 }
 0x3f2   : > { %2203 = vmatpush2.msra.mxu1 %v8993_v35 }
 0x3f3   : > { %2204 = vmatprep.subr.mxu1 %v12526_v44 }
 0x3f4   : > { %2205 = vmatpush2.msra.mxu1 %v8966_v43 }
 0x3f5   : > { %2206 = vmatprep.subr.mxu1 %v12526_v44 }
 0x3f6   : > { %2207 = vmatpush2.msra.mxu1 %v9348_v11 }
 0x3f7   : > { %2209 = vmatmul.mubr.f32.vlgmr.msra.gmra.mxu1 %v6389_v23  ;;  %4575 = vmatprep.subr.mxu1 %v12526_v44  ;;  %v6411_v23 = vunpack.i.l.bf16 %v8551_v14 }
 0x3f8   : > { %2213 = vmatprep.mubr.f32.mxu1 %v6391_v18  ;;  %v6414_v18 = vunpack.i.h.bf16 %v8551_v14  ;;  %v6431_v14 = vunpack.i.l.bf16 %v8578_v21 }
 0x3fb   : > { %2214 = vmatmul.mubr.f32.gmra.mxu1 %v6394_v41  ;;  %v6419_v41 = vunpack.i.h.bf16 %v8559_v6  ;;  %v6436_v6 = vunpack.i.l.bf16 %v8584_v39 }
 0x3fc   : > { %2218 = vmatprep.mubr.f32.mxu1 %v6396_v27  ;;  %v6424_v27 = vunpack.i.h.bf16 %v8562_v1  ;;  %v6441_v1 = vunpack.i.l.bf16 %v8598_v48 }
 0x3ff   : > { %2219 = vmatmul.mubr.f32.gmra.mxu1 %v6399_v22  ;;  %v6434_v22 = vunpack.i.h.bf16 %v8578_v21  ;;  %v6451_v21 = vunpack.i.l.bf16 %v8636_v34 }
 0x400   : > { %2223 = vmatprep.mubr.f32.mxu1 %v6401_v49  ;;  %v6439_v49 = vunpack.i.h.bf16 %v8584_v39  ;;  %v6456_v39 = vunpack.i.l.bf16 %v8660_v56 }
 0x403   : > { %2224 = vmatmul.mubr.f32.gmra.mxu1 %v6404_v26  ;;  %v6444_v26 = vunpack.i.h.bf16 %v8598_v48  ;;  %v6461_v48 = vunpack.i.l.bf16 %v8685_v28 }
 0x404   : > { %2228 = vmatprep.mubr.f32.mxu1 %v6406_v20  ;;  %v6429_v20 = vunpack.i.h.bf16 %v8570_v55  ;;  %v6446_v55 = vunpack.i.l.bf16 %v8615_v52 }
 0x407   : > { %2229 = vmatmul.mubr.f32.gmra.mxu1 %v6409_v38  ;;  %v6449_v38 = vunpack.i.h.bf16 %v8615_v52  ;;  %v6498_v52 = vunpack.i.l.bf16 %v8703_v9 }
 0x408   : > { %2233 = vmatprep.mubr.f32.mxu1 %v6411_v23  ;;  %v6454_v23 = vunpack.i.h.bf16 %v8636_v34  ;;  %v6503_v34 = vunpack.i.l.bf16 %v8725_v13 }
 0x40b   : > { %2234 = vmatmul.mubr.f32.gmra.mxu1 %v6414_v18  ;;  %v6459_v18 = vunpack.i.h.bf16 %v8660_v56  ;;  %v12577_v56 = vld [vmem:[#allocation58_spill] sm:$0xff] }
 0x40c   : > { %2238 = vmatprep.mubr.f32.mxu1 %v6416_v30  ;;  %v6464_v30 = vunpack.i.h.bf16 %v8685_v28  ;;  %v12578_v28 = vld [vmem:[#allocation62_spill] sm:$0xff] }
 0x40f   : > { %2239 = vmatmul.mubr.f32.gmra.mxu1 %v6419_v41  ;;  %v6501_v41 = vunpack.i.h.bf16 %v8703_v9  ;;  %v12579_v9 = vld [vmem:[#allocation66_spill] sm:$0xff] }
 0x410   : > { %2243 = vmatprep.mubr.f32.mxu1 %v6421_v60  ;;  %v6506_v60 = vunpack.i.h.bf16 %v8725_v13  ;;  %v6523_v13 = vunpack.i.l.bf16 %v8810_v40 }
 0x413   : > { %2244 = vmatmul.mubr.f32.gmra.mxu1 %v6424_v27  ;;  %v6508_v27 = vunpack.i.l.bf16 %v12577_v56 }
 0x414   : > { %2248 = vmatprep.mubr.f32.mxu1 %v6426_v46  ;;  %v6511_v46 = vunpack.i.h.bf16 %v12577_v56  ;;  %v6556_v56 = vunpack.i.h.bf16 %v8941_v54 }
 0x417   : > { %2249 = vmatmul.mubr.f32.gmra.mxu1 %v6429_v20  ;;  %v6513_v20 = vunpack.i.l.bf16 %v12578_v28 }
 0x418   : > { %2253 = vmatprep.mubr.f32.mxu1 %v6431_v14  ;;  %v6516_v14 = vunpack.i.h.bf16 %v12578_v28  ;;  %v6566_v28 = vunpack.i.h.bf16 %v8991_v0 }
 0x41b   : > { %2254 = vmatmul.mubr.f32.gmra.mxu1 %v6434_v22  ;;  %v6518_v22 = vunpack.i.l.bf16 %v12579_v9 }
 0x41c   : > { %2258 = vmatprep.mubr.f32.mxu1 %v6436_v6  ;;  %v6521_v6 = vunpack.i.h.bf16 %v12579_v9  ;;  %v6576_v9 = vunpack.i.h.bf16 %v9048_v19 }
 0x41f   : > { %2259 = vmatmul.mubr.f32.gmra.mxu1 %v6439_v49  ;;  %v6526_v49 = vunpack.i.h.bf16 %v8810_v40  ;;  %v6543_v40 = vunpack.i.l.bf16 %v8898_v58 }
 0x420   : > { %2263 = vmatprep.mubr.f32.mxu1 %v6441_v1  ;;  %v12580_v1 = vld [vmem:[#allocation73_spill] sm:$0xff] }
 0x423   : > { %2264 = vmatmul.mubr.f32.gmra.mxu1 %v6444_v26  ;;  %v6528_v26 = vunpack.i.l.bf16 %v12580_v1 }
 0x424   : > { %2268 = vmatprep.mubr.f32.mxu1 %v6446_v55  ;;  %v6531_v55 = vunpack.i.h.bf16 %v12580_v1 }
 0x427   : > { %2269 = vmatmul.mubr.f32.gmra.mxu1 %v6449_v38  ;;  %v12581_v38 = vld [vmem:[#allocation77_spill] sm:$0xff] }
 0x428   : > { %2273 = vmatprep.mubr.f32.mxu1 %v6451_v21  ;;  %v6533_v21 = vunpack.i.l.bf16 %v12581_v38 }
 0x42b   : > { %2274 = vmatmul.mubr.f32.gmra.mxu1 %v6454_v23  ;;  %v6536_v23 = vunpack.i.h.bf16 %v12581_v38 }
 0x42c   : > { %2278 = vmatprep.mubr.f32.mxu1 %v6456_v39  ;;  %v12582_v39 = vld [vmem:[#allocation81_spill] sm:$0xff] }
 0x42f   : > { %2279 = vmatmul.mubr.f32.gmra.mxu1 %v6459_v18  ;;  %v6538_v18 = vunpack.i.l.bf16 %v12582_v39 }
 0x430   : > { %2283 = vmatprep.mubr.f32.mxu1 %v6461_v48  ;;  %v6541_v48 = vunpack.i.h.bf16 %v12582_v39 }
 0x433   : > { %2284 = vmatmul.mubr.f32.gmra.mxu1 %v6464_v30  ;;  %v6546_v30 = vunpack.i.h.bf16 %v8898_v58  ;;  %v6563_v58 = vunpack.i.l.bf16 %v8991_v0 }
 0x434   : > { %2288 = vmatprep.mubr.f32.mxu1 %v6498_v52  ;;  %v12583_v52 = vld [vmem:[#allocation87_spill] sm:$0xff] }
 0x437   : > { %2289 = vmatmul.mubr.f32.gmra.mxu1 %v6501_v41  ;;  %v6548_v41 = vunpack.i.l.bf16 %v12583_v52 }
 0x438   : > { %2293 = vmatprep.mubr.f32.mxu1 %v6503_v34  ;;  %v6551_v34 = vunpack.i.h.bf16 %v12583_v52 }
 0x43b   : > { %2294 = vmatmul.mubr.f32.gmra.mxu1 %v6506_v60  ;;  %v6553_v60 = vunpack.i.l.bf16 %v8941_v54  ;;  %v6573_v54 = vunpack.i.l.bf16 %v9048_v19 }
 0x43c   : > { %2298 = vmatprep.mubr.f32.mxu1 %v6508_v27  ;;  %v6558_v27 = vunpack.i.l.bf16 %v8964_v33 }
 0x43f   : > { %2299 = vmatmul.mubr.f32.gmra.mxu1 %v6511_v46  ;;  %v6561_v46 = vunpack.i.h.bf16 %v8964_v33  ;;  %v12584_v33 = vld [vmem:[#allocation6_spill] sm:$0xff] }
 0x440   : > { %2303 = vmatprep.mubr.f32.mxu1 %v6513_v20  ;;  %v6568_v20 = vunpack.i.l.bf16 %v9020_v36 }
 0x443   : > { %2304 = vmatmul.mubr.f32.gmra.mxu1 %v6516_v14  ;;  %v6571_v14 = vunpack.i.h.bf16 %v9020_v36  ;;  %v7033_v36 = vld [vmem:[%s12147_s5 + $0x10] sm:$0xff] }
 0x444   : > { %2308 = vmatprep.mubr.f32.mxu1 %v6518_v22  ;;  %v12585_v22 = vunpack.i.l.bf16 %v12584_v33 }
 0x447   : > { %2309 = vmatmul.mubr.f32.gmra.mxu1 %v6521_v6 }
 0x448   : > { %2313 = vmatprep.mubr.f32.mxu1 %v6523_v13 }
 0x44b   : > { %2314 = vmatmul.mubr.f32.gmra.mxu1 %v6526_v49 }
 0x44c   : > { %2318 = vmatprep.mubr.f32.mxu1 %v6528_v26 }
 0x44f   : > { %2319 = vmatmul.mubr.f32.gmra.mxu1 %v6531_v55 }
 0x450   : > { %2323 = vmatprep.mubr.f32.mxu1 %v6533_v21  ;;  %v7034_v21 = vld [vmem:[%s12147_s5 + $0x18] sm:$0xff] }
 0x453   : > { %2324 = vmatmul.mubr.f32.gmra.mxu1 %v6536_v23 }
 0x454   : > { %2328 = vmatprep.mubr.f32.mxu1 %v6538_v18 }
 0x457   : > { %2329 = vmatmul.mubr.f32.gmra.mxu1 %v6541_v48 }
 0x458   : > { %2333 = vmatprep.mubr.f32.mxu1 %v6543_v40 }
 0x45b   : > { %2334 = vmatmul.mubr.f32.gmra.mxu1 %v6546_v30  ;;  %v7035_v30 = vld [vmem:[%s12147_s5 + $0x20] sm:$0xff] }
 0x45c   : > { %2338 = vmatprep.mubr.f32.mxu1 %v6548_v41 }
 0x45f   : > { %2339 = vmatmul.mubr.f32.gmra.mxu1 %v6551_v34 }
 0x460   : > { %2343 = vmatprep.mubr.f32.mxu1 %v6553_v60 }
 0x463   : > { %2344 = vmatmul.mubr.f32.gmra.mxu1 %v6556_v56 }
 0x464   : > { %2348 = vmatprep.mubr.f32.mxu1 %v6558_v27  ;;  %v7036_v27 = vld [vmem:[%s12147_s5 + $0x28] sm:$0xff] }
 0x467   : > { %2349 = vmatmul.mubr.f32.gmra.mxu1 %v6561_v46 }
 0x468   : > { %2353 = vmatprep.mubr.f32.mxu1 %v6563_v58 }
 0x46b   : > { %2354 = vmatmul.mubr.f32.gmra.mxu1 %v6566_v28 }
 0x46c   : > { %2358 = vmatprep.mubr.f32.mxu1 %v6568_v20 }
 0x46f   : > { %2359 = vmatmul.mubr.f32.gmra.mxu1 %v6571_v14 }
 0x470   : > { %2363 = vmatprep.mubr.f32.mxu1 %v6573_v54  ;;  %v7037_v54 = vld [vmem:[%s12147_s5 + $0x30] sm:$0xff] }
 0x473   : > { %2364 = vmatmul.mubr.f32.gmra.mxu1 %v6576_v9 }
 0x474   : > { %4639 = vmatprep.mubr.f32.mxu1 %v12585_v22 }
 0x4b7   : > { %v9418_v6 = vpop.f32.mrf.mxu1 }
 0x4b9   : > { %v2212_v0 = vpop.f32.mrf.mxu1 }
 0x4bb   : > { %v9420_v13 = vpop.f32.mrf.mxu1 }
 0x4bd   : > { %v2217_v49 = vpop.f32.mrf.mxu1 }
 0x4bf   : > { %v2220_v1 = vpop.f32.mrf.mxu1 }
 0x4c0   : > { %v9425_v26 = vmul.f32 %v7033_v36, %v2220_v1  ;;  %v7038_v36 = vld [vmem:[%s12147_s5 + $0x38] sm:$0xff] }
 0x4c1   : > { %v2222_v55 = vpop.f32.mrf.mxu1 }
 0x4c2   : > { %v2692_v19 = vmul.f32 %v9425_v26, %v9425_v26 }
 0x4c3   : > { %v2225_v38 = vpop.f32.mrf.mxu1 }
 0x4c4   : > { %v9432_v23 = vmul.f32 %v7034_v21, %v2225_v38  ;;  %v2728_v39 = vsel %vm2465_vm12, %v2692_v19, 0.0 }
 0x4c5   : > { %2729 = vadd.xlane.f32.xlu1 %v2728_v39  ;;  %v2227_v18 = vpop.f32.mrf.mxu1 }
 0x4c6   : > { %v2693_v48 = vmul.f32 %v9432_v23, %v9432_v23  ;;  %v7039_v18 = vld [vmem:[%s12147_s5 + $0x40] sm:$0xff] }
 0x4c7   : > { %v2230_v40 = vpop.f32.mrf.mxu1 }
 0x4c8   : > { %v9440_v52 = vmul.f32 %v7035_v30, %v2230_v40  ;;  %v2731_v41 = vsel %vm2465_vm12, %v2693_v48, 0.0 }
 0x4c9   : > { %2732 = vadd.xlane.f32.xlu1 %v2731_v41  ;;  %v2232_v34 = vpop.f32.mrf.mxu1 }
 0x4ca   : > { %v2694_v60 = vmul.f32 %v9440_v52, %v9440_v52 }
 0x4cb   : > { %v2235_v56 = vpop.f32.mrf.mxu1 }
 0x4cc   : > { %v9448_v46 = vmul.f32 %v7036_v27, %v2235_v56  ;;  %v2734_v58 = vsel %vm2465_vm12, %v2694_v60, 0.0  ;;  %v7040_v60 = vld [vmem:[%s12147_s5 + $0x48] sm:$0xff] }
 0x4cd   : > { %2735 = vadd.xlane.f32.xlu1 %v2734_v58  ;;  %v2237_v28 = vpop.f32.mrf.mxu1 }
 0x4ce   : > { %v2695_v20 = vmul.f32 %v9448_v46, %v9448_v46 }
 0x4cf   : > { %v2240_v14 = vpop.f32.mrf.mxu1 }
 0x4d0   : > { %v9456_v9 = vmul.f32 %v7037_v54, %v2240_v14  ;;  %v2737_v22 = vsel %vm2465_vm12, %v2695_v20, 0.0  ;;  %v7041_v14 = vld [vmem:[%s12147_s5 + $0x50] sm:$0xff] }
 0x4d1   : > { %2738 = vadd.xlane.f32.xlu1 %v2737_v22  ;;  %v2242_v0 = vpop.f32.mrf.mxu1 }
 0x4d2   : > { %v2696_v49 = vmul.f32 %v9456_v9, %v9456_v9 }
 0x4d3   : > { %v2245_v1 = vpop.f32.mrf.mxu1 }
 0x4d4   : > { %v9464_v55 = vmul.f32 %v7038_v36, %v2245_v1  ;;  %v2740_v19 = vsel %vm2465_vm12, %v2696_v49, 0.0  ;;  %v12586_v36 = vld [vmem:[#allocation71_spill] sm:$0xff] }
 0x4d5   : > { %2741 = vadd.xlane.f32.xlu1 %v2740_v19  ;;  %v2247_v38 = vpop.f32.mrf.mxu1 }
 0x4d6   : > { %v2697_v21 = vmul.f32 %v9464_v55, %v9464_v55  ;;  %v7042_v38 = vld [vmem:[%s12147_s5 + $0x58] sm:$0xff] }
 0x4d7   : > { %v2250_v39 = vpop.f32.mrf.mxu1 }
 0x4d8   : > { %v9472_v48 = vmul.f32 %v7039_v18, %v2250_v39  ;;  %v2743_v40 = vsel %vm2465_vm12, %v2697_v21, 0.0 }
 0x4d9   : > { %2744 = vadd.xlane.f32.xlu1 %v2743_v40  ;;  %v2252_v30 = vpop.f32.mrf.mxu1 }
 0x4da   : > { %v2698_v41 = vmul.f32 %v9472_v48, %v9472_v48 }
 0x4db   : > { %v2255_v34 = vpop.f32.mrf.mxu1 }
 0x4dc   : > { %v9480_v56 = vmul.f32 %v7040_v60, %v2255_v34  ;;  %v2746_v27 = vsel %vm2465_vm12, %v2698_v41, 0.0 }
 0x4dd   : > { %2747 = vadd.xlane.f32.xlu1 %v2746_v27  ;;  %v2257_v58 = vpop.f32.mrf.mxu1  ;;  %v12587_v27 = vld [vmem:[#allocation75_spill] sm:$0xff] }
 0x4de   : > { %v2699_v28 = vmul.f32 %v9480_v56, %v9480_v56 }
 0x4df   : > { %v2260_v20 = vpop.f32.mrf.mxu1 }
 0x4e0   : > { %v2411_v54 = vmul.f32 %v7041_v14, %v2260_v20  ;;  %v2749_v22 = vsel %vm2465_vm12, %v2699_v28, 0.0  ;;  %v7043_v28 = vld [vmem:[%s12147_s5 + $0x60] sm:$0xff] }
 0x4e1   : > { %2750 = vadd.xlane.f32.xlu1 %v2749_v22  ;;  %v2262_v0 = vpop.f32.mrf.mxu1 }
 0x4e2   : > { %v2700_v49 = vmul.f32 %v2411_v54, %v2411_v54  ;;  %v2443_v19 = vmul.f32 %v2411_v54, %v12586_v36 }
 0x4e3   : > { %v2265_v1 = vpop.f32.mrf.mxu1 }
 0x4e4   : > { %v2412_v21 = vmul.f32 %v7042_v38, %v2265_v1  ;;  %v2752_v39 = vsel %vm2465_vm12, %v2700_v49, 0.0  ;;  %v2496_v41 = vsel %vm2465_vm12, %v2443_v19, 0.0  ;;  %v12588_v19 = vld [vmem:[#allocation79_spill] sm:$0xff] }
 0x4e5   : > { %2753 = vadd.xlane.f32.xlu1 %v2752_v39  ;;  %v2267_v18 = vpop.f32.mrf.mxu1 }
 0x4e6   : > { %v2701_v30 = vmul.f32 %v2412_v21, %v2412_v21  ;;  %v2444_v58 = vmul.f32 %v2412_v21, %v12587_v27  ;;  %v7044_v21 = vld [vmem:[%s12147_s5 + $0x68] sm:$0xff] }
 0x4e7   : > { %v2270_v40 = vpop.f32.mrf.mxu1 }
 0x4e8   : > { %v2413_v20 = vmul.f32 %v7043_v28, %v2270_v40  ;;  %v2755_v14 = vsel %vm2465_vm12, %v2701_v30, 0.0  ;;  %v2499_v49 = vsel %vm2465_vm12, %v2444_v58, 0.0  ;;  %v12589_v28 = vld [vmem:[#allocation83_spill] sm:$0xff] }
 0x4e9   : > { %2497 = vadd.xlane.f32.xlu1 %v2496_v41  ;;  %v2272_v34 = vpop.f32.mrf.mxu1 }
 0x4ea   : > { %v2702_v0 = vmul.f32 %v2413_v20, %v2413_v20  ;;  %v2445_v38 = vmul.f32 %v2413_v20, %v12588_v19  ;;  %v7045_v20 = vld [vmem:[%s12147_s5 + $0x70] sm:$0xff] }
 0x4eb   : > { %v2275_v60 = vpop.f32.mrf.mxu1 }
 0x4ec   : > { %v2414_v39 = vmul.f32 %v7044_v21, %v2275_v60  ;;  %v2758_v18 = vsel %vm2465_vm12, %v2702_v0, 0.0  ;;  %v2502_v34 = vsel %vm2465_vm12, %v2445_v38, 0.0  ;;  %v9519_v38 = vpop.xlane.xlu0 %2598 }
 0x4ed   : > { %2756 = vadd.xlane.f32.xlu1 %v2755_v14  ;;  %v2277_v54 = vpop.f32.mrf.mxu1 }
 0x4ee   : > { %v2703_v41 = vmul.f32 %v2414_v39, %v2414_v39  ;;  %v2446_v14 = vmul.f32 %v2414_v39, %v12589_v28 }
 0x4ef   : > { %v2280_v22 = vpop.f32.mrf.mxu1 }
 0x4f0   : > { %v2415_v54 = vmul.f32 %v7045_v20, %v2280_v22  ;;  %v2761_v0 = vsel %vm2465_vm12, %v2703_v41, 0.0  ;;  %v12590_v41 = vld [vmem:[#allocation86_spill] sm:$0xff] }
 0x4f1   : > { %2500 = vadd.xlane.f32.xlu1 %v2499_v49  ;;  %v2282_v1 = vpop.f32.mrf.mxu1 }
 0x4f2   : > { %v2704_v21 = vmul.f32 %v2415_v54, %v2415_v54 }
 0x4f3   : > { %v2285_v36 = vpop.f32.mrf.mxu1 }
 0x4f5   : > { %2759 = vadd.xlane.f32.xlu1 %v2758_v18  ;;  %v2287_v40 = vpop.f32.mrf.mxu1  ;;  %v2505_v18 = vsel %vm2465_vm12, %v2446_v14, 0.0  ;;  %v2764_v14 = vsel %vm2465_vm12, %v2704_v21, 0.0 }
 0x4f7   : > { %v9506_v30 = vpop.f32.mrf.mxu1 }
 0x4f9   : > { %2503 = vadd.xlane.f32.xlu1 %v2502_v34  ;;  %v2292_v27 = vpop.f32.mrf.mxu1  ;;  %v2447_v34 = vmul.f32 %v2415_v54, %v12590_v41 }
 0x4fb   : > { %v2295_v58 = vpop.f32.mrf.mxu1 }
 0x4fc   : > { %v9514_v60 = vmul.f32 %v2295_v58, %v8954_v32  ;;  %v7046_v58 = vld [vmem:[%s12147_s5 + $0x78] sm:$0xff] }
 0x4fd   : > { %2762 = vadd.xlane.f32.xlu1 %v2761_v0  ;;  %v2297_v49 = vpop.f32.mrf.mxu1  ;;  %v2416_v28 = vmul.f32 %v7046_v58, %v2285_v36  ;;  %v2508_v36 = vsel %vm2465_vm12, %v2447_v34, 0.0  ;;  %v12592_v58 = vld [vmem:[#allocation89_spill] sm:$0xff] }
 0x4fe   : > { %v2707_v1 = vmul.f32 %v9514_v60, %v9514_v60 }
 0x4ff   : > { %v2300_v19 = vpop.f32.mrf.mxu1 }
 0x500   : > { %v9522_v39 = vmul.f32 %v2300_v19, %v8980_v2  ;;  %v2773_v22 = vsel %vm2465_vm12, %v2707_v1, 0.0  ;;  %v12591_v2 = vld [vmem:[#allocation97_spill] sm:$0xff]  ;;  %v9537_v1 = vpop.xlane.xlu0 %2601 }
 0x501   : > { %2506 = vadd.xlane.f32.xlu1 %v2505_v18  ;;  %2774 = vadd.xlane.f32.xlu0 %v2773_v22  ;;  %v2302_v32 = vpop.f32.mrf.mxu1  ;;  %v2705_v18 = vmul.f32 %v2416_v28, %v2416_v28 }
 0x502   : > { %v2708_v40 = vmul.f32 %v9522_v39, %v9522_v39 }
 0x503   : > { %v2305_v27 = vpop.f32.mrf.mxu1 }
 0x504   : > { %v9533_v20 = vmul.f32 %v2305_v27, %v12591_v2  ;;  %v2776_v0 = vsel %vm2465_vm12, %v2708_v40, 0.0  ;;  %v9548_v27 = vpop.xlane.xlu0 %2604  ;;  %v2448_v2 = vmul.f32 %v2416_v28, %v12592_v58 }
 0x505   : > { %2765 = vadd.xlane.f32.xlu1 %v2764_v14  ;;  %2777 = vadd.xlane.f32.xlu0 %v2776_v0  ;;  %v2307_v49 = vpop.f32.mrf.mxu1 }
 0x506   : > { %v2709_v54 = vmul.f32 %v9533_v20, %v9533_v20 }
 0x507   : > { %v2310_v19 = vpop.f32.mrf.mxu1 }
 0x508   : > { %v9542_v22 = vmul.f32 %v2310_v19, %v9038_v17  ;;  %v2779_v32 = vsel %vm2465_vm12, %v2709_v54, 0.0  ;;  %v2767_v17 = vsel %vm2465_vm12, %v2705_v18, 0.0  ;;  %v9563_v18 = vpop.xlane.xlu0 %2607 }
 0x509   : > { %2509 = vadd.xlane.f32.xlu1 %v2508_v36  ;;  %2780 = vadd.xlane.f32.xlu0 %v2779_v32  ;;  %v2312_v21 = vpop.f32.mrf.mxu1  ;;  %v2511_v36 = vsel %vm2465_vm12, %v2448_v2, 0.0 }
 0x50a   : > { %v2710_v40 = vmul.f32 %v9542_v22, %v9542_v22 }
 0x50b   : > { %v2315_v41 = vpop.f32.mrf.mxu1 }
 0x50c   : > { %v9552_v14 = vmul.f32 %v2315_v41, %v9071_v63  ;;  %v2782_v34 = vsel %vm2465_vm12, %v2710_v40, 0.0 }
 0x50d   : > { %2768 = vadd.xlane.f32.xlu1 %v2767_v17  ;;  %2783 = vadd.xlane.f32.xlu0 %v2782_v34  ;;  %v2317_v0 = vpop.f32.mrf.mxu1  ;;  %v9573_v17 = vpop.xlane.xlu0 %2610 }
 0x50e   : > { %v2711_v49 = vmul.f32 %v9552_v14, %v9552_v14 }
 0x50f   : > { %v2320_v54 = vpop.f32.mrf.mxu1 }
 0x510   : > { %v9559_v19 = vmul.f32 %v2320_v54, %v9100_v15  ;;  %v2785_v28 = vsel %vm2465_vm12, %v2711_v49, 0.0 }
 0x511   : > { %2512 = vadd.xlane.f32.xlu1 %v2511_v36  ;;  %2786 = vadd.xlane.f32.xlu0 %v2785_v28  ;;  %v2322_v63 = vpop.f32.mrf.mxu1 }
 0x512   : > { %v2712_v32 = vmul.f32 %v9559_v19, %v9559_v19 }
 0x513   : > { %v2325_v21 = vpop.f32.mrf.mxu1 }
 0x514   : > { %v9568_v40 = vmul.f32 %v2325_v21, %v9128_v51  ;;  %v2788_v41 = vsel %vm2465_vm12, %v2712_v32, 0.0  ;;  %v9583_v32 = vpop.xlane.xlu0 %2613 }
 0x515   : > { %2789 = vadd.xlane.f32.xlu0 %v2788_v41  ;;  %v2327_v15 = vpop.f32.mrf.mxu1 }
 0x516   : > { %v2713_v58 = vmul.f32 %v9568_v40, %v9568_v40 }
 0x517   : > { %v2330_v2 = vpop.f32.mrf.mxu1 }
 0x518   : > { %v9576_v34 = vmul.f32 %v2330_v2, %v9154_v25  ;;  %v2791_v0 = vsel %vm2465_vm12, %v2713_v58, 0.0  ;;  %v12593_v2 = vld [vmem:[#allocation123_spill] sm:$0xff]  ;;  %v9588_v33 = vpop.xlane.xlu0 %2616 }
 0x519   : > { %2792 = vadd.xlane.f32.xlu1 %v2791_v0  ;;  %v2332_v49 = vpop.f32.mrf.mxu1 }
 0x51a   : > { %v2714_v51 = vmul.f32 %v9576_v34, %v9576_v34 }
 0x51b   : > { %v2335_v54 = vpop.f32.mrf.mxu1 }
 0x51c   : > { %v2426_v36 = vmul.f32 %v2335_v54, %v9177_v61  ;;  %v2794_v28 = vsel %vm2465_vm12, %v2714_v51, 0.0  ;;  %v12594_v61 = vld [vmem:[#allocation124_spill] sm:$0xff] }
 0x51d   : > { %2795 = vadd.xlane.f32.xlu1 %v2794_v28  ;;  %v2337_v63 = vpop.f32.mrf.mxu1 }
 0x51e   : > { %v2715_v21 = vmul.f32 %v2426_v36, %v2426_v36 }
 0x51f   : > { %v2340_v41 = vpop.f32.mrf.mxu1 }
 0x520   : > { %v2427_v25 = vmul.f32 %v2340_v41, %v9200_v50  ;;  %v2797_v15 = vsel %vm2465_vm12, %v2715_v21, 0.0  ;;  %v12595_v50 = vld [vmem:[#allocation127_spill] sm:$0xff] }
 0x521   : > { %2798 = vadd.xlane.f32.xlu1 %v2797_v15  ;;  %v2342_v58 = vpop.f32.mrf.mxu1 }
 0x522   : > { %v2459_v0 = vmul.f32 %v2427_v25, %v12593_v2  ;;  %v2716_v49 = vmul.f32 %v2427_v25, %v2427_v25  ;;  %v12596_v58 = vld [vmem:[#allocation128_spill] sm:$0xff] }
 0x523   : > { %v2345_v24 = vpop.f32.mrf.mxu1 }
 0x524   : > { %v2428_v51 = vmul.f32 %v2345_v24, %v12594_v61  ;;  %v2800_v54 = vsel %vm2465_vm12, %v2716_v49, 0.0  ;;  %v2544_v28 = vsel %vm2465_vm12, %v2459_v0, 0.0  ;;  %v9597_v61 = vpop.xlane.xlu0 %2619  ;;  %v12597_v49 = vld [vmem:[#allocation131_spill] sm:$0xff] }
 0x525   : > { %2801 = vadd.xlane.f32.xlu1 %v2800_v54  ;;  %2545 = vadd.xlane.f32.xlu0 %v2544_v28  ;;  %v2347_v63 = vpop.f32.mrf.mxu1 }
 0x526   : > { %v2460_v41 = vmul.f32 %v2428_v51, %v12595_v50  ;;  %v2717_v21 = vmul.f32 %v2428_v51, %v2428_v51  ;;  %v9600_v63 = vpop.xlane.xlu1 %2646  ;;  %v12598_v50 = vld [vmem:[#allocation132_spill] sm:$0xff] }
 0x527   : > { %v2350_v15 = vpop.f32.mrf.mxu1 }
 0x528   : > { %v2429_v37 = vmul.f32 %v2350_v15, %v12596_v58  ;;  %v2803_v25 = vsel %vm2465_vm12, %v2717_v21, 0.0  ;;  %v2547_v2 = vsel %vm2465_vm12, %v2460_v41, 0.0 }
 0x529   : > { %2804 = vadd.xlane.f32.xlu1 %v2803_v25  ;;  %2548 = vadd.xlane.f32.xlu0 %v2547_v2  ;;  %v2352_v24 = vpop.f32.mrf.mxu1  ;;  %v9606_v2 = vpop.xlane.xlu0 %2622 }
 0x52a   : > { %v2461_v0 = vmul.f32 %v2429_v37, %v12597_v49  ;;  %v2718_v54 = vmul.f32 %v2429_v37, %v2429_v37 }
 0x52b   : > { %v2355_v28 = vpop.f32.mrf.mxu1 }
 0x52c   : > { %v2430_v51 = vmul.f32 %v2355_v28, %v12598_v50  ;;  %v2806_v53 = vsel %vm2465_vm12, %v2718_v54, 0.0  ;;  %v2550_v15 = vsel %vm2465_vm12, %v2461_v0, 0.0  ;;  %v9611_v28 = vpop.xlane.xlu1 %2649 }
 0x52d   : > { %2807 = vadd.xlane.f32.xlu1 %v2806_v53  ;;  %2551 = vadd.xlane.f32.xlu0 %v2550_v15  ;;  %v2357_v41 = vpop.f32.mrf.mxu1  ;;  %v552_v53 = vld [vmem:[%s12147_s5 + $0x80] sm:$0xff] }
 0x52e   : > { %v2462_v21 = vmul.f32 %v2430_v51, %v9269_v7  ;;  %v2719_v58 = vmul.f32 %v2430_v51, %v2430_v51  ;;  %v9624_v51 = vmul.f32 %v9506_v30, %v552_v53  ;;  %v536_v41 = vld [vmem:[%s12147_s5] sm:$0xff] }
 0x52f   : > { %v2360_v25 = vpop.f32.mrf.mxu1 }
 0x530   : > { %v2431_v37 = vmul.f32 %v2360_v25, %v9276_v31  ;;  %v2809_v24 = vsel %vm2465_vm12, %v2719_v58, 0.0  ;;  %v2553_v49 = vsel %vm2465_vm12, %v2462_v21, 0.0  ;;  %v7047_v31 = vld [vmem:[%s12147_s5 + $0x8] sm:$0xff]  ;;  %v12599_v21 = vld [vmem:[#allocation120_spill] sm:$0xff] }
 0x531   : > { %2810 = vadd.xlane.f32.xlu1 %v2809_v24  ;;  %2554 = vadd.xlane.f32.xlu0 %v2553_v49  ;;  %v2362_v54 = vpop.f32.mrf.mxu1  ;;  %v9621_v50 = vmul.f32 %v7047_v31, %v9420_v13  ;;  %v2458_v58 = vmul.f32 %v2426_v36, %v12599_v21  ;;  %v9635_v24 = vpop.xlane.xlu0 %2625  ;;  %v12600_v49 = vld [vmem:[#allocation110_spill] sm:$0xff]  ;;  %v9643_v36 = vmul.f32 %v9348_v11, %v552_v53 }
 0x532   : > { %v2463_v7 = vmul.f32 %v2431_v37, %v9288_v8  ;;  %v2720_v0 = vmul.f32 %v2431_v37, %v2431_v37  ;;  %v9640_v54 = vmul.f32 %v12600_v49, %v536_v41 }
 0x533   : > { %v2365_v15 = vpop.f32.mrf.mxu1  ;;  %v2541_v31 = vsel %vm2465_vm12, %v2458_v58, 0.0 }
 0x534   : > { %v9631_v8 = vmul.f32 %v2365_v15, %v9295_v47  ;;  %v2812_v25 = vsel %vm2465_vm12, %v2720_v0, 0.0  ;;  %v2556_v37 = vsel %vm2465_vm12, %v2463_v7, 0.0  ;;  %v9645_v47 = vpop.xlane.xlu1 %2652  ;;  %v2691_v0 = vmul.f32 %v9621_v50, %v9621_v50 }
 0x535   : > { %2813 = vadd.xlane.f32.xlu1 %v2812_v25  ;;  %2557 = vadd.xlane.f32.xlu0 %v2556_v37  ;;  %v2367_v13 = vpop.f32.mrf.mxu1  ;;  %v2706_v7 = vmul.f32 %v9624_v51, %v9624_v51  ;;  %v2562_v21 = vmul.f32 %v9640_v54, %v9640_v54  ;;  %v9655_v25 = vpop.xlane.xlu0 %2628 }
 0x536   : > { %v2721_v30 = vmul.f32 %v9631_v8, %v9631_v8  ;;  %v2725_v37 = vsel %vm2465_vm12, %v2691_v0, 0.0  ;;  %v2578_v13 = vmul.f32 %v9643_v36, %v9643_v36 }
 0x537   : > { %v2770_v53 = vsel %vm2465_vm12, %v2706_v7, 0.0  ;;  %v2594_v58 = vsel %vm2465_vm12, %v2562_v21, 0.0  ;;  %v2457_v7 = vmul.f32 %v9576_v34, %v12602_v42  ;;  %v12604_v34 = vld [vmem:[#allocation64_spill] sm:$0xff] }
 0x538   : > { %v2815_v15 = vsel %vm2465_vm12, %v2721_v30, 0.0  ;;  %v9661_v10 = vpop.xlane.xlu1 %2655  ;;  %v9665_v30 = vmul.f32 %v9418_v6, %v536_v41  ;;  %v2642_v0 = vsel %vm2465_vm12, %v2578_v13, 0.0  ;;  %v2441_v13 = vmul.f32 %v9472_v48, %v12604_v34  ;;  %v12609_v34 = vld [vmem:[#allocation103_spill] sm:$0xff] }
 0x539   : > { %2542 = vadd.xlane.f32.xlu0 %v2541_v31  ;;  %2816 = vadd.xlane.f32.xlu1 %v2815_v15  ;;  %v12601_v31 = vld [vmem:[#allocation68_spill] sm:$0xff]  ;;  %v9672_v5 = vpop.xlane.xlu0 %2631  ;;  %v2538_v41 = vsel %vm2465_vm12, %v2457_v7, 0.0 }
 0x53a   : > { %v2442_v15 = vmul.f32 %v9480_v56, %v12601_v31  ;;  %v2690_v21 = vmul.f32 %v9665_v30, %v9665_v30  ;;  %v12606_v7 = vld [vmem:[#allocation60_spill] sm:$0xff]  ;;  %v2490_v48 = vsel %vm2465_vm12, %v2441_v13, 0.0 }
 0x53c   : > { %v2493_v56 = vsel %vm2465_vm12, %v2442_v15, 0.0  ;;  %v2722_v57 = vsel %vm2465_vm12, %v2690_v21, 0.0  ;;  %v2440_v15 = vmul.f32 %v9464_v55, %v12606_v7  ;;  %v12608_v21 = vld [vmem:[#allocation56_spill] sm:$0xff] }
 0x53d   : > { %2771 = vadd.xlane.f32.xlu0 %v2770_v53  ;;  %2726 = vadd.xlane.f32.xlu1 %v2725_v37  ;;  %v9674_v53 = vpop.xlane.xlu1 %2658  ;;  %v12603_v37 = vld [vmem:[#allocation114_spill] sm:$0xff]  ;;  %v9682_v42 = vpop.xlane.xlu0 %2634 }
 0x53e   : > { %v2456_v6 = vmul.f32 %v9568_v40, %v12603_v37  ;;  %v12607_v37 = vld [vmem:[#allocation107_spill] sm:$0xff] }
 0x541   : > { %2595 = vadd.xlane.f32.xlu0 %v2594_v58  ;;  %2643 = vadd.xlane.f32.xlu1 %v2642_v0  ;;  %v12605_v58 = vld [vmem:[#allocation111_spill] sm:$0xff]  ;;  %v2535_v0 = vsel %vm2465_vm12, %v2456_v6, 0.0  ;;  %v9690_v40 = vpop.xlane.xlu1 %2661 }
 0x542   : > { %v2455_v31 = vmul.f32 %v9559_v19, %v12605_v58  ;;  %v9698_v19 = vpop.xlane.xlu0 %2637  ;;  %v2453_v58 = vmul.f32 %v9542_v22, %v12609_v34  ;;  %v12613_v34 = vld [vmem:[#allocation96_spill] sm:$0xff] }
 0x545   : > { %2539 = vadd.xlane.f32.xlu0 %v2538_v41  ;;  %2494 = vadd.xlane.f32.xlu1 %v2493_v56  ;;  %v2454_v41 = vmul.f32 %v9552_v14, %v12607_v37  ;;  %v2532_v56 = vsel %vm2465_vm12, %v2455_v31, 0.0  ;;  %v2487_v14 = vsel %vm2465_vm12, %v2440_v15, 0.0  ;;  %v12611_v37 = vld [vmem:[#allocation100_spill] sm:$0xff] }
 0x546   : > { %v9710_v13 = vpop.xlane.xlu0 %2640 }
 0x547   : > { %v2529_v55 = vsel %vm2465_vm12, %v2454_v41, 0.0 }
 0x549   : > { %2536 = vadd.xlane.f32.xlu0 %v2535_v0  ;;  %2723 = vadd.xlane.f32.xlu1 %v2722_v57  ;;  %v2439_v57 = vmul.f32 %v9456_v9, %v12608_v21  ;;  %v12610_v0 = vld [vmem:[#allocation53_spill] sm:$0xff]  ;;  %v2526_v9 = vsel %vm2465_vm12, %v2453_v58, 0.0 }
 0x54a   : > { %v2438_v7 = vmul.f32 %v9448_v46, %v12610_v0  ;;  %v9720_v15 = vpop.xlane.xlu0 %2664  ;;  %v12615_v0 = vld [vmem:[#allocation93_spill] sm:$0xff] }
 0x54b   : > { %v2484_v22 = vsel %vm2465_vm12, %v2439_v57, 0.0  ;;  %v12614_v57 = vld [vmem:[#allocation47_spill] sm:$0xff] }
 0x54d   : > { %2533 = vadd.xlane.f32.xlu0 %v2532_v56  ;;  %2491 = vadd.xlane.f32.xlu1 %v2490_v48  ;;  %v2452_v56 = vmul.f32 %v9533_v20, %v12611_v37  ;;  %v12612_v48 = vld [vmem:[#allocation50_spill] sm:$0xff]  ;;  %v2481_v20 = vsel %vm2465_vm12, %v2438_v7, 0.0  ;;  %v2450_v37 = vmul.f32 %v9514_v60, %v12615_v0  ;;  %v12616_v7 = vld [vmem:[#allocation44_spill] sm:$0xff] }
 0x54e   : > { %v9700_v6 = vpop.xlane.xlu1 %2729  ;;  %v2437_v21 = vmul.f32 %v9440_v52, %v12612_v48  ;;  %v2449_v48 = vmul.f32 %v9624_v51, %v9643_v36 }
 0x54f   : > { %v2523_v46 = vsel %vm2465_vm12, %v2452_v56, 0.0 }
 0x550   : > { %v2478_v52 = vsel %vm2465_vm12, %v2437_v21, 0.0 }
 0x551   : > { %2530 = vadd.xlane.f32.xlu0 %v2529_v55  ;;  %2488 = vadd.xlane.f32.xlu1 %v2487_v14  ;;  %v2451_v55 = vmul.f32 %v9522_v39, %v12613_v34  ;;  %v2436_v14 = vmul.f32 %v9432_v23, %v12614_v57  ;;  %v9736_v39 = vpop.xlane.xlu0 %2667  ;;  %v2517_v23 = vsel %vm2465_vm12, %v2450_v37, 0.0  ;;  %v2433_v57 = vmul.f32 %v9665_v30, %v9640_v54 }
 0x552   : > { %v9708_v31 = vpop.xlane.xlu1 %2732 }
 0x553   : > { %v2475_v60 = vsel %vm2465_vm12, %v2436_v14, 0.0 }
 0x555   : > { %2527 = vadd.xlane.f32.xlu0 %v2526_v9  ;;  %2485 = vadd.xlane.f32.xlu1 %v2484_v22  ;;  %v2520_v9 = vsel %vm2465_vm12, %v2451_v55, 0.0  ;;  %v2435_v22 = vmul.f32 %v9425_v26, %v12616_v7  ;;  %v9748_v21 = vpop.xlane.xlu0 %2670  ;;  %v12617_v55 = vld [vmem:[#allocation41_spill] sm:$0xff]  ;;  %v2514_v26 = vsel %vm2465_vm12, %v2449_v48, 0.0 }
 0x556   : > { %v9718_v41 = vpop.xlane.xlu1 %2735 }
 0x557   : > { %v2472_v51 = vsel %vm2465_vm12, %v2435_v22, 0.0 }
 0x559   : > { %2524 = vadd.xlane.f32.xlu0 %v2523_v46  ;;  %2482 = vadd.xlane.f32.xlu1 %v2481_v20  ;;  %v2434_v46 = vmul.f32 %v9621_v50, %v12617_v55  ;;  %v2464_v20 = vmul.f32 %v9631_v8, %v9304_v12  ;;  %v9762_v50 = vpop.xlane.xlu0 %2673  ;;  %v2466_v8 = vsel %vm2465_vm12, %v2433_v57, 0.0 }
 0x55a   : > { %v9728_v58 = vpop.xlane.xlu1 %2738 }
 0x55b   : > { %v2469_v14 = vsel %vm2465_vm12, %v2434_v46, 0.0  ;;  %v2559_v0 = vsel %vm2465_vm12, %v2464_v20, 0.0 }
 0x55d   : > { %2521 = vadd.xlane.f32.xlu0 %v2520_v9  ;;  %2479 = vadd.xlane.f32.xlu1 %v2478_v52  ;;  %v9767_v9 = vpop.xlane.xlu0 %2676 }
 0x55e   : > { %v9738_v56 = vpop.xlane.xlu1 %2741 }
 0x561   : > { %2518 = vadd.xlane.f32.xlu0 %v2517_v23  ;;  %2476 = vadd.xlane.f32.xlu1 %v2475_v60  ;;  %v9769_v7 = vpop.xlane.xlu0 %2679 }
 0x562   : > { %v9746_v34 = vpop.xlane.xlu1 %2744 }
 0x565   : > { %2515 = vadd.xlane.f32.xlu0 %v2514_v26  ;;  %2473 = vadd.xlane.f32.xlu1 %v2472_v51  ;;  %v9772_v48 = vpop.xlane.xlu0 %2682 }
 0x566   : > { %v9756_v36 = vpop.xlane.xlu1 %2747 }
 0x569   : > { %2470 = vadd.xlane.f32.xlu1 %v2469_v14  ;;  %2560 = vadd.xlane.f32.xlu0 %v2559_v0  ;;  %v9775_v46 = vpop.xlane.xlu0 %2685 }
 0x56a   : > { %v9764_v12 = vpop.xlane.xlu1 %2750 }
 0x56d   : > { %2467 = vadd.xlane.f32.xlu1 %v2466_v8 }
 0x56e   : > { %v2754_v37 = vpop.xlane.xlu1 %2753 }
 0x56f   : > { %v2828_v30 = vmul.f32 %v2754_v37, %v9635_v24  ;;  %v9779_v24 = vpop.xlane.xlu0 %2688 }
 0x571   : > { %v2860_v23 = vmax.f32 %v2828_v30, 1e-12 }
 0x572   : > { %v2498_v52 = vpop.xlane.xlu1 %2497 }
 0x573   : > { %6777 = vrsqrt.f32 %v2860_v23 }
 0x576   : > { %v2757_v54 = vpop.xlane.xlu1 %2756 }
 0x577   : > { %v2829_v60 = vmul.f32 %v2757_v54, %v9655_v25 }
 0x579   : > { %v2861_v20 = vmax.f32 %v2829_v60, 1e-12 }
 0x57a   : > { %v2501_v22 = vpop.xlane.xlu1 %2500 }
 0x57b   : > { %6779 = vrsqrt.f32 %v2861_v20 }
 0x57e   : > { %v2760_v55 = vpop.xlane.xlu1 %2759 }
 0x57f   : > { %v2830_v26 = vmul.f32 %v2760_v55, %v9672_v5  ;;  %v577_v5 = vld [vmem:[%s12150_s8] sm:$0xff] }
 0x580   : > { %v6778_v25 = vpop.eup %6777 }
 0x581   : > { %v2862_v57 = vmax.f32 %v2830_v26, 1e-12  ;;  %v2924_v60 = vmul.f32 %v6778_v25, %v2498_v52 }
 0x582   : > { %v2504_v51 = vpop.xlane.xlu1 %2503 }
 0x583   : > { %6781 = vrsqrt.f32 %v2862_v57 }
 0x586   : > { %v2763_v14 = vpop.xlane.xlu1 %2762 }
 0x587   : > { %v2831_v0 = vmul.f32 %v2763_v14, %v9682_v42  ;;  %v593_v42 = vld [vmem:[%s12150_s8 + $0x80] sm:$0xff] }
 0x588   : > { %v6577_v57 = vpack.i.bf16 %v577_v5, %v593_v42  ;;  %v6780_v14 = vpop.eup %6779  ;;  %v579_v5 = vld [vmem:[%s12150_s8 + $0x10] sm:$0xff] }
 0x589   : > { %v2863_v8 = vmax.f32 %v2831_v0, 1e-12  ;;  %v594_v0 = vld [vmem:[%s12150_s8 + $0x88] sm:$0xff]  ;;  %v595_v42 = vld [vmem:[%s12150_s8 + $0x90] sm:$0xff] }
 0x58a   : > { %v2507_v37 = vpop.xlane.xlu1 %2506  ;;  %v9781_v30 = vpop.xlane.xlu0 %2774 }
 0x58b   : > { %6783 = vrsqrt.f32 %v2863_v8  ;;  %v2956_v8 = vmax.f32 %v2924_v60, 0.0 }
 0x58e   : > { %v2766_v54 = vpop.xlane.xlu1 %2765  ;;  %v9790_v20 = vpop.xlane.xlu0 %2777 }
 0x58f   : > { %v2832_v23 = vmul.f32 %v2766_v54, %v9698_v19  ;;  %v578_v19 = vld [vmem:[%s12150_s8 + $0x8] sm:$0xff]  ;;  %v2925_v54 = vmul.f32 %v6780_v14, %v2501_v22 }
 0x590   : > { %v6579_v52 = vpack.i.bf16 %v578_v19, %v594_v0  ;;  %v6782_v25 = vpop.eup %6781  ;;  %v6581_v19 = vpack.i.bf16 %v579_v5, %v595_v42  ;;  %v596_v0 = vld [vmem:[%s12150_s8 + $0x98] sm:$0xff] }
 0x591   : > { %v2864_v55 = vmax.f32 %v2832_v23, 1e-12  ;;  %v2957_v14 = vmax.f32 %v2925_v54, 0.0 }
 0x592   : > { %v2510_v26 = vpop.xlane.xlu1 %2509  ;;  %v9807_v45 = vpop.xlane.xlu0 %2780 }
 0x593   : > { %6785 = vrsqrt.f32 %v2864_v55  ;;  %v9805_v55 = vmin.f32 %v2956_v8, 1.0  ;;  %v2821_v8 = vmul.f32 %v9708_v31, %v9548_v27  ;;  %v581_v27 = vld [vmem:[%s12150_s8 + $0x20] sm:$0xff] }
 0x595   : > { %v12393_v54 = vsub.f32 1.0, %v9805_v55  ;;  %vm3020_vm10 = vcmp.gt.f32.partialorder %v9805_v55, 0.0  ;;  %vm3244_vm11 = vcmp.lt.f32.partialorder %v9805_v55, 1.0 }
 0x596   : > { %v2769_v62 = vpop.xlane.xlu1 %2768  ;;  %6578 = vxpose.xlu0.b32.start [1/16] (narrow) %v6577_v57, 32  ;;  %v2926_v57 = vmul.f32 %v6782_v25, %v2504_v51  ;;  %v2822_v51 = vmul.f32 %v9718_v41, %v9563_v18  ;;  %v9822_v25 = vmin.f32 %v2957_v14, 1.0  ;;  %v597_v18 = vld [vmem:[%s12150_s8 + $0xa0] sm:$0xff]  ;;  %v2853_v41 = vmax.f32 %v2821_v8, 1e-12 }
 0x597   : > { %v2833_v23 = vmul.f32 %v2769_v62, %v9710_v13  ;;  %v2820_v62 = vmul.f32 %v9700_v6, %v9537_v1  ;;  %v580_v13 = vld [vmem:[%s12150_s8 + $0x18] sm:$0xff]  ;;  %v9824_v6 = vpop.xlane.xlu0 %2783  ;;  %v3052_v8 = vmax.f32 %v9805_v55, 1e-30 }
 0x598   : > { %v6784_v22 = vpop.eup %6783  ;;  %v2958_v1 = vmax.f32 %v2926_v57, 0.0  ;;  %v6583_v5 = vpack.i.bf16 %v580_v13, %v596_v0  ;;  %v598_v13 = vld [vmem:[%s12150_s8 + $0xa8] sm:$0xff]  ;;  %v12394_v0 = vsub.f32 1.0, %v9822_v25  ;;  %vm3245_vm13 = vcmp.lt.f32.partialorder %v9822_v25, 1.0 }
 0x599   : > { %v2865_v60 = vmax.f32 %v2833_v23, 1e-12  ;;  %v2852_v42 = vmax.f32 %v2820_v62, 1e-12  ;;  %v6585_v62 = vpack.i.bf16 %v581_v27, %v597_v18  ;;  %v2826_v18 = vmul.f32 %v9756_v36, %v9597_v61 }
 0x59a   : > { %6580 = vxpose.xlu0.b32.cont [2/16] (narrow) %v6579_v52, 32  ;;  %v2927_v52 = vmul.f32 %v6784_v22, %v2507_v37  ;;  %v2513_v23 = vpop.xlane.xlu1 %2512  ;;  %v3308_v37 = vmax.f32 %v12393_v54, 1e-30  ;;  %v2854_v22 = vmax.f32 %v2822_v51, 1e-12  ;;  %v2824_v51 = vmul.f32 %v9738_v56, %v9583_v32  ;;  %v599_v32 = vld [vmem:[%s12150_s8 + $0xb0] sm:$0xff] }
 0x59b   : > { %6787 = vrsqrt.f32 %v2865_v60  ;;  %v2823_v60 = vmul.f32 %v9728_v58, %v9573_v17  ;;  %v582_v17 = vld [vmem:[%s12150_s8 + $0x28] sm:$0xff]  ;;  %v9839_v58 = vmin.f32 %v2958_v1, 1.0  ;;  %v2825_v1 = vmul.f32 %v9746_v34, %v9588_v33 }
 0x59c   : > { %v2959_v14 = vmax.f32 %v2927_v52, 0.0  ;;  %6789 = vrsqrt.f32 %v2852_v42  ;;  %v3340_v27 = vmul.f32 2.0, %v3308_v37  ;;  %v6587_v54 = vpack.i.bf16 %v582_v17, %v598_v13  ;;  %v583_v42 = vld [vmem:[%s12150_s8 + $0x30] sm:$0xff] }
 0x59d   : > { %6791 = vrsqrt.f32 %v2853_v41  ;;  %v12395_v34 = vsub.f32 1.0, %v9839_v58  ;;  %v3309_v61 = vmax.f32 %v12394_v0, 1e-30  ;;  %v3084_v36 = vmul.f32 2.0, %v3052_v8 }
 0x59e   : > { %6582 = vxpose.xlu0.b32.cont [3/16] (narrow) %v6581_v19, 32  ;;  %6793 = vrsqrt.f32 %v2854_v22  ;;  %v3053_v41 = vmax.f32 %v9822_v25, 1e-30  ;;  %v2857_v22 = vmax.f32 %v2825_v1, 1e-12  ;;  %vm3021_vm14 = vcmp.gt.f32.partialorder %v9822_v25, 0.0 }
 0x59f   : > { %v2858_v17 = vmax.f32 %v2826_v18, 1e-12  ;;  %v3054_v8 = vmax.f32 %v9839_v58, 1e-30  ;;  %v3341_v1 = vmul.f32 2.0, %v3309_v61  ;;  %vm3246_vm15 = vcmp.lt.f32.partialorder %v9839_v58, 1.0 }
 0x5a0   : > { %v6786_v31 = vpop.eup %6785  ;;  %v3085_v18 = vmul.f32 2.0, %v3053_v41  ;;  %vm3022_vm1 = vcmp.gt.f32.partialorder %v9839_v58, 0.0 }
 0x5a1   : > { %v2928_v57 = vmul.f32 %v6786_v31, %v2510_v26  ;;  %v2855_v26 = vmax.f32 %v2823_v60, 1e-12  ;;  %v9856_v31 = vmin.f32 %v2959_v14, 1.0  ;;  %v2856_v60 = vmax.f32 %v2824_v51, 1e-12 }
 0x5a2   : > { %v9841_v19 = vpop.xlane.xlu1 %2792  ;;  %6584 = vxpose.xlu0.b32.cont [4/16] (narrow) %v6583_v5, 32  ;;  %v9852_v5 = vpop.xlane.xlu0 %2786  ;;  %v2827_v14 = vmul.f32 %v9764_v12, %v9606_v2  ;;  %v600_v2 = vld [vmem:[%s12150_s8 + $0xb8] sm:$0xff]  ;;  %v3086_v12 = vmul.f32 2.0, %v3054_v8 }
 0x5a3   : > { %v2960_v52 = vmax.f32 %v2928_v57, 0.0  ;;  %6795 = vrsqrt.f32 %v2855_v26  ;;  %v6589_v57 = vpack.i.bf16 %v583_v42, %v599_v32  ;;  %v3055_v32 = vmax.f32 %v9856_v31, 1e-30 }
 0x5a4   : > { %6797 = vlog2.f32 %v3340_v27  ;;  %v2859_v42 = vmax.f32 %v2827_v14, 1e-12  ;;  %vm3023_vm2 = vcmp.gt.f32.partialorder %v9856_v31, 0.0  ;;  %vm3247_vm4 = vcmp.lt.f32.partialorder %v9856_v31, 1.0 }
 0x5a5   : > { %v9864_v56 = vmin.f32 %v2960_v52, 1.0  ;;  %v12396_v52 = vsub.f32 1.0, %v9856_v31  ;;  %6799 = vlog2.f32 %v3084_v36 }
 0x5a6   : > { %v9866_v33 = vpop.xlane.xlu1 %2795  ;;  %6586 = vxpose.xlu0.b32.cont [5/16] (narrow) %v6585_v62, 32  ;;  %v584_v62 = vld [vmem:[%s12150_s8 + $0x38] sm:$0xff]  ;;  %v9879_v26 = vpop.xlane.xlu0 %2789  ;;  %6801 = vrsqrt.f32 %v2856_v60  ;;  %v601_v60 = vld [vmem:[%s12150_s8 + $0xc0] sm:$0xff] }
 0x5a7   : > { %6803 = vrsqrt.f32 %v2857_v22  ;;  %v3311_v0 = vmax.f32 %v12396_v52, 1e-30  ;;  %v12618_v41 = vsub.f32 1.0, %v9864_v56  ;;  %v3056_v8 = vmax.f32 %v9864_v56, 1e-30  ;;  %v9958_v52 = vld [vmem:[%s12150_s8 + $0xe0] sm:$0xff] }
 0x5a8   : > { %v6788_v37 = vpop.eup %6787  ;;  %6805 = vrsqrt.f32 %v2858_v17  ;;  %vm3024_vm5 = vcmp.gt.f32.partialorder %v9864_v56, 0.0  ;;  %vm3248_vm6 = vcmp.lt.f32.partialorder %v9864_v56, 1.0 }
 0x5a9   : > { %v2929_v13 = vmul.f32 %v6788_v37, %v2513_v23  ;;  %v3310_v23 = vmax.f32 %v12395_v34, 1e-30  ;;  %v585_v37 = vld [vmem:[%s12150_s8 + $0x40] sm:$0xff]  ;;  %v3312_v22 = vmax.f32 %v12618_v41, 1e-30  ;;  %6807 = vlog2.f32 %v3341_v1 }
 0x5aa   : > { %v9881_v51 = vpop.xlane.xlu1 %2798  ;;  %6588 = vxpose.xlu0.b32.cont [6/16] (narrow) %v6587_v54, 32  ;;  %v6591_v54 = vpack.i.bf16 %v584_v62, %v600_v2  ;;  %6809 = vlog2.f32 %v3085_v18  ;;  %v9910_v62 = vld [vmem:[%s12150_s8 + $0x48] sm:$0xff]  ;;  %v3087_v2 = vmul.f32 2.0, %v3055_v32  ;;  %v6593_v1 = vpack.i.bf16 %v585_v37, %v601_v60  ;;  %v9928_v18 = vld [vmem:[%s12150_s8 + $0xd0] sm:$0xff]  ;;  %v9939_v37 = vld [vmem:[%s12150_s8 + $0x58] sm:$0xff] }
 0x5ab   : > { %v2961_v27 = vmax.f32 %v2929_v13, 0.0  ;;  %v3342_v14 = vmul.f32 2.0, %v3310_v23  ;;  %v9905_v13 = vpop.eup %6789  ;;  %6811 = vrsqrt.f32 %v2859_v42  ;;  %v3343_v42 = vmul.f32 2.0, %v3311_v0  ;;  %v9944_v60 = vld [vmem:[%s12150_s8 + $0xd8] sm:$0xff] }
 0x5ac   : > { %v9918_v23 = vpop.eup %6791  ;;  %6813 = vlog2.f32 %v3086_v12  ;;  %v2835_v32 = vmul.f32 %v9781_v30, %v9600_v63  ;;  %v3344_v12 = vmul.f32 2.0, %v3312_v22  ;;  %v9963_v22 = vld [vmem:[%s12150_s8 + $0x68] sm:$0xff]  ;;  %v3088_v0 = vmul.f32 2.0, %v3056_v8 }
 0x5ad   : > { %v9895_v34 = vmin.f32 %v2961_v27, 1.0  ;;  %v9923_v27 = vld [vmem:[%s12150_s8 + $0x50] sm:$0xff]  ;;  %6815 = vlog2.f32 %v3342_v14 }
 0x5ae   : > { %v2802_v61 = vpop.xlane.xlu1 %2801  ;;  %v9897_v36 = vpop.xlane.xlu0 %2545  ;;  %6590 = vxpose.xlu0.b32.cont [7/16] (narrow) %v6589_v57, 32  ;;  %v9915_v57 = vld [vmem:[%s12150_s8 + $0xc8] sm:$0xff]  ;;  %v2867_v8 = vmax.f32 %v2835_v32, 1e-12 }
 0x5af   : > { %v2844_v17 = vmul.f32 %v2802_v61, %v9762_v50  ;;  %v9930_v61 = vpop.eup %6793  ;;  %v6595_v30 = vpack.i.bf16 %v9910_v62, %v9915_v57  ;;  %v9974_v57 = vld [vmem:[%s12150_s8 + $0xe8] sm:$0xff]  ;;  %vm3249_vm7 = vcmp.lt.f32.partialorder %v9895_v34, 1.0  ;;  %vm3025_vm8 = vcmp.gt.f32.partialorder %v9895_v34, 0.0 }
 0x5b0   : > { %v9965_v14 = vpop.eup %6795 }
 0x5b1   : > { %v2876_v50 = vmax.f32 %v2844_v17, 1e-12 }
 0x5b2   : > { %v2805_v41 = vpop.xlane.xlu1 %2804  ;;  %v9934_v17 = vpop.xlane.xlu0 %2548  ;;  %6592 = vxpose.xlu0.b32.cont [8/16] (narrow) %v6591_v54, 32  ;;  %v9953_v54 = vld [vmem:[%s12150_s8 + $0x60] sm:$0xff] }
 0x5b3   : > { %6817 = vrsqrt.f32 %v2876_v50  ;;  %v2845_v63 = vmul.f32 %v2805_v41, %v9767_v9  ;;  %v2836_v9 = vmul.f32 %v9790_v20, %v9611_v28  ;;  %v9979_v50 = vld [vmem:[%s12150_s8 + $0x70] sm:$0xff]  ;;  %v6798_v28 = vpop.eup %6797  ;;  %v2837_v20 = vmul.f32 %v9807_v45, %v9645_v47 }
 0x5b4   : > { %v9984_v41 = vld [vmem:[%s12150_s8 + $0xf0] sm:$0xff]  ;;  %6819 = vlog2.f32 %v3087_v2  ;;  %v12619_v47 = vsub.f32 1.0, %v9895_v34  ;;  %v6800_v59 = vpop.eup %6799 }
 0x5b5   : > { %v2877_v62 = vmax.f32 %v2845_v63, 1e-12  ;;  %6821 = vlog2.f32 %v3343_v42  ;;  %v10011_v32 = vpop.eup %6801  ;;  %v3057_v42 = vmax.f32 %v9895_v34, 1e-30 }
 0x5b6   : > { %v2808_v2 = vpop.xlane.xlu1 %2807  ;;  %v10000_v3 = vpop.xlane.xlu0 %2551  ;;  %6594 = vxpose.xlu0.b32.cont [9/16] (narrow) %v6593_v1, 32  ;;  %v3313_v63 = vmax.f32 %v12619_v47, 1e-30  ;;  %6823 = vlog2.f32 %v3344_v12  ;;  %v2868_v1 = vmax.f32 %v2836_v9, 1e-12  ;;  %v619_v12 = vld [vmem:[%s12151_s9 + $0x50] sm:$0xff] }
 0x5b7   : > { %6825 = vrsqrt.f32 %v2877_v62  ;;  %v2846_v4 = vmul.f32 %v2808_v2, %v9769_v7  ;;  %v3383_v62 = vmul.f32 0.6931472, %v6798_v28  ;;  %v10018_v47 = vpop.eup %6803  ;;  %v2869_v7 = vmax.f32 %v2837_v20, 1e-12 }
 0x5b8   : > { %6827 = vlog2.f32 %v3088_v0  ;;  %v2838_v2 = vmul.f32 %v9824_v6, %v9661_v10  ;;  %v10023_v43 = vpop.eup %6805  ;;  %v3345_v0 = vmul.f32 2.0, %v3313_v63  ;;  %v3127_v28 = vmul.f32 0.6931472, %v6800_v59  ;;  %v620_v59 = vld [vmem:[%s12151_s9 + $0x58] sm:$0xff] }
 0x5b9   : > { %v2878_v35 = vmax.f32 %v2846_v4, 1e-12  ;;  %6829 = vrsqrt.f32 %v2867_v8  ;;  %v6808_v11 = vpop.eup %6807  ;;  %v10031_v4 = vmul.f32 %v9805_v55, %v619_v12  ;;  %v2839_v6 = vmul.f32 %v9852_v5, %v9674_v53  ;;  %v621_v53 = vld [vmem:[%s12151_s9 + $0x60] sm:$0xff] }
 0x5ba   : > { %v2811_v9 = vpop.xlane.xlu1 %2810  ;;  %v10025_v45 = vpop.xlane.xlu0 %2554  ;;  %6596 = vxpose.xlu0.b32.cont [10/16] (narrow) %v6595_v30, 32  ;;  %v2840_v30 = vmul.f32 %v9879_v26, %v9690_v40  ;;  %v2870_v63 = vmax.f32 %v2838_v2, 1e-12  ;;  %v2843_v5 = vmul.f32 %v9881_v51, %v9748_v21  ;;  %v10059_v21 = vmul.f32 %v9822_v25, %v620_v59 }
 0x5bb   : > { %6831 = vrsqrt.f32 %v2878_v35  ;;  %v2847_v20 = vmul.f32 %v2811_v9, %v9772_v48  ;;  %v6810_v10 = vpop.eup %6809  ;;  %v12620_v35 = vsub.f32 1.0, %v9805_v55  ;;  %v3089_v9 = vmul.f32 2.0, %v3057_v42 }
 0x5bc   : > { %6833 = vrsqrt.f32 %v2868_v1  ;;  %v10042_v8 = vpop.eup %6811  ;;  %v3385_v42 = vmul.f32 0.6931472, %v6808_v11  ;;  %v2871_v49 = vmax.f32 %v2839_v6, 1e-12  ;;  %v2872_v44 = vmax.f32 %v2840_v30, 1e-12 }
 0x5bd   : > { %v3436_v48 = vmul.f32 %v3383_v62, %v12620_v35  ;;  %6835 = vrsqrt.f32 %v2869_v7  ;;  %v2879_v12 = vmax.f32 %v2847_v20, 1e-12  ;;  %v6814_v40 = vpop.eup %6813  ;;  %v12621_v62 = vpack.i.bf16 %v9923_v27, %v9928_v18 }
 0x5be   : > { %v2814_v26 = vpop.xlane.xlu1 %2813  ;;  %v10050_v1 = vpop.xlane.xlu0 %2557  ;;  %6837 = vlog2.f32 %v3345_v0  ;;  %v3180_v7 = vmul.f32 %v3127_v28, %v9805_v55  ;;  %v3129_v35 = vmul.f32 0.6931472, %v6810_v10  ;;  %v10062_v27 = vmul.f32 %v9839_v58, %v621_v53  ;;  %v622_v10 = vld [vmem:[%s12151_s9 + $0x68] sm:$0xff] }
 0x5bf   : > { %6598 = vxpose.xlu0.b32.cont [11/16] (narrow) %v12621_v62, 32  ;;  %v6816_v2 = vpop.eup %6815  ;;  %6839 = vrsqrt.f32 %v2879_v12  ;;  %v2848_v20 = vmul.f32 %v2814_v26, %v9775_v46  ;;  %v3468_v18 = vsel %vm3244_vm11, %v3436_v48, 0.0  ;;  %v2841_v0 = vmul.f32 %v9841_v19, %v9720_v15 }
 0x5c0   : > { %v6818_v51 = vpop.eup %6817  ;;  %6841 = vlog2.f32 %v3089_v9  ;;  %v2875_v30 = vmax.f32 %v2843_v5, 1e-12  ;;  %v12622_v48 = vpack.i.bf16 %v9939_v37, %v9944_v60  ;;  %v12623_v15 = vsub.f32 1.0, %v9822_v25 }
 0x5c1   : > { %v6820_v11 = vpop.eup %6819  ;;  %v2940_v28 = vmul.f32 %v6818_v51, %v9897_v36  ;;  %v2880_v46 = vmax.f32 %v2848_v20, 1e-12  ;;  %6843 = vrsqrt.f32 %v2870_v63  ;;  %v3212_v36 = vsel %vm3020_vm10, %v3180_v7, 0.0 }
 0x5c2   : > { %v6822_v6 = vpop.eup %6821  ;;  %v10072_v59 = vpop.xlane.xlu0 %2542  ;;  %v3437_v19 = vmul.f32 %v3385_v42, %v12623_v15  ;;  %v3387_v63 = vmul.f32 0.6931472, %v6816_v2  ;;  %v3181_v53 = vmul.f32 %v3129_v35, %v9822_v25  ;;  %v3500_v5 = vadd.f32 %v3468_v18, %v3212_v36 }
 0x5c3   : > { %v10074_v12 = vpop.xlane.xlu1 %2816  ;;  %6600 = vxpose.xlu0.b32.cont [12/16] (narrow) %v12622_v48, 32  ;;  %v6824_v9 = vpop.eup %6823  ;;  %6845 = vrsqrt.f32 %v2880_v46  ;;  %v2842_v37 = vmul.f32 %v9866_v33, %v9736_v39  ;;  %v2972_v60 = vmax.f32 %v2940_v28, 0.0  ;;  %v10088_v62 = vmul.f32 %v9856_v31, %v622_v10 }
 0x5c4   : > { %v6826_v26 = vpop.eup %6825  ;;  %6847 = vrsqrt.f32 %v2871_v49  ;;  %v2873_v55 = vmax.f32 %v2841_v0, 1e-12  ;;  %v3131_v2 = vmul.f32 0.6931472, %v6814_v40  ;;  %v12624_v33 = vpack.i.bf16 %v9953_v54, %v9958_v52  ;;  %v623_v40 = vld [vmem:[%s12151_s9 + $0x70] sm:$0xff] }
 0x5c5   : > { %v6828_v42 = vpop.eup %6827  ;;  %6849 = vrsqrt.f32 %v2872_v44  ;;  %v2941_v7 = vmul.f32 %v6826_v26, %v9934_v17  ;;  %v3133_v20 = vmul.f32 0.6931472, %v6820_v11  ;;  %v3389_v35 = vmul.f32 0.6931472, %v6822_v6 }
 0x5c6   : > { %6851 = vrsqrt.f32 %v2875_v30  ;;  %v10094_v49 = vpop.xlane.xlu0 %2771  ;;  %v3469_v44 = vsel %vm3245_vm13, %v3437_v19, 0.0  ;;  %v10103_v17 = vpop.eup %6829  ;;  %v3391_v51 = vmul.f32 0.6931472, %v6824_v9  ;;  %v12625_v18 = vsub.f32 1.0, %v9839_v58 }
 0x5c7   : > { %v10096_v39 = vpop.xlane.xlu1 %2726  ;;  %6602 = vxpose.xlu0.b32.cont [13/16] (narrow) %v12624_v33, 32  ;;  %v3213_v28 = vsel %vm3021_vm14, %v3181_v53, 0.0  ;;  %v10114_v52 = vsel %vm715_vm3, %v10031_v4, %v3500_v5  ;;  %v2874_v11 = vmax.f32 %v2842_v37, 1e-12  ;;  %v10116_v46 = vmin.f32 %v2972_v60, 1.0 }
 0x5c8   : > { %v3438_v0 = vmul.f32 %v3387_v63, %v12625_v18  ;;  %v6832_v54 = vpop.eup %6831  ;;  %v2973_v10 = vmax.f32 %v2941_v7, 0.0  ;;  %v3135_v6 = vmul.f32 0.6931472, %v6828_v42  ;;  %6853 = vrsqrt.f32 %v2873_v55 }
 0x5c9   : > { %v10118_v30 = vpop.eup %6833  ;;  %v2942_v48 = vmul.f32 %v6832_v54, %v10000_v3  ;;  %v3182_v15 = vmul.f32 %v3131_v2, %v9839_v58  ;;  %v3501_v19 = vadd.f32 %v3469_v44, %v3213_v28  ;;  %v12626_v9 = vpack.i.bf16 %v9963_v22, %v9974_v57 }
 0x5ca   : > { %v10122_v25 = vpop.eup %6835  ;;  %v10124_v36 = vpop.xlane.xlu0 %2595  ;;  %v3183_v63 = vmul.f32 %v3133_v20, %v9856_v31  ;;  %v12627_v3 = vsub.f32 1.0, %v9856_v31  ;;  %v12628_v37 = vsub.f32 1.0, %v9864_v56  ;;  %v3536_v42 = vmul.f32 %v9864_v56, %v623_v40 }
 0x5cb   : > { %v10126_v4 = vpop.xlane.xlu1 %2643  ;;  %6604 = vxpose.xlu0.b32.cont [14/16] (narrow) %v12626_v9, 32  ;;  %v6838_v5 = vpop.eup %6837  ;;  %v2974_v26 = vmax.f32 %v2942_v48, 0.0  ;;  %v3470_v22 = vsel %vm3246_vm15, %v3438_v0, 0.0  ;;  %6855 = vrsqrt.f32 %v2874_v11  ;;  %v10141_v55 = vmin.f32 %v2973_v10, 1.0 }
 0x5cc   : > { %v3439_v53 = vmul.f32 %v3389_v35, %v12627_v3  ;;  %v3440_v60 = vmul.f32 %v3391_v51, %v12628_v37  ;;  %v6840_v57 = vpop.eup %6839  ;;  %v3184_v7 = vmul.f32 %v3135_v6, %v9864_v56  ;;  %v3068_v2 = vmax.f32 %v10116_v46, 1e-30 }
 0x5cd   : > { %v10145_v33 = vmin.f32 %v2974_v26, 1.0  ;;  %v2943_v20 = vmul.f32 %v6840_v57, %v10025_v45  ;;  %v3214_v35 = vsel %vm3022_vm1, %v3182_v15, 0.0  ;;  %v10152_v44 = vsel %vm715_vm3, %v10059_v21, %v3501_v19  ;;  %v6842_v40 = vpop.eup %6841 }
 0x5ce   : > { %v10154_v51 = vpop.xlane.xlu0 %2539  ;;  %v12629_v0 = vpack.i.bf16 %v9979_v50, %v9984_v41  ;;  %v3215_v45 = vsel %vm3023_vm2, %v3183_v63, 0.0  ;;  %v3471_v58 = vsel %vm3247_vm4, %v3439_v53, 0.0  ;;  %v3502_v28 = vadd.f32 %v3470_v22, %v3214_v35  ;;  %v10166_v21 = vpop.eup %6843  ;;  %v624_v50 = vld [vmem:[%s12151_s9 + $0x78] sm:$0xff] }
 0x5cf   : > { %v10156_v18 = vpop.xlane.xlu1 %2494  ;;  %v2975_v54 = vmax.f32 %v2943_v20, 0.0  ;;  %v2849_v11 = vmul.f32 %v10074_v12, %v9779_v24  ;;  %v3393_v41 = vmul.f32 0.6931472, %v6838_v5  ;;  %v3472_v10 = vsel %vm3248_vm6, %v3440_v60, 0.0 }
 0x5d0   : > { %6606 = vxpose.xlu0.b32.cont [15/16] (narrow) %v12629_v0, 32  ;;  %v6846_v6 = vpop.eup %6845  ;;  %v3216_v31 = vsel %vm3024_vm5, %v3184_v7, 0.0  ;;  %v3294_v48 = vsub.f32 1.0, %v10145_v33  ;;  %v3069_v15 = vmax.f32 %v10141_v55, 1e-30  ;;  %v3100_v19 = vmul.f32 2.0, %v3068_v2 }
 0x5d1   : > { %v10180_v24 = vpop.eup %6847  ;;  %v10182_v12 = vmin.f32 %v2975_v54, 1.0  ;;  %v2944_v9 = vmul.f32 %v6846_v6, %v10050_v1  ;;  %v3137_v63 = vmul.f32 0.6931472, %v6842_v40  ;;  %v3070_v3 = vmax.f32 %v10145_v33, 1e-30 }
 0x5d2   : > { %v10186_v53 = vpop.eup %6849  ;;  %v2819_v56 = vmul.f32 %v10096_v39, %v9519_v38  ;;  %v2537_v5 = vpop.xlane.xlu0 %2536  ;;  %v12630_v37 = vpack.i.bf16 %v9993_v29, %v9998_v16  ;;  %v3537_v60 = vmul.f32 %v9895_v34, %v624_v50  ;;  %v3504_v22 = vadd.f32 %v3472_v10, %v3216_v31 }
 0x5d3   : > { %v2724_v26 = vpop.xlane.xlu1 %2723  ;;  %v3503_v57 = vadd.f32 %v3471_v58, %v3215_v45  ;;  %v6852_v7 = vpop.eup %6851  ;;  %v2976_v1 = vmax.f32 %v2944_v9, 0.0  ;;  %v2881_v2 = vmax.f32 %v2849_v11, 1e-12  ;;  %v12631_v20 = vsub.f32 1.0, %v9895_v34 }
 0x5d4   : > { %6608 = vxpose.xlu0.b32.end [16/16] (narrow) %v12630_v37, 32  ;;  %v3326_v40 = vmax.f32 %v3294_v48, 1e-30  ;;  %v2939_v38 = vmul.f32 %v6852_v7, %v10072_v59  ;;  %v10201_v39 = vsel %vm715_vm3, %v10062_v27, %v3502_v28  ;;  %v3101_v29 = vmul.f32 2.0, %v3069_v15 }
 0x5d5   : > { %v3441_v35 = vmul.f32 %v3393_v41, %v12631_v20  ;;  %6857 = vlog2.f32 %v3100_v19  ;;  %v10203_v16 = vmin.f32 %v2976_v1, 1.0  ;;  %v3185_v0 = vmul.f32 %v3137_v63, %v9895_v34  ;;  %v6854_v54 = vpop.eup %6853  ;;  %v635_v34 = vld [vmem:[%s12151_s9 + $0xd0] sm:$0xff] }
 0x5d6   : > { %v3071_v45 = vmax.f32 %v10182_v12, 1e-30  ;;  %v3102_v58 = vmul.f32 2.0, %v3070_v3  ;;  %v2851_v11 = vmax.f32 %v2819_v56, 1e-12  ;;  %v2534_v50 = vpop.xlane.xlu0 %2533  ;;  %v10208_v10 = vsel %vm715_vm3, %v3536_v42, %v3504_v22 }
 0x5d7   : > { %v2492_v41 = vpop.xlane.xlu1 %2491  ;;  %v3295_v59 = vsub.f32 1.0, %v10182_v12  ;;  %v10213_v27 = vsel %vm715_vm3, %v10088_v62, %v3503_v57  ;;  %6859 = vrsqrt.f32 %v2881_v2  ;;  %v2834_v28 = vmul.f32 %v10094_v49, %v10126_v4 }
 0x5d8   : > { %v3473_v6 = vsel %vm3249_vm7, %v3441_v35, 0.0  ;;  %v3358_v31 = vmul.f32 2.0, %v3326_v40  ;;  %v3072_v15 = vmax.f32 %v10203_v16, 1e-30  ;;  %v3296_v19 = vsub.f32 1.0, %v10203_v16  ;;  %v6856_v9 = vpop.eup %6855 }
 0x5d9   : > { %6861 = vlog2.f32 %v3101_v29  ;;  %v3293_v42 = vsub.f32 1.0, %v10141_v55  ;;  %v2971_v63 = vmax.f32 %v2939_v38, 0.0  ;;  %v3217_v62 = vsel %vm3025_vm8, %v3185_v0, 0.0 }
 0x5da   : > { %v3103_v3 = vmul.f32 2.0, %v3071_v45  ;;  %6863 = vlog2.f32 %v3102_v58  ;;  %v2531_v49 = vpop.xlane.xlu0 %2530  ;;  %v3505_v56 = vadd.f32 %v3473_v6, %v3217_v62  ;;  %v3328_v37 = vmax.f32 %v3296_v19, 1e-30 }
 0x5db   : > { %6865 = vrsqrt.f32 %v2851_v11  ;;  %v2489_v4 = vpop.xlane.xlu1 %2488  ;;  %v3327_v22 = vmax.f32 %v3295_v59, 1e-30  ;;  %v2938_v57 = vmul.f32 %v6856_v9, %v10154_v51  ;;  %v2923_v7 = vmul.f32 %v10042_v8, %v10156_v18  ;;  %v636_v8 = vld [vmem:[%s12151_s9 + $0xd8] sm:$0xff] }
 0x5dc   : > { %v3104_v1 = vmul.f32 2.0, %v3072_v15  ;;  %6867 = vlog2.f32 %v3358_v31  ;;  %v2866_v2 = vmax.f32 %v2834_v28, 1e-12  ;;  %v2937_v20 = vmul.f32 %v6854_v54, %v2537_v5 }
 0x5dd   : > { %v3360_v35 = vmul.f32 2.0, %v3328_v37  ;;  %v3325_v40 = vmax.f32 %v3293_v42, 1e-30  ;;  %v10236_v38 = vmin.f32 %v2971_v63, 1.0  ;;  %v2818_v29 = vmul.f32 %v2724_v26, %v10124_v36  ;;  %v637_v26 = vld [vmem:[%s12151_s9 + $0xe0] sm:$0xff] }
 0x5de   : > { %6869 = vlog2.f32 %v3103_v3  ;;  %v3359_v51 = vmul.f32 2.0, %v3327_v22  ;;  %v2528_v18 = vpop.xlane.xlu0 %2527  ;;  %v10243_v45 = vsel %vm715_vm3, %v3537_v60, %v3505_v56  ;;  %v12408_v5 = vsub.f32 1.0, %v10116_v46  ;;  %v639_v56 = vld [vmem:[%s12151_s9 + $0xf0] sm:$0xff] }
 0x5df   : > { %v2486_v0 = vpop.xlane.xlu1 %2485  ;;  %6871 = vlog2.f32 %v3360_v35  ;;  %v10247_v58 = vmul.f32 %v10116_v46, %v635_v34  ;;  %v2970_v54 = vmax.f32 %v2938_v57, 0.0  ;;  %v2955_v11 = vmax.f32 %v2923_v7, 0.0 }
 0x5e0   : > { %v2936_v36 = vmul.f32 %v10186_v53, %v2534_v50  ;;  %6873 = vlog2.f32 %v3104_v1  ;;  %v2969_v28 = vmax.f32 %v2937_v20, 0.0  ;;  %v3357_v6 = vmul.f32 2.0, %v3325_v40  ;;  %v638_v53 = vld [vmem:[%s12151_s9 + $0xe8] sm:$0xff] }
 0x5e1   : > { %6875 = vrsqrt.f32 %v2866_v2  ;;  %v10254_v60 = vmul.f32 %v10141_v55, %v636_v8  ;;  %v2850_v15 = vmax.f32 %v2818_v29, 1e-12  ;;  %v2922_v9 = vmul.f32 %v10023_v43, %v2492_v41 }
 0x5e2   : > { %v6858_v31 = vpop.eup %6857  ;;  %v2935_v63 = vmul.f32 %v10180_v24, %v2531_v49  ;;  %6877 = vlog2.f32 %v3359_v51  ;;  %v2921_v50 = vmul.f32 %v10018_v47, %v2489_v4  ;;  %v2525_v62 = vpop.xlane.xlu0 %2524  ;;  %v10266_v37 = vmul.f32 %v10145_v33, %v637_v26 }
 0x5e3   : > { %v2483_v3 = vpop.xlane.xlu1 %2482  ;;  %v3324_v43 = vmax.f32 %v12408_v5, 1e-30  ;;  %v12407_v24 = vsub.f32 1.0, %v10236_v38  ;;  %v10271_v41 = vmin.f32 %v2970_v54, 1.0  ;;  %v10273_v49 = vmin.f32 %v2955_v11, 1.0 }
 0x5e4   : > { %v2968_v22 = vmax.f32 %v2936_v36, 0.0  ;;  %vm3036_vm9 = vcmp.gt.f32.partialorder %v10116_v46, 0.0  ;;  %v3067_v47 = vmax.f32 %v10236_v38, 1e-30  ;;  %v10277_v4 = vpop.eup %6859  ;;  %v10279_v57 = vmin.f32 %v2969_v28, 1.0 }
 0x5e5   : > { %v10282_v7 = vmul.f32 %v10182_v12, %v638_v53  ;;  %6879 = vlog2.f32 %v3357_v6  ;;  %v3159_v1 = vmul.f32 0.6931472, %v6858_v31  ;;  %v2954_v2 = vmax.f32 %v2922_v9, 0.0 }
 0x5e6   : > { %v6862_v34 = vpop.eup %6861  ;;  %6881 = vrsqrt.f32 %v2850_v15  ;;  %v2967_v20 = vmax.f32 %v2935_v63, 0.0  ;;  %v10285_v35 = vmul.f32 %v10203_v16, %v639_v56  ;;  %v2953_v29 = vmax.f32 %v2921_v50, 0.0  ;;  %v2522_v8 = vpop.xlane.xlu0 %2521 }
 0x5e7   : > { %v6864_v40 = vpop.eup %6863  ;;  %v2934_v51 = vmul.f32 %v10166_v21, %v2528_v18  ;;  %v2480_v54 = vpop.xlane.xlu1 %2479  ;;  %v3356_v11 = vmul.f32 2.0, %v3324_v43  ;;  %v3323_v36 = vmax.f32 %v12407_v24, 1e-30  ;;  %v10292_v28 = vmin.f32 %v2968_v22, 1.0 }
 0x5e8   : > { %v10290_v26 = vpop.eup %6865  ;;  %v2920_v6 = vmul.f32 %v10011_v32, %v2486_v0  ;;  %v10296_v31 = vmul.f32 %v10118_v30, %v2522_v8  ;;  %vm3037_vm10 = vcmp.gt.f32.partialorder %v10141_v55, 0.0  ;;  %v3099_v15 = vmul.f32 2.0, %v3067_v47 }
 0x5e9   : > { %v6868_v9 = vpop.eup %6867  ;;  %v2933_v21 = vmul.f32 %v10122_v25, %v2525_v62  ;;  %vm3038_vm11 = vcmp.gt.f32.partialorder %v10145_v33, 0.0  ;;  %v3161_v18 = vmul.f32 0.6931472, %v6862_v34  ;;  %v3196_v63 = vmul.f32 %v3159_v1, %v10116_v46  ;;  %v634_v25 = vld [vmem:[%s12151_s9 + $0xc8] sm:$0xff] }
 0x5ea   : > { %v12406_v53 = vsub.f32 1.0, %v10273_v49  ;;  %v10303_v50 = vmin.f32 %v2954_v2, 1.0  ;;  %v10305_v56 = vmin.f32 %v2967_v20, 1.0  ;;  %v2919_v32 = vmul.f32 %v9965_v14, %v2483_v3  ;;  %v2519_v47 = vpop.xlane.xlu0 %2518 }
 0x5eb   : > { %v3163_v30 = vmul.f32 0.6931472, %v6864_v40  ;;  %v6870_v0 = vpop.eup %6869  ;;  %v10308_v43 = vmin.f32 %v2953_v29, 1.0  ;;  %v2966_v22 = vmax.f32 %v2934_v51, 0.0  ;;  %vm3262_vm13 = vcmp.lt.f32.partialorder %v10145_v33, 1.0  ;;  %v2477_v14 = vpop.xlane.xlu1 %2476 }
 0x5ec   : > { %6883 = vlog2.f32 %v3356_v11  ;;  %v3355_v62 = vmul.f32 2.0, %v3323_v36  ;;  %v6872_v1 = vpop.eup %6871  ;;  %v2952_v34 = vmax.f32 %v2920_v6, 0.0  ;;  %v10315_v2 = vmul.f32 %v10103_v17, %v2519_v47 }
 0x5ed   : > { %v3419_v3 = vmul.f32 0.6931472, %v6868_v9  ;;  %6885 = vlog2.f32 %v3099_v15  ;;  %v6874_v20 = vpop.eup %6873  ;;  %v2965_v40 = vmax.f32 %v2933_v21, 0.0  ;;  %v3197_v29 = vmul.f32 %v3161_v18, %v10141_v55 }
 0x5ee   : > { %v10320_v51 = vsel %vm3036_vm9, %v3196_v63, 0.0  ;;  %v3307_v8 = vmax.f32 %v12406_v53, 1e-30  ;;  %v6876_v11 = vpop.eup %6875  ;;  %v2951_v36 = vmax.f32 %v2919_v32, 0.0  ;;  %vm3264_vm14 = vcmp.lt.f32.partialorder %v10203_v16, 1.0  ;;  %v2516_v63 = vpop.xlane.xlu0 %2515 }
 0x5ef   : > { %v3198_v17 = vmul.f32 %v3163_v30, %v10145_v33  ;;  %v10327_v6 = vmul.f32 %v10236_v38, %v634_v25  ;;  %v3051_v15 = vmax.f32 %v10273_v49, 1e-30  ;;  %v6878_v9 = vpop.eup %6877  ;;  %v10330_v21 = vmin.f32 %v2966_v22, 1.0 }
 0x5f0   : > { %v2918_v18 = vmul.f32 %v9930_v61, %v2480_v54  ;;  %v3423_v47 = vmul.f32 0.6931472, %v6872_v1  ;;  %vm3039_vm15 = vcmp.gt.f32.partialorder %v10182_v12, 0.0  ;;  %6887 = vlog2.f32 %v3355_v62  ;;  %v2474_v1 = vpop.xlane.xlu1 %2473 }
 0x5f1   : > { %v2930_v32 = vmul.f32 %v6876_v11, %v2516_v63  ;;  %vm3040_vm1 = vcmp.gt.f32.partialorder %v10203_v16, 0.0  ;;  %v3167_v53 = vmul.f32 0.6931472, %v6874_v20  ;;  %v3165_v30 = vmul.f32 0.6931472, %v6870_v0 }
 0x5f2   : > { %v3454_v25 = vmul.f32 %v3419_v3, %v3294_v48  ;;  %v10337_v24 = vmin.f32 %v2952_v34, 1.0  ;;  %v10339_v5 = vmin.f32 %v2965_v40, 1.0  ;;  %vm3263_vm2 = vcmp.lt.f32.partialorder %v10182_v12, 1.0  ;;  %v6880_v22 = vpop.eup %6879  ;;  %v2561_v63 = vpop.xlane.xlu0 %2560 }
 0x5f3   : > { %v10344_v61 = vsel %vm3037_vm10, %v3197_v29, 0.0  ;;  %v3339_v54 = vmul.f32 2.0, %v3307_v8  ;;  %v10346_v62 = vmin.f32 %v2951_v36, 1.0  ;;  %v3421_v20 = vmul.f32 0.6931472, %v6878_v9  ;;  %v10350_v34 = vpop.eup %6881  ;;  %v618_v8 = vld [vmem:[%s12151_s9 + $0x48] sm:$0xff] }
 0x5f4   : > { %v3230_v0 = vsel %vm3038_vm11, %v3198_v17, 0.0  ;;  %v3083_v48 = vmul.f32 2.0, %v3051_v15  ;;  %v2964_v3 = vmax.f32 %v10296_v31, 0.0  ;;  %v2950_v40 = vmax.f32 %v2918_v18, 0.0 }
 0x5f5   : > { %v2917_v11 = vmul.f32 %v9918_v23, %v2477_v14  ;;  %v3456_v29 = vmul.f32 %v3423_v47, %v3296_v19  ;;  %v2945_v36 = vmul.f32 %v10277_v4, %v2561_v63  ;;  %v3200_v17 = vmul.f32 %v3167_v53, %v10203_v16 }
 0x5f6   : > { %v3199_v15 = vmul.f32 %v3165_v30, %v10182_v12  ;;  %v3486_v31 = vsel %vm3262_vm13, %v3454_v25, 0.0  ;;  %vm3261_vm4 = vcmp.lt.f32.partialorder %v10141_v55, 1.0  ;;  %v2963_v23 = vmax.f32 %v10315_v2, 0.0  ;;  %v2471_v25 = vpop.xlane.xlu1 %2470 }
 0x5f7   : > { %v2916_v14 = vmul.f32 %v9905_v13, %v2474_v1  ;;  %v3417_v19 = vmul.f32 0.6931472, %v6880_v22  ;;  %6889 = vlog2.f32 %v3339_v54  ;;  %v2977_v9 = vmax.f32 %v2945_v36, 0.0 }
 0x5f8   : > { %v3455_v18 = vmul.f32 %v3421_v20, %v3295_v59  ;;  %6891 = vlog2.f32 %v3083_v48  ;;  %v10370_v4 = vmul.f32 %v10273_v49, %v618_v8  ;;  %v10372_v53 = vmin.f32 %v2964_v3, 1.0 }
 0x5f9   : > { %v10374_v33 = vmin.f32 %v2950_v40, 1.0  ;;  %v2949_v47 = vmax.f32 %v2917_v11, 0.0  ;;  %v3488_v2 = vsel %vm3264_vm14, %v3456_v29, 0.0  ;;  %v6884_v30 = vpop.eup %6883  ;;  %v2962_v13 = vmax.f32 %v2930_v32, 0.0 }
 0x5fa   : > { %v10378_v54 = vmin.f32 %v2977_v9, 1.0  ;;  %v3231_v59 = vsel %vm3039_vm15, %v3199_v15, 0.0  ;;  %v3518_v22 = vadd.f32 %v3486_v31, %v3230_v0  ;;  %v6886_v1 = vpop.eup %6885  ;;  %v10382_v20 = vmin.f32 %v2963_v23, 1.0 }
 0x5fb   : > { %v2948_v48 = vmax.f32 %v2916_v14, 0.0  ;;  %v3232_v3 = vsel %vm3040_vm1, %v3200_v17, 0.0  ;;  %v3453_v40 = vmul.f32 %v3417_v19, %v3293_v42  ;;  %v3487_v63 = vsel %vm3263_vm2, %v3455_v18, 0.0 }
 0x5fc   : > { %v3073_v11 = vmax.f32 %v10378_v54, 1e-30  ;;  %v3520_v32 = vadd.f32 %v3488_v2, %v3232_v3  ;;  %vm3260_vm5 = vcmp.lt.f32.partialorder %v10116_v46, 1.0  ;;  %v3066_v0 = vmax.f32 %v10271_v41, 1e-30 }
 0x5fd   : > { %v10393_v29 = vmin.f32 %v2949_v47, 1.0  ;;  %v2915_v8 = vmul.f32 %v10290_v26, %v2471_v25  ;;  %v3297_v16 = vsub.f32 1.0, %v10378_v54  ;;  %v3415_v36 = vmul.f32 0.6931472, %v6884_v30  ;;  %v6888_v17 = vpop.eup %6887 }
 0x5fe   : > { %v10397_v15 = vmin.f32 %v2962_v13, 1.0  ;;  %v3105_v42 = vmul.f32 2.0, %v3073_v11  ;;  %v10401_v31 = vsel %vm715_vm3, %v10266_v37, %v3518_v22  ;;  %v3157_v12 = vmul.f32 0.6931472, %v6886_v1  ;;  %v2468_v1 = vpop.xlane.xlu1 %2467 }
 0x5ff   : > { %v3329_v23 = vmax.f32 %v3297_v16, 1e-30  ;;  %v3519_v14 = vadd.f32 %v3487_v63, %v3231_v59  ;;  %v3485_v19 = vsel %vm3261_vm4, %v3453_v40, 0.0  ;;  %v3290_v26 = vsub.f32 1.0, %v10271_v41 }
 0x600   : > { %v10408_v9 = vmin.f32 %v2948_v48, 1.0  ;;  %6893 = vlog2.f32 %v3105_v42  ;;  %v10412_v18 = vsel %vm715_vm3, %v10285_v35, %v3520_v32  ;;  %vm3035_vm6 = vcmp.gt.f32.partialorder %v10236_v38, 0.0 }
 0x601   : > { %v3098_v37 = vmul.f32 2.0, %v3066_v0  ;;  %v2947_v47 = vmax.f32 %v2915_v8, 0.0  ;;  %v3361_v2 = vmul.f32 2.0, %v3329_v23  ;;  %v12632_v30 = vsub.f32 1.0, %v10116_v46 }
 0x602   : > { %vm3259_vm7 = vcmp.lt.f32.partialorder %v10236_v38, 1.0  ;;  %v3322_v55 = vmax.f32 %v3290_v26, 1e-30  ;;  %v3517_v25 = vadd.f32 %v3485_v19, %v10344_v61  ;;  %v3413_v59 = vmul.f32 0.6931472, %v6888_v17 }
 0x603   : > { %v3452_v13 = vmul.f32 %v3415_v36, %v12632_v30  ;;  %v3050_v22 = vmax.f32 %v10303_v50, 1e-30  ;;  %v3274_v35 = vsub.f32 1.0, %v10303_v50  ;;  %6895 = vlog2.f32 %v3361_v2 }
 0x604   : > { %v10425_v48 = vsel %vm715_vm3, %v10282_v7, %v3519_v14  ;;  %v3195_v3 = vmul.f32 %v3157_v12, %v10236_v38  ;;  %v3354_v40 = vmul.f32 2.0, %v3322_v55  ;;  %v6890_v11 = vpop.eup %6889  ;;  %6897 = vlog2.f32 %v3098_v37 }
 0x605   : > { %v3082_v32 = vmul.f32 2.0, %v3050_v22  ;;  %v3306_v61 = vmax.f32 %v3274_v35, 1e-30  ;;  %v3065_v63 = vmax.f32 %v10279_v57, 1e-30  ;;  %v6892_v0 = vpop.eup %6891  ;;  %v10431_v8 = vmin.f32 %v2947_v47, 1.0 }
 0x606   : > { %v3484_v36 = vsel %vm3260_vm5, %v3452_v13, 0.0  ;;  %6899 = vlog2.f32 %v3354_v40  ;;  %v3289_v7 = vsub.f32 1.0, %v10279_v57  ;;  %v10437_v17 = vmul.f32 %v10350_v34, %v2468_v1 }
 0x607   : > { %v12633_v42 = vsub.f32 1.0, %v10236_v38  ;;  %v3338_v23 = vmul.f32 2.0, %v3306_v61  ;;  %v3097_v14 = vmul.f32 2.0, %v3065_v63  ;;  %vm3243_vm8 = vcmp.lt.f32.partialorder %v10273_v49, 1.0 }
 0x608   : > { %v3381_v19 = vmul.f32 0.6931472, %v6890_v11  ;;  %6901 = vlog2.f32 %v3082_v32  ;;  %v3321_v37 = vmax.f32 %v3289_v7, 1e-30  ;;  %v3049_v46 = vmax.f32 %v10308_v43, 1e-30 }
 0x609   : > { %v3451_v12 = vmul.f32 %v3413_v59, %v12633_v42  ;;  %v10447_v47 = vsel %vm715_vm3, %v10254_v60, %v3517_v25  ;;  %v3516_v34 = vadd.f32 %v3484_v36, %v10320_v51  ;;  %6903 = vlog2.f32 %v3338_v23  ;;  %v640_v11 = vld [vmem:[%s12151_s9 + $0xf8] sm:$0xff] }
 0x60a   : > { %v3273_v2 = vsub.f32 1.0, %v10308_v43  ;;  %v3227_v30 = vsel %vm3035_vm6, %v3195_v3, 0.0  ;;  %vm3019_vm9 = vcmp.gt.f32.partialorder %v10273_v49, 0.0  ;;  %v3125_v13 = vmul.f32 0.6931472, %v6892_v0 }
 0x60b   : > { %v3353_v55 = vmul.f32 2.0, %v3321_v37  ;;  %v3081_v59 = vmul.f32 2.0, %v3049_v46  ;;  %v3483_v22 = vsel %vm3259_vm7, %v3451_v12, 0.0  ;;  %6905 = vlog2.f32 %v3097_v14 }
 0x60c   : > { %v3305_v60 = vmax.f32 %v3273_v2, 1e-30  ;;  %v3064_v51 = vmax.f32 %v10292_v28, 1e-30  ;;  %v2946_v25 = vmax.f32 %v10437_v17, 0.0  ;;  %v12634_v1 = vsub.f32 1.0, %v10273_v49 }
 0x60d   : > { %6907 = vlog2.f32 %v3353_v55  ;;  %v3288_v3 = vsub.f32 1.0, %v10292_v28  ;;  %vm3041_vm10 = vcmp.gt.f32.partialorder %v10378_v54, 0.0  ;;  %v3048_v61 = vmax.f32 %v10337_v24, 1e-30  ;;  %v6894_v63 = vpop.eup %6893 }
 0x60e   : > { %v3435_v40 = vmul.f32 %v3381_v19, %v12634_v1  ;;  %6909 = vlog2.f32 %v3081_v59  ;;  %v3337_v38 = vmul.f32 2.0, %v3305_v60  ;;  %v3096_v32 = vmul.f32 2.0, %v3064_v51 }
 0x60f   : > { %vm3265_vm11 = vcmp.lt.f32.partialorder %v10378_v54, 1.0  ;;  %v3515_v0 = vadd.f32 %v3483_v22, %v3227_v30  ;;  %v3320_v36 = vmax.f32 %v3288_v3, 1e-30  ;;  %v3272_v42 = vsub.f32 1.0, %v10337_v24 }
 0x610   : > { %v3169_v12 = vmul.f32 0.6931472, %v6894_v63  ;;  %v3179_v23 = vmul.f32 %v3125_v13, %v10273_v49  ;;  %6911 = vlog2.f32 %v3337_v38  ;;  %v3080_v14 = vmul.f32 2.0, %v3048_v61  ;;  %v6896_v55 = vpop.eup %6895  ;;  %v633_v13 = vld [vmem:[%s12151_s9 + $0xc0] sm:$0xff]  ;;  %v632_v49 = vld [vmem:[%s12151_s9 + $0xb8] sm:$0xff] }
 0x611   : > { %v3553_v19 = vmul.f32 %v10378_v54, %v640_v11  ;;  %6913 = vlog2.f32 %v3096_v32  ;;  %v3352_v37 = vmul.f32 2.0, %v3320_v36  ;;  %v3304_v46 = vmax.f32 %v3272_v42, 1e-30  ;;  %v6898_v60 = vpop.eup %6897 }
 0x612   : > { %v10478_v30 = vsel %vm715_vm3, %v10247_v58, %v3516_v34  ;;  %v3467_v59 = vsel %vm3243_vm8, %v3435_v40, 0.0  ;;  %6915 = vlog2.f32 %v3080_v14  ;;  %v3063_v22 = vmax.f32 %v10305_v56, 1e-30  ;;  %v617_v40 = vld [vmem:[%s12151_s9 + $0x40] sm:$0xff] }
 0x613   : > { %v3201_v51 = vmul.f32 %v3169_v12, %v10378_v54  ;;  %v3425_v1 = vmul.f32 0.6931472, %v6896_v55  ;;  %6917 = vlog2.f32 %v3352_v37  ;;  %v3336_v11 = vmul.f32 2.0, %v3304_v46  ;;  %v6900_v38 = vpop.eup %6899 }
 0x614   : > { %v10489_v58 = vsel %vm715_vm3, %v10327_v6, %v3515_v0  ;;  %v3211_v34 = vsel %vm3019_vm9, %v3179_v23, 0.0  ;;  %vm3258_vm13 = vcmp.lt.f32.partialorder %v10271_v41, 1.0  ;;  %v3095_v32 = vmul.f32 2.0, %v3063_v22 }
 0x615   : > { %v3287_v61 = vsub.f32 1.0, %v10305_v56  ;;  %v3457_v63 = vmul.f32 %v3425_v1, %v3297_v16  ;;  %v3411_v36 = vmul.f32 0.6931472, %v6900_v38  ;;  %v10501_v12 = vmul.f32 %v10271_v41, %v633_v13  ;;  %v6902_v6 = vpop.eup %6901 }
 0x616   : > { %6919 = vlog2.f32 %v3336_v11  ;;  %v3499_v0 = vadd.f32 %v3467_v59, %v3211_v34  ;;  %vm3034_vm14 = vcmp.gt.f32.partialorder %v10271_v41, 0.0  ;;  %v3155_v23 = vmul.f32 0.6931472, %v6898_v60  ;;  %v6904_v14 = vpop.eup %6903  ;;  %v616_v59 = vld [vmem:[%s12151_s9 + $0x38] sm:$0xff]  ;;  %v631_v34 = vld [vmem:[%s12151_s9 + $0xb0] sm:$0xff] }
 0x617   : > { %vm3242_vm15 = vcmp.lt.f32.partialorder %v10303_v50, 1.0  ;;  %6921 = vlog2.f32 %v3095_v32  ;;  %v3319_v16 = vmax.f32 %v3287_v61, 1e-30  ;;  %v3233_v37 = vsel %vm3041_vm10, %v3201_v51, 0.0 }
 0x618   : > { %v3489_v46 = vsel %vm3265_vm11, %v3457_v63, 0.0  ;;  %v10515_v55 = vmul.f32 %v10303_v50, %v617_v40  ;;  %v3047_v13 = vmax.f32 %v10346_v62, 1e-30  ;;  %vm3018_vm1 = vcmp.gt.f32.partialorder %v10303_v50, 0.0  ;;  %v6906_v11 = vpop.eup %6905 }
 0x619   : > { %v3521_v22 = vadd.f32 %v3489_v46, %v3233_v37  ;;  %v3379_v60 = vmul.f32 0.6931472, %v6904_v14  ;;  %v10523_v1 = vmul.f32 %v10279_v57, %v632_v49  ;;  %v3351_v51 = vmul.f32 2.0, %v3319_v16 }
 0x61a   : > { %v3450_v54 = vmul.f32 %v3411_v36, %v3290_v26  ;;  %v3123_v38 = vmul.f32 0.6931472, %v6902_v6  ;;  %vm3257_vm2 = vcmp.lt.f32.partialorder %v10279_v57, 1.0  ;;  %v3079_v40 = vmul.f32 2.0, %v3047_v13  ;;  %v6908_v63 = vpop.eup %6907 }
 0x61b   : > { %v3271_v32 = vsub.f32 1.0, %v10346_v62  ;;  %v3585_v14 = vsel %vm715_vm3, %v3553_v19, %v3521_v22  ;;  %v10535_v49 = vsel %vm715_vm3, %v10370_v4, %v3499_v0  ;;  %v3194_v16 = vmul.f32 %v3155_v23, %v10271_v41  ;;  %v6910_v36 = vpop.eup %6909  ;;  %v615_v4 = vld [vmem:[%s12151_s9 + $0x30] sm:$0xff] }
 0x61c   : > { %vm3241_vm4 = vcmp.lt.f32.partialorder %v10308_v43, 1.0  ;;  %v10540_v26 = vmul.f32 %v10308_v43, %v616_v59  ;;  %5727 = vmatprep.subr.mxu0 %v3585_v14  ;;  %v3434_v6 = vmul.f32 %v3379_v60, %v3274_v35  ;;  %vm3033_vm5 = vcmp.gt.f32.partialorder %v10279_v57, 0.0 }
 0x61d   : > { %v3409_v37 = vmul.f32 0.6931472, %v6908_v63  ;;  %6923 = vlog2.f32 %v3351_v51  ;;  %v3303_v19 = vmax.f32 %v3271_v32, 1e-30  ;;  %5728 = vmatpush3.msra.mxu0 %v10243_v45  ;;  %v3153_v0 = vmul.f32 0.6931472, %v6906_v11  ;;  %v6912_v23 = vpop.eup %6911 }
 0x61e   : > { %vm3017_vm6 = vcmp.gt.f32.partialorder %v10308_v43, 0.0  ;;  %vm3256_vm7 = vcmp.lt.f32.partialorder %v10292_v28, 1.0  ;;  %v10554_v35 = vmul.f32 %v10292_v28, %v631_v34  ;;  %6925 = vlog2.f32 %v3079_v40  ;;  %5729 = vmatprep.subr.mxu0 %v10412_v18  ;;  %v6914_v22 = vpop.eup %6913 }
 0x61f   : > { %v3482_v46 = vsel %vm3258_vm13, %v3450_v54, 0.0  ;;  %v3178_v59 = vmul.f32 %v3123_v38, %v10303_v50  ;;  %v3121_v13 = vmul.f32 0.6931472, %v6910_v36  ;;  %vm3032_vm8 = vcmp.gt.f32.partialorder %v10292_v28, 0.0  ;;  %5730 = vmatpush3.msra.mxu0 %v10208_v10  ;;  %v6916_v11 = vpop.eup %6915 }
 0x620   : > { %v3335_v45 = vmul.f32 2.0, %v3303_v19  ;;  %v3449_v60 = vmul.f32 %v3409_v37, %v3289_v7  ;;  %v3377_v51 = vmul.f32 0.6931472, %v6912_v23  ;;  %vm3016_vm9 = vcmp.gt.f32.partialorder %v10337_v24, 0.0  ;;  %5731 = vmatprep.subr.mxu0 %v10425_v48  ;;  %v6918_v7 = vpop.eup %6917 }
 0x621   : > { %vm3240_vm10 = vcmp.lt.f32.partialorder %v10337_v24, 1.0  ;;  %v10567_v18 = vmul.f32 %v10337_v24, %v615_v4  ;;  %v3226_v54 = vsel %vm3034_vm14, %v3194_v16, 0.0  ;;  %v3466_v10 = vsel %vm3242_vm15, %v3434_v6, 0.0  ;;  %5732 = vmatpush3.msra.mxu0 %v10213_v27 }
 0x622   : > { %v3151_v38 = vmul.f32 0.6931472, %v6914_v22  ;;  %6927 = vlog2.f32 %v3335_v45  ;;  %v3514_v34 = vadd.f32 %v3482_v46, %v3226_v54  ;;  %v3193_v40 = vmul.f32 %v3153_v0, %v10279_v57  ;;  %5733 = vmatprep.subr.mxu0 %v10401_v31 }
 0x623   : > { %v3433_v63 = vmul.f32 %v3377_v51, %v3273_v2  ;;  %v3119_v14 = vmul.f32 0.6931472, %v6916_v11  ;;  %v3210_v41 = vsel %vm3018_vm1, %v3178_v59, 0.0  ;;  %v3177_v48 = vmul.f32 %v3121_v13, %v10308_v43  ;;  %v6920_v6 = vpop.eup %6919  ;;  %5734 = vmatpush3.msra.mxu0 %v10201_v39 }
 0x624   : > { %v3407_v16 = vmul.f32 0.6931472, %v6918_v7  ;;  %v3062_v36 = vmax.f32 %v10330_v21, 1e-30  ;;  %v3498_v27 = vadd.f32 %v3466_v10, %v3210_v41  ;;  %v3481_v37 = vsel %vm3257_vm2, %v3449_v60, 0.0  ;;  %v6922_v31 = vpop.eup %6921  ;;  %5735 = vmatprep.subr.mxu0 %v10447_v47 }
 0x625   : > { %v3192_v2 = vmul.f32 %v3151_v38, %v10292_v28  ;;  %v3286_v4 = vsub.f32 1.0, %v10330_v21  ;;  %v3465_v50 = vsel %vm3241_vm4, %v3433_v63, 0.0  ;;  %v3176_v0 = vmul.f32 %v3119_v14, %v10337_v24  ;;  %5736 = vmatpush3.msra.mxu0 %v10152_v44 }
 0x626   : > { %v3448_v19 = vmul.f32 %v3407_v16, %v3288_v3  ;;  %v3375_v39 = vmul.f32 0.6931472, %v6920_v6  ;;  %vm3031_vm11 = vcmp.gt.f32.partialorder %v10305_v56, 0.0  ;;  %v3225_v23 = vsel %vm3033_vm5, %v3193_v40, 0.0  ;;  %5737 = vmatprep.subr.mxu0 %v10478_v30 }
 0x627   : > { %v3149_v46 = vmul.f32 0.6931472, %v6922_v31  ;;  %vm3255_vm13 = vcmp.lt.f32.partialorder %v10305_v56, 1.0  ;;  %v3094_v47 = vmul.f32 2.0, %v3062_v36  ;;  %v3318_v59 = vmax.f32 %v3286_v4, 1e-30  ;;  %5738 = vmatpush3.msra.mxu0 %v10114_v52 }
 0x628   : > { %v3513_v3 = vadd.f32 %v3481_v37, %v3225_v23  ;;  %v3209_v13 = vsel %vm3017_vm6, %v3177_v48, 0.0  ;;  %v3480_v45 = vsel %vm3256_vm7, %v3448_v19, 0.0  ;;  %v3432_v44 = vmul.f32 %v3375_v39, %v3272_v42  ;;  %5739 = vmatprep.subr.mxu0 %v10489_v58  ;;  %v614_v31 = vld [vmem:[%s12151_s9 + $0x28] sm:$0xff] }
 0x629   : > { %v3497_v57 = vadd.f32 %v3465_v50, %v3209_v13  ;;  %v3224_v22 = vsel %vm3032_vm8, %v3192_v2, 0.0  ;;  %6929 = vlog2.f32 %v3094_v47  ;;  %v3350_v60 = vmul.f32 2.0, %v3318_v59  ;;  %5740 = vmatpush3.msra.mxu0 %v10535_v49 }
 0x62a   : > { %v3512_v30 = vadd.f32 %v3480_v45, %v3224_v22  ;;  %v3208_v43 = vsel %vm3016_vm9, %v3176_v0, 0.0  ;;  %v3464_v51 = vsel %vm3240_vm10, %v3432_v44, 0.0  ;;  %v3046_v11 = vmax.f32 %v10374_v33, 1e-30  ;;  %v6924_v42 = vpop.eup %6923 }
 0x62b   : > { %v3578_v52 = vsel %vm715_vm3, %v10501_v12, %v3514_v34  ;;  %v3496_v28 = vadd.f32 %v3464_v51, %v3208_v43  ;;  %v3191_v54 = vmul.f32 %v3149_v46, %v10305_v56  ;;  %6931 = vlog2.f32 %v3350_v60  ;;  %v6926_v58 = vpop.eup %6925 }
 0x62c   : > { %5741 = vmatprep.subr.mxu0 %v3578_v52  ;;  %v3562_v10 = vsel %vm715_vm3, %v10515_v55, %v3498_v27  ;;  %v3405_v38 = vmul.f32 0.6931472, %v6924_v42  ;;  %v3078_v24 = vmul.f32 2.0, %v3046_v11  ;;  %v3270_v7 = vsub.f32 1.0, %v10374_v33  ;;  %v630_v55 = vld [vmem:[%s12151_s9 + $0xa8] sm:$0xff] }
 0x62d   : > { %5742 = vmatpush3.msra.mxu0 %v3562_v10  ;;  %v3577_v49 = vsel %vm715_vm3, %v10523_v1, %v3513_v3  ;;  %v3561_v12 = vsel %vm715_vm3, %v10540_v26, %v3497_v57  ;;  %v3117_v34 = vmul.f32 0.6931472, %v6926_v58  ;;  %v3061_v40 = vmax.f32 %v10339_v5, 1e-30 }
 0x62e   : > { %5743 = vmatprep.subr.mxu0 %v3577_v49  ;;  %v3576_v63 = vsel %vm715_vm3, %v10554_v35, %v3512_v30  ;;  %v3447_v14 = vmul.f32 %v3405_v38, %v3287_v61  ;;  %6933 = vlog2.f32 %v3078_v24  ;;  %v3302_v1 = vmax.f32 %v3270_v7, 1e-30  ;;  %v629_v30 = vld [vmem:[%s12151_s9 + $0xa0] sm:$0xff] }
 0x62f   : > { %v6928_v41 = vpop.eup %6927  ;;  %5744 = vmatpush3.msra.mxu0 %v3561_v12  ;;  %v3560_v26 = vsel %vm715_vm3, %v10567_v18, %v3496_v28  ;;  %v3223_v48 = vsel %vm3031_vm11, %v3191_v54, 0.0  ;;  %v3093_v35 = vmul.f32 2.0, %v3061_v40  ;;  %v3285_v16 = vsub.f32 1.0, %v10339_v5  ;;  %v613_v24 = vld [vmem:[%s12151_s9 + $0x20] sm:$0xff] }
 0x630   : > { %5745 = vmatprep.subr.mxu0 %v3576_v63  ;;  %v3479_v36 = vsel %vm3255_vm13, %v3447_v14, 0.0  ;;  %v3175_v61 = vmul.f32 %v3117_v34, %v10346_v62  ;;  %v3373_v6 = vmul.f32 0.6931472, %v6928_v41  ;;  %v3334_v27 = vmul.f32 2.0, %v3302_v1 }
 0x631   : > { %5746 = vmatpush3.msra.mxu0 %v3560_v26  ;;  %v3511_v37 = vadd.f32 %v3479_v36, %v3223_v48  ;;  %v3543_v2 = vmul.f32 %v10305_v56, %v630_v55  ;;  %6935 = vlog2.f32 %v3093_v35  ;;  %v3317_v18 = vmax.f32 %v3285_v16, 1e-30  ;;  %v10693_v55 = vpop.trf.xlu0  ;;  %v628_v35 = vld [vmem:[%s12151_s9 + $0x98] sm:$0xff] }
 0x632   : > { %vm3015_vm14 = vcmp.gt.f32.partialorder %v10346_v62, 0.0  ;;  %v3431_v50 = vmul.f32 %v3373_v6, %v3271_v32  ;;  %6937 = vlog2.f32 %v3334_v27  ;;  %v3045_v19 = vmax.f32 %v10393_v29, 1e-30  ;;  %v612_v27 = vld [vmem:[%s12151_s9 + $0x18] sm:$0xff] }
 0x633   : > { %v3575_v0 = vsel %vm715_vm3, %v3543_v2, %v3511_v37  ;;  %vm3239_vm15 = vcmp.lt.f32.partialorder %v10346_v62, 1.0  ;;  %v3349_v56 = vmul.f32 2.0, %v3317_v18  ;;  %v3269_v39 = vsub.f32 1.0, %v10393_v29 }
 0x634   : > { %5747 = vmatprep.subr.mxu0 %v3575_v0  ;;  %v3207_v23 = vsel %vm3015_vm14, %v3175_v61, 0.0  ;;  %v3463_v46 = vsel %vm3239_vm15, %v3431_v50, 0.0  ;;  %v3077_v47 = vmul.f32 2.0, %v3045_v19  ;;  %v3060_v59 = vmax.f32 %v10372_v53, 1e-30 }
 0x635   : > { %v3495_v3 = vadd.f32 %v3463_v46, %v3207_v23  ;;  %v3527_v13 = vmul.f32 %v10346_v62, %v614_v31  ;;  %6939 = vlog2.f32 %v3349_v56  ;;  %v3301_v32 = vmax.f32 %v3269_v39, 1e-30 }
 0x636   : > { %v6930_v45 = vpop.eup %6929  ;;  %v10665_v44 = vmin.f32 %v2946_v25, 1.0  ;;  %6941 = vlog2.f32 %v3077_v47  ;;  %v3092_v57 = vmul.f32 2.0, %v3060_v59  ;;  %v3284_v22 = vsub.f32 1.0, %v10372_v53 }
 0x637   : > { %v3559_v60 = vsel %vm715_vm3, %v3527_v13, %v3495_v3  ;;  %vm3030_vm1 = vcmp.gt.f32.partialorder %v10330_v21, 0.0  ;;  %v3147_v62 = vmul.f32 0.6931472, %v6930_v45  ;;  %v3333_v43 = vmul.f32 2.0, %v3301_v32 }
 0x638   : > { %v6932_v51 = vpop.eup %6931  ;;  %5748 = vmatpush3.msra.mxu0 %v3559_v60  ;;  %vm3254_vm2 = vcmp.lt.f32.partialorder %v10330_v21, 1.0  ;;  %6943 = vlog2.f32 %v3092_v57  ;;  %v3316_v17 = vmax.f32 %v3284_v22, 1e-30  ;;  %v3044_v25 = vmax.f32 %v10408_v9, 1e-30 }
 0x639   : > { %v3190_v11 = vmul.f32 %v3147_v62, %v10330_v21  ;;  %v3403_v42 = vmul.f32 0.6931472, %v6932_v51  ;;  %6945 = vlog2.f32 %v3333_v43  ;;  %v3268_v52 = vsub.f32 1.0, %v10408_v9 }
 0x63a   : > { %v3542_v28 = vmul.f32 %v10330_v21, %v629_v30  ;;  %vm3014_vm4 = vcmp.gt.f32.partialorder %v10374_v33, 0.0  ;;  %v3348_v54 = vmul.f32 2.0, %v3316_v17  ;;  %v3076_v58 = vmul.f32 2.0, %v3044_v25 }
 0x63b   : > { %v6934_v10 = vpop.eup %6933  ;;  %v3446_v38 = vmul.f32 %v3403_v42, %v3286_v4  ;;  %vm3238_vm5 = vcmp.lt.f32.partialorder %v10374_v33, 1.0  ;;  %v3300_v49 = vmax.f32 %v3268_v52, 1e-30  ;;  %v3059_v12 = vmax.f32 %v10382_v20, 1e-30  ;;  %v10735_v42 = vpop.trf.xlu0 }
 0x63c   : > { %v3222_v34 = vsel %vm3030_vm1, %v3190_v11, 0.0  ;;  %v3115_v40 = vmul.f32 0.6931472, %v6934_v10  ;;  %6947 = vlog2.f32 %v3348_v54  ;;  %v3283_v63 = vsub.f32 1.0, %v10382_v20 }
 0x63d   : > { %v3478_v4 = vsel %vm3254_vm2, %v3446_v38, 0.0  ;;  %6949 = vlog2.f32 %v3076_v58  ;;  %v3332_v14 = vmul.f32 2.0, %v3300_v49  ;;  %v3091_v1 = vmul.f32 2.0, %v3059_v12 }
 0x63e   : > { %v6936_v41 = vpop.eup %6935  ;;  %v3510_v26 = vadd.f32 %v3478_v4, %v3222_v34  ;;  %v3526_v48 = vmul.f32 %v10374_v33, %v613_v24  ;;  %vm3029_vm6 = vcmp.gt.f32.partialorder %v10339_v5, 0.0  ;;  %v3315_v36 = vmax.f32 %v3283_v63, 1e-30 }
 0x63f   : > { %v6938_v61 = vpop.eup %6937  ;;  %v3174_v21 = vmul.f32 %v3115_v40, %v10374_v33  ;;  %v3145_v6 = vmul.f32 0.6931472, %v6936_v41  ;;  %6951 = vlog2.f32 %v3332_v14  ;;  %vm3253_vm7 = vcmp.lt.f32.partialorder %v10339_v5, 1.0  ;;  %v627_v33 = vld [vmem:[%s12151_s9 + $0x90] sm:$0xff] }
 0x640   : > { %v3574_v37 = vsel %vm715_vm3, %v3542_v28, %v3510_v26  ;;  %v3371_v2 = vmul.f32 0.6931472, %v6938_v61  ;;  %6953 = vlog2.f32 %v3091_v1  ;;  %v3541_v31 = vmul.f32 %v10339_v5, %v628_v35  ;;  %v611_v61 = vld [vmem:[%s12151_s9 + $0x10] sm:$0xff] }
 0x641   : > { %5749 = vmatprep.subr.mxu0 %v3574_v37  ;;  %v3189_v18 = vmul.f32 %v3145_v6, %v10339_v5  ;;  %v3347_v50 = vmul.f32 2.0, %v3315_v36  ;;  %vm3013_vm8 = vcmp.gt.f32.partialorder %v10393_v29, 0.0  ;;  %vm3237_vm9 = vcmp.lt.f32.partialorder %v10393_v29, 1.0 }
 0x642   : > { %v6940_v19 = vpop.eup %6939  ;;  %v3430_v0 = vmul.f32 %v3371_v2, %v3270_v7  ;;  %v3525_v56 = vmul.f32 %v10393_v29, %v612_v27  ;;  %v3043_v23 = vmax.f32 %v10431_v8, 1e-30  ;;  %v3267_v46 = vsub.f32 1.0, %v10431_v8 }
 0x643   : > { %v6942_v47 = vpop.eup %6941  ;;  %v3206_v59 = vsel %vm3014_vm4, %v3174_v21, 0.0  ;;  %v3401_v3 = vmul.f32 0.6931472, %v6940_v19  ;;  %vm3028_vm10 = vcmp.gt.f32.partialorder %v10372_v53, 0.0  ;;  %6955 = vlog2.f32 %v3347_v50 }
 0x644   : > { %v3462_v7 = vsel %vm3238_vm5, %v3430_v0, 0.0  ;;  %v3113_v13 = vmul.f32 0.6931472, %v6942_v47  ;;  %v3075_v32 = vmul.f32 2.0, %v3043_v23  ;;  %v3299_v45 = vmax.f32 %v3267_v46, 1e-30 }
 0x645   : > { %v6944_v57 = vpop.eup %6943  ;;  %v3494_v60 = vadd.f32 %v3462_v7, %v3206_v59  ;;  %v3221_v30 = vsel %vm3029_vm6, %v3189_v18, 0.0  ;;  %v3445_v62 = vmul.f32 %v3401_v3, %v3285_v16  ;;  %v3058_v43 = vmax.f32 %v10397_v15, 1e-30 }
 0x646   : > { %v6946_v51 = vpop.eup %6945  ;;  %v3173_v17 = vmul.f32 %v3113_v13, %v10393_v29  ;;  %v3143_v25 = vmul.f32 0.6931472, %v6944_v57  ;;  %6957 = vlog2.f32 %v3075_v32  ;;  %v3331_v11 = vmul.f32 2.0, %v3299_v45  ;;  %v10763_v29 = vpop.trf.xlu0  ;;  %v626_v57 = vld [vmem:[%s12151_s9 + $0x88] sm:$0xff] }
 0x647   : > { %v3558_v28 = vsel %vm715_vm3, %v3526_v48, %v3494_v60  ;;  %v3477_v54 = vsel %vm3253_vm7, %v3445_v62, 0.0  ;;  %v3369_v16 = vmul.f32 0.6931472, %v6946_v51  ;;  %v3090_v58 = vmul.f32 2.0, %v3058_v43 }
 0x648   : > { %5750 = vmatpush3.msra.mxu0 %v3558_v28  ;;  %v3509_v10 = vadd.f32 %v3477_v54, %v3221_v30  ;;  %v3188_v38 = vmul.f32 %v3143_v25, %v10372_v53  ;;  %vm3252_vm11 = vcmp.lt.f32.partialorder %v10372_v53, 1.0  ;;  %6959 = vlog2.f32 %v3331_v11 }
 0x649   : > { %v6948_v24 = vpop.eup %6947  ;;  %v3429_v49 = vmul.f32 %v3369_v16, %v3269_v39  ;;  %v3540_v12 = vmul.f32 %v10372_v53, %v627_v33  ;;  %6961 = vlog2.f32 %v3090_v58  ;;  %v3282_v34 = vsub.f32 1.0, %v10397_v15 }
 0x64a   : > { %v6950_v5 = vpop.eup %6949  ;;  %v3573_v40 = vsel %vm715_vm3, %v3541_v31, %v3509_v10  ;;  %v3399_v4 = vmul.f32 0.6931472, %v6948_v24  ;;  %vm3012_vm13 = vcmp.gt.f32.partialorder %v10408_v9, 0.0  ;;  %vm3236_vm14 = vcmp.lt.f32.partialorder %v10408_v9, 1.0  ;;  %v10786_v30 = vpop.trf.xlu0 }
 0x64b   : > { %5751 = vmatprep.subr.mxu0 %v3573_v40  ;;  %v3205_v14 = vsel %vm3013_vm8, %v3173_v17, 0.0  ;;  %v3461_v39 = vsel %vm3237_vm9, %v3429_v49, 0.0  ;;  %v3111_v1 = vmul.f32 0.6931472, %v6950_v5  ;;  %v3314_v41 = vmax.f32 %v3282_v34, 1e-30 }
 0x64c   : > { %v6952_v26 = vpop.eup %6951  ;;  %v3493_v48 = vadd.f32 %v3461_v39, %v3205_v14  ;;  %v3220_v35 = vsel %vm3028_vm10, %v3188_v38, 0.0  ;;  %v3444_v36 = vmul.f32 %v3399_v4, %v3284_v22  ;;  %v3042_v21 = vmax.f32 %v10665_v44, 1e-30 }
 0x64d   : > { %v6954_v6 = vpop.eup %6953  ;;  %v3172_v27 = vmul.f32 %v3111_v1, %v10408_v9  ;;  %v3367_v37 = vmul.f32 0.6931472, %v6952_v26  ;;  %v3346_v2 = vmul.f32 2.0, %v3314_v41  ;;  %v3266_v18 = vsub.f32 1.0, %v10665_v44  ;;  %v625_v41 = vld [vmem:[%s12151_s9 + $0x80] sm:$0xff] }
 0x64e   : > { %v3557_v31 = vsel %vm715_vm3, %v3525_v56, %v3493_v48  ;;  %v3476_v22 = vsel %vm3252_vm11, %v3444_v36, 0.0  ;;  %v3141_v50 = vmul.f32 0.6931472, %v6954_v6  ;;  %v3074_v19 = vmul.f32 2.0, %v3042_v21 }
 0x64f   : > { %5752 = vmatpush3.msra.mxu0 %v3557_v31  ;;  %v3508_v0 = vadd.f32 %v3476_v22, %v3220_v35  ;;  %v3428_v23 = vmul.f32 %v3367_v37, %v3268_v52  ;;  %v3524_v47 = vmul.f32 %v10408_v9, %v611_v61  ;;  %6963 = vlog2.f32 %v3346_v2  ;;  %v609_v37 = vld [vmem:[%s12151_s9] sm:$0xff] }
 0x650   : > { %v6956_v59 = vpop.eup %6955  ;;  %v3204_v3 = vsel %vm3012_vm13, %v3172_v27, 0.0  ;;  %v3187_v7 = vmul.f32 %v3141_v50, %v10382_v20  ;;  %6965 = vlog2.f32 %v3074_v19  ;;  %v3298_v53 = vmax.f32 %v3266_v18, 1e-30 }
 0x651   : > { %v3572_v56 = vsel %vm715_vm3, %v3540_v12, %v3508_v0  ;;  %v3460_v13 = vsel %vm3236_vm14, %v3428_v23, 0.0  ;;  %v3397_v32 = vmul.f32 0.6931472, %v6956_v59  ;;  %v6610_v52 = vunpack.i.l.bf16 %v10693_v55  ;;  %v7048_v59 = vld [vmem:[%s12150_s8] sm:$0xff] }
 0x652   : > { %5753 = vmatprep.subr.mxu0 %v3572_v56  ;;  %v3492_v45 = vadd.f32 %v3460_v13, %v3204_v3  ;;  %vm3027_vm15 = vcmp.gt.f32.partialorder %v10382_v20, 0.0  ;;  %v3330_v60 = vmul.f32 2.0, %v3298_v53  ;;  %vm3251_vm1 = vcmp.lt.f32.partialorder %v10382_v20, 1.0 }
 0x653   : > { %v6958_v62 = vpop.eup %6957  ;;  %v3443_v9 = vmul.f32 %v3397_v32, %v3283_v63  ;;  %3714 = vmatprep.mubr.f32.mxu0 %v6610_v52  ;;  %v3219_v33 = vsel %vm3027_vm15, %v3187_v7, 0.0  ;;  %v3539_v11 = vmul.f32 %v10382_v20, %v626_v57  ;;  %v610_v63 = vld [vmem:[%s12151_s9 + $0x8] sm:$0xff]  ;;  %vm3011_vm2 = vcmp.gt.f32.partialorder %v10431_v8, 0.0 }
 0x654   : > { %v3556_v43 = vsel %vm715_vm3, %v3524_v47, %v3492_v45  ;;  %v3109_v51 = vmul.f32 0.6931472, %v6958_v62  ;;  %6967 = vlog2.f32 %v3330_v60  ;;  %vm3235_vm4 = vcmp.lt.f32.partialorder %v10431_v8, 1.0  ;;  %v574_v62 = vld [vmem:[%s12148_s6 + $0x30] sm:$0xff] }
 0x655   : > { %v6960_v17 = vpop.eup %6959  ;;  %5754 = vmatpush3.msra.mxu0 %v3556_v43  ;;  %v3475_v25 = vsel %vm3251_vm1, %v3443_v9, 0.0  ;;  %v3523_v5 = vmul.f32 %v10431_v8, %v610_v63  ;;  %vm3026_vm5 = vcmp.gt.f32.partialorder %v10397_v15, 0.0  ;;  %vm3250_vm6 = vcmp.lt.f32.partialorder %v10397_v15, 1.0  ;;  %v7049_v9 = vld [vmem:[%s12150_s8 + $0x8] sm:$0xff]  ;;  %v7050_v43 = vld [vmem:[%s12150_s8 + $0x10] sm:$0xff]  ;;  %v7055_v63 = vld [vmem:[%s12150_s8 + $0x38] sm:$0xff] }
 0x656   : > { %v6962_v28 = vpop.eup %6961  ;;  %v3507_v54 = vadd.f32 %v3475_v25, %v3219_v33  ;;  %v3171_v16 = vmul.f32 %v3109_v51, %v10431_v8  ;;  %v3365_v58 = vmul.f32 0.6931472, %v6960_v17  ;;  %v3538_v61 = vmul.f32 %v10397_v15, %v625_v41  ;;  %v573_v51 = vld [vmem:[%s12148_s6 + $0x28] sm:$0xff]  ;;  %v572_v17 = vld [vmem:[%s12148_s6 + $0x20] sm:$0xff]  ;;  %v7051_v33 = vld [vmem:[%s12150_s8 + $0x18] sm:$0xff] }
 0x657   : > { %v3139_v20 = vmul.f32 0.6931472, %v6962_v28  ;;  %vm3010_vm7 = vcmp.gt.f32.partialorder %v10665_v44, 0.0  ;;  %vm3234_vm8 = vcmp.lt.f32.partialorder %v10665_v44, 1.0  ;;  %v3522_v50 = vmul.f32 %v10665_v44, %v609_v37  ;;  %v7052_v25 = vld [vmem:[%s12150_s8 + $0x20] sm:$0xff]  ;;  %v570_v28 = vld [vmem:[%s12148_s6 + $0x10] sm:$0xff] }
 0x658   : > { %v3571_v10 = vsel %vm715_vm3, %v3539_v11, %v3507_v54  ;;  %v3427_v38 = vmul.f32 %v3365_v58, %v3267_v46  ;;  %v3203_v24 = vsel %vm3011_vm2, %v3171_v16, 0.0  ;;  %v6615_v19 = vunpack.i.l.bf16 %v10735_v42  ;;  %v571_v11 = vld [vmem:[%s12148_s6 + $0x18] sm:$0xff]  ;;  %v7053_v54 = vld [vmem:[%s12150_s8 + $0x28] sm:$0xff]  ;;  %v7054_v16 = vld [vmem:[%s12150_s8 + $0x30] sm:$0xff] }
 0x659   : > { %5755 = vmatprep.subr.mxu0 %v3571_v10  ;;  %v3186_v39 = vmul.f32 %v3139_v20, %v10397_v15  ;;  %v6613_v15 = vunpack.i.h.bf16 %v10693_v55  ;;  %v6620_v23 = vunpack.i.l.bf16 %v10763_v29  ;;  %v6623_v47 = vunpack.i.h.bf16 %v10763_v29  ;;  %v569_v58 = vld [vmem:[%s12148_s6 + $0x8] sm:$0xff]  ;;  %v568_v10 = vld [vmem:[%s12148_s6] sm:$0xff]  ;;  %v7067_v41 = vld [vmem:[%s12150_s8 + $0x98] sm:$0xff] }
 0x65a   : > { %v3459_v49 = vsel %vm3235_vm4, %v3427_v38, 0.0  ;;  %v6625_v55 = vunpack.i.l.bf16 %v10786_v30  ;;  %v7056_v38 = vld [vmem:[%s12150_s8 + $0x40] sm:$0xff]  ;;  %v7057_v20 = vld [vmem:[%s12150_s8 + $0x48] sm:$0xff] }
 0x65b   : > { %v3491_v12 = vadd.f32 %v3459_v49, %v3203_v24  ;;  %v3218_v48 = vsel %vm3026_vm5, %v3186_v39, 0.0  ;;  %v12635_v24 = vmov 0.0   ;;  %v7058_v49 = vld [vmem:[%s12150_s8 + $0x50] sm:$0xff]  ;;  %v7064_v39 = vld [vmem:[%s12150_s8 + $0x80] sm:$0xff]  ;;  %v7077_v37 = vld [vmem:[%s12150_s8 + $0xe8] sm:$0xff] }
 0x65c   : > { %v6964_v40 = vpop.eup %6963 }
 0x65d   : > { %v6966_v4 = vpop.eup %6965  ;;  %v3555_v14 = vsel %vm715_vm3, %v3523_v5, %v3491_v12  ;;  %v3395_v1 = vmul.f32 0.6931472, %v6964_v40  ;;  %v7059_v12 = vld [vmem:[%s12150_s8 + $0x58] sm:$0xff]  ;;  %v7060_v5 = vld [vmem:[%s12150_s8 + $0x60] sm:$0xff]  ;;  %v7061_v40 = vld [vmem:[%s12150_s8 + $0x68] sm:$0xff] }
 0x65e   : > { %5756 = vmatpush3.msra.mxu0 %v3555_v14  ;;  %v3107_v46 = vmul.f32 0.6931472, %v6966_v4  ;;  %v7062_v4 = vld [vmem:[%s12150_s8 + $0x70] sm:$0xff]  ;;  %v7063_v14 = vld [vmem:[%s12150_s8 + $0x78] sm:$0xff] }
 0x65f   : > { %v3442_v26 = vmul.f32 %v3395_v1, %v3282_v34  ;;  %v7065_v1 = vld [vmem:[%s12150_s8 + $0x88] sm:$0xff] }
 0x660   : > { %v3170_v21 = vmul.f32 %v3107_v46, %v10665_v44  ;;  %v6628_v44 = vunpack.i.h.bf16 %v10786_v30  ;;  %v575_v30 = vld [vmem:[%s12148_s6 + $0x38] sm:$0xff]  ;;  %v7066_v46 = vld [vmem:[%s12150_s8 + $0x90] sm:$0xff] }
 0x661   : > { %v6968_v8 = vpop.eup %6967  ;;  %v3474_v35 = vsel %vm3250_vm6, %v3442_v26, 0.0  ;;  %v7068_v26 = vld [vmem:[%s12150_s8 + $0xa0] sm:$0xff] }
 0x662   : > { %v3506_v36 = vadd.f32 %v3474_v35, %v3218_v48  ;;  %v3363_v6 = vmul.f32 0.6931472, %v6968_v8  ;;  %v3202_v2 = vsel %vm3010_vm7, %v3170_v21, 0.0  ;;  %v7069_v8 = vld [vmem:[%s12150_s8 + $0xa8] sm:$0xff]  ;;  %v7070_v48 = vld [vmem:[%s12150_s8 + $0xb0] sm:$0xff]  ;;  %v7071_v35 = vld [vmem:[%s12150_s8 + $0xb8] sm:$0xff] }
 0x663   : > { %v7074_v21 = vld [vmem:[%s12150_s8 + $0xd0] sm:$0xff] }
 0x664   : > { %v3570_v27 = vsel %vm715_vm3, %v3538_v61, %v3506_v36  ;;  %v3426_v34 = vmul.f32 %v3363_v6, %v3266_v18  ;;  %v6618_v18 = vunpack.i.h.bf16 %v10735_v42  ;;  %v7072_v36 = vld [vmem:[%s12150_s8 + $0xc0] sm:$0xff]  ;;  %v7073_v61 = vld [vmem:[%s12150_s8 + $0xc8] sm:$0xff]  ;;  %v7075_v6 = vld [vmem:[%s12150_s8 + $0xd8] sm:$0xff] }
 0x665   : > { %5757 = vmatprep.subr.mxu0 %v3570_v27  ;;  %v7076_v27 = vld [vmem:[%s12150_s8 + $0xe0] sm:$0xff] }
 0x666   : > { %v3458_v31 = vsel %vm3234_vm8, %v3426_v34, 0.0  ;;  %v7078_v34 = vld [vmem:[%s12150_s8 + $0xf0] sm:$0xff] }
 0x667   : > { %v3490_v22 = vadd.f32 %v3458_v31, %v3202_v2  ;;  %v7079_v2 = vld [vmem:[%s12150_s8 + $0xf8] sm:$0xff]  ;;  %v12636_v31 = vld [vmem:[#allocation110_spill] sm:$0xff] }
 0x669   : > { %v3554_v0 = vsel %vm715_vm3, %v3522_v50, %v3490_v22  ;;  %v12638_v22 = vld [vmem:[#allocation43_spill] sm:$0xff]  ;;  %v12639_v50 = vld [vmem:[#allocation46_spill] sm:$0xff] }
 0x66a   : > { %5758 = vmatpush3.msra.mxu0 %v3554_v0  ;;  %v12641_v0 = vld [vmem:[#allocation52_spill] sm:$0xff] }
 0x66b   : > { %3715 = vmatmul.mubr.f32.vlgmr.msra.gmra.mxu0 %v6613_v15  ;;  %v12637_v15 = vld [vmem:[#allocation40_spill] sm:$0xff] }
 0x66c   : > { %3719 = vmatprep.mubr.f32.mxu0 %v6615_v19  ;;  %v12640_v19 = vld [vmem:[#allocation49_spill] sm:$0xff] }
 0x66f   : > { %3720 = vmatmul.mubr.f32.gmra.mxu0 %v6618_v18  ;;  %v12642_v18 = vld [vmem:[#allocation55_spill] sm:$0xff] }
 0x670   : > { %3724 = vmatprep.mubr.f32.mxu0 %v6620_v23  ;;  %v12643_v23 = vld [vmem:[#allocation59_spill] sm:$0xff] }
 0x673   : > { %3725 = vmatmul.mubr.f32.gmra.mxu0 %v6623_v47  ;;  %v12644_v47 = vld [vmem:[#allocation63_spill] sm:$0xff] }
 0x674   : > { %3729 = vmatprep.mubr.f32.mxu0 %v6625_v55  ;;  %v12645_v55 = vld [vmem:[#allocation67_spill] sm:$0xff] }
 0x677   : > { %3730 = vmatmul.mubr.f32.gmra.mxu0 %v6628_v44  ;;  %v12646_v44 = vld [vmem:[#allocation70_spill] sm:$0xff] }
 0x678   : > { %5911 = vmatprep.mubr.msk.f32.mxu0 %vm1052_vm0, %v7048_v59  ;;  %v12647_v59 = vld [vmem:[#allocation74_spill] sm:$0xff] }
 0x72b   : > { %v5759_v42 = vpop.f32.mrf.mxu0 }
 0x72d   : > { %v5760_v3 = vpop.f32.mrf.mxu0 }
 0x72e   : > { %v5761_v60 = vadd.f32 %v5760_v3, %v5759_v42  ;;  %v12648_v42 = vld [vmem:[#allocation78_spill] sm:$0xff] }
 0x72f   : > { %v5762_v7 = vpop.f32.mrf.mxu0  ;;  %v12649_v3 = vld [vmem:[#allocation82_spill] sm:$0xff] }
 0x731   : > { %v5763_v53 = vpop.f32.mrf.mxu0 }
 0x732   : > { %v5764_v57 = vadd.f32 %v5763_v53, %v5762_v7  ;;  %v12650_v7 = vld [vmem:[#allocation85_spill] sm:$0xff]  ;;  %v12651_v53 = vld [vmem:[#allocation88_spill] sm:$0xff] }
 0x733   : > { %v5765_v56 = vpop.f32.mrf.mxu0 }
 0x735   : > { %v5766_v29 = vpop.f32.mrf.mxu0 }
 0x736   : > { %v5767_v45 = vadd.f32 %v5766_v29, %v5765_v56  ;;  %v12652_v56 = vld [vmem:[#allocation139_spill] sm:$0xff]  ;;  %v12653_v29 = vld [vmem:[#allocation92_spill] sm:$0xff] }
 0x737   : > { %v5768_v13 = vpop.f32.mrf.mxu0 }
 0x739   : > { %v5769_v32 = vpop.f32.mrf.mxu0 }
 0x73a   : > { %v5770_v52 = vadd.f32 %v5769_v32, %v5768_v13  ;;  %v12654_v13 = vld [vmem:[#allocation95_spill] sm:$0xff] }
 0x73b   : > { %v12655_v32 = vld [vmem:[#allocation99_spill] sm:$0xff] }
 0x73c   : > { %5903 = vmatprep.subr.mxu0 %v5770_v52 }
 0x73d   : > { %5904 = vmatpush3.msra.mxu0 %v5770_v52  ;;  %v12656_v52 = vld [vmem:[#allocation102_spill] sm:$0xff] }
 0x73e   : > { %5905 = vmatprep.subr.mxu0 %v5767_v45 }
 0x73f   : > { %5906 = vmatpush3.msra.mxu0 %v5767_v45  ;;  %v12657_v45 = vld [vmem:[#allocation106_spill] sm:$0xff] }
 0x740   : > { %5907 = vmatprep.subr.mxu0 %v5764_v57 }
 0x741   : > { %5908 = vmatpush3.msra.mxu0 %v5764_v57  ;;  %v12658_v57 = vld [vmem:[#allocation109_spill] sm:$0xff] }
 0x742   : > { %5909 = vmatprep.subr.mxu0 %v5761_v60 }
 0x743   : > { %5910 = vmatpush3.msra.mxu0 %v5761_v60  ;;  %v12659_v60 = vld [vmem:[#allocation113_spill] sm:$0xff] }
 0x744   : > { %5912 = vmatmul.mubr.msk.f32.vlgmr.msra.gmra.mxu0 %vm1052_vm0, %v7049_v9  ;;  %5959 = vmatprep.subr.mxu0 %v575_v30  ;;  %v12662_v9 = vld [vmem:[#allocation121_spill] sm:$0xff] }
 0x745   : > { %5914 = vmatprep.mubr.msk.f32.mxu0 %vm1052_vm0, %v7050_v43  ;;  %5960 = vmatpush3.msra.mxu0 %v575_v30  ;;  %v12660_v30 = vld [vmem:[#allocation116_spill] sm:$0xff]  ;;  %v12663_v43 = vld [vmem:[#allocation126_spill] sm:$0xff] }
 0x746   : > { %5961 = vmatprep.subr.mxu0 %v574_v62 }
 0x747   : > { %5962 = vmatpush3.msra.mxu0 %v574_v62  ;;  %v12661_v62 = vld [vmem:[#allocation119_spill] sm:$0xff] }
 0x748   : > { %5915 = vmatmul.mubr.msk.f32.gmra.mxu0 %vm1052_vm0, %v7051_v33  ;;  %5963 = vmatprep.subr.mxu0 %v573_v51  ;;  %v12666_v33 = vld [vmem:[#allocation135_spill] sm:$0xff] }
 0x749   : > { %5917 = vmatprep.mubr.msk.f32.mxu0 %vm1052_vm0, %v7052_v25  ;;  %5964 = vmatpush3.msra.mxu0 %v573_v51  ;;  %v12664_v51 = vld [vmem:[#allocation129_spill] sm:$0xff] }
 0x74a   : > { %5965 = vmatprep.subr.mxu0 %v572_v17  ;;  %v12667_v25 = vld [vmem:[#allocation137_spill] sm:$0xff] }
 0x74b   : > { %5966 = vmatpush3.msra.mxu0 %v572_v17  ;;  %v12665_v17 = vld [vmem:[#allocation133_spill] sm:$0xff] }
 0x74c   : > { %5918 = vmatmul.mubr.msk.f32.gmra.mxu0 %vm1052_vm0, %v7053_v54  ;;  %5967 = vmatprep.subr.mxu0 %v571_v11 }
 0x74d   : > { %5920 = vmatprep.mubr.msk.f32.mxu0 %vm1052_vm0, %v7054_v16  ;;  %5968 = vmatpush3.msra.mxu0 %v571_v11  ;;  %v7080_v11 = vld [vmem:[%s7366_s28 + $0x8] sm:$0xff] }
 0x74e   : > { %5969 = vmatprep.subr.mxu0 %v570_v28 }
 0x74f   : > { %5970 = vmatpush3.msra.mxu0 %v570_v28  ;;  %v7081_v28 = vld [vmem:[%s8214_s21 + $0x8] sm:$0xff] }
 0x750   : > { %5921 = vmatmul.mubr.msk.f32.gmra.mxu0 %vm1052_vm0, %v7055_v63  ;;  %5971 = vmatprep.subr.mxu0 %v569_v58  ;;  %v4057_v54 = vmul.f32 0.5, %v7081_v28 }
 0x751   : > { %5923 = vmatprep.mubr.msk.f32.mxu0 %vm1052_vm0, %v7056_v38  ;;  %5972 = vmatpush3.msra.mxu0 %v569_v58  ;;  %v7082_v58 = vld [vmem:[%s8214_s21] sm:$0xff] }
 0x752   : > { %5973 = vmatprep.subr.mxu0 %v568_v10 }
 0x753   : > { %5974 = vmatpush3.msra.mxu0 %v568_v10  ;;  %v4056_v10 = vmul.f32 0.5, %v7082_v58 }
 0x754   : > { %5924 = vmatmul.mubr.msk.f32.gmra.mxu0 %vm1052_vm0, %v7057_v20  ;;  %4800 = vmatprep.subr.mxu0 %v12635_v24  ;;  %v7083_v20 = vld [vmem:[%s8214_s21 + $0x18] sm:$0xff] }
 0x755   : > { %5926 = vmatprep.mubr.msk.f32.mxu0 %vm1052_vm0, %v7058_v49  ;;  %v4059_v49 = vmul.f32 0.5, %v7083_v20 }
 0x758   : > { %5927 = vmatmul.mubr.msk.f32.gmra.mxu0 %vm1052_vm0, %v7059_v12 }
 0x759   : > { %5929 = vmatprep.mubr.msk.f32.mxu0 %vm1052_vm0, %v7060_v5 }
 0x75c   : > { %5930 = vmatmul.mubr.msk.f32.gmra.mxu0 %vm1052_vm0, %v7061_v40 }
 0x75d   : > { %5932 = vmatprep.mubr.msk.f32.mxu0 %vm1052_vm0, %v7062_v4  ;;  %v7084_v4 = vld [vmem:[%s8214_s21 + $0x10] sm:$0xff] }
 0x760   : > { %5933 = vmatmul.mubr.msk.f32.gmra.mxu0 %vm1052_vm0, %v7063_v14  ;;  %v4058_v14 = vmul.f32 0.5, %v7084_v4 }
 0x761   : > { %5935 = vmatprep.mubr.msk.f32.mxu0 %vm1052_vm0, %v7064_v39 }
 0x764   : > { %5936 = vmatmul.mubr.msk.f32.gmra.mxu0 %vm1052_vm0, %v7065_v1 }
 0x765   : > { %5938 = vmatprep.mubr.msk.f32.mxu0 %vm1052_vm0, %v7066_v46 }
 0x768   : > { %5939 = vmatmul.mubr.msk.f32.gmra.mxu0 %vm1052_vm0, %v7067_v41  ;;  %v7085_v41 = vld [vmem:[%s8214_s21 + $0x28] sm:$0xff] }
 0x769   : > { %5941 = vmatprep.mubr.msk.f32.mxu0 %vm1052_vm0, %v7068_v26  ;;  %v4061_v26 = vmul.f32 0.5, %v7085_v41 }
 0x76c   : > { %5942 = vmatmul.mubr.msk.f32.gmra.mxu0 %vm1052_vm0, %v7069_v8 }
 0x76d   : > { %5944 = vmatprep.mubr.msk.f32.mxu0 %vm1052_vm0, %v7070_v48 }
 0x770   : > { %5945 = vmatmul.mubr.msk.f32.gmra.mxu0 %vm1052_vm0, %v7071_v35  ;;  %v7086_v35 = vld [vmem:[%s8214_s21 + $0x20] sm:$0xff] }
 0x771   : > { %5947 = vmatprep.mubr.msk.f32.mxu0 %vm1052_vm0, %v7072_v36  ;;  %v4060_v36 = vmul.f32 0.5, %v7086_v35 }
 0x774   : > { %5948 = vmatmul.mubr.msk.f32.gmra.mxu0 %vm1052_vm0, %v7073_v61 }
 0x775   : > { %5950 = vmatprep.mubr.msk.f32.mxu0 %vm1052_vm0, %v7074_v21 }
 0x778   : > { %5951 = vmatmul.mubr.msk.f32.gmra.mxu0 %vm1052_vm0, %v7075_v6 }
 0x779   : > { %5953 = vmatprep.mubr.msk.f32.mxu0 %vm1052_vm0, %v7076_v27 }
 0x77c   : > { %5954 = vmatmul.mubr.msk.f32.gmra.mxu0 %vm1052_vm0, %v7077_v37 }
 0x77d   : > { %5956 = vmatprep.mubr.msk.f32.mxu0 %vm1052_vm0, %v7078_v34 }
 0x780   : > { %5957 = vmatmul.mubr.msk.f32.gmra.mxu0 %vm1052_vm0, %v7079_v2 }
 0x781   : > { %5975 = vmatprep.mubr.msk.f32.mxu0 %vm2465_vm12, %v12636_v31  ;;  %v7087_v31 = vld [vmem:[%s8214_s21 + $0x38] sm:$0xff] }
 0x784   : > { %5976 = vmatmul.mubr.msk.f32.vlgmr.msra.gmra.mxu0 %vm2465_vm12, %v12637_v15  ;;  %v4063_v15 = vmul.f32 0.5, %v7087_v31 }
 0x785   : > { %5978 = vmatprep.mubr.msk.f32.mxu0 %vm2465_vm12, %v12638_v22 }
 0x788   : > { %5979 = vmatmul.mubr.msk.f32.gmra.mxu0 %vm2465_vm12, %v12639_v50 }
 0x789   : > { %5981 = vmatprep.mubr.msk.f32.mxu0 %vm2465_vm12, %v12640_v19  ;;  %v7088_v19 = vld [vmem:[%s8214_s21 + $0x30] sm:$0xff] }
 0x78c   : > { %5982 = vmatmul.mubr.msk.f32.gmra.mxu0 %vm2465_vm12, %v12641_v0  ;;  %v4062_v0 = vmul.f32 0.5, %v7088_v19 }
 0x78d   : > { %5984 = vmatprep.mubr.msk.f32.mxu0 %vm2465_vm12, %v12642_v18 }
 0x790   : > { %5985 = vmatmul.mubr.msk.f32.gmra.mxu0 %vm2465_vm12, %v12643_v23 }
 0x791   : > { %5987 = vmatprep.mubr.msk.f32.mxu0 %vm2465_vm12, %v12644_v47 }
 0x794   : > { %5988 = vmatmul.mubr.msk.f32.gmra.mxu0 %vm2465_vm12, %v12645_v55 }
 0x795   : > { %5990 = vmatprep.mubr.msk.f32.mxu0 %vm2465_vm12, %v12646_v44 }
 0x798   : > { %5991 = vmatmul.mubr.msk.f32.gmra.mxu0 %vm2465_vm12, %v12647_v59 }
 0x799   : > { %5993 = vmatprep.mubr.msk.f32.mxu0 %vm2465_vm12, %v12648_v42 }
 0x79c   : > { %5994 = vmatmul.mubr.msk.f32.gmra.mxu0 %vm2465_vm12, %v12649_v3  ;;  %v7089_v3 = vld [vmem:[%s8214_s21 + $0x48] sm:$0xff] }
 0x79d   : > { %5996 = vmatprep.mubr.msk.f32.mxu0 %vm2465_vm12, %v12650_v7  ;;  %v4065_v7 = vmul.f32 0.5, %v7089_v3 }
 0x7a0   : > { %5997 = vmatmul.mubr.msk.f32.gmra.mxu0 %vm2465_vm12, %v12651_v53 }
 0x7a1   : > { %5999 = vmatprep.mubr.msk.f32.mxu0 %vm2465_vm12, %v12652_v56 }
 0x7a4   : > { %6000 = vmatmul.mubr.msk.f32.gmra.mxu0 %vm2465_vm12, %v12653_v29  ;;  %v7090_v29 = vld [vmem:[%s8214_s21 + $0x40] sm:$0xff] }
 0x7a5   : > { %6002 = vmatprep.mubr.msk.f32.mxu0 %vm2465_vm12, %v12654_v13  ;;  %v4064_v13 = vmul.f32 0.5, %v7090_v29 }
 0x7a8   : > { %6003 = vmatmul.mubr.msk.f32.gmra.mxu0 %vm2465_vm12, %v12655_v32 }
 0x7a9   : > { %6005 = vmatprep.mubr.msk.f32.mxu0 %vm2465_vm12, %v12656_v52 }
 0x7ac   : > { %6006 = vmatmul.mubr.msk.f32.gmra.mxu0 %vm2465_vm12, %v12657_v45 }
 0x7ad   : > { %6008 = vmatprep.mubr.msk.f32.mxu0 %vm2465_vm12, %v12658_v57 }
 0x7b0   : > { %6009 = vmatmul.mubr.msk.f32.gmra.mxu0 %vm2465_vm12, %v12659_v60 }
 0x7b1   : > { %6011 = vmatprep.mubr.msk.f32.mxu0 %vm2465_vm12, %v12660_v30 }
 0x7b4   : > { %6012 = vmatmul.mubr.msk.f32.gmra.mxu0 %vm2465_vm12, %v12661_v62 }
 0x7b5   : > { %6014 = vmatprep.mubr.msk.f32.mxu0 %vm2465_vm12, %v12662_v9  ;;  %v7091_v9 = vld [vmem:[%s8214_s21 + $0x58] sm:$0xff] }
 0x7b8   : > { %6015 = vmatmul.mubr.msk.f32.gmra.mxu0 %vm2465_vm12, %v12663_v43  ;;  %v4067_v43 = vmul.f32 0.5, %v7091_v9 }
 0x7b9   : > { %6017 = vmatprep.mubr.msk.f32.mxu0 %vm2465_vm12, %v12664_v51 }
 0x7bc   : > { %6018 = vmatmul.mubr.msk.f32.gmra.mxu0 %vm2465_vm12, %v12665_v17 }
 0x7bd   : > { %6020 = vmatprep.mubr.msk.f32.mxu0 %vm2465_vm12, %v12666_v33  ;;  %v7092_v33 = vld [vmem:[%s8214_s21 + $0x50] sm:$0xff] }
 0x7c0   : > { %6021 = vmatmul.mubr.msk.f32.gmra.mxu0 %vm2465_vm12, %v12667_v25  ;;  %v4066_v25 = vmul.f32 0.5, %v7092_v33 }
 0x7c1   : > { %4864 = vmatprep.mubr.f32.mxu0 %v7080_v11 }
 0x804   : > { %v5913_v16 = vpop.f32.mrf.mxu0 }
 0x805   : > { %v4089_v63 = vmul.f32 0.5, %v5913_v16 }
 0x806   : > { %v3897_v38 = vpop.f32.mrf.mxu0 }
 0x807   : > { %v4121_v12 = vadd.f32 %v4089_v63, %v4057_v54  ;;  %v4088_v5 = vmul.f32 0.5, %v3897_v38  ;;  %5219 = vrot.lane.b32.xlu1 %v4089_v63, %s7239_s26  ;;  %v7093_v38 = vld [vmem:[%s8214_s21 + $0x68] sm:$0xff] }
 0x808   : > { %v5916_v40 = vpop.f32.mrf.mxu0  ;;  %v4069_v20 = vmul.f32 0.5, %v7093_v38  ;;  %v7102_v38 = vld [vmem:[%s8214_s21 + $0xa0] sm:$0xff] }
 0x809   : > { %vm4153_vm0 = vcmp.gt.f32.partialorder %v4121_v12, 0.4  ;;  %v4120_v39 = vadd.f32 %v4088_v5, %v4056_v10  ;;  %v4091_v1 = vmul.f32 0.5, %v5916_v40 }
 0x80a   : > { %v3907_v46 = vpop.f32.mrf.mxu0  ;;  %v5620_v61 = vsel %vm4153_vm0, 1.0, %v12635_v24 }
 0x80b   : > { %vm4152_vm12 = vcmp.gt.f32.partialorder %v4120_v39, 0.4  ;;  %v4123_v8 = vadd.f32 %v4091_v1, %v4059_v49  ;;  %v4090_v48 = vmul.f32 0.5, %v3907_v46  ;;  %5217 = vrot.lane.b32.xlu1 %v4088_v5, %s7239_s26  ;;  %v7094_v5 = vld [vmem:[%s8214_s21 + $0x60] sm:$0xff] }
 0x80c   : > { %v5619_v21 = vsel %vm4152_vm12, 1.0, %v12635_v24  ;;  %v5919_v6 = vpop.f32.mrf.mxu0  ;;  %v4068_v40 = vmul.f32 0.5, %v7094_v5 }
 0x80d   : > { %v6629_v27 = vpack.i.bf16 %v5620_v61, %v5619_v21  ;;  %vm4155_vm9 = vcmp.gt.f32.partialorder %v4123_v8, 0.4  ;;  %v4122_v37 = vadd.f32 %v4090_v48, %v4058_v14  ;;  %v4093_v34 = vmul.f32 0.5, %v5919_v6  ;;  %v7095_v8 = vld [vmem:[%s8214_s21 + $0x78] sm:$0xff]  ;;  %v7096_v61 = vld [vmem:[%s8214_s21 + $0x70] sm:$0xff] }
 0x80e   : > { %v3917_v2 = vpop.f32.mrf.mxu0  ;;  %v5622_v18 = vsel %vm4155_vm9, 1.0, %v12635_v24  ;;  %v4070_v21 = vmul.f32 0.5, %v7096_v61 }
 0x80f   : > { %vm4154_vm10 = vcmp.gt.f32.partialorder %v4122_v37, 0.4  ;;  %v4125_v22 = vadd.f32 %v4093_v34, %v4061_v26  ;;  %v11060_v50 = vmul.f32 0.5, %v3917_v2  ;;  %5223 = vrot.lane.b32.xlu1 %v4091_v1, %s7239_s26 }
 0x810   : > { %v5621_v23 = vsel %vm4154_vm10, 1.0, %v12635_v24  ;;  %v5922_v47 = vpop.f32.mrf.mxu0 }
 0x811   : > { %v6634_v55 = vpack.i.bf16 %v5622_v18, %v5621_v23  ;;  %vm4157_vm11 = vcmp.gt.f32.partialorder %v4125_v22, 0.4  ;;  %v4124_v44 = vadd.f32 %v11060_v50, %v4060_v36  ;;  %v4095_v59 = vmul.f32 0.5, %v5922_v47  ;;  %v7097_v22 = vld [vmem:[%s8214_s21 + $0x88] sm:$0xff]  ;;  %v7098_v23 = vld [vmem:[%s8214_s21 + $0x80] sm:$0xff] }
 0x812   : > { %v3927_v42 = vpop.f32.mrf.mxu0  ;;  %v11074_v32 = vsel %vm4157_vm11, 1.0, %v12635_v24  ;;  %v4073_v19 = vmul.f32 0.5, %v7097_v22  ;;  %v4072_v47 = vmul.f32 0.5, %v7098_v23 }
 0x813   : > { %vm4156_vm13 = vcmp.gt.f32.partialorder %v4124_v44, 0.4  ;;  %v4127_v53 = vadd.f32 %v4095_v59, %v4063_v15  ;;  %v11068_v56 = vmul.f32 0.5, %v3927_v42  ;;  %6630 = vrot.lane.b32.xlu1 %v6629_v27, %s7239_s26  ;;  %5231 = vrot.lane.b32.xlu0 %v4095_v59, %s7239_s26 }
 0x814   : > { %v11077_v52 = vsel %vm4156_vm13, 1.0, %v12635_v24  ;;  %v5925_v45 = vpop.f32.mrf.mxu0 }
 0x815   : > { %v6639_v57 = vpack.i.bf16 %v11074_v32, %v11077_v52  ;;  %vm4159_vm14 = vcmp.gt.f32.partialorder %v4127_v53, 0.4  ;;  %v4126_v60 = vadd.f32 %v11068_v56, %v4062_v0  ;;  %v11082_v30 = vmul.f32 0.5, %v5925_v45  ;;  %v7101_v52 = vld [vmem:[%s8214_s21 + $0xa8] sm:$0xff] }
 0x816   : > { %v3937_v62 = vpop.f32.mrf.mxu0  ;;  %v11091_v11 = vsel %vm4159_vm14, 1.0, %v12635_v24 }
 0x817   : > { %vm4158_vm15 = vcmp.gt.f32.partialorder %v4126_v60, 0.4  ;;  %v4129_v51 = vadd.f32 %v11082_v30, %v4065_v7  ;;  %v11086_v17 = vmul.f32 0.5, %v3937_v62  ;;  %5221 = vrot.lane.b32.xlu1 %v4090_v48, %s7239_s26  ;;  %v4071_v48 = vmul.f32 0.5, %v7095_v8  ;;  %v7100_v60 = vld [vmem:[%s8214_s21 + $0x90] sm:$0xff]  ;;  %v7103_v8 = vld [vmem:[%s8214_s21 + $0xb8] sm:$0xff] }
 0x818   : > { %v11094_v28 = vsel %vm4158_vm15, 1.0, %v12635_v24  ;;  %v5928_v54 = vpop.f32.mrf.mxu0  ;;  %v4074_v62 = vmul.f32 0.5, %v7100_v60 }
 0x819   : > { %v6644_v16 = vpack.i.bf16 %v11091_v11, %v11094_v28  ;;  %vm4161_vm1 = vcmp.gt.f32.partialorder %v4129_v51, 0.4  ;;  %v4128_v58 = vadd.f32 %v11086_v17, %v4064_v13  ;;  %v11099_v10 = vmul.f32 0.5, %v5928_v54  ;;  %v7107_v28 = vld [vmem:[%s8214_s21 + $0xd8] sm:$0xff] }
 0x81a   : > { %v3947_v63 = vpop.f32.mrf.mxu0  ;;  %v11108_v4 = vsel %vm4161_vm1, 1.0, %v12635_v24 }
 0x81b   : > { %vm4160_vm2 = vcmp.gt.f32.partialorder %v4128_v58, 0.4  ;;  %v4131_v49 = vadd.f32 %v11099_v10, %v4067_v43  ;;  %v11103_v12 = vmul.f32 0.5, %v3947_v63  ;;  %5227 = vrot.lane.b32.xlu1 %v4093_v34, %s7239_s26 }
 0x81c   : > { %v11111_v14 = vsel %vm4160_vm2, 1.0, %v12635_v24  ;;  %v5931_v39 = vpop.f32.mrf.mxu0 }
 0x81d   : > { %v6649_v1 = vpack.i.bf16 %v11108_v4, %v11111_v14  ;;  %vm4163_vm4 = vcmp.gt.f32.partialorder %v4131_v49, 0.4  ;;  %v4130_v46 = vadd.f32 %v11103_v12, %v4066_v25  ;;  %v11116_v41 = vmul.f32 0.5, %v5931_v39 }
 0x81e   : > { %v3957_v26 = vpop.f32.mrf.mxu0  ;;  %v11125_v6 = vsel %vm4163_vm4, 1.0, %v12635_v24 }
 0x81f   : > { %vm4162_vm5 = vcmp.gt.f32.partialorder %v4130_v46, 0.4  ;;  %v4133_v35 = vadd.f32 %v11116_v41, %v4069_v20  ;;  %v11120_v36 = vmul.f32 0.5, %v3957_v26  ;;  %6635 = vrot.lane.b32.xlu1 %v6634_v55, %s7239_s26  ;;  %v4076_v20 = vmul.f32 0.5, %v7102_v38 }
 0x820   : > { %v11128_v27 = vsel %vm4162_vm5, 1.0, %v12635_v24  ;;  %v5934_v37 = vpop.f32.mrf.mxu0 }
 0x821   : > { %v6654_v34 = vpack.i.bf16 %v11125_v6, %v11128_v27  ;;  %vm4165_vm6 = vcmp.gt.f32.partialorder %v4133_v35, 0.4  ;;  %v4132_v2 = vadd.f32 %v11120_v36, %v4068_v40  ;;  %v11133_v31 = vmul.f32 0.5, %v5934_v37 }
 0x822   : > { %v3967_v15 = vpop.f32.mrf.mxu0  ;;  %v11143_v55 = vsel %vm4165_vm6, 1.0, %v12635_v24 }
 0x823   : > { %vm4164_vm7 = vcmp.gt.f32.partialorder %v4132_v2, 0.4  ;;  %v4135_v0 = vadd.f32 %v11133_v31, %v4071_v48  ;;  %v11137_v18 = vmul.f32 0.5, %v3967_v15  ;;  %5225 = vrot.lane.b32.xlu1 %v11060_v50, %s7239_s26  ;;  %v7099_v50 = vld [vmem:[%s8214_s21 + $0x98] sm:$0xff]  ;;  %v4079_v48 = vmul.f32 0.5, %v7103_v8 }
 0x824   : > { %v11146_v44 = vsel %vm4164_vm7, 1.0, %v12635_v24  ;;  %v5937_v59 = vpop.f32.mrf.mxu0  ;;  %v4075_v29 = vmul.f32 0.5, %v7099_v50  ;;  %v7106_v50 = vld [vmem:[%s8214_s21 + $0xc0] sm:$0xff] }
 0x825   : > { %v6659_v42 = vpack.i.bf16 %v11143_v55, %v11146_v44  ;;  %vm4167_vm8 = vcmp.gt.f32.partialorder %v4135_v0, 0.4  ;;  %v4134_v3 = vadd.f32 %v11137_v18, %v4070_v21  ;;  %v11151_v7 = vmul.f32 0.5, %v5937_v59  ;;  %v7104_v21 = vld [vmem:[%s8214_s21 + $0xb0] sm:$0xff] }
 0x826   : > { %v3977_v53 = vpop.f32.mrf.mxu0  ;;  %v11163_v9 = vsel %vm4167_vm8, 1.0, %v12635_v24  ;;  %v4078_v37 = vmul.f32 0.5, %v7104_v21 }
 0x827   : > { %vm4166_vm0 = vcmp.gt.f32.partialorder %v4134_v3, 0.4  ;;  %v4137_v13 = vadd.f32 %v11151_v7, %v4073_v19  ;;  %v11155_v45 = vmul.f32 0.5, %v3977_v53  ;;  %6640 = vrot.lane.b32.xlu1 %v6639_v57, %s7239_s26  ;;  %v4077_v57 = vmul.f32 0.5, %v7101_v52 }
 0x828   : > { %v11166_v43 = vsel %vm4166_vm0, 1.0, %v12635_v24  ;;  %v5940_v51 = vpop.f32.mrf.mxu0 }
 0x829   : > { %v6664_v33 = vpack.i.bf16 %v11163_v9, %v11166_v43  ;;  %vm4169_vm12 = vcmp.gt.f32.partialorder %v4137_v13, 0.4  ;;  %v4136_v25 = vadd.f32 %v11155_v45, %v4072_v47  ;;  %v11171_v54 = vmul.f32 0.5, %v5940_v51  ;;  %v7105_v47 = vld [vmem:[%s8214_s21 + $0xc8] sm:$0xff] }
 0x82a   : > { %v3987_v32 = vpop.f32.mrf.mxu0  ;;  %v11179_v49 = vsel %vm4169_vm12, 1.0, %v12635_v24  ;;  %v4081_v59 = vmul.f32 0.5, %v7105_v47 }
 0x82b   : > { %vm4168_vm9 = vcmp.gt.f32.partialorder %v4136_v25, 0.4  ;;  %v4139_v58 = vadd.f32 %v11171_v54, %v4075_v29  ;;  %v4106_v63 = vmul.f32 0.5, %v3987_v32  ;;  %5229 = vrot.lane.b32.xlu1 %v11068_v56, %s7239_s26  ;;  %v4080_v29 = vmul.f32 0.5, %v7106_v50  ;;  %v7111_v50 = vld [vmem:[%s8214_s21 + $0xf8] sm:$0xff] }
 0x82c   : > { %v11182_v5 = vsel %vm4168_vm9, 1.0, %v12635_v24  ;;  %v5943_v40 = vpop.f32.mrf.mxu0  ;;  %vm5345_vm9 = vcmask 130048  }
 0x82d   : > { %v6669_v39 = vpack.i.bf16 %v11179_v49, %v11182_v5  ;;  %vm4171_vm10 = vcmp.gt.f32.partialorder %v4139_v58, 0.4  ;;  %v4138_v46 = vadd.f32 %v4106_v63, %v4074_v62  ;;  %v11186_v26 = vmul.f32 0.5, %v5943_v40  ;;  %5253 = vrot.lane.b32.xlu0 %v4106_v63, %s7239_s26  ;;  %v7108_v58 = vld [vmem:[%s8214_s21 + $0xd0] sm:$0xff] }
 0x82e   : > { %v3997_v56 = vpop.f32.mrf.mxu0  ;;  %v11195_v2 = vsel %vm4171_vm10, 1.0, %v12635_v24  ;;  %v4082_v63 = vmul.f32 0.5, %v7108_v58  ;;  %vm5378_vm10 = vcmask 138240  }
 0x82f   : > { %vm4170_vm11 = vcmp.gt.f32.partialorder %v4138_v46, 0.4  ;;  %v4141_v35 = vadd.f32 %v11186_v26, %v4077_v57  ;;  %v4108_v61 = vmul.f32 0.5, %v3997_v56  ;;  %5235 = vrot.lane.b32.xlu1 %v11082_v30, %s7239_s26 }
 0x830   : > { %v11198_v15 = vsel %vm4170_vm11, 1.0, %v12635_v24  ;;  %v5946_v22 = vpop.f32.mrf.mxu0 }
 0x831   : > { %v6674_v19 = vpack.i.bf16 %v11195_v2, %v11198_v15  ;;  %vm4173_vm13 = vcmp.gt.f32.partialorder %v4141_v35, 0.4  ;;  %v4140_v0 = vadd.f32 %v4108_v61, %v4076_v20  ;;  %v11202_v23 = vmul.f32 0.5, %v5946_v22  ;;  %5257 = vrot.lane.b32.xlu0 %v4108_v61, %s7239_s26 }
 0x832   : > { %v4007_v30 = vpop.f32.mrf.mxu0  ;;  %v11213_v13 = vsel %vm4173_vm13, 1.0, %v12635_v24 }
 0x833   : > { %vm4172_vm14 = vcmp.gt.f32.partialorder %v4140_v0, 0.4  ;;  %v4143_v3 = vadd.f32 %v11202_v23, %v4079_v48  ;;  %v4110_v53 = vmul.f32 0.5, %v4007_v30  ;;  %6645 = vrot.lane.b32.xlu1 %v6644_v16, %s7239_s26  ;;  %v4083_v16 = vmul.f32 0.5, %v7107_v28  ;;  %v7109_v48 = vld [vmem:[%s8214_s21 + $0xe8] sm:$0xff] }
 0x834   : > { %v11216_v60 = vsel %vm4172_vm14, 1.0, %v12635_v24  ;;  %v5949_v62 = vpop.f32.mrf.mxu0  ;;  %v4085_v35 = vmul.f32 0.5, %v7109_v48 }
 0x835   : > { %v6679_v51 = vpack.i.bf16 %v11213_v13, %v11216_v60  ;;  %vm4175_vm15 = vcmp.gt.f32.partialorder %v4143_v3, 0.4  ;;  %v4142_v25 = vadd.f32 %v4110_v53, %v4078_v37  ;;  %v11220_v32 = vmul.f32 0.5, %v5949_v62  ;;  %5261 = vrot.lane.b32.xlu0 %v4110_v53, %s7239_s26  ;;  %v7110_v37 = vld [vmem:[%s8214_s21 + $0xe0] sm:$0xff] }
 0x836   : > { %v4017_v11 = vpop.f32.mrf.mxu0  ;;  %v11229_v38 = vsel %vm4175_vm15, 1.0, %v12635_v24  ;;  %v4084_v22 = vmul.f32 0.5, %v7110_v37 }
 0x837   : > { %vm4174_vm1 = vcmp.gt.f32.partialorder %v4142_v25, 0.4  ;;  %v4145_v52 = vadd.f32 %v11220_v32, %v4081_v59  ;;  %v4112_v57 = vmul.f32 0.5, %v4017_v11  ;;  %5233 = vrot.lane.b32.xlu1 %v11086_v17, %s7239_s26  ;;  %v7112_v11 = vld [vmem:[%s8214_s21 + $0xf0] sm:$0xff]  ;;  %s7240_s21 = smov [#allocation2]  }
 0x838   : > { %v11232_v20 = vsel %vm4174_vm1, 1.0, %v12635_v24  ;;  %v5952_v40 = vpop.f32.mrf.mxu0  ;;  %v4086_v28 = vmul.f32 0.5, %v7112_v11  ;;  %s7180_s27 = sshll.u32 %s7240_s21, 4  ;;  %s7181_s27 = int_to_ptr.vmem [resolvable:$false] %s7180_s27 }
 0x839   : > { %v6684_v46 = vpack.i.bf16 %v11229_v38, %v11232_v20  ;;  %vm4177_vm2 = vcmp.gt.f32.partialorder %v4145_v52, 0.4  ;;  %v4144_v56 = vadd.f32 %v4112_v57, %v4080_v29  ;;  %v11236_v8 = vmul.f32 0.5, %v5952_v40  ;;  %5265 = vrot.lane.b32.xlu0 %v4112_v57, %s7239_s26 }
 0x83a   : > { %v4027_v17 = vpop.f32.mrf.mxu0  ;;  %v11245_v0 = vsel %vm4177_vm2, 1.0, %v12635_v24  ;;  %v4087_v29 = vmul.f32 0.5, %v7111_v50 }
 0x83b   : > { %vm4176_vm4 = vcmp.gt.f32.partialorder %v4144_v56, 0.4  ;;  %v4147_v61 = vadd.f32 %v11236_v8, %v4083_v16  ;;  %v4114_v21 = vmul.f32 0.5, %v4027_v17  ;;  %5239 = vrot.lane.b32.xlu1 %v11099_v10, %s7239_s26 }
 0x83c   : > { %v11248_v30 = vsel %vm4176_vm4, 1.0, %v12635_v24  ;;  %v5955_v47 = vpop.f32.mrf.mxu0 }
 0x83d   : > { %v6689_v59 = vpack.i.bf16 %v11245_v0, %v11248_v30  ;;  %vm4179_vm5 = vcmp.gt.f32.partialorder %v4147_v61, 0.4  ;;  %v4146_v3 = vadd.f32 %v4114_v21, %v4082_v63  ;;  %v11252_v53 = vmul.f32 0.5, %v5955_v47  ;;  %5269 = vrot.lane.b32.xlu0 %v4114_v21, %s7239_s26 }
 0x83e   : > { %v4037_v10 = vpop.f32.mrf.mxu0  ;;  %v11263_v16 = vsel %vm4179_vm5, 1.0, %v12635_v24 }
 0x83f   : > { %vm4178_vm6 = vcmp.gt.f32.partialorder %v4146_v3, 0.4  ;;  %v4149_v62 = vadd.f32 %v11252_v53, %v4085_v35  ;;  %v4116_v25 = vmul.f32 0.5, %v4037_v10  ;;  %6650 = vrot.lane.b32.xlu1 %v6649_v1, %s7239_s26 }
 0x840   : > { %v11266_v52 = vsel %vm4178_vm6, 1.0, %v12635_v24  ;;  %v5958_v57 = vpop.f32.mrf.mxu0 }
 0x841   : > { %v6694_v58 = vpack.i.bf16 %v11263_v16, %v11266_v52  ;;  %vm4181_vm7 = vcmp.gt.f32.partialorder %v4149_v62, 0.4  ;;  %v4148_v63 = vadd.f32 %v4116_v25, %v4084_v22  ;;  %v11270_v40 = vmul.f32 0.5, %v5958_v57  ;;  %5273 = vrot.lane.b32.xlu0 %v4116_v25, %s7239_s26  ;;  %v12668_v52 = vld [vmem:[#allocation6_spill] sm:$0xff] }
 0x842   : > { %v4047_v4 = vpop.f32.mrf.mxu0  ;;  %v11277_v56 = vsel %vm4181_vm7, 1.0, %v12635_v24 }
 0x843   : > { %vm4180_vm8 = vcmp.gt.f32.partialorder %v4148_v63, 0.4  ;;  %v4151_v14 = vadd.f32 %v11270_v40, %v4087_v29  ;;  %v4118_v1 = vmul.f32 0.5, %v4047_v4  ;;  %5237 = vrot.lane.b32.xlu1 %v11103_v12, %s7239_s26 }
 0x844   : > { %v11280_v17 = vsel %vm4180_vm8, 1.0, %v12635_v24  ;;  %v11282_v48 = vpop.f32.mrf.mxu0 }
 0x845   : > { %v6699_v35 = vpack.i.bf16 %v11277_v56, %v11280_v17  ;;  %vm4183_vm0 = vcmp.gt.f32.partialorder %v4151_v14, 0.4  ;;  %v4150_v61 = vadd.f32 %v4118_v1, %v4086_v28  ;;  %5277 = vrot.lane.b32.xlu0 %v4118_v1, %s7239_s26  ;;  %v12670_v56 = vld [vmem:[#allocation15_spill] sm:$0xff] }
 0x846   : > { %v11287_v21 = vpop.f32.mrf.mxu0  ;;  %v11292_v12 = vsel %vm4183_vm0, 1.0, %v12635_v24  ;;  %v12671_v17 = vunpack.i.l.bf16 %v12670_v56 }
 0x847   : > { %vm4182_vm12 = vcmp.gt.f32.partialorder %v4150_v61, 0.4  ;;  %5243 = vrot.lane.b32.xlu1 %v11116_v41, %s7239_s26 }
 0x848   : > { %v11295_v37 = vsel %vm4182_vm12, 1.0, %v12635_v24  ;;  %v11297_v22 = vpop.f32.mrf.mxu0 }
 0x849   : > { %v6704_v47 = vpack.i.bf16 %v11292_v12, %v11295_v37 }
 0x84a   : > { %v11301_v3 = vpop.f32.mrf.mxu0 }
 0x84b   : > { %6655 = vrot.lane.b32.xlu1 %v6654_v34, %s7239_s26 }
 0x84c   : > { %v5983_v10 = vpop.f32.mrf.mxu0 }
 0x84e   : > { %v11307_v41 = vpop.f32.mrf.mxu0 }
 0x84f   : > { %5241 = vrot.lane.b32.xlu1 %v11120_v36, %s7239_s26  ;;  %v11324_v36 = vld [vmem:[%s12149_s7] ss:$0 sm:$0xff] }
 0x850   : > { %v5986_v50 = vpop.f32.mrf.mxu0  ;;  %v4442_v5 = vadd.f32 %v5983_v10, %v11324_v36  ;;  %v4422_v15 = vadd.f32 %v11282_v48, %v11324_v36 }
 0x851   : > { %v4452_v61 = vadd.f32 %v5986_v50, %v11324_v36  ;;  %v4437_v50 = vadd.f32 %v11324_v36, %v11307_v41 }
 0x852   : > { %v4446_v29 = vpop.f32.mrf.mxu0 }
 0x853   : > { %5247 = vrot.lane.b32.xlu1 %v11133_v31, %s7239_s26 }
 0x854   : > { %v5989_v62 = vpop.f32.mrf.mxu0 }
 0x856   : > { %v4456_v25 = vpop.f32.mrf.mxu0 }
 0x857   : > { %6660 = vrot.lane.b32.xlu1 %v6659_v42, %s7239_s26  ;;  %v4457_v1 = vadd.f32 %v11324_v36, %v4456_v25  ;;  %v4427_v25 = vadd.f32 %v11324_v36, %v11301_v3 }
 0x858   : > { %v5992_v6 = vpop.f32.mrf.mxu0 }
 0x859   : > { %v4472_v43 = vadd.f32 %v5992_v6, %v11324_v36  ;;  %v4447_v6 = vadd.f32 %v11324_v36, %v4446_v29  ;;  %v4432_v29 = vadd.f32 %v11297_v22, %v11324_v36  ;;  %v4417_v22 = vadd.f32 %v11324_v36, %v11287_v21 }
 0x85a   : > { %v4466_v27 = vpop.f32.mrf.mxu0 }
 0x85b   : > { %5245 = vrot.lane.b32.xlu1 %v11137_v18, %s7239_s26  ;;  %v4467_v63 = vadd.f32 %v11324_v36, %v4466_v27  ;;  %v12673_v27 = vld [vmem:[#allocation9_spill] sm:$0xff] }
 0x85c   : > { %v5995_v34 = vpop.f32.mrf.mxu0  ;;  %v12674_v12 = vunpack.i.l.bf16 %v12673_v27  ;;  %v12675_v37 = vunpack.i.h.bf16 %v12673_v27  ;;  %v12736_v27 = vld [vmem:[#allocation24_spill] sm:$0xff] }
 0x85d   : > { %v4482_v42 = vadd.f32 %v5995_v34, %v11324_v36 }
 0x85e   : > { %v4476_v11 = vpop.f32.mrf.mxu0 }
 0x85f   : > { %5251 = vrot.lane.b32.xlu1 %v11151_v7, %s7239_s26  ;;  %v4477_v57 = vadd.f32 %v11324_v36, %v4476_v11 }
 0x860   : > { %v5998_v31 = vpop.f32.mrf.mxu0 }
 0x861   : > { %v4492_v28 = vadd.f32 %v5998_v31, %v11324_v36 }
 0x862   : > { %v4486_v55 = vpop.f32.mrf.mxu0 }
 0x863   : > { %v4487_v44 = vadd.f32 %v11324_v36, %v4486_v55  ;;  %6665 = vrot.lane.b32.xlu1 %v6664_v33, %s7239_s26  ;;  %4576 = vmatpush1.msra.mxu1 %v4492_v28  ;;  %v12682_v28 = vld [vmem:[#allocation19_spill] sm:$0xff] }
 0x864   : > { %v11332_v18 = vpop.f32.mrf.mxu0  ;;  %4577 = vmatprep.subr.mxu1 %v12635_v24  ;;  %v12683_v55 = vunpack.i.l.bf16 %v12682_v28 }
 0x865   : > { %4578 = vmatpush1.msra.mxu1 %v4487_v44  ;;  %v12684_v44 = vunpack.i.h.bf16 %v12682_v28  ;;  %v12745_v28 = vld [vmem:[#allocation30_spill] sm:$0xff] }
 0x866   : > { %v11336_v7 = vpop.f32.mrf.mxu0  ;;  %4579 = vmatprep.subr.mxu1 %v12635_v24 }
 0x867   : > { %5249 = vrot.lane.b32.xlu1 %v11155_v45, %s7239_s26  ;;  %4580 = vmatpush1.msra.mxu1 %v4482_v42  ;;  %v4462_v45 = vadd.f32 %v5989_v62, %v11324_v36  ;;  %v4497_v16 = vadd.f32 %v11324_v36, %v11336_v7 }
 0x868   : > { %v11342_v9 = vpop.f32.mrf.mxu0  ;;  %4581 = vmatprep.subr.mxu1 %v12635_v24 }
 0x869   : > { %4582 = vmatpush1.msra.mxu1 %v4477_v57  ;;  %v4512_v30 = vadd.f32 %v11342_v9, %v11324_v36  ;;  %v12688_v57 = vld [vmem:[#allocation20_spill] sm:$0xff] }
 0x86a   : > { %v11346_v33 = vpop.f32.mrf.mxu0  ;;  %4583 = vmatprep.subr.mxu1 %v12635_v24  ;;  %v12689_v9 = vunpack.i.l.bf16 %v12688_v57 }
 0x86b   : > { %5255 = vrot.lane.b32.xlu1 %v11171_v54, %s7239_s26  ;;  %4584 = vmatpush1.msra.mxu1 %v4472_v43  ;;  %v12690_v43 = vunpack.i.h.bf16 %v12688_v57  ;;  %v12751_v57 = vld [vmem:[#allocation34_spill] sm:$0xff] }
 0x86c   : > { %v11352_v4 = vpop.f32.mrf.mxu0  ;;  %4585 = vmatprep.subr.mxu1 %v12635_v24 }
 0x86d   : > { %4586 = vmatpush1.msra.mxu1 %v4467_v63 }
 0x86e   : > { %v11356_v14 = vpop.f32.mrf.mxu0  ;;  %4587 = vmatprep.subr.mxu1 %v12635_v24 }
 0x86f   : > { %6670 = vrot.lane.b32.xlu1 %v6669_v39, %s7239_s26  ;;  %4588 = vmatpush1.msra.mxu1 %v4462_v45  ;;  %v4517_v0 = vadd.f32 %v11324_v36, %v11356_v14  ;;  %v12694_v45 = vld [vmem:[#allocation21_spill] sm:$0xff] }
 0x870   : > { %v11364_v54 = vpop.f32.mrf.mxu0  ;;  %4589 = vmatprep.subr.mxu1 %v12635_v24  ;;  %v12695_v14 = vunpack.i.l.bf16 %v12694_v45 }
 0x871   : > { %4590 = vmatpush1.msra.mxu1 %v4457_v1  ;;  %v4532_v20 = vadd.f32 %v11364_v54, %v11324_v36  ;;  %v12696_v1 = vunpack.i.h.bf16 %v12694_v45  ;;  %v12697_v54 = vld [vmem:[#allocation23_spill] sm:$0xff]  ;;  %v12757_v45 = vld [vmem:[#allocation36_spill] sm:$0xff] }
 0x872   : > { %v11368_v62 = vpop.f32.mrf.mxu0  ;;  %4591 = vmatprep.subr.mxu1 %v12635_v24 }
 0x873   : > { %5259 = vrot.lane.b32.xlu1 %v11186_v26, %s7239_s26  ;;  %4592 = vmatpush1.msra.mxu1 %v4452_v61  ;;  %v12698_v61 = vunpack.i.l.bf16 %v12697_v54 }
 0x874   : > { %v6013_v49 = vpop.f32.mrf.mxu0  ;;  %4593 = vmatprep.subr.mxu1 %v12635_v24 }
 0x875   : > { %4594 = vmatpush1.msra.mxu1 %v4447_v6  ;;  %v4542_v21 = vadd.f32 %v6013_v49, %v11324_v36  ;;  %v12700_v6 = vld [vmem:[#allocation25_spill] sm:$0xff] }
 0x876   : > { %v4536_v39 = vpop.f32.mrf.mxu0  ;;  %4595 = vmatprep.subr.mxu1 %v12635_v24  ;;  %v12701_v49 = vunpack.i.l.bf16 %v12700_v6 }
 0x877   : > { %6675 = vrot.lane.b32.xlu1 %v6674_v19, %s7239_s26  ;;  %4596 = vmatpush1.msra.mxu1 %v4442_v5  ;;  %v4537_v38 = vadd.f32 %v11324_v36, %v4536_v39  ;;  %v12702_v5 = vunpack.i.h.bf16 %v12700_v6  ;;  %v12703_v39 = vld [vmem:[#allocation27_spill] sm:$0xff]  ;;  %v7113_v6 = vld [vmem:[%s7366_s28 + $0x1d8] sm:$0xff] }
 0x878   : > { %v6016_v26 = vpop.f32.mrf.mxu0  ;;  %4597 = vmatprep.subr.mxu1 %v12635_v24 }
 0x879   : > { %4598 = vmatpush1.msra.mxu1 %v4437_v50  ;;  %v12704_v50 = vunpack.i.l.bf16 %v12703_v39 }
 0x87a   : > { %v4546_v10 = vpop.f32.mrf.mxu0  ;;  %4599 = vmatprep.subr.mxu1 %v12635_v24 }
 0x87b   : > { %5263 = vrot.lane.b32.xlu1 %v11202_v23, %s7239_s26  ;;  %4600 = vmatpush1.msra.mxu1 %v4432_v29  ;;  %v12706_v29 = vld [vmem:[#allocation29_spill] sm:$0xff] }
 0x87c   : > { %v6019_v2 = vpop.f32.mrf.mxu0  ;;  %4601 = vmatprep.subr.mxu1 %v12635_v24 }
 0x87d   : > { %4602 = vmatpush1.msra.mxu1 %v4427_v25  ;;  %v4562_v13 = vadd.f32 %v6019_v2, %v11324_v36  ;;  %v12708_v25 = vunpack.i.h.bf16 %v12706_v29  ;;  %v12709_v2 = vld [vmem:[#allocation31_spill] sm:$0xff] }
 0x87e   : > { %v4556_v19 = vpop.f32.mrf.mxu0  ;;  %4603 = vmatprep.subr.mxu1 %v12635_v24 }
 0x87f   : > { %6680 = vrot.lane.b32.xlu1 %v6679_v51, %s7239_s26  ;;  %4604 = vmatpush1.msra.mxu1 %v4422_v15  ;;  %v4557_v60 = vadd.f32 %v11324_v36, %v4556_v19  ;;  %v4552_v51 = vadd.f32 %v6016_v26, %v11324_v36  ;;  %v12705_v26 = vunpack.i.h.bf16 %v12703_v39  ;;  %v12710_v15 = vunpack.i.l.bf16 %v12709_v2 }
 0x880   : > { %v6022_v23 = vpop.f32.mrf.mxu0  ;;  %4605 = vmatprep.subr.mxu1 %v12635_v24  ;;  %v12711_v19 = vunpack.i.h.bf16 %v12709_v2 }
 0x881   : > { %v4572_v3 = vadd.f32 %v6022_v23, %v11324_v36  ;;  %4606 = vmatpush1.msra.mxu1 %v4417_v22  ;;  %v12712_v22 = vld [vmem:[#allocation33_spill] sm:$0xff] }
 0x882   : > { %v4566_v48 = vpop.f32.mrf.mxu0  ;;  %4607 = vmatprep.subr.mxu1 %v12635_v24  ;;  %v12713_v23 = vunpack.i.l.bf16 %v12712_v22 }
 0x883   : > { %v4567_v41 = vadd.f32 %v11324_v36, %v4566_v48  ;;  %5267 = vrot.lane.b32.xlu1 %v11220_v32, %s7239_s26  ;;  %4608 = vmatpush2.msra.mxu1 %v4572_v3  ;;  %v4547_v32 = vadd.f32 %v11324_v36, %v4546_v10  ;;  %v12707_v10 = vunpack.i.l.bf16 %v12706_v29  ;;  %v12714_v3 = vunpack.i.h.bf16 %v12712_v22  ;;  %v12715_v48 = vld [vmem:[#allocation7_spill] sm:$0xff] }
 0x884   : > { %4609 = vmatprep.subr.mxu1 %v12635_v24 }
 0x885   : > { %4610 = vmatpush2.msra.mxu1 %v4567_v41  ;;  %v12716_v41 = vunpack.i.l.bf16 %v12715_v48 }
 0x886   : > { %4611 = vmatprep.subr.mxu1 %v12635_v24 }
 0x887   : > { %6685 = vrot.lane.b32.xlu1 %v6684_v46, %s7239_s26  ;;  %4612 = vmatpush2.msra.mxu1 %v4562_v13  ;;  %v4527_v46 = vadd.f32 %v11324_v36, %v11368_v62  ;;  %v12699_v62 = vunpack.i.h.bf16 %v12697_v54  ;;  %v12717_v13 = vunpack.i.h.bf16 %v12715_v48  ;;  %v12760_v54 = vld [vmem:[#allocation37_spill] sm:$0xff] }
 0x888   : > { %4613 = vmatprep.subr.mxu1 %v12635_v24 }
 0x889   : > { %4614 = vmatpush2.msra.mxu1 %v4557_v60  ;;  %v12718_v60 = vld [vmem:[#allocation10_spill] sm:$0xff] }
 0x88a   : > { %4615 = vmatprep.subr.mxu1 %v12635_v24 }
 0x88b   : > { %5271 = vrot.lane.b32.xlu1 %v11236_v8, %s7239_s26  ;;  %4616 = vmatpush2.msra.mxu1 %v4552_v51  ;;  %v4522_v8 = vadd.f32 %v11352_v4, %v11324_v36  ;;  %v12719_v51 = vunpack.i.l.bf16 %v12718_v60 }
 0x88c   : > { %4617 = vmatprep.subr.mxu1 %v12635_v24 }
 0x88d   : > { %4618 = vmatpush2.msra.mxu1 %v4547_v32  ;;  %v12720_v32 = vunpack.i.h.bf16 %v12718_v60 }
 0x88e   : > { %4619 = vmatprep.subr.mxu1 %v12635_v24 }
 0x88f   : > { %6690 = vrot.lane.b32.xlu1 %v6689_v59, %s7239_s26  ;;  %4620 = vmatpush2.msra.mxu1 %v4542_v21  ;;  %v4507_v59 = vadd.f32 %v11324_v36, %v11346_v33  ;;  %v12691_v33 = vld [vmem:[#allocation13_spill] sm:$0xff]  ;;  %v12721_v21 = vld [vmem:[#allocation8_spill] sm:$0xff] }
 0x890   : > { %4621 = vmatprep.subr.mxu1 %v12635_v24  ;;  %v12692_v63 = vunpack.i.l.bf16 %v12691_v33  ;;  %v12693_v4 = vunpack.i.h.bf16 %v12691_v33  ;;  %v12754_v33 = vld [vmem:[#allocation35_spill] sm:$0xff] }
 0x891   : > { %4622 = vmatpush2.msra.mxu1 %v4537_v38  ;;  %v12722_v38 = vunpack.i.l.bf16 %v12721_v21 }
 0x892   : > { %4623 = vmatprep.subr.mxu1 %v12635_v24 }
 0x893   : > { %5275 = vrot.lane.b32.xlu1 %v11252_v53, %s7239_s26  ;;  %4624 = vmatpush2.msra.mxu1 %v4532_v20  ;;  %v4502_v53 = vadd.f32 %v11332_v18, %v11324_v36  ;;  %v12679_v36 = vld [vmem:[#allocation16_spill] sm:$0xff]  ;;  %v12685_v18 = vld [vmem:[#allocation17_spill] sm:$0xff]  ;;  %v12723_v20 = vunpack.i.h.bf16 %v12721_v21 }
 0x894   : > { %4625 = vmatprep.subr.mxu1 %v12635_v24  ;;  %v12680_v31 = vunpack.i.l.bf16 %v12679_v36  ;;  %v12686_v42 = vunpack.i.l.bf16 %v12685_v18  ;;  %v12687_v7 = vunpack.i.h.bf16 %v12685_v18  ;;  %v12748_v18 = vld [vmem:[#allocation32_spill] sm:$0xff] }
 0x895   : > { %4626 = vmatpush2.msra.mxu1 %v4527_v46  ;;  %v12724_v46 = vld [vmem:[#allocation11_spill] sm:$0xff] }
 0x896   : > { %4627 = vmatprep.subr.mxu1 %v12635_v24 }
 0x897   : > { %6695 = vrot.lane.b32.xlu1 %v6694_v58, %s7239_s26  ;;  %4628 = vmatpush2.msra.mxu1 %v4522_v8  ;;  %v12669_v58 = vunpack.i.h.bf16 %v12668_v52  ;;  %v12725_v8 = vunpack.i.l.bf16 %v12724_v46 }
 0x898   : > { %4629 = vmatprep.subr.mxu1 %v12635_v24 }
 0x899   : > { %4630 = vmatpush2.msra.mxu1 %v4517_v0  ;;  %v12726_v0 = vunpack.i.h.bf16 %v12724_v46 }
 0x89a   : > { %4631 = vmatprep.subr.mxu1 %v12635_v24 }
 0x89b   : > { %6700 = vrot.lane.b32.xlu1 %v6699_v35, %s7239_s26  ;;  %4632 = vmatpush2.msra.mxu1 %v4512_v30  ;;  %v12672_v35 = vunpack.i.h.bf16 %v12670_v56  ;;  %v12727_v30 = vld [vmem:[#allocation12_spill] sm:$0xff]  ;;  %v12733_v56 = vld [vmem:[#allocation22_spill] sm:$0xff] }
 0x89c   : > { %4633 = vmatprep.subr.mxu1 %v12635_v24 }
 0x89d   : > { %4634 = vmatpush2.msra.mxu1 %v4507_v59  ;;  %v12728_v59 = vunpack.i.l.bf16 %v12727_v30 }
 0x89e   : > { %4635 = vmatprep.subr.mxu1 %v12635_v24 }
 0x89f   : > { %4636 = vmatpush2.msra.mxu1 %v4502_v53  ;;  %6705 = vrot.lane.b32.xlu1 %v6704_v47, %s7239_s26  ;;  %v12676_v47 = vld [vmem:[#allocation18_spill] sm:$0xff]  ;;  %v12729_v53 = vunpack.i.h.bf16 %v12727_v30 }
 0x8a0   : > { %4637 = vmatprep.subr.mxu1 %v12635_v24  ;;  %v12677_v34 = vunpack.i.l.bf16 %v12676_v47  ;;  %v12678_v11 = vunpack.i.h.bf16 %v12676_v47  ;;  %v12739_v47 = vld [vmem:[#allocation26_spill] sm:$0xff] }
 0x8a1   : > { %4638 = vmatpush2.msra.mxu1 %v4497_v16  ;;  %v12730_v16 = vld [vmem:[#allocation14_spill] sm:$0xff] }
 0x8a2   : > { %4640 = vmatmul.mubr.f32.vlgmr.msra.gmra.mxu1 %v12669_v58  ;;  %6023 = vmatprep.subr.mxu1 %v12635_v24  ;;  %v12731_v52 = vunpack.i.l.bf16 %v12730_v16  ;;  %v12732_v58 = vunpack.i.h.bf16 %v12730_v16 }
 0x8a3   : > { %4644 = vmatprep.mubr.f32.mxu1 %v12671_v17  ;;  %5279 = vrot.lane.b32.xlu1 %v11270_v40, %s7239_s26  ;;  %v12681_v40 = vunpack.i.h.bf16 %v12679_v36  ;;  %v12734_v17 = vunpack.i.l.bf16 %v12733_v56  ;;  %v12742_v36 = vld [vmem:[#allocation28_spill] sm:$0xff] }
 0x8a6   : > { %4645 = vmatmul.mubr.f32.gmra.mxu1 %v12672_v35  ;;  %v12735_v35 = vunpack.i.h.bf16 %v12733_v56 }
 0x8a7   : > { %4649 = vmatprep.mubr.f32.mxu1 %v12674_v12  ;;  %v12737_v12 = vunpack.i.l.bf16 %v12736_v27 }
 0x8aa   : > { %4650 = vmatmul.mubr.f32.gmra.mxu1 %v12675_v37  ;;  %v12738_v37 = vunpack.i.h.bf16 %v12736_v27 }
 0x8ab   : > { %4654 = vmatprep.mubr.f32.mxu1 %v12677_v34  ;;  %v12740_v34 = vunpack.i.l.bf16 %v12739_v47 }
 0x8ae   : > { %4655 = vmatmul.mubr.f32.gmra.mxu1 %v12678_v11  ;;  %v12741_v11 = vunpack.i.h.bf16 %v12739_v47 }
 0x8af   : > { %4659 = vmatprep.mubr.f32.mxu1 %v12680_v31  ;;  %v12743_v31 = vunpack.i.l.bf16 %v12742_v36 }
 0x8b2   : > { %4660 = vmatmul.mubr.f32.gmra.mxu1 %v12681_v40  ;;  %v12744_v40 = vunpack.i.h.bf16 %v12742_v36 }
 0x8b3   : > { %4664 = vmatprep.mubr.f32.mxu1 %v12683_v55  ;;  %v12746_v55 = vunpack.i.l.bf16 %v12745_v28 }
 0x8b6   : > { %4665 = vmatmul.mubr.f32.gmra.mxu1 %v12684_v44  ;;  %v12747_v44 = vunpack.i.h.bf16 %v12745_v28 }
 0x8b7   : > { %4669 = vmatprep.mubr.f32.mxu1 %v12686_v42  ;;  %v12749_v42 = vunpack.i.l.bf16 %v12748_v18 }
 0x8ba   : > { %4670 = vmatmul.mubr.f32.gmra.mxu1 %v12687_v7  ;;  %v12750_v7 = vunpack.i.h.bf16 %v12748_v18 }
 0x8bb   : > { %4674 = vmatprep.mubr.f32.mxu1 %v12689_v9  ;;  %v12752_v9 = vunpack.i.l.bf16 %v12751_v57 }
 0x8be   : > { %4675 = vmatmul.mubr.f32.gmra.mxu1 %v12690_v43  ;;  %v12753_v43 = vunpack.i.h.bf16 %v12751_v57 }
 0x8bf   : > { %4679 = vmatprep.mubr.f32.mxu1 %v12692_v63  ;;  %v12755_v63 = vunpack.i.l.bf16 %v12754_v33 }
 0x8c2   : > { %4680 = vmatmul.mubr.f32.gmra.mxu1 %v12693_v4  ;;  %v12756_v4 = vunpack.i.h.bf16 %v12754_v33 }
 0x8c3   : > { %4684 = vmatprep.mubr.f32.mxu1 %v12695_v14  ;;  %v12758_v14 = vunpack.i.l.bf16 %v12757_v45 }
 0x8c6   : > { %4685 = vmatmul.mubr.f32.gmra.mxu1 %v12696_v1  ;;  %v12759_v1 = vunpack.i.h.bf16 %v12757_v45 }
 0x8c7   : > { %4689 = vmatprep.mubr.f32.mxu1 %v12698_v61  ;;  %v12761_v61 = vunpack.i.l.bf16 %v12760_v54 }
 0x8ca   : > { %4690 = vmatmul.mubr.f32.gmra.mxu1 %v12699_v62  ;;  %v12762_v62 = vunpack.i.h.bf16 %v12760_v54 }
 0x8cb   : > { %4694 = vmatprep.mubr.f32.mxu1 %v12701_v49 }
 0x8ce   : > { %4695 = vmatmul.mubr.f32.gmra.mxu1 %v12702_v5 }
 0x8cf   : > { %4699 = vmatprep.mubr.f32.mxu1 %v12704_v50 }
 0x8d2   : > { %4700 = vmatmul.mubr.f32.gmra.mxu1 %v12705_v26 }
 0x8d3   : > { %4704 = vmatprep.mubr.f32.mxu1 %v12707_v10 }
 0x8d6   : > { %4705 = vmatmul.mubr.f32.gmra.mxu1 %v12708_v25 }
 0x8d7   : > { %4709 = vmatprep.mubr.f32.mxu1 %v12710_v15 }
 0x8da   : > { %4710 = vmatmul.mubr.f32.gmra.mxu1 %v12711_v19 }
 0x8db   : > { %4714 = vmatprep.mubr.f32.mxu1 %v12713_v23 }
 0x8de   : > { %4715 = vmatmul.mubr.f32.gmra.mxu1 %v12714_v3 }
 0x8df   : > { %4719 = vmatprep.mubr.f32.mxu1 %v12716_v41 }
 0x8e2   : > { %4720 = vmatmul.mubr.f32.gmra.mxu1 %v12717_v13 }
 0x8e3   : > { %4724 = vmatprep.mubr.f32.mxu1 %v12719_v51 }
 0x8e6   : > { %4725 = vmatmul.mubr.f32.gmra.mxu1 %v12720_v32 }
 0x8e7   : > { %4729 = vmatprep.mubr.f32.mxu1 %v12722_v38 }
 0x8ea   : > { %4730 = vmatmul.mubr.f32.gmra.mxu1 %v12723_v20 }
 0x8eb   : > { %4734 = vmatprep.mubr.f32.mxu1 %v12725_v8 }
 0x8ee   : > { %4735 = vmatmul.mubr.f32.gmra.mxu1 %v12726_v0 }
 0x8ef   : > { %4739 = vmatprep.mubr.f32.mxu1 %v12728_v59 }
 0x8f2   : > { %4740 = vmatmul.mubr.f32.gmra.mxu1 %v12729_v53 }
 0x8f3   : > { %4744 = vmatprep.mubr.f32.mxu1 %v12731_v52 }
 0x8f6   : > { %4745 = vmatmul.mubr.f32.gmra.mxu1 %v12732_v58 }
 0x8f7   : > { %4749 = vmatprep.mubr.f32.mxu1 %v12734_v17 }
 0x8fa   : > { %4750 = vmatmul.mubr.f32.gmra.mxu1 %v12735_v35 }
 0x8fb   : > { %4754 = vmatprep.mubr.f32.mxu1 %v12737_v12 }
 0x8fe   : > { %4755 = vmatmul.mubr.f32.gmra.mxu1 %v12738_v37 }
 0x8ff   : > { %4759 = vmatprep.mubr.f32.mxu1 %v12740_v34 }
 0x902   : > { %4760 = vmatmul.mubr.f32.gmra.mxu1 %v12741_v11 }
 0x903   : > { %4764 = vmatprep.mubr.f32.mxu1 %v12743_v31 }
 0x906   : > { %4765 = vmatmul.mubr.f32.gmra.mxu1 %v12744_v40 }
 0x907   : > { %4769 = vmatprep.mubr.f32.mxu1 %v12746_v55 }
 0x90a   : > { %4770 = vmatmul.mubr.f32.gmra.mxu1 %v12747_v44 }
 0x90b   : > { %4774 = vmatprep.mubr.f32.mxu1 %v12749_v42 }
 0x90e   : > { %4775 = vmatmul.mubr.f32.gmra.mxu1 %v12750_v7 }
 0x90f   : > { %4779 = vmatprep.mubr.f32.mxu1 %v12752_v9 }
 0x912   : > { %4780 = vmatmul.mubr.f32.gmra.mxu1 %v12753_v43 }
 0x913   : > { %4784 = vmatprep.mubr.f32.mxu1 %v12755_v63 }
 0x916   : > { %4785 = vmatmul.mubr.f32.gmra.mxu1 %v12756_v4 }
 0x917   : > { %4789 = vmatprep.mubr.f32.mxu1 %v12758_v14 }
 0x91a   : > { %4790 = vmatmul.mubr.f32.gmra.mxu1 %v12759_v1 }
 0x91b   : > { %4794 = vmatprep.mubr.f32.mxu1 %v12761_v61 }
 0x91e   : > { %4795 = vmatmul.mubr.f32.gmra.mxu1 %v12762_v62  ;;  %v11672_v62 = vpop.permute.xlu1 %5219 }
 0x91f   : > { %5009 = vmatprep.mubr.f32.mxu1 %v7113_v6 }
 0x962   : > { %v11598_v49 = vpop.f32.mrf.mxu1 }
 0x964   : > { %v4643_v5 = vpop.f32.mrf.mxu1 }
 0x966   : > { %v11600_v39 = vpop.f32.mrf.mxu1 }
 0x968   : > { %v4648_v50 = vpop.f32.mrf.mxu1 }
 0x96a   : > { %v11602_v26 = vpop.f32.mrf.mxu1 }
 0x96c   : > { %v4653_v29 = vpop.f32.mrf.mxu1 }
 0x96e   : > { %v11604_v10 = vpop.f32.mrf.mxu1 }
 0x970   : > { %v4658_v25 = vpop.f32.mrf.mxu1 }
 0x971   : > { %v7114_v25 = vld [vmem:[%s7366_s28] sm:$0xff] }
 0x972   : > { %v11606_v2 = vpop.f32.mrf.mxu1 }
 0x974   : > { %v4663_v15 = vpop.f32.mrf.mxu1 }
 0x976   : > { %v11608_v19 = vpop.f32.mrf.mxu1 }
 0x978   : > { %v4668_v22 = vpop.f32.mrf.mxu1 }
 0x979   : > { %v7117_v22 = vld [vmem:[%s7366_s28 + $0x1e8] sm:$0xff] }
 0x97a   : > { %v11610_v23 = vpop.f32.mrf.mxu1 }
 0x97c   : > { %v4673_v3 = vpop.f32.mrf.mxu1 }
 0x97d   : > { %v7120_v3 = vld [vmem:[%s7366_s28 + $0x28] sm:$0xff] }
 0x97e   : > { %v4676_v48 = vpop.f32.mrf.mxu1 }
 0x980   : > { %v4678_v41 = vpop.f32.mrf.mxu1 }
 0x982   : > { %v4681_v13 = vpop.f32.mrf.mxu1 }
 0x984   : > { %v4683_v60 = vpop.f32.mrf.mxu1 }
 0x985   : > { %v7123_v60 = vld [vmem:[%s7366_s28 + $0x1f0] sm:$0xff] }
 0x986   : > { %v4686_v51 = vpop.f32.mrf.mxu1 }
 0x988   : > { %v4688_v32 = vpop.f32.mrf.mxu1 }
 0x989   : > { %v7125_v32 = vld [vmem:[%s7366_s28 + $0x30] sm:$0xff] }
 0x98a   : > { %v4691_v21 = vpop.f32.mrf.mxu1 }
 0x98c   : > { %v4693_v38 = vpop.f32.mrf.mxu1 }
 0x98d   : > { %v7126_v38 = vld [vmem:[%s7366_s28 + $0x48] sm:$0xff] }
 0x98e   : > { %v4696_v20 = vpop.f32.mrf.mxu1 }
 0x990   : > { %v4698_v46 = vpop.f32.mrf.mxu1 }
 0x991   : > { %v7128_v46 = vld [vmem:[%s7366_s28 + $0x58] sm:$0xff] }
 0x992   : > { %v4701_v8 = vpop.f32.mrf.mxu1 }
 0x994   : > { %v4703_v0 = vpop.f32.mrf.mxu1 }
 0x995   : > { %v7129_v0 = vld [vmem:[%s7366_s28 + $0x50] sm:$0xff] }
 0x996   : > { %v4706_v30 = vpop.f32.mrf.mxu1 }
 0x998   : > { %v4708_v59 = vpop.f32.mrf.mxu1 }
 0x999   : > { %v7131_v59 = vld [vmem:[%s7366_s28 + $0x60] sm:$0xff] }
 0x99a   : > { %v4711_v53 = vpop.f32.mrf.mxu1 }
 0x99c   : > { %v4713_v16 = vpop.f32.mrf.mxu1 }
 0x99d   : > { %v7132_v16 = vld [vmem:[%s7366_s28 + $0x78] sm:$0xff] }
 0x99e   : > { %v4716_v52 = vpop.f32.mrf.mxu1 }
 0x99f   : > { %4801 = vmatpush1.msra.mxu0 %v4716_v52  ;;  %6055 = vmatpush1.msra.mxu1 %v4716_v52  ;;  %v7133_v52 = vld [vmem:[%s7366_s28 + $0x70] sm:$0xff] }
 0x9a0   : > { %v4718_v58 = vpop.f32.mrf.mxu1  ;;  %4802 = vmatprep.subr.mxu0 %v12635_v24  ;;  %6024 = vmatprep.subr.mxu1 %v12635_v24 }
 0x9a1   : > { %4803 = vmatpush1.msra.mxu0 %v4711_v53  ;;  %6056 = vmatpush1.msra.mxu1 %v4711_v53  ;;  %v7134_v58 = vld [vmem:[%s7366_s28 + $0x88] sm:$0xff] }
 0x9a2   : > { %v11614_v56 = vpop.f32.mrf.mxu1  ;;  %4804 = vmatprep.subr.mxu0 %v12635_v24  ;;  %6025 = vmatprep.subr.mxu1 %v12635_v24 }
 0x9a3   : > { %4805 = vmatpush1.msra.mxu0 %v4706_v30  ;;  %6057 = vmatpush1.msra.mxu1 %v4706_v30  ;;  %v7130_v30 = vld [vmem:[%s7366_s28 + $0x68] sm:$0xff] }
 0x9a4   : > { %v4723_v17 = vpop.f32.mrf.mxu1  ;;  %4806 = vmatprep.subr.mxu0 %v12635_v24  ;;  %6026 = vmatprep.subr.mxu1 %v12635_v24 }
 0x9a5   : > { %4807 = vmatpush1.msra.mxu0 %v4701_v8  ;;  %6058 = vmatpush1.msra.mxu1 %v4701_v8  ;;  %v7135_v17 = vld [vmem:[%s7366_s28 + $0x80] sm:$0xff] }
 0x9a6   : > { %v11620_v35 = vpop.f32.mrf.mxu1  ;;  %4808 = vmatprep.subr.mxu0 %v12635_v24  ;;  %6027 = vmatprep.subr.mxu1 %v12635_v24 }
 0x9a7   : > { %4809 = vmatpush1.msra.mxu0 %v4696_v20  ;;  %6059 = vmatpush1.msra.mxu1 %v4696_v20  ;;  %v7127_v20 = vld [vmem:[%s7366_s28 + $0x40] sm:$0xff] }
 0x9a8   : > { %v4728_v27 = vpop.f32.mrf.mxu1  ;;  %4810 = vmatprep.subr.mxu0 %v12635_v24  ;;  %6028 = vmatprep.subr.mxu1 %v12635_v24 }
 0x9a9   : > { %4811 = vmatpush1.msra.mxu0 %v4691_v21  ;;  %6060 = vmatpush1.msra.mxu1 %v4691_v21  ;;  %v7137_v27 = vld [vmem:[%s7366_s28 + $0x90] sm:$0xff] }
 0x9aa   : > { %v11626_v12 = vpop.f32.mrf.mxu1  ;;  %4812 = vmatprep.subr.mxu0 %v12635_v24  ;;  %6029 = vmatprep.subr.mxu1 %v12635_v24 }
 0x9ab   : > { %4813 = vmatpush1.msra.mxu0 %v4686_v51  ;;  %6061 = vmatpush1.msra.mxu1 %v4686_v51  ;;  %v7124_v51 = vld [vmem:[%s7366_s28 + $0x38] sm:$0xff] }
 0x9ac   : > { %v4733_v37 = vpop.f32.mrf.mxu1  ;;  %4814 = vmatprep.subr.mxu0 %v12635_v24  ;;  %6030 = vmatprep.subr.mxu1 %v12635_v24 }
 0x9ad   : > { %4815 = vmatpush1.msra.mxu0 %v4681_v13  ;;  %6062 = vmatpush1.msra.mxu1 %v4681_v13  ;;  %v7122_v13 = vld [vmem:[%s7366_s28 + $0x20] sm:$0xff]  ;;  %v7138_v37 = vld [vmem:[%s7366_s28 + $0xa8] sm:$0xff] }
 0x9ae   : > { %v11632_v47 = vpop.f32.mrf.mxu1  ;;  %4816 = vmatprep.subr.mxu0 %v12635_v24  ;;  %6031 = vmatprep.subr.mxu1 %v12635_v24 }
 0x9af   : > { %4817 = vmatpush1.msra.mxu0 %v4676_v48  ;;  %6063 = vmatpush1.msra.mxu1 %v4676_v48  ;;  %v7121_v48 = vld [vmem:[%s7366_s28 + $0x1f8] sm:$0xff] }
 0x9b0   : > { %v4738_v34 = vpop.f32.mrf.mxu1  ;;  %4818 = vmatprep.subr.mxu0 %v12635_v24  ;;  %6032 = vmatprep.subr.mxu1 %v12635_v24 }
 0x9b1   : > { %4819 = vmatpush1.msra.mxu0 %v11610_v23  ;;  %6064 = vmatpush1.msra.mxu1 %v11610_v23  ;;  %v7119_v23 = vld [vmem:[%s7366_s28 + $0x1e0] sm:$0xff]  ;;  %v7140_v34 = vld [vmem:[%s7366_s28 + $0xb8] sm:$0xff] }
 0x9b2   : > { %v11640_v11 = vpop.f32.mrf.mxu1  ;;  %4820 = vmatprep.subr.mxu0 %v12635_v24  ;;  %6033 = vmatprep.subr.mxu1 %v12635_v24 }
 0x9b3   : > { %4821 = vmatpush1.msra.mxu0 %v11608_v19  ;;  %6065 = vmatpush1.msra.mxu1 %v11608_v19  ;;  %v7116_v19 = vld [vmem:[%s7366_s28 + $0x18] sm:$0xff] }
 0x9b4   : > { %v4743_v36 = vpop.f32.mrf.mxu1  ;;  %4822 = vmatprep.subr.mxu0 %v12635_v24  ;;  %6034 = vmatprep.subr.mxu1 %v12635_v24 }
 0x9b5   : > { %4823 = vmatpush1.msra.mxu0 %v11606_v2  ;;  %6066 = vmatpush1.msra.mxu1 %v11606_v2  ;;  %v7115_v2 = vld [vmem:[%s7366_s28 + $0x1d0] sm:$0xff] }
 0x9b6   : > { %v11650_v31 = vpop.f32.mrf.mxu1  ;;  %4824 = vmatprep.subr.mxu0 %v12635_v24  ;;  %6035 = vmatprep.subr.mxu1 %v12635_v24  ;;  %v7141_v36 = vld [vmem:[%s7366_s28 + $0xb0] sm:$0xff] }
 0x9b7   : > { %4825 = vmatpush1.msra.mxu0 %v11604_v10  ;;  %6067 = vmatpush1.msra.mxu1 %v11604_v10 }
 0x9b8   : > { %v4748_v40 = vpop.f32.mrf.mxu1  ;;  %4826 = vmatprep.subr.mxu0 %v12635_v24  ;;  %6036 = vmatprep.subr.mxu1 %v12635_v24 }
 0x9b9   : > { %4827 = vmatpush1.msra.mxu0 %v11602_v26  ;;  %6068 = vmatpush1.msra.mxu1 %v11602_v26  ;;  %v7143_v40 = vld [vmem:[%s7366_s28 + $0xc0] sm:$0xff] }
 0x9ba   : > { %v11660_v28 = vpop.f32.mrf.mxu1  ;;  %4828 = vmatprep.subr.mxu0 %v12635_v24  ;;  %6037 = vmatprep.subr.mxu1 %v12635_v24 }
 0x9bb   : > { %4829 = vmatpush1.msra.mxu0 %v11600_v39  ;;  %6069 = vmatpush1.msra.mxu1 %v11600_v39  ;;  %v11676_v39 = vpop.permute.xlu1 %5217 }
 0x9bc   : > { %v4753_v55 = vpop.f32.mrf.mxu1  ;;  %4830 = vmatprep.subr.mxu0 %v12635_v24  ;;  %6038 = vmatprep.subr.mxu1 %v12635_v24 }
 0x9bd   : > { %4831 = vmatpush1.msra.mxu0 %v11598_v49  ;;  %6070 = vmatpush1.msra.mxu1 %v11598_v49  ;;  %v7144_v55 = vld [vmem:[%s7366_s28 + $0xd8] sm:$0xff] }
 0x9be   : > { %v4756_v44 = vpop.f32.mrf.mxu1  ;;  %4832 = vmatprep.subr.mxu0 %v12635_v24  ;;  %6039 = vmatprep.subr.mxu1 %v12635_v24 }
 0x9bf   : > { %v11684_v50 = vpop.permute.xlu1 %5223 }
 0x9c0   : > { %v4758_v18 = vpop.f32.mrf.mxu1 }
 0x9c1   : > { %v7146_v18 = vld [vmem:[%s7366_s28 + $0xe8] sm:$0xff] }
 0x9c2   : > { %v4761_v42 = vpop.f32.mrf.mxu1 }
 0x9c3   : > { %v11692_v26 = vpop.permute.xlu1 %6630 }
 0x9c4   : > { %v4763_v7 = vpop.f32.mrf.mxu1 }
 0x9c5   : > { %v7147_v7 = vld [vmem:[%s7366_s28 + $0xe0] sm:$0xff] }
 0x9c6   : > { %v4766_v57 = vpop.f32.mrf.mxu1 }
 0x9c7   : > { %v11702_v29 = vpop.permute.xlu1 %5221 }
 0x9c8   : > { %v4768_v9 = vpop.f32.mrf.mxu1 }
 0x9c9   : > { %v7149_v9 = vld [vmem:[%s7366_s28 + $0xf0] sm:$0xff] }
 0x9ca   : > { %v4771_v43 = vpop.f32.mrf.mxu1 }
 0x9cb   : > { %v11716_v10 = vpop.permute.xlu1 %5227 }
 0x9cc   : > { %v4773_v33 = vpop.f32.mrf.mxu1 }
 0x9cd   : > { %v7150_v33 = vld [vmem:[%s7366_s28 + $0x108] sm:$0xff] }
 0x9ce   : > { %v4776_v63 = vpop.f32.mrf.mxu1 }
 0x9cf   : > { %v11730_v15 = vpop.permute.xlu1 %6635 }
 0x9d0   : > { %v4778_v4 = vpop.f32.mrf.mxu1 }
 0x9d1   : > { %v7152_v4 = vld [vmem:[%s7366_s28 + $0x118] sm:$0xff] }
 0x9d2   : > { %v4781_v45 = vpop.f32.mrf.mxu1 }
 0x9d3   : > { %v11738_v41 = vpop.permute.xlu1 %5225 }
 0x9d4   : > { %v4783_v14 = vpop.f32.mrf.mxu1 }
 0x9d5   : > { %v7153_v14 = vld [vmem:[%s7366_s28 + $0x110] sm:$0xff] }
 0x9d6   : > { %v4786_v1 = vpop.f32.mrf.mxu1 }
 0x9d7   : > { %v11744_v21 = vpop.permute.xlu1 %6640 }
 0x9d8   : > { %v4788_v54 = vpop.f32.mrf.mxu1 }
 0x9d9   : > { %v7155_v54 = vld [vmem:[%s7366_s28 + $0x120] sm:$0xff] }
 0x9da   : > { %v4791_v61 = vpop.f32.mrf.mxu1 }
 0x9db   : > { %v11749_v8 = vpop.permute.xlu1 %5229 }
 0x9dc   : > { %v4793_v6 = vpop.f32.mrf.mxu1 }
 0x9dd   : > { %v7156_v6 = vld [vmem:[%s7366_s28 + $0x138] sm:$0xff] }
 0x9de   : > { %v4796_v49 = vpop.f32.mrf.mxu1 }
 0x9df   : > { %4833 = vmatpush2.msra.mxu0 %v4796_v49  ;;  %6071 = vmatpush2.msra.mxu1 %v4796_v49  ;;  %v11754_v53 = vpop.permute.xlu1 %5235  ;;  %v7157_v49 = vld [vmem:[%s7366_s28 + $0x130] sm:$0xff] }
 0x9e0   : > { %v4798_v5 = vpop.f32.mrf.mxu1  ;;  %4834 = vmatprep.subr.mxu0 %v12635_v24  ;;  %6040 = vmatprep.subr.mxu1 %v12635_v24 }
 0x9e1   : > { %4835 = vmatpush2.msra.mxu0 %v4791_v61  ;;  %6072 = vmatpush2.msra.mxu1 %v4791_v61  ;;  %v7158_v5 = vld [vmem:[%s7366_s28 + $0x148] sm:$0xff] }
 0x9e2   : > { %4836 = vmatprep.subr.mxu0 %v12635_v24  ;;  %6041 = vmatprep.subr.mxu1 %v12635_v24 }
 0x9e3   : > { %4837 = vmatpush2.msra.mxu0 %v4786_v1  ;;  %6073 = vmatpush2.msra.mxu1 %v4786_v1  ;;  %v7154_v1 = vld [vmem:[%s7366_s28 + $0x128] sm:$0xff] }
 0x9e4   : > { %4838 = vmatprep.subr.mxu0 %v12635_v24  ;;  %6042 = vmatprep.subr.mxu1 %v12635_v24 }
 0x9e5   : > { %4839 = vmatpush2.msra.mxu0 %v4781_v45  ;;  %6074 = vmatpush2.msra.mxu1 %v4781_v45 }
 0x9e6   : > { %4840 = vmatprep.subr.mxu0 %v12635_v24  ;;  %6043 = vmatprep.subr.mxu1 %v12635_v24 }
 0x9e7   : > { %4841 = vmatpush2.msra.mxu0 %v4776_v63  ;;  %6075 = vmatpush2.msra.mxu1 %v4776_v63  ;;  %v7151_v63 = vld [vmem:[%s7366_s28 + $0x100] sm:$0xff] }
 0x9e8   : > { %4842 = vmatprep.subr.mxu0 %v12635_v24  ;;  %6044 = vmatprep.subr.mxu1 %v12635_v24 }
 0x9e9   : > { %4843 = vmatpush2.msra.mxu0 %v4771_v43  ;;  %6076 = vmatpush2.msra.mxu1 %v4771_v43 }
 0x9ea   : > { %4844 = vmatprep.subr.mxu0 %v12635_v24  ;;  %6045 = vmatprep.subr.mxu1 %v12635_v24 }
 0x9eb   : > { %4845 = vmatpush2.msra.mxu0 %v4766_v57  ;;  %6077 = vmatpush2.msra.mxu1 %v4766_v57  ;;  %v7148_v57 = vld [vmem:[%s7366_s28 + $0xf8] sm:$0xff] }
 0x9ec   : > { %4846 = vmatprep.subr.mxu0 %v12635_v24  ;;  %6046 = vmatprep.subr.mxu1 %v12635_v24 }
 0x9ed   : > { %4847 = vmatpush2.msra.mxu0 %v4761_v42  ;;  %6078 = vmatpush2.msra.mxu1 %v4761_v42 }
 0x9ee   : > { %4848 = vmatprep.subr.mxu0 %v12635_v24  ;;  %6047 = vmatprep.subr.mxu1 %v12635_v24 }
 0x9ef   : > { %4849 = vmatpush2.msra.mxu0 %v4756_v44  ;;  %6079 = vmatpush2.msra.mxu1 %v4756_v44  ;;  %v7145_v44 = vld [vmem:[%s7366_s28 + $0xd0] sm:$0xff] }
 0x9f0   : > { %4850 = vmatprep.subr.mxu0 %v12635_v24  ;;  %6048 = vmatprep.subr.mxu1 %v12635_v24 }
 0x9f1   : > { %4851 = vmatpush2.msra.mxu0 %v11660_v28  ;;  %6080 = vmatpush2.msra.mxu1 %v11660_v28 }
 0x9f2   : > { %4852 = vmatprep.subr.mxu0 %v12635_v24  ;;  %6049 = vmatprep.subr.mxu1 %v12635_v24 }
 0x9f3   : > { %4853 = vmatpush2.msra.mxu0 %v11650_v31  ;;  %6081 = vmatpush2.msra.mxu1 %v11650_v31  ;;  %v7142_v31 = vld [vmem:[%s7366_s28 + $0xc8] sm:$0xff] }
 0x9f4   : > { %4854 = vmatprep.subr.mxu0 %v12635_v24  ;;  %6050 = vmatprep.subr.mxu1 %v12635_v24 }
 0x9f5   : > { %4855 = vmatpush2.msra.mxu0 %v11640_v11  ;;  %6082 = vmatpush2.msra.mxu1 %v11640_v11 }
 0x9f6   : > { %4856 = vmatprep.subr.mxu0 %v12635_v24  ;;  %6051 = vmatprep.subr.mxu1 %v12635_v24 }
 0x9f7   : > { %4857 = vmatpush2.msra.mxu0 %v11632_v47  ;;  %6083 = vmatpush2.msra.mxu1 %v11632_v47  ;;  %v7139_v47 = vld [vmem:[%s7366_s28 + $0xa0] sm:$0xff] }
 0x9f8   : > { %4858 = vmatprep.subr.mxu0 %v12635_v24  ;;  %6052 = vmatprep.subr.mxu1 %v12635_v24 }
 0x9f9   : > { %4859 = vmatpush2.msra.mxu0 %v11626_v12  ;;  %6084 = vmatpush2.msra.mxu1 %v11626_v12 }
 0x9fa   : > { %4860 = vmatprep.subr.mxu0 %v12635_v24  ;;  %6053 = vmatprep.subr.mxu1 %v12635_v24 }
 0x9fb   : > { %4861 = vmatpush2.msra.mxu0 %v11620_v35  ;;  %6085 = vmatpush2.msra.mxu1 %v11620_v35  ;;  %v7136_v35 = vld [vmem:[%s7366_s28 + $0x98] sm:$0xff] }
 0x9fc   : > { %4862 = vmatprep.subr.mxu0 %v12635_v24  ;;  %6054 = vmatprep.subr.mxu1 %v12635_v24  ;;  %v7118_v24 = vld [vmem:[%s7366_s28 + $0x10] sm:$0xff] }
 0x9fd   : > { %4863 = vmatpush2.msra.mxu0 %v11614_v56  ;;  %6086 = vmatpush2.msra.mxu1 %v11614_v56  ;;  %v11759_v56 = vpop.permute.xlu1 %6645 }
 0x9fe   : > { %4865 = vmatmul.mubr.f32.vlgmr.msra.gmra.mxu0 %v7114_v25  ;;  %5010 = vmatmul.mubr.f32.vlgmr.msra.gmra.mxu1 %v7115_v2  ;;  %v7159_v2 = vld [vmem:[%s7366_s28 + $0x140] sm:$0xff] }
 0x9ff   : > { %4869 = vmatprep.mubr.f32.mxu0 %v7116_v19  ;;  %5014 = vmatprep.mubr.f32.mxu1 %v7117_v22  ;;  %v7160_v19 = vld [vmem:[%s7366_s28 + $0x158] sm:$0xff]  ;;  %v7161_v22 = vld [vmem:[%s7366_s28 + $0x150] sm:$0xff] }
 0xa01   : > { %v11764_v12 = vpop.permute.xlu1 %5233 }
 0xa02   : > { %4870 = vmatmul.mubr.f32.gmra.mxu0 %v7118_v24  ;;  %5015 = vmatmul.mubr.f32.gmra.mxu1 %v7119_v23  ;;  %v7162_v23 = vld [vmem:[%s7366_s28 + $0x168] sm:$0xff] }
 0xa03   : > { %4874 = vmatprep.mubr.f32.mxu0 %v7120_v3  ;;  %5019 = vmatprep.mubr.f32.mxu1 %v7121_v48  ;;  %v7163_v3 = vld [vmem:[%s7366_s28 + $0x160] sm:$0xff]  ;;  %v7164_v48 = vld [vmem:[%s7366_s28 + $0x178] sm:$0xff] }
 0xa05   : > { %v11769_v11 = vpop.permute.xlu1 %5239 }
 0xa06   : > { %4875 = vmatmul.mubr.f32.gmra.mxu0 %v7122_v13  ;;  %5020 = vmatmul.mubr.f32.gmra.mxu1 %v7123_v60  ;;  %v7165_v60 = vld [vmem:[%s7366_s28 + $0x170] sm:$0xff] }
 0xa07   : > { %4879 = vmatprep.mubr.f32.mxu0 %v7124_v51  ;;  %v7166_v51 = vld [vmem:[%s7366_s28 + $0x188] sm:$0xff] }
 0xa09   : > { %v11774_v28 = vpop.permute.xlu1 %6650 }
 0xa0a   : > { %4880 = vmatmul.mubr.f32.gmra.mxu0 %v7125_v32  ;;  %v7167_v32 = vld [vmem:[%s7366_s28 + $0x180] sm:$0xff] }
 0xa0b   : > { %4884 = vmatprep.mubr.f32.mxu0 %v7126_v38 }
 0xa0d   : > { %v11779_v42 = vpop.permute.xlu1 %5237 }
 0xa0e   : > { %4885 = vmatmul.mubr.f32.gmra.mxu0 %v7127_v20  ;;  %v7168_v20 = vld [vmem:[%s7366_s28 + $0x198] sm:$0xff] }
 0xa0f   : > { %4889 = vmatprep.mubr.f32.mxu0 %v7128_v46  ;;  %v7169_v46 = vld [vmem:[%s7366_s28 + $0x190] sm:$0xff] }
 0xa11   : > { %v11784_v43 = vpop.permute.xlu1 %5243 }
 0xa12   : > { %4890 = vmatmul.mubr.f32.gmra.mxu0 %v7129_v0  ;;  %v7170_v0 = vld [vmem:[%s7366_s28 + $0x1a8] sm:$0xff] }
 0xa13   : > { %4894 = vmatprep.mubr.f32.mxu0 %v7130_v30 }
 0xa15   : > { %v11789_v45 = vpop.permute.xlu1 %6655 }
 0xa16   : > { %4895 = vmatmul.mubr.f32.gmra.mxu0 %v7131_v59  ;;  %v7171_v59 = vld [vmem:[%s7366_s28 + $0x1a0] sm:$0xff] }
 0xa17   : > { %4899 = vmatprep.mubr.f32.mxu0 %v7132_v16  ;;  %v7172_v16 = vld [vmem:[%s7366_s28 + $0x1b8] sm:$0xff] }
 0xa19   : > { %v11794_v61 = vpop.permute.xlu1 %5241 }
 0xa1a   : > { %4900 = vmatmul.mubr.f32.gmra.mxu0 %v7133_v52  ;;  %v7173_v52 = vld [vmem:[%s7366_s28 + $0x1b0] sm:$0xff] }
 0xa1b   : > { %4904 = vmatprep.mubr.f32.mxu0 %v7134_v58 }
 0xa1d   : > { %v11799_v25 = vpop.permute.xlu1 %5247 }
 0xa1e   : > { %4905 = vmatmul.mubr.f32.gmra.mxu0 %v7135_v17  ;;  %v7174_v17 = vld [vmem:[%s7366_s28 + $0x1c8] sm:$0xff] }
 0xa1f   : > { %4909 = vmatprep.mubr.f32.mxu0 %v7136_v35  ;;  %v7175_v35 = vld [vmem:[%s7366_s28 + $0x1c0] sm:$0xff]  ;;  %s382_s28 = sand.u32 1, %s7228_s14  }
 0xa20   : > { %s5547_s30 = sshll.u32 %s382_s28, 8  ;;  %s12101_s17 = scalar_lea.sflag [#allocation3], %s382_s28 }
 0xa21   : > { %v11804_v24 = vpop.permute.xlu1 %6660  ;;  %s11883_s11 = scalar_lea.vmem [#allocation2], %s5547_s30  ;;  %s7182_s30 = scalar_lea.vmem %s7181_s27, 8192 }
 0xa22   : > { %4910 = vmatmul.mubr.f32.gmra.mxu0 %v7137_v27  ;;  %s5457_s12 = sshll.u32 %s11883_s11, 4  ;;  %s12095_s12 = int_to_ptr.vmem [resolvable:$true] %s5457_s12 }
 0xa23   : > { %4914 = vmatprep.mubr.f32.mxu0 %v7138_v37  ;;  %s7176_s25 = scalar_lea.vmem %s12095_s12, 4096  ;;  %p7183_p1 = scmp.lt.s32.totalorder %s12095_s12, %s7181_s27 }
 0xa24   : > { %p7177_p12 = scmp.ne.s32.totalorder %s12095_s12, %s7176_s25  ;;  %p7184_p2 = scmp.lt.s32.totalorder %s7182_s30, %s7176_s25 }
 0xa25   : > { %v11809_v13 = vpop.permute.xlu1 %5245 }
 0xa26   : > { %4915 = vmatmul.mubr.f32.gmra.mxu0 %v7139_v47  ;;  %p7178_p13 = pnand %p7177_p12, %p7335_p5  ;;  %p7185_p3 = por %p7184_p2, %p7183_p1 }
 0xa27   : > { %4919 = vmatprep.mubr.f32.mxu0 %v7140_v34 }
 0xa28   : > { %p7179_p0 = pneg %p7178_p13 }
 0xa29   : > { %v11814_v38 = vpop.permute.xlu1 %5251 }
 0xa2a   : > { %4920 = vmatmul.mubr.f32.gmra.mxu0 %v7141_v36  ;;  %p7186_p4 = pnand %p7185_p3, %p7179_p0 }
 0xa2b   : > { %4924 = vmatprep.mubr.f32.mxu0 %v7142_v31 }
 0xa2d   : > { %v11819_v30 = vpop.permute.xlu1 %6665 }
 0xa2e   : > { %4925 = vmatmul.mubr.f32.gmra.mxu0 %v7143_v40 }
 0xa2f   : > { %4929 = vmatprep.mubr.f32.mxu0 %v7144_v55 }
 0xa31   : > { %v11824_v58 = vpop.permute.xlu1 %5249 }
 0xa32   : > { %4930 = vmatmul.mubr.f32.gmra.mxu0 %v7145_v44  ;;  %v11844_v44 = vpop.permute.xlu0 %5231 }
 0xa33   : > { %4934 = vmatprep.mubr.f32.mxu0 %v7146_v18 }
 0xa35   : > { %v11828_v27 = vpop.permute.xlu1 %5255 }
 0xa36   : > { %4935 = vmatmul.mubr.f32.gmra.mxu0 %v7147_v7  ;;  %v11846_v18 = vpop.permute.xlu0 %5253 }
 0xa37   : > { %4939 = vmatprep.mubr.f32.mxu0 %v7148_v57 }
 0xa39   : > { %v11830_v37 = vpop.permute.xlu1 %6670 }
 0xa3a   : > { %4940 = vmatmul.mubr.f32.gmra.mxu0 %v7149_v9  ;;  %v11850_v57 = vpop.permute.xlu0 %5257 }
 0xa3b   : > { %4944 = vmatprep.mubr.f32.mxu0 %v7150_v33 }
 0xa3d   : > { %v11832_v47 = vpop.permute.xlu1 %5259 }
 0xa3e   : > { %4945 = vmatmul.mubr.f32.gmra.mxu0 %v7151_v63  ;;  %v11854_v33 = vpop.permute.xlu0 %5261 }
 0xa3f   : > { %4949 = vmatprep.mubr.f32.mxu0 %v7152_v4 }
 0xa41   : > { %v11834_v34 = vpop.permute.xlu1 %6675 }
 0xa42   : > { %4950 = vmatmul.mubr.f32.gmra.mxu0 %v7153_v14  ;;  %v11856_v4 = vpop.permute.xlu0 %5265 }
 0xa43   : > { %4954 = vmatprep.mubr.f32.mxu0 %v7154_v1 }
 0xa45   : > { %v11836_v36 = vpop.permute.xlu1 %5263 }
 0xa46   : > { %4955 = vmatmul.mubr.f32.gmra.mxu0 %v7155_v54  ;;  %v11860_v1 = vpop.permute.xlu0 %5269 }
 0xa47   : > { %4959 = vmatprep.mubr.f32.mxu0 %v7156_v6  ;;  %v6632_v6 = vunpack.i.l.bf16 %v11692_v26 }
 0xa49   : > { %v11838_v31 = vpop.permute.xlu1 %6680 }
 0xa4a   : > { %4960 = vmatmul.mubr.f32.gmra.mxu0 %v7157_v49 }
 0xa4b   : > { %4964 = vmatprep.mubr.f32.mxu0 %v7158_v5 }
 0xa4d   : > { %v11840_v40 = vpop.permute.xlu1 %5267 }
 0xa4e   : > { %4965 = vmatmul.mubr.f32.gmra.mxu0 %v7159_v2  ;;  %v11868_v2 = vpop.permute.xlu0 %5273 }
 0xa4f   : > { %4969 = vmatprep.mubr.f32.mxu0 %v7160_v19 }
 0xa51   : > { %v11842_v55 = vpop.permute.xlu1 %6685 }
 0xa52   : > { %4970 = vmatmul.mubr.f32.gmra.mxu0 %v7161_v22 }
 0xa53   : > { %4974 = vmatprep.mubr.f32.mxu0 %v7162_v23  ;;  %v12763_v23 = vld [vmem:[#allocation104_spill] sm:$0xff] }
 0xa55   : > { %v11848_v7 = vpop.permute.xlu1 %5271 }
 0xa56   : > { %4975 = vmatmul.mubr.f32.gmra.mxu0 %v7163_v3 }
 0xa57   : > { %4979 = vmatprep.mubr.f32.mxu0 %v7164_v48  ;;  %v12764_v48 = vld [vmem:[#allocation130_spill] sm:$0xff] }
 0xa59   : > { %v11852_v9 = vpop.permute.xlu1 %6690 }
 0xa5a   : > { %4980 = vmatmul.mubr.f32.gmra.mxu0 %v7165_v60 }
 0xa5b   : > { %4984 = vmatprep.mubr.f32.mxu0 %v7166_v51 }
 0xa5d   : > { %v5276_v63 = vpop.permute.xlu1 %5275 }
 0xa5e   : > { %4985 = vmatmul.mubr.f32.gmra.mxu0 %v7167_v32 }
 0xa5f   : > { %4989 = vmatprep.mubr.f32.mxu0 %v7168_v20 }
 0xa61   : > { %v11858_v14 = vpop.permute.xlu1 %6695 }
 0xa62   : > { %4990 = vmatmul.mubr.f32.gmra.mxu0 %v7169_v46 }
 0xa63   : > { %4994 = vmatprep.mubr.f32.mxu0 %v7170_v0  ;;  %v6633_v0 = vunpack.i.h.bf16 %v11692_v26 }
 0xa65   : > { %v11862_v54 = vpop.permute.xlu1 %6700 }
 0xa66   : > { %4995 = vmatmul.mubr.f32.gmra.mxu0 %v7171_v59  ;;  %v6703_v19 = vunpack.i.h.bf16 %v11862_v54 }
 0xa67   : > { %4999 = vmatprep.mubr.f32.mxu0 %v7172_v16 }
 0xa69   : > { %v6706_v22 = vpop.permute.xlu1 %6705 }
 0xa6a   : > { %5000 = vmatmul.mubr.f32.gmra.mxu0 %v7173_v52  ;;  %v6707_v59 = vunpack.i.l.bf16 %v6706_v22 }
 0xa6b   : > { %5004 = vmatprep.mubr.f32.mxu0 %v7174_v17 }
 0xa6e   : > { %5005 = vmatmul.mubr.f32.gmra.mxu0 %v7175_v35 }
 0xabe   : > { %v4866_v49 = vpop.f32.mrf.mxu0  ;;  %v5011_v5 = vpop.f32.mrf.mxu1 }
 0xabf   : > { %v5025_v3 = vmul.f32 %v4866_v49, %v12763_v23  ;;  %v5054_v60 = vmul.f32 %v5011_v5, %v12764_v48  ;;  %v12765_v23 = vld [vmem:[#allocation38_spill] sm:$0xff] }
 0xac0   : > { %v4868_v51 = vpop.f32.mrf.mxu0  ;;  %v5013_v32 = vpop.f32.mrf.mxu1 }
 0xac1   : > { %v5313_v20 = vsel %vm715_vm3, %v5025_v3, %v6632_v6  ;;  %v5342_v46 = vsel %vm715_vm3, %v5054_v60, %v6703_v19  ;;  %v12766_v51 = vld [vmem:[#allocation134_spill] sm:$0xff]  ;;  %v6637_v60 = vunpack.i.l.bf16 %v11730_v15  ;;  %v6708_v32 = vunpack.i.h.bf16 %v6706_v22 }
 0xac2   : > { %v5346_v16 = vsel %vm5345_vm9, %v5313_v20, %v11676_v39  ;;  %v5375_v52 = vsel %vm5345_vm9, %v5342_v46, %v5276_v63  ;;  %v4871_v17 = vpop.f32.mrf.mxu0  ;;  %v5016_v35 = vpop.f32.mrf.mxu1 }
 0xac3   : > { %v5379_v49 = vsel %vm5378_vm10, %v5346_v16, 0.0  ;;  %v5408_v5 = vsel %vm5378_vm10, %v5375_v52, 0.0  ;;  %v5026_v48 = vmul.f32 %v4871_v17, %v12765_v23  ;;  %v5055_v6 = vmul.f32 %v5016_v35, %v12766_v51  ;;  %v5278_v63 = vpop.permute.xlu0 %5277  ;;  %v12768_v23 = vld [vmem:[#allocation136_spill] sm:$0xff] }
 0xac4   : > { %5411 = vst [vmem:[%s11883_s11] sm:$0xff] %v5379_v49  ;;  %5440 = vst [vmem:[%s11883_s11 + $0xe8] sm:$0xff] %v5408_v5  ;;  %v4873_v39 = vpop.f32.mrf.mxu0  ;;  %v5018_v26 = vpop.f32.mrf.mxu1  ;;  %v12767_v49 = vld [vmem:[#allocation39_spill] sm:$0xff] }
 0xac5   : > { %v5314_v19 = vsel %vm715_vm3, %v5026_v48, %v6633_v0  ;;  %v5343_v3 = vsel %vm715_vm3, %v5055_v6, %v6707_v59  ;;  %v5280_v48 = vpop.permute.xlu1 %5279 }
 0xac6   : > { %v5347_v20 = vsel %vm5345_vm9, %v5314_v19, %v11672_v62  ;;  %v5376_v46 = vsel %vm5345_vm9, %v5343_v3, %v5278_v63  ;;  %v4876_v16 = vpop.f32.mrf.mxu0  ;;  %v5021_v52 = vpop.f32.mrf.mxu1  ;;  %v6638_v63 = vunpack.i.h.bf16 %v11730_v15 }
 0xac7   : > { %v5380_v17 = vsel %vm5378_vm10, %v5347_v20, 0.0  ;;  %v5409_v35 = vsel %vm5378_vm10, %v5376_v46, 0.0  ;;  %v5027_v5 = vmul.f32 %v4876_v16, %v12767_v49  ;;  %v5056_v0 = vmul.f32 %v5021_v52, %v12768_v23  ;;  %v12769_v20 = vld [vmem:[#allocation42_spill] sm:$0xff] }
 0xac8   : > { %5412 = vst [vmem:[%s11883_s11 + $0x8] sm:$0xff] %v5380_v17  ;;  %5441 = vst [vmem:[%s11883_s11 + $0xf0] sm:$0xff] %v5409_v35  ;;  %v4878_v22 = vpop.f32.mrf.mxu0  ;;  %v5023_v59 = vpop.f32.mrf.mxu1  ;;  %v6642_v52 = vunpack.i.l.bf16 %v11744_v21  ;;  %v12770_v17 = vld [vmem:[#allocation45_spill] sm:$0xff] }
 0xac9   : > { %v5315_v62 = vsel %vm715_vm3, %v5027_v5, %v6637_v60  ;;  %v5344_v51 = vsel %vm715_vm3, %v5056_v0, %v6708_v32  ;;  %v6643_v22 = vunpack.i.h.bf16 %v11744_v21  ;;  %v12771_v59 = vld [vmem:[#allocation48_spill] sm:$0xff] }
 0xaca   : > { %v5348_v6 = vsel %vm5345_vm9, %v5315_v62, %v11702_v29  ;;  %v5377_v39 = vsel %vm5345_vm9, %v5344_v51, %v5280_v48  ;;  %v4881_v26 = vpop.f32.mrf.mxu0 }
 0xacb   : > { %v5381_v19 = vsel %vm5378_vm10, %v5348_v6, 0.0  ;;  %v5410_v3 = vsel %vm5378_vm10, %v5377_v39, 0.0  ;;  %v5028_v46 = vmul.f32 %v4881_v26, %v12769_v20  ;;  %v6647_v26 = vunpack.i.l.bf16 %v11759_v56 }
 0xacc   : > { %5413 = vst [vmem:[%s11883_s11 + $0x10] sm:$0xff] %v5381_v19  ;;  %5442 = vst [vmem:[%s11883_s11 + $0xf8] sm:$0xff] %v5410_v3  ;;  %v4883_v60 = vpop.f32.mrf.mxu0 }
 0xacd   : > { %v5316_v32 = vsel %vm715_vm3, %v5028_v46, %v6638_v63  ;;  %v12772_v63 = vld [vmem:[#allocation51_spill] sm:$0xff]  ;;  %v6648_v60 = vunpack.i.h.bf16 %v11759_v56 }
 0xace   : > { %v5349_v29 = vsel %vm5345_vm9, %v5316_v32, %v11684_v50  ;;  %v4886_v16 = vpop.f32.mrf.mxu0  ;;  %v12773_v32 = vld [vmem:[#allocation54_spill] sm:$0xff] }
 0xacf   : > { %v5382_v15 = vsel %vm5378_vm10, %v5349_v29, 0.0  ;;  %v5029_v35 = vmul.f32 %v4886_v16, %v12770_v17 }
 0xad0   : > { %5414 = vst [vmem:[%s11883_s11 + $0x18] sm:$0xff] %v5382_v15  ;;  %v4888_v49 = vpop.f32.mrf.mxu0 }
 0xad1   : > { %v5317_v5 = vsel %vm715_vm3, %v5029_v35, %v6642_v52  ;;  %v6652_v35 = vunpack.i.l.bf16 %v11774_v28  ;;  %v12774_v49 = vld [vmem:[#allocation57_spill] sm:$0xff] }
 0xad2   : > { %v5350_v23 = vsel %vm5345_vm9, %v5317_v5, %v11738_v41  ;;  %v4891_v0 = vpop.f32.mrf.mxu0 }
 0xad3   : > { %v5383_v50 = vsel %vm5378_vm10, %v5350_v23, 0.0  ;;  %v5030_v48 = vmul.f32 %v4891_v0, %v12771_v59  ;;  %v12775_v59 = vld [vmem:[#allocation61_spill] sm:$0xff] }
 0xad4   : > { %5415 = vst [vmem:[%s11883_s11 + $0x20] sm:$0xff] %v5383_v50  ;;  %v4893_v62 = vpop.f32.mrf.mxu0  ;;  %v6653_v50 = vunpack.i.h.bf16 %v11774_v28 }
 0xad5   : > { %v5318_v51 = vsel %vm715_vm3, %v5030_v48, %v6643_v22 }
 0xad6   : > { %v5351_v6 = vsel %vm5345_vm9, %v5318_v51, %v11716_v10  ;;  %v4896_v39 = vpop.f32.mrf.mxu0 }
 0xad7   : > { %v5384_v41 = vsel %vm5378_vm10, %v5351_v6, 0.0  ;;  %v5031_v19 = vmul.f32 %v4896_v39, %v12772_v63 }
 0xad8   : > { %5416 = vst [vmem:[%s11883_s11 + $0x28] sm:$0xff] %v5384_v41  ;;  %v4898_v21 = vpop.f32.mrf.mxu0  ;;  %v12776_v41 = vld [vmem:[#allocation65_spill] sm:$0xff] }
 0xad9   : > { %v5319_v3 = vsel %vm715_vm3, %v5031_v19, %v6647_v26  ;;  %v6657_v26 = vunpack.i.l.bf16 %v11789_v45 }
 0xada   : > { %v5352_v20 = vsel %vm5345_vm9, %v5319_v3, %v11749_v8  ;;  %v4901_v46 = vpop.f32.mrf.mxu0 }
 0xadb   : > { %v5385_v10 = vsel %vm5378_vm10, %v5352_v20, 0.0  ;;  %v5032_v29 = vmul.f32 %v4901_v46, %v12773_v32  ;;  %v6658_v20 = vunpack.i.h.bf16 %v11789_v45  ;;  %v12777_v46 = vld [vmem:[#allocation69_spill] sm:$0xff] }
 0xadc   : > { %5417 = vst [vmem:[%s11883_s11 + $0x30] sm:$0xff] %v5385_v10  ;;  %v4903_v16 = vpop.f32.mrf.mxu0 }
 0xadd   : > { %v5320_v52 = vsel %vm715_vm3, %v5032_v29, %v6648_v60 }
 0xade   : > { %v5353_v15 = vsel %vm5345_vm9, %v5320_v52, %v11844_v44  ;;  %v4906_v17 = vpop.f32.mrf.mxu0  ;;  %v6662_v52 = vunpack.i.l.bf16 %v11804_v24 }
 0xadf   : > { %v5386_v8 = vsel %vm5378_vm10, %v5353_v15, 0.0  ;;  %v5033_v5 = vmul.f32 %v4906_v17, %v12774_v49  ;;  %v12778_v15 = vld [vmem:[#allocation72_spill] sm:$0xff] }
 0xae0   : > { %5418 = vst [vmem:[%s11883_s11 + $0x38] sm:$0xff] %v5386_v8  ;;  %v4908_v56 = vpop.f32.mrf.mxu0 }
 0xae1   : > { %v5321_v23 = vsel %vm715_vm3, %v5033_v5, %v6652_v35  ;;  %v6663_v5 = vunpack.i.h.bf16 %v11804_v24  ;;  %v12779_v56 = vld [vmem:[#allocation76_spill] sm:$0xff] }
 0xae2   : > { %v5354_v0 = vsel %vm5345_vm9, %v5321_v23, %v11764_v12  ;;  %v4911_v22 = vpop.f32.mrf.mxu0 }
 0xae3   : > { %v5387_v44 = vsel %vm5378_vm10, %v5354_v0, 0.0  ;;  %v5034_v48 = vmul.f32 %v4911_v22, %v12775_v59  ;;  %v6667_v59 = vunpack.i.l.bf16 %v11819_v30 }
 0xae4   : > { %5419 = vst [vmem:[%s11883_s11 + $0x40] sm:$0xff] %v5387_v44  ;;  %v4913_v62 = vpop.f32.mrf.mxu0 }
 0xae5   : > { %v5322_v51 = vsel %vm715_vm3, %v5034_v48, %v6653_v50  ;;  %v12780_v48 = vld [vmem:[#allocation80_spill] sm:$0xff] }
 0xae6   : > { %v5355_v6 = vsel %vm5345_vm9, %v5322_v51, %v11754_v53  ;;  %v4916_v39 = vpop.f32.mrf.mxu0 }
 0xae7   : > { %v5388_v12 = vsel %vm5378_vm10, %v5355_v6, 0.0  ;;  %v5035_v63 = vmul.f32 %v4916_v39, %v12776_v41 }
 0xae8   : > { %5420 = vst [vmem:[%s11883_s11 + $0x48] sm:$0xff] %v5388_v12  ;;  %v4918_v28 = vpop.f32.mrf.mxu0  ;;  %v12781_v12 = vld [vmem:[#allocation84_spill] sm:$0xff] }
 0xae9   : > { %v5323_v19 = vsel %vm715_vm3, %v5035_v63, %v6657_v26  ;;  %v6668_v26 = vunpack.i.h.bf16 %v11819_v30 }
 0xaea   : > { %v5356_v21 = vsel %vm5345_vm9, %v5323_v19, %v11779_v42  ;;  %v4921_v3 = vpop.f32.mrf.mxu0 }
 0xaeb   : > { %v5389_v53 = vsel %vm5378_vm10, %v5356_v21, 0.0  ;;  %v5036_v60 = vmul.f32 %v4921_v3, %v12777_v46  ;;  %v6672_v3 = vunpack.i.l.bf16 %v11830_v37 }
 0xaec   : > { %5421 = vst [vmem:[%s11883_s11 + $0x50] sm:$0xff] %v5389_v53  ;;  %v4923_v10 = vpop.f32.mrf.mxu0 }
 0xaed   : > { %v5324_v32 = vsel %vm715_vm3, %v5036_v60, %v6658_v20  ;;  %v12782_v20 = vld [vmem:[#allocation138_spill] sm:$0xff] }
 0xaee   : > { %v5357_v29 = vsel %vm5345_vm9, %v5324_v32, %v11769_v11  ;;  %v4926_v16 = vpop.f32.mrf.mxu0  ;;  %v6673_v32 = vunpack.i.h.bf16 %v11830_v37 }
 0xaef   : > { %v5390_v42 = vsel %vm5378_vm10, %v5357_v29, 0.0  ;;  %v5037_v17 = vmul.f32 %v4926_v16, %v12778_v15  ;;  %v12783_v29 = vld [vmem:[#allocation90_spill] sm:$0xff] }
 0xaf0   : > { %5422 = vst [vmem:[%s11883_s11 + $0x58] sm:$0xff] %v5390_v42  ;;  %v4928_v45 = vpop.f32.mrf.mxu0 }
 0xaf1   : > { %v5325_v35 = vsel %vm715_vm3, %v5037_v17, %v6662_v52  ;;  %v6677_v45 = vunpack.i.l.bf16 %v11834_v34 }
 0xaf2   : > { %v5358_v8 = vsel %vm5345_vm9, %v5325_v35, %v11794_v61  ;;  %v4931_v49 = vpop.f32.mrf.mxu0  ;;  %v12784_v35 = vld [vmem:[#allocation91_spill] sm:$0xff] }
 0xaf3   : > { %v5391_v11 = vsel %vm5378_vm10, %v5358_v8, 0.0  ;;  %v5038_v23 = vmul.f32 %v4931_v49, %v12779_v56  ;;  %v6678_v56 = vunpack.i.h.bf16 %v11834_v34 }
 0xaf4   : > { %5423 = vst [vmem:[%s11883_s11 + $0x60] sm:$0xff] %v5391_v11  ;;  %v4933_v0 = vpop.f32.mrf.mxu0 }
 0xaf5   : > { %v5326_v22 = vsel %vm715_vm3, %v5038_v23, %v6663_v5  ;;  %v12785_v23 = vld [vmem:[#allocation94_spill] sm:$0xff] }
 0xaf6   : > { %v5359_v50 = vsel %vm5345_vm9, %v5326_v22, %v11784_v43  ;;  %v4936_v44 = vpop.f32.mrf.mxu0 }
 0xaf7   : > { %v5392_v61 = vsel %vm5378_vm10, %v5359_v50, 0.0  ;;  %v5039_v62 = vmul.f32 %v4936_v44, %v12780_v48  ;;  %v12786_v48 = vld [vmem:[#allocation98_spill] sm:$0xff] }
 0xaf8   : > { %5424 = vst [vmem:[%s11883_s11 + $0x68] sm:$0xff] %v5392_v61  ;;  %v4938_v24 = vpop.f32.mrf.mxu0  ;;  %v6682_v61 = vunpack.i.l.bf16 %v11838_v31 }
 0xaf9   : > { %v5327_v51 = vsel %vm715_vm3, %v5039_v62, %v6667_v59 }
 0xafa   : > { %v5360_v6 = vsel %vm5345_vm9, %v5327_v51, %v11809_v13  ;;  %v4941_v39 = vpop.f32.mrf.mxu0 }
 0xafb   : > { %v5393_v43 = vsel %vm5378_vm10, %v5360_v6, 0.0  ;;  %v5040_v41 = vmul.f32 %v4941_v39, %v12781_v12  ;;  %v6683_v39 = vunpack.i.h.bf16 %v11838_v31 }
 0xafc   : > { %5425 = vst [vmem:[%s11883_s11 + $0x70] sm:$0xff] %v5393_v43  ;;  %v4943_v63 = vpop.f32.mrf.mxu0 }
 0xafd   : > { %v5328_v28 = vsel %vm715_vm3, %v5040_v41, %v6668_v26  ;;  %v12787_v26 = vld [vmem:[#allocation101_spill] sm:$0xff] }
 0xafe   : > { %v5361_v19 = vsel %vm5345_vm9, %v5328_v28, %v11799_v25  ;;  %v4946_v21 = vpop.f32.mrf.mxu0 }
 0xaff   : > { %v5394_v13 = vsel %vm5378_vm10, %v5361_v19, 0.0  ;;  %v5041_v53 = vmul.f32 %v4946_v21, %v12782_v20  ;;  %v6687_v19 = vunpack.i.l.bf16 %v11842_v55  ;;  %v12788_v21 = vld [vmem:[#allocation105_spill] sm:$0xff] }
 0xb00   : > { %5426 = vst [vmem:[%s11883_s11 + $0x78] sm:$0xff] %v5394_v13  ;;  %v4948_v30 = vpop.f32.mrf.mxu0 }
 0xb01   : > { %v5329_v46 = vsel %vm715_vm3, %v5041_v53, %v6672_v3  ;;  %v6688_v30 = vunpack.i.h.bf16 %v11842_v55 }
 0xb02   : > { %v5362_v60 = vsel %vm5345_vm9, %v5329_v46, %v11824_v58  ;;  %v4951_v10 = vpop.f32.mrf.mxu0  ;;  %v12789_v46 = vld [vmem:[#allocation108_spill] sm:$0xff] }
 0xb03   : > { %v5395_v25 = vsel %vm5378_vm10, %v5362_v60, 0.0  ;;  %v5042_v16 = vmul.f32 %v4951_v10, %v12783_v29 }
 0xb04   : > { %5427 = vst [vmem:[%s11883_s11 + $0x80] sm:$0xff] %v5395_v25  ;;  %v4953_v52 = vpop.f32.mrf.mxu0 }
 0xb05   : > { %v5330_v42 = vsel %vm715_vm3, %v5042_v16, %v6673_v32  ;;  %v6692_v16 = vunpack.i.l.bf16 %v11852_v9  ;;  %v12790_v52 = vld [vmem:[#allocation112_spill] sm:$0xff] }
 0xb06   : > { %v5363_v15 = vsel %vm5345_vm9, %v5330_v42, %v11814_v38  ;;  %v4956_v17 = vpop.f32.mrf.mxu0 }
 0xb07   : > { %v5396_v58 = vsel %vm5378_vm10, %v5363_v15, 0.0  ;;  %v5043_v8 = vmul.f32 %v4956_v17, %v12784_v35  ;;  %v12791_v35 = vld [vmem:[#allocation115_spill] sm:$0xff] }
 0xb08   : > { %5428 = vst [vmem:[%s11883_s11 + $0x88] sm:$0xff] %v5396_v58  ;;  %v4958_v37 = vpop.f32.mrf.mxu0  ;;  %v6693_v58 = vunpack.i.h.bf16 %v11852_v9 }
 0xb09   : > { %v5331_v49 = vsel %vm715_vm3, %v5043_v8, %v6677_v45 }
 0xb0a   : > { %v5364_v5 = vsel %vm5345_vm9, %v5331_v49, %v11846_v18  ;;  %v4961_v11 = vpop.f32.mrf.mxu0 }
 0xb0b   : > { %v5397_v38 = vsel %vm5378_vm10, %v5364_v5, 0.0  ;;  %v5044_v0 = vmul.f32 %v4961_v11, %v12785_v23 }
 0xb0c   : > { %5429 = vst [vmem:[%s11883_s11 + $0x90] sm:$0xff] %v5397_v38  ;;  %v4963_v22 = vpop.f32.mrf.mxu0  ;;  %v12792_v38 = vld [vmem:[#allocation118_spill] sm:$0xff] }
 0xb0d   : > { %v5332_v50 = vsel %vm715_vm3, %v5044_v0, %v6678_v56  ;;  %v6697_v56 = vunpack.i.l.bf16 %v11858_v14 }
 0xb0e   : > { %v5365_v44 = vsel %vm5345_vm9, %v5332_v50, %v11828_v27  ;;  %v4966_v59 = vpop.f32.mrf.mxu0 }
 0xb0f   : > { %v5398_v18 = vsel %vm5378_vm10, %v5365_v44, 0.0  ;;  %v5045_v62 = vmul.f32 %v4966_v59, %v12786_v48  ;;  %v12793_v59 = vld [vmem:[#allocation122_spill] sm:$0xff] }
 0xb10   : > { %5430 = vst [vmem:[%s11883_s11 + $0x98] sm:$0xff] %v5398_v18  ;;  %v4968_v34 = vpop.f32.mrf.mxu0 }
 0xb11   : > { %v5333_v24 = vsel %vm715_vm3, %v5045_v62, %v6682_v61 }
 0xb12   : > { %v5366_v51 = vsel %vm5345_vm9, %v5333_v24, %v11850_v57  ;;  %v4971_v6 = vpop.f32.mrf.mxu0  ;;  %v12794_v24 = vld [vmem:[#allocation125_spill] sm:$0xff] }
 0xb13   : > { %v5399_v27 = vsel %vm5378_vm10, %v5366_v51, 0.0  ;;  %v5046_v43 = vmul.f32 %v4971_v6, %v12787_v26 }
 0xb14   : > { %5431 = vst [vmem:[%s11883_s11 + $0xa0] sm:$0xff] %v5399_v27  ;;  %v4973_v12 = vpop.f32.mrf.mxu0 }
 0xb15   : > { %v5334_v41 = vsel %vm715_vm3, %v5046_v43, %v6683_v39 }
 0xb16   : > { %v5367_v63 = vsel %vm5345_vm9, %v5334_v41, %v11832_v47  ;;  %v4976_v28 = vpop.f32.mrf.mxu0 }
 0xb17   : > { %v5400_v57 = vsel %vm5378_vm10, %v5367_v63, 0.0  ;;  %v5047_v3 = vmul.f32 %v4976_v28, %v12788_v21 }
 0xb18   : > { %5432 = vst [vmem:[%s11883_s11 + $0xa8] sm:$0xff] %v5400_v57  ;;  %v4978_v31 = vpop.f32.mrf.mxu0 }
 0xb19   : > { %v5335_v13 = vsel %vm715_vm3, %v5047_v3, %v6687_v19 }
 0xb1a   : > { %v5368_v20 = vsel %vm5345_vm9, %v5335_v13, %v11854_v33  ;;  %v4981_v53 = vpop.f32.mrf.mxu0 }
 0xb1b   : > { %v5401_v47 = vsel %vm5378_vm10, %v5368_v20, 0.0  ;;  %v5048_v60 = vmul.f32 %v4981_v53, %v12789_v46 }
 0xb1c   : > { %5433 = vst [vmem:[%s11883_s11 + $0xb0] sm:$0xff] %v5401_v47  ;;  %v4983_v10 = vpop.f32.mrf.mxu0 }
 0xb1d   : > { %v5336_v32 = vsel %vm715_vm3, %v5048_v60, %v6688_v30 }
 0xb1e   : > { %v5369_v25 = vsel %vm5345_vm9, %v5336_v32, %v11836_v36  ;;  %v4986_v29 = vpop.f32.mrf.mxu0 }
 0xb1f   : > { %v5402_v33 = vsel %vm5378_vm10, %v5369_v25, 0.0  ;;  %v5049_v42 = vmul.f32 %v4986_v29, %v12790_v52 }
 0xb20   : > { %5434 = vst [vmem:[%s11883_s11 + $0xb8] sm:$0xff] %v5402_v33  ;;  %v4988_v55 = vpop.f32.mrf.mxu0 }
 0xb21   : > { %v5337_v15 = vsel %vm715_vm3, %v5049_v42, %v6692_v16 }
 0xb22   : > { %v5370_v17 = vsel %vm5345_vm9, %v5337_v15, %v11856_v4  ;;  %v4991_v45 = vpop.f32.mrf.mxu0 }
 0xb23   : > { %v5403_v36 = vsel %vm5378_vm10, %v5370_v17, 0.0  ;;  %v5050_v8 = vmul.f32 %v4991_v45, %v12791_v35 }
 0xb24   : > { %5435 = vst [vmem:[%s11883_s11 + $0xc0] sm:$0xff] %v5403_v36  ;;  %v4993_v37 = vpop.f32.mrf.mxu0 }
 0xb25   : > { %v5338_v49 = vsel %vm715_vm3, %v5050_v8, %v6693_v58 }
 0xb26   : > { %v5371_v5 = vsel %vm5345_vm9, %v5338_v49, %v11840_v40  ;;  %v4996_v11 = vpop.f32.mrf.mxu0  ;;  %v6698_v40 = vunpack.i.h.bf16 %v11858_v14 }
 0xb27   : > { %v5404_v4 = vsel %vm5378_vm10, %v5371_v5, 0.0  ;;  %v5051_v9 = vmul.f32 %v4996_v11, %v12792_v38 }
 0xb28   : > { %5436 = vst [vmem:[%s11883_s11 + $0xc8] sm:$0xff] %v5404_v4  ;;  %v4998_v23 = vpop.f32.mrf.mxu0 }
 0xb29   : > { %v5339_v0 = vsel %vm715_vm3, %v5051_v9, %v6697_v56 }
 0xb2a   : > { %v5372_v22 = vsel %vm5345_vm9, %v5339_v0, %v11860_v1  ;;  %v5001_v50 = vpop.f32.mrf.mxu0  ;;  %v6702_v1 = vunpack.i.l.bf16 %v11862_v54 }
 0xb2b   : > { %v5405_v44 = vsel %vm5378_vm10, %v5372_v22, 0.0  ;;  %v5052_v61 = vmul.f32 %v5001_v50, %v12793_v59 }
 0xb2c   : > { %5437 = vst [vmem:[%s11883_s11 + $0xd0] sm:$0xff] %v5405_v44  ;;  %v5003_v18 = vpop.f32.mrf.mxu0 }
 0xb2d   : > { %v5340_v48 = vsel %vm715_vm3, %v5052_v61, %v6698_v40 }
 0xb2e   : > { %v5373_v62 = vsel %vm5345_vm9, %v5340_v48, %v11848_v7  ;;  %v5006_v34 = vpop.f32.mrf.mxu0 }
 0xb2f   : > { %v5406_v14 = vsel %vm5378_vm10, %v5373_v62, 0.0  ;;  %v5053_v51 = vmul.f32 %v5006_v34, %v12794_v24 }
 0xb30   : > { %5438 = vst [vmem:[%s11883_s11 + $0xd8] sm:$0xff] %v5406_v14  ;;  %v5008_v6 = vpop.f32.mrf.mxu0 }
 0xb31   : > { %v5341_v39 = vsel %vm715_vm3, %v5053_v51, %v6702_v1 }
 0xb32   : > { %v5374_v7 = vsel %vm5345_vm9, %v5341_v39, %v11868_v2 }
 0xb33   : > { %v5407_v54 = vsel %vm5378_vm10, %v5374_v7, 0.0 }
 0xb34   : > { %5439 = vst [vmem:[%s11883_s11 + $0xe0] sm:$0xff] %v5407_v54 }
 0xb35   : > { %7189 = shalt.err (!%p7186_p4)
}
 0xb36   : > { %s7190_s28 = scalar_lea.hbm %s12091_s29, 4096  ;;  %s7194_s18 = scalar_lea.hbm %s12152_s10, 8192 }
 0xb37   : > { %p7191_p7 = scmp.ne.s32.totalorder %s12091_s29, %s7190_s28  ;;  %p7195_p10 = scmp.lt.s32.totalorder %s12091_s29, %s12152_s10 }
 0xb38   : > { %p7196_p11 = scmp.lt.s32.totalorder %s7194_s18, %s7190_s28 }
 0xb39   : > { %p7192_p8 = pnand %p7191_p7, %p7335_p5 }
 0xb3a   : > { %p7197_p12 = por %p7196_p11, %p7195_p10 }
 0xb3b   : > { %p7193_p9 = pneg %p7192_p8 }
 0xb3d   : > { %p7198_p13 = pnand %p7197_p12, %p7193_p9 }
 0xb3f   : > { %7201 = shalt.err (!%p7198_p13)
}
 0xb40   : > { %s7241_s25 = smov 128  }
 0xb41   : > { %6087 = dma.vmem_to_hbm [thread:$0]  (%p7335_p5), %s12095_s12, 4096, %s12091_s29, %s12101_s17, %s7241_s25, %s7241_s25, %s7239_s26  }
 0xb42 PF: > { %p6093_p0 = scmp.ge.s32.totalorder %s7236_s16, 2  ;;  %s5472_s27 = sand.u32 1, %s7224_s13  }
 0xb43   : > { %s5473_s30 = scalar_lea.sflag [#allocation3], %s5472_s27 }
 0xb44   : > { %p6090_p1 = pnand %p6093_p0, %p7339_p6 }
 0xb46   : > { %p6091_p2 = pneg %p6090_p1 }
 0xb48   : > { %7219 = dma.done.wait (%p6091_p2), %s5473_s30, 4096  }
 0xb49   : > { %7221 = vsyncadd (%p6091_p2), %s5473_s30, 4294963200  ;;  %s12795_s23 = sld [smem:[#allocation5_spill]]  ;;  %p20_p3 = scmp.ge.s32.totalorder %s7322_s19, 4  }
 0xb4a   : > { %s12796_s13 = smov %s7228_s14  ;;  %s12797_s14 = smov %s7232_s15 }
 0xb4b   : > { %s12799_s16 = smov %s7322_s19  ;;  %22 = sbr.rel (!%p20_p3) target bundleno = 3 (0x3), region = 101 }
 0xb4f   : > { %s12798_s15 = smov %s12795_s23 }
 0xb50   :  { %5478 = vsyncpa [#allocation3], 1 }
 0xb51   :  { %5480 = vsyncpa [#allocation3 + $0x1], 1 }

</bundles_post_ra>
